<compile_context>
chip_gen: v6e
topology: v6e:2x2x1
jax: 0.10.0
libtpu: 0.0.40
codegen_flags: <defaults>
</compile_context>

<pallas_src>
import functools
import math

import jax
import jax.numpy as jnp
from jax.experimental import pallas as pl
from jax.experimental.pallas import tpu as pltpu

F32 = jnp.float32
BF16 = jnp.bfloat16
VPAD = 128                    # codebook rows padded to a full lane width
CH_PAD = 128                  # every conv channel dim padded to a full lane width
NEG = -1e30                   # plain Python float (never close over jnp scalars)
VMEM_LIMIT = 32 * 1024 * 1024  # <= 48 MiB recommended on v7x (64 MiB physical)


def _vmem_spec():
    return pl.BlockSpec(memory_space=pltpu.MemorySpace.VMEM)


def _round_up(v, m):
    return (v + m - 1) // m * m


def _apply_act(y, act):
    # f32 elementwise epilogue (v5e has no bf16 VPU/EUP).
    if act == "relu":
        return jnp.maximum(y, 0.0)
    if act == "sigmoid":
        return jax.nn.sigmoid(y)
    return y


# --------------------------- fused GEMM (conv) kernel ------------------------

def _gemm_bias_act_kernel(x_ref, w_ref, b_ref, o_ref, *, act):
    y = jnp.dot(x_ref[...], w_ref[...], preferred_element_type=jnp.float32)
    y = y + b_ref[...]
    o_ref[...] = _apply_act(y, act).astype(o_ref.dtype)


def gemm_bias_act(x, w, b, act="none", out_dtype=BF16):
    """act(x @ w + b): x(M,K) bf16, w(K,N) bf16, b(1,N) f32 -> (M,N) out_dtype.

    f32 accumulation + f32 epilogue, single cast at the store.  Grid always has
    >=2 row tiles so v7x megacore can split M across both TensorCores (neutral
    on single-TC v5e/v6e).
    """
    M, K = x.shape
    N = w.shape[1]
    tm = min(_round_up(M, 8), max(8, _round_up(pl.cdiv(M, 2), 8)))
    grid_m = pl.cdiv(M, tm)
    Mp = grid_m * tm
    if Mp != M:
        x = jnp.pad(x, ((0, Mp - M), (0, 0)))
    out = pl.pallas_call(
        functools.partial(_gemm_bias_act_kernel, act=act),
        grid=(grid_m,),
        in_specs=[pl.BlockSpec((tm, K), lambda i: (i, 0)),
                  pl.BlockSpec((K, N), lambda i: (0, 0)),
                  pl.BlockSpec((1, N), lambda i: (0, 0))],
        out_specs=pl.BlockSpec((tm, N), lambda i: (i, 0)),
        out_shape=jax.ShapeDtypeStruct((Mp, N), out_dtype),
        compiler_params=pltpu.CompilerParams(
            dimension_semantics=("parallel",),
            vmem_limit_bytes=VMEM_LIMIT),
    )(x, w, b)
    return out if Mp == M else out[:M]


# --------------------------- stride-2 conv (NHWC) ----------------------------

def conv2d(x, w_mat, b, act="relu", out_dtype=BF16):
    """4x4 / stride-2 / pad-1 Conv2d in NHWC as one fused Pallas GEMM.

    Output channels are already padded to 128 inside w_mat/b (lane-dense
    stores); padded channels are exactly zero after ReLU so they can be
    carried straight into the next layer (its weight K rows are zero there).
    """
    B, H, W, C = x.shape
    Ho, Wo = H // 2, W // 2
    Cout = w_mat.shape[1]
    xp = jnp.pad(x, ((0, 0), (1, 1), (1, 1), (0, 0)))
    # TODO(synk): perf review asks for in-kernel im2col (strided VMEM reads);
    # kept in XLA because stride-2 sublane reads are the one Mosaic mechanism
    # we could not validate, and the patch matrix here is < 2 MB (bf16).
    taps = [xp[:, i:i + 2 * Ho - 1:2, j:j + 2 * Wo - 1:2, :]
            for i in range(4) for j in range(4)]
    patches = jnp.concatenate(taps, axis=-1).reshape(B * Ho * Wo, 16 * C)
    y = gemm_bias_act(patches.astype(BF16), w_mat, b, act=act, out_dtype=out_dtype)
    return y.reshape(B, Ho, Wo, Cout)


# --------------------- stride-2 transposed conv (sub-pixel) ------------------

def _convt_phase_kernel(x_ref, w_ref, b_ref, o_ref, *, act):
    # One sub-pixel phase per grid step: (M, 4C) @ (4C, N) with f32 epilogue.
    y = jnp.dot(x_ref[0], w_ref[0], preferred_element_type=jnp.float32)
    y = y + b_ref[0]
    o_ref[0] = _apply_act(y, act).astype(o_ref.dtype)


def conv_transpose2d(x, w_phase, b, act="relu", out_dtype=BF16):
    """4x4 / stride-2 / pad-1 ConvTranspose2d in NHWC via sub-pixel phases.

    x:(B,H,W,Cin_pad), w_phase:(4, 4*Cin_pad, N=128) bf16 (pre-split at init),
    b:(1,1,N) f32.  No zero-dilated input is built; the grid over the 4 output
    phases is marked "parallel" so v7x uses both TensorCores.
    """
    B, H, W, C = x.shape
    N = w_phase.shape[-1]
    M = B * H * W
    xp = jnp.pad(x, ((0, 0), (1, 1), (1, 1), (0, 0)))
    phases = []
    for p in range(2):
        for q in range(2):
            taps = [xp[:, p + a:p + a + H, q + c:q + c + W, :]
                    for a in range(2) for c in range(2)]
            phases.append(jnp.concatenate(taps, axis=-1).reshape(M, 4 * C))
    patches = jnp.stack(phases, axis=0).astype(BF16)            # (4, M, 4C)
    out = pl.pallas_call(
        functools.partial(_convt_phase_kernel, act=act),
        grid=(4,),
        in_specs=[pl.BlockSpec((1, M, 4 * C), lambda p: (p, 0, 0)),
                  pl.BlockSpec((1, 4 * C, N), lambda p: (p, 0, 0)),
                  pl.BlockSpec((1, 1, N), lambda p: (0, 0, 0))],
        out_specs=pl.BlockSpec((1, M, N), lambda p: (p, 0, 0)),
        out_shape=jax.ShapeDtypeStruct((4, M, N), out_dtype),
        compiler_params=pltpu.CompilerParams(
            dimension_semantics=("parallel",),
            vmem_limit_bytes=VMEM_LIMIT),
    )(patches, w_phase, b)
    # TODO(synk): perf review suggests writing (B,H,2,W,2,N) directly from the
    # kernel; that needs a (M,N)->(B,H,W,N) value reshape which is not
    # layout-free when W < 8 (convT1), so the depth-to-space stays in XLA.
    out = out.reshape(2, 2, B, H, W, N).transpose(2, 3, 0, 4, 1, 5)
    return out.reshape(B, 2 * H, 2 * W, N)


# ----------------- fused dense / bottleneck / decoder-MLP kernel -------------

def _fused_dense_kernel(feat_ref,
                        el1w, el1b, el2w, el2b,
                        embw, embg, embb,
                        codet_ref, code_ref, vbias_ref,
                        p1w, p1b, p1g, p1beta, p2w, p2b,
                        d1w, d1b, d2w, d2b, d3w, d3b,
                        out_ref,
                        *, num_topk, inv_temp, use_softmax, eps):
    def mm(x, w_ref):
        return jnp.dot(x.astype(BF16), w_ref[...],
                       preferred_element_type=jnp.float32)

    def bn(y, g_ref, beta_ref):
        # BatchNorm1d with training-mode batch statistics (biased variance).
        # NOTE: will not match a PyTorch model run in eval() with running stats.
        mean = jnp.mean(y, axis=0, keepdims=True)
        var = jnp.mean(jnp.square(y - mean), axis=0, keepdims=True)
        return (y - mean) * jax.lax.rsqrt(var + eps) * g_ref[...] + beta_ref[...]

    x = feat_ref[...]                                          # (B, 2048) bf16
    h = jnp.maximum(mm(x, el1w) + el1b[...], 0.0)              # e_lin1 + relu
    latent = jnp.maximum(mm(h, el2w) + el2b[...], 0.0)         # e_lin2 + relu

    emb = bn(mm(latent, embw), embg, embb)                     # embedder (no bias) + BN

    # --- sparse top-k codebook attention (vocab lanes padded to 128) ---
    # TODO(synk): SparseAttnBottleneck source was not provided; this is the
    # canonical top-k masked-softmax attention over a learned codebook.
    # vbias bakes -inf into the padded vocab lanes (mask hoisted out of the
    # hot path, feedback #9).
    dots = mm(emb, codet_ref) * inv_temp + vbias_ref[...]      # (B, VPAD)
    rem = dots
    kth = dots
    for _ in range(num_topk):                                  # k-th largest value
        kth = jnp.max(rem, axis=-1, keepdims=True)
        rem = jnp.where(rem >= kth, NEG, rem)
    # NOTE: under exact ties this can select more than k codes (differs from
    # torch.topk); fine at voc_size=8, k=6 with continuous logits.
    mask = dots >= kth
    if use_softmax:
        m = jnp.max(jnp.where(mask, dots, NEG), axis=-1, keepdims=True)
        e = jnp.where(mask, jnp.exp(dots - m), 0.0)
        wgt = e * pl.reciprocal(jnp.sum(e, axis=-1, keepdims=True), approx=True)
    else:
        wgt = jnp.where(mask, dots, 0.0)
    attn = jnp.dot(wgt.astype(BF16), code_ref[...],
                   preferred_element_type=jnp.float32)         # (B, D)

    # --- projector: Linear -> BN -> ReLU -> Linear ---
    pr = jnp.maximum(bn(mm(attn, p1w) + p1b[...], p1g, p1beta), 0.0)
    lat_sem = mm(pr, p2w) + p2b[...]

    # --- decoder MLP (d_lin3 emits the channel-padded NHWC flatten) ---
    d = jnp.maximum(mm(lat_sem, d1w) + d1b[...], 0.0)
    d = jnp.maximum(mm(d, d2w) + d2b[...], 0.0)
    d = jnp.maximum(mm(d, d3w) + d3b[...], 0.0)
    out_ref[...] = d.astype(out_ref.dtype)


def fused_bottleneck_and_dense(params, feat, *, num_topk, temperature, use_softmax):
    # TODO(synk): whole-array VMEM specs are fine at B=2 (<4 MB total); add an
    # M-row-tile grid before scaling the batch (v7x has only 64 MiB VMEM).
    B, flat = feat.shape
    args = [feat,
            params["e_lin1_w"], params["e_lin1_b"],
            params["e_lin2_w"], params["e_lin2_b"],
            params["emb_w"], params["emb_gamma"], params["emb_beta"],
            params["codebook_t"], params["codebook"], params["vocab_bias"],
            params["proj1_w"], params["proj1_b"],
            params["proj1_gamma"], params["proj1_beta"],
            params["proj2_w"], params["proj2_b"],
            params["d_lin1_w"], params["d_lin1_b"],
            params["d_lin2_w"], params["d_lin2_b"],
            params["d_lin3_w"], params["d_lin3_b"]]
    return pl.pallas_call(
        functools.partial(_fused_dense_kernel,
                          num_topk=int(num_topk),
                          inv_temp=1.0 / float(temperature),
                          use_softmax=bool(use_softmax),
                          eps=1e-5),
        out_shape=jax.ShapeDtypeStruct((B, flat), BF16),
        in_specs=[_vmem_spec()] * len(args),
        out_specs=_vmem_spec(),
        compiler_params=pltpu.CompilerParams(vmem_limit_bytes=VMEM_LIMIT),
    )(*args)


# ----------------------------- parameter init --------------------------------

def _make_params(key, *, latent_dim, ch, voc_size, proj_hidden_dim, hid_channels):
    ks = iter(jax.random.split(key, 64))

    def w_uniform(shape, fan_in):
        bound = math.sqrt(6.0 / fan_in)          # kaiming-uniform-like (relu)
        return jax.random.uniform(next(ks), shape, F32, -bound, bound)

    def b_uniform(n, fan_in):
        bound = 1.0 / math.sqrt(fan_in)
        return jax.random.uniform(next(ks), (1, n), F32, -bound, bound)

    def pad_last(a, n_to):
        pad = n_to - a.shape[-1]
        return a if pad <= 0 else jnp.pad(a, [(0, 0)] * (a.ndim - 1) + [(0, pad)])

    def conv_w(cin, cin_pad, cout):
        # torch Conv2d (Cout, Cin, 4, 4) -> im2col matrix (16*cin_pad, CH_PAD),
        # K ordered (i, j, ci); zero rows for padded in-channels and zero cols
        # for padded out-channels (lane-dense stores).  Done once at init.
        w = w_uniform((cout, cin, 4, 4), cin * 16)
        w = jnp.transpose(w, (2, 3, 1, 0))                       # (4,4,cin,cout)
        w = jnp.pad(w, ((0, 0), (0, 0), (0, cin_pad - cin), (0, CH_PAD - cout)))
        return w.reshape(16 * cin_pad, CH_PAD).astype(BF16)

    def conv_b(cout, fan_in):
        return pad_last(b_uniform(cout, fan_in), CH_PAD)

    def convt_w(cin, cin_pad, cout):
        # torch ConvTranspose2d (Cin, Cout, 4, 4) -> 4 sub-pixel phase matrices
        # (4, 4*cin_pad, CH_PAD): output phase (p,q), tap (a,c) uses kernel
        # element (3 - p - 2a, 3 - q - 2c).  Channel-padded once at init.
        w = w_uniform((cin, cout, 4, 4), cin * 16)
        mats = []
        for p in range(2):
            for q in range(2):
                taps = []
                for a in range(2):
                    for c in range(2):
                        m = w[:, :, 3 - p - 2 * a, 3 - q - 2 * c]   # (cin, cout)
                        m = jnp.pad(m, ((0, cin_pad - cin), (0, CH_PAD - cout)))
                        taps.append(m)
                mats.append(jnp.concatenate(taps, axis=0))          # (4*cin_pad, CH_PAD)
        return jnp.stack(mats, axis=0).astype(BF16)

    def convt_b(cout, fan_in):
        return pad_last(b_uniform(cout, fan_in), CH_PAD).reshape(1, 1, CH_PAD)

    hd = 256
    flat_real = hid_channels * 16            # 512 (true feature width)
    flat_pad = CH_PAD * 16                   # 2048 (channel-padded NHWC flatten)
    p = {}

    # encoder convs (all outputs padded to 128 channels)
    p["e_conv1_w"] = conv_w(ch, ch, hid_channels)
    p["e_conv1_b"] = conv_b(hid_channels, ch * 16)
    p["e_conv2_w"] = conv_w(hid_channels, CH_PAD, hid_channels)
    p["e_conv2_b"] = conv_b(hid_channels, hid_channels * 16)
    p["e_conv3_w"] = conv_w(hid_channels, CH_PAD, hid_channels)
    p["e_conv3_b"] = conv_b(hid_channels, hid_channels * 16)

    # e_lin1 consumes the channel-padded NHWC flatten: zero rows for padding.
    el1 = w_uniform((4, 4, hid_channels, hd), flat_real)
    el1 = jnp.pad(el1, ((0, 0), (0, 0), (0, CH_PAD - hid_channels), (0, 0)))
    p["e_lin1_w"] = el1.reshape(flat_pad, hd).astype(BF16)
    p["e_lin1_b"] = b_uniform(hd, flat_real)
    p["e_lin2_w"] = w_uniform((hd, latent_dim), hd).astype(BF16)
    p["e_lin2_b"] = b_uniform(latent_dim, hd)

    p["emb_w"] = w_uniform((latent_dim, latent_dim), latent_dim).astype(BF16)
    p["emb_gamma"] = jnp.ones((1, latent_dim), F32)
    p["emb_beta"] = jnp.zeros((1, latent_dim), F32)

    code = jax.random.normal(next(ks), (voc_size, latent_dim), F32)
    code = jnp.pad(code, ((0, VPAD - voc_size), (0, 0)))
    p["codebook"] = code.astype(BF16)                       # (VPAD, D)
    p["codebook_t"] = jnp.transpose(code).astype(BF16)      # (D, VPAD)
    col = jnp.arange(VPAD)
    p["vocab_bias"] = jnp.where(col < voc_size, 0.0, NEG).astype(F32).reshape(1, VPAD)

    p["proj1_w"] = w_uniform((latent_dim, proj_hidden_dim), latent_dim).astype(BF16)
    p["proj1_b"] = b_uniform(proj_hidden_dim, latent_dim)
    p["proj1_gamma"] = jnp.ones((1, proj_hidden_dim), F32)
    p["proj1_beta"] = jnp.zeros((1, proj_hidden_dim), F32)
    p["proj2_w"] = w_uniform((proj_hidden_dim, latent_dim), proj_hidden_dim).astype(BF16)
    p["proj2_b"] = b_uniform(latent_dim, proj_hidden_dim)

    p["d_lin1_w"] = w_uniform((latent_dim, hd), latent_dim).astype(BF16)
    p["d_lin1_b"] = b_uniform(hd, latent_dim)
    p["d_lin2_w"] = w_uniform((hd, hd), hd).astype(BF16)
    p["d_lin2_b"] = b_uniform(hd, hd)
    # d_lin3 emits the channel-padded NHWC flatten (zero cols for padding).
    dl3 = w_uniform((hd, 4, 4, hid_channels), hd)
    dl3 = jnp.pad(dl3, ((0, 0), (0, 0), (0, 0), (0, CH_PAD - hid_channels)))
    p["d_lin3_w"] = dl3.reshape(hd, flat_pad).astype(BF16)
    bound3 = 1.0 / math.sqrt(hd)
    b3 = jax.random.uniform(next(ks), (4, 4, hid_channels), F32, -bound3, bound3)
    b3 = jnp.pad(b3, ((0, 0), (0, 0), (0, CH_PAD - hid_channels)))
    p["d_lin3_b"] = b3.reshape(1, flat_pad)

    # decoder transposed convs (sub-pixel phase weights, channel-padded)
    p["d_convT1_w"] = convt_w(hid_channels, CH_PAD, hid_channels)
    p["d_convT1_b"] = convt_b(hid_channels, hid_channels * 16)
    p["d_convT2_w"] = convt_w(hid_channels, CH_PAD, hid_channels)
    p["d_convT2_b"] = convt_b(hid_channels, hid_channels * 16)
    p["d_convT3_w"] = convt_w(hid_channels, CH_PAD, ch)
    p["d_convT3_b"] = convt_b(ch, hid_channels * 16)
    return p


# ------------------------------- forward pass --------------------------------

def sparse_attn_autoencoder_forward(params, x, *, ch, image_size, hid_channels,
                                    voc_size, num_topk, temperature, use_softmax):
    del voc_size  # vocab mask is baked into params["vocab_bias"] at init
    B = x.shape[0]
    # NCHW (PyTorch interface) -> NHWC bf16 once at the boundary.
    x = x.reshape(B, ch, image_size, image_size).astype(BF16).transpose(0, 2, 3, 1)

    # --- EncoderBurgess (image_size == 32 branch: 3 stride-2 convs) ---
    # TODO(synk): feedback #5 asks for one fused pallas_call for all three
    # convs; kept per-layer because the inter-layer stride-2 im2col has no
    # guaranteed-lowerable in-kernel mechanism (see conv2d TODO).
    h = conv2d(x, params["e_conv1_w"], params["e_conv1_b"], "relu")
    h = conv2d(h, params["e_conv2_w"], params["e_conv2_b"], "relu")
    h = conv2d(h, params["e_conv3_w"], params["e_conv3_b"], "relu")
    feat = h.reshape(B, -1)                     # (B, 2048) channel-padded flatten

    # --- e_lin1/2, embedder+BN, sparse attention, projector, decoder MLP:
    #     ONE fused Pallas kernel ---
    d = fused_bottleneck_and_dense(params, feat, num_topk=num_topk,
                                   temperature=temperature,
                                   use_softmax=use_softmax)
    d = d.reshape(B, 4, 4, CH_PAD)              # NHWC, channel-padded

    # --- DecoderBurgess transposed convs (sub-pixel, no zero dilation) ---
    d = conv_transpose2d(d, params["d_convT1_w"], params["d_convT1_b"], "relu")
    d = conv_transpose2d(d, params["d_convT2_w"], params["d_convT2_b"], "relu")
    r = conv_transpose2d(d, params["d_convT3_w"], params["d_convT3_b"],
                         "sigmoid", out_dtype=F32)
    r = r[..., :ch]                             # drop lane padding of last conv
    return r.transpose(0, 3, 1, 2)              # back to NCHW at the boundary


# ----------------------------------- main -------------------------------------

if __name__ == "__main__":
    cfg = dict(latent_dim=128, ch=1, image_size=32, voc_size=8,
               proj_hidden_dim=512, hid_channels=32, num_topk=6,
               temperature=1.0, use_softmax=True)
    batch = 2

    key = jax.random.PRNGKey(0)
    pkey, xkey = jax.random.split(key)
    params = _make_params(pkey, latent_dim=cfg["latent_dim"], ch=cfg["ch"],
                          voc_size=cfg["voc_size"],
                          proj_hidden_dim=cfg["proj_hidden_dim"],
                          hid_channels=cfg["hid_channels"])
    x = jax.random.uniform(xkey, (batch, cfg["ch"], cfg["image_size"],
                                  cfg["image_size"]), F32)

    fwd = jax.jit(functools.partial(
        sparse_attn_autoencoder_forward,
        ch=cfg["ch"], image_size=cfg["image_size"],
        hid_channels=cfg["hid_channels"], voc_size=cfg["voc_size"],
        num_topk=cfg["num_topk"], temperature=cfg["temperature"],
        use_softmax=cfg["use_softmax"]))

    recon = fwd(params, x)
    recon = jax.block_until_ready(recon)
    assert recon.shape == (batch, cfg["ch"], cfg["image_size"], cfg["image_size"])
    assert bool(jnp.all(jnp.isfinite(recon)))
    print("KERNEL_OK")
</pallas_src>

<mosaic_0001>
module attributes {stable_mosaic.version = 11 : i64} {
  func.func @_gemm_bias_act_kernel(%arg0: i32, %arg1: memref<256x16xbf16, #tpu.memory_space<vmem>>, %arg2: memref<16x128xbf16, #tpu.memory_space<vmem>>, %arg3: memref<1x128xf32, #tpu.memory_space<vmem>>, %arg4: memref<256x128xbf16, #tpu.memory_space<vmem>>) attributes {dimension_semantics = [#tpu.dimension_semantics<parallel>], iteration_bounds = array<i64: 2>, scalar_prefetch = 0 : i64, scratch_operands = 0 : i64, tpu.core_type = #tpu.core_type<tc>, window_params = [{transform_indices = @transform_0, window_bounds = array<i64: 256, 16>}, {pipeline_mode = #tpu.pipeline_mode<synchronous>, transform_indices = @transform_1, window_bounds = array<i64: 16, 128>}, {pipeline_mode = #tpu.pipeline_mode<synchronous>, transform_indices = @transform_2, window_bounds = array<i64: 1, 128>}, {transform_indices = @transform_3, window_bounds = array<i64: 256, 128>}]} {
    %c0 = arith.constant 0 : index
    %c0_0 = arith.constant 0 : index
    %0 = vector.load %arg1[%c0, %c0_0] : memref<256x16xbf16, #tpu.memory_space<vmem>>, vector<256x16xbf16>
    %c0_1 = arith.constant 0 : index
    %c0_2 = arith.constant 0 : index
    %1 = vector.load %arg2[%c0_1, %c0_2] : memref<16x128xbf16, #tpu.memory_space<vmem>>, vector<16x128xbf16>
    %cst = arith.constant dense<0.000000e+00> : vector<256x128xf32>
    %2 = tpu.matmul %0, %1, %cst {dimension_numbers = #tpu.dot_dimension_numbers<[1], [0], [0], [1], [0, 0, 1, 1], [], []>} : vector<256x16xbf16>, vector<16x128xbf16>, vector<256x128xf32> -> vector<256x128xf32>
    %c0_3 = arith.constant 0 : index
    %c0_4 = arith.constant 0 : index
    %3 = vector.load %arg3[%c0_3, %c0_4] : memref<1x128xf32, #tpu.memory_space<vmem>>, vector<1x128xf32>
    %4 = vector.broadcast %3 : vector<1x128xf32> to vector<256x128xf32>
    %5 = arith.addf %2, %4 : vector<256x128xf32>
    %cst_5 = arith.constant 0.000000e+00 : f32
    %6 = vector.broadcast %cst_5 : f32 to vector<256x128xf32>
    %7 = arith.maximumf %5, %6 : vector<256x128xf32>
    %8 = arith.truncf %7 : vector<256x128xf32> to vector<256x128xbf16>
    %c0_6 = arith.constant 0 : index
    %c0_7 = arith.constant 0 : index
    %9 = vector.load %arg4[%c0_6, %c0_7] : memref<256x128xbf16, #tpu.memory_space<vmem>>, vector<256x128xbf16>
    tpu.vector_store %arg4[%c0_6, %c0_7], %8 {strides = array<i32>} : memref<256x128xbf16, #tpu.memory_space<vmem>>, vector<256x128xbf16>,
    return
  }
  func.func @transform_0(%arg0: i32) -> (i32, i32) {
    %c0_i32 = arith.constant 0 : i32
    %c0_i32_0 = arith.constant 0 : i32
    return %arg0, %c0_i32 : i32, i32
  }
  func.func @transform_1(%arg0: i32) -> (i32, i32) {
    %c0_i32 = arith.constant 0 : i32
    %c0_i32_0 = arith.constant 0 : i32
    %c0_i32_1 = arith.constant 0 : i32
    return %c0_i32, %c0_i32_0 : i32, i32
  }
  func.func @transform_2(%arg0: i32) -> (i32, i32) {
    %c0_i32 = arith.constant 0 : i32
    %c0_i32_0 = arith.constant 0 : i32
    %c0_i32_1 = arith.constant 0 : i32
    return %c0_i32, %c0_i32_0 : i32, i32
  }
  func.func @transform_3(%arg0: i32) -> (i32, i32) {
    %c0_i32 = arith.constant 0 : i32
    %c0_i32_0 = arith.constant 0 : i32
    return %arg0, %c0_i32 : i32, i32
  }
}

module attributes {stable_mosaic.version = 11 : i64} {
  func.func @_gemm_bias_act_kernel(%arg0: i32, %arg1: memref<64x2048xbf16, #tpu.memory_space<vmem>>, %arg2: memref<2048x128xbf16, #tpu.memory_space<vmem>>, %arg3: memref<1x128xf32, #tpu.memory_space<vmem>>, %arg4: memref<64x128xbf16, #tpu.memory_space<vmem>>) attributes {dimension_semantics = [#tpu.dimension_semantics<parallel>], iteration_bounds = array<i64: 2>, scalar_prefetch = 0 : i64, scratch_operands = 0 : i64, tpu.core_type = #tpu.core_type<tc>, window_params = [{transform_indices = @transform_0, window_bounds = array<i64: 64, 2048>}, {pipeline_mode = #tpu.pipeline_mode<synchronous>, transform_indices = @transform_1, window_bounds = array<i64: 2048, 128>}, {pipeline_mode = #tpu.pipeline_mode<synchronous>, transform_indices = @transform_2, window_bounds = array<i64: 1, 128>}, {transform_indices = @transform_3, window_bounds = array<i64: 64, 128>}]} {
    %c0 = arith.constant 0 : index
    %c0_0 = arith.constant 0 : index
    %0 = vector.load %arg1[%c0, %c0_0] : memref<64x2048xbf16, #tpu.memory_space<vmem>>, vector<64x2048xbf16>
    %c0_1 = arith.constant 0 : index
    %c0_2 = arith.constant 0 : index
    %1 = vector.load %arg2[%c0_1, %c0_2] : memref<2048x128xbf16, #tpu.memory_space<vmem>>, vector<2048x128xbf16>
    %cst = arith.constant dense<0.000000e+00> : vector<64x128xf32>
    %2 = tpu.matmul %0, %1, %cst {dimension_numbers = #tpu.dot_dimension_numbers<[1], [0], [0], [1], [0, 0, 1, 1], [], []>} : vector<64x2048xbf16>, vector<2048x128xbf16>, vector<64x128xf32> -> vector<64x128xf32>
    %c0_3 = arith.constant 0 : index
    %c0_4 = arith.constant 0 : index
    %3 = vector.load %arg3[%c0_3, %c0_4] : memref<1x128xf32, #tpu.memory_space<vmem>>, vector<1x128xf32>
    %4 = vector.broadcast %3 : vector<1x128xf32> to vector<64x128xf32>
    %5 = arith.addf %2, %4 : vector<64x128xf32>
    %cst_5 = arith.constant 0.000000e+00 : f32
    %6 = vector.broadcast %cst_5 : f32 to vector<64x128xf32>
    %7 = arith.maximumf %5, %6 : vector<64x128xf32>
    %8 = arith.truncf %7 : vector<64x128xf32> to vector<64x128xbf16>
    %c0_6 = arith.constant 0 : index
    %c0_7 = arith.constant 0 : index
    %9 = vector.load %arg4[%c0_6, %c0_7] : memref<64x128xbf16, #tpu.memory_space<vmem>>, vector<64x128xbf16>
    tpu.vector_store %arg4[%c0_6, %c0_7], %8 {strides = array<i32>} : memref<64x128xbf16, #tpu.memory_space<vmem>>, vector<64x128xbf16>,
    return
  }
  func.func @transform_0(%arg0: i32) -> (i32, i32) {
    %c0_i32 = arith.constant 0 : i32
    %c0_i32_0 = arith.constant 0 : i32
    return %arg0, %c0_i32 : i32, i32
  }
  func.func @transform_1(%arg0: i32) -> (i32, i32) {
    %c0_i32 = arith.constant 0 : i32
    %c0_i32_0 = arith.constant 0 : i32
    %c0_i32_1 = arith.constant 0 : i32
    return %c0_i32, %c0_i32_0 : i32, i32
  }
  func.func @transform_2(%arg0: i32) -> (i32, i32) {
    %c0_i32 = arith.constant 0 : i32
    %c0_i32_0 = arith.constant 0 : i32
    %c0_i32_1 = arith.constant 0 : i32
    return %c0_i32, %c0_i32_0 : i32, i32
  }
  func.func @transform_3(%arg0: i32) -> (i32, i32) {
    %c0_i32 = arith.constant 0 : i32
    %c0_i32_0 = arith.constant 0 : i32
    return %arg0, %c0_i32 : i32, i32
  }
}

module attributes {stable_mosaic.version = 11 : i64} {
  func.func @_gemm_bias_act_kernel(%arg0: i32, %arg1: memref<16x2048xbf16, #tpu.memory_space<vmem>>, %arg2: memref<2048x128xbf16, #tpu.memory_space<vmem>>, %arg3: memref<1x128xf32, #tpu.memory_space<vmem>>, %arg4: memref<16x128xbf16, #tpu.memory_space<vmem>>) attributes {dimension_semantics = [#tpu.dimension_semantics<parallel>], iteration_bounds = array<i64: 2>, scalar_prefetch = 0 : i64, scratch_operands = 0 : i64, tpu.core_type = #tpu.core_type<tc>, window_params = [{transform_indices = @transform_0, window_bounds = array<i64: 16, 2048>}, {pipeline_mode = #tpu.pipeline_mode<synchronous>, transform_indices = @transform_1, window_bounds = array<i64: 2048, 128>}, {pipeline_mode = #tpu.pipeline_mode<synchronous>, transform_indices = @transform_2, window_bounds = array<i64: 1, 128>}, {transform_indices = @transform_3, window_bounds = array<i64: 16, 128>}]} {
    %c0 = arith.constant 0 : index
    %c0_0 = arith.constant 0 : index
    %0 = vector.load %arg1[%c0, %c0_0] : memref<16x2048xbf16, #tpu.memory_space<vmem>>, vector<16x2048xbf16>
    %c0_1 = arith.constant 0 : index
    %c0_2 = arith.constant 0 : index
    %1 = vector.load %arg2[%c0_1, %c0_2] : memref<2048x128xbf16, #tpu.memory_space<vmem>>, vector<2048x128xbf16>
    %cst = arith.constant dense<0.000000e+00> : vector<16x128xf32>
    %2 = tpu.matmul %0, %1, %cst {dimension_numbers = #tpu.dot_dimension_numbers<[1], [0], [0], [1], [0, 0, 1, 1], [], []>} : vector<16x2048xbf16>, vector<2048x128xbf16>, vector<16x128xf32> -> vector<16x128xf32>
    %c0_3 = arith.constant 0 : index
    %c0_4 = arith.constant 0 : index
    %3 = vector.load %arg3[%c0_3, %c0_4] : memref<1x128xf32, #tpu.memory_space<vmem>>, vector<1x128xf32>
    %4 = vector.broadcast %3 : vector<1x128xf32> to vector<16x128xf32>
    %5 = arith.addf %2, %4 : vector<16x128xf32>
    %cst_5 = arith.constant 0.000000e+00 : f32
    %6 = vector.broadcast %cst_5 : f32 to vector<16x128xf32>
    %7 = arith.maximumf %5, %6 : vector<16x128xf32>
    %8 = arith.truncf %7 : vector<16x128xf32> to vector<16x128xbf16>
    %c0_6 = arith.constant 0 : index
    %c0_7 = arith.constant 0 : index
    %9 = vector.load %arg4[%c0_6, %c0_7] : memref<16x128xbf16, #tpu.memory_space<vmem>>, vector<16x128xbf16>
    tpu.vector_store %arg4[%c0_6, %c0_7], %8 {strides = array<i32>} : memref<16x128xbf16, #tpu.memory_space<vmem>>, vector<16x128xbf16>,
    return
  }
  func.func @transform_0(%arg0: i32) -> (i32, i32) {
    %c0_i32 = arith.constant 0 : i32
    %c0_i32_0 = arith.constant 0 : i32
    return %arg0, %c0_i32 : i32, i32
  }
  func.func @transform_1(%arg0: i32) -> (i32, i32) {
    %c0_i32 = arith.constant 0 : i32
    %c0_i32_0 = arith.constant 0 : i32
    %c0_i32_1 = arith.constant 0 : i32
    return %c0_i32, %c0_i32_0 : i32, i32
  }
  func.func @transform_2(%arg0: i32) -> (i32, i32) {
    %c0_i32 = arith.constant 0 : i32
    %c0_i32_0 = arith.constant 0 : i32
    %c0_i32_1 = arith.constant 0 : i32
    return %c0_i32, %c0_i32_0 : i32, i32
  }
  func.func @transform_3(%arg0: i32) -> (i32, i32) {
    %c0_i32 = arith.constant 0 : i32
    %c0_i32_0 = arith.constant 0 : i32
    return %arg0, %c0_i32 : i32, i32
  }
}

module attributes {stable_mosaic.version = 11 : i64} {
  func.func @_fused_dense_kernel(%arg0: memref<2x2048xbf16, #tpu.memory_space<vmem>>, %arg1: memref<2048x256xbf16, #tpu.memory_space<vmem>>, %arg2: memref<1x256xf32, #tpu.memory_space<vmem>>, %arg3: memref<256x128xbf16, #tpu.memory_space<vmem>>, %arg4: memref<1x128xf32, #tpu.memory_space<vmem>>, %arg5: memref<128x128xbf16, #tpu.memory_space<vmem>>, %arg6: memref<1x128xf32, #tpu.memory_space<vmem>>, %arg7: memref<1x128xf32, #tpu.memory_space<vmem>>, %arg8: memref<128x128xbf16, #tpu.memory_space<vmem>>, %arg9: memref<128x128xbf16, #tpu.memory_space<vmem>>, %arg10: memref<1x128xf32, #tpu.memory_space<vmem>>, %arg11: memref<128x512xbf16, #tpu.memory_space<vmem>>, %arg12: memref<1x512xf32, #tpu.memory_space<vmem>>, %arg13: memref<1x512xf32, #tpu.memory_space<vmem>>, %arg14: memref<1x512xf32, #tpu.memory_space<vmem>>, %arg15: memref<512x128xbf16, #tpu.memory_space<vmem>>, %arg16: memref<1x128xf32, #tpu.memory_space<vmem>>, %arg17: memref<128x256xbf16, #tpu.memory_space<vmem>>, %arg18: memref<1x256xf32, #tpu.memory_space<vmem>>, %arg19: memref<256x256xbf16, #tpu.memory_space<vmem>>, %arg20: memref<1x256xf32, #tpu.memory_space<vmem>>, %arg21: memref<256x2048xbf16, #tpu.memory_space<vmem>>, %arg22: memref<1x2048xf32, #tpu.memory_space<vmem>>, %arg23: memref<2x2048xbf16, #tpu.memory_space<vmem>>) attributes {dimension_semantics = [], scalar_prefetch = 0 : i64, scratch_operands = 0 : i64, tpu.core_type = #tpu.core_type<tc>} {
    %c0 = arith.constant 0 : index
    %c0_0 = arith.constant 0 : index
    %0 = vector.load %arg0[%c0, %c0_0] : memref<2x2048xbf16, #tpu.memory_space<vmem>>, vector<2x2048xbf16>
    %c0_1 = arith.constant 0 : index
    %c0_2 = arith.constant 0 : index
    %1 = vector.load %arg1[%c0_1, %c0_2] : memref<2048x256xbf16, #tpu.memory_space<vmem>>, vector<2048x256xbf16>
    %cst = arith.constant dense<0.000000e+00> : vector<2x256xf32>
    %2 = tpu.matmul %0, %1, %cst {dimension_numbers = #tpu.dot_dimension_numbers<[1], [0], [0], [1], [0, 0, 1, 1], [], []>} : vector<2x2048xbf16>, vector<2048x256xbf16>, vector<2x256xf32> -> vector<2x256xf32>
    %c0_3 = arith.constant 0 : index
    %c0_4 = arith.constant 0 : index
    %3 = vector.load %arg2[%c0_3, %c0_4] : memref<1x256xf32, #tpu.memory_space<vmem>>, vector<1x256xf32>
    %4 = vector.broadcast %3 : vector<1x256xf32> to vector<2x256xf32>
    %5 = arith.addf %2, %4 : vector<2x256xf32>
    %cst_5 = arith.constant 0.000000e+00 : f32
    %6 = vector.broadcast %cst_5 : f32 to vector<2x256xf32>
    %7 = arith.maximumf %5, %6 : vector<2x256xf32>
    %8 = arith.truncf %7 : vector<2x256xf32> to vector<2x256xbf16>
    %c0_6 = arith.constant 0 : index
    %c0_7 = arith.constant 0 : index
    %9 = vector.load %arg3[%c0_6, %c0_7] : memref<256x128xbf16, #tpu.memory_space<vmem>>, vector<256x128xbf16>
    %cst_8 = arith.constant dense<0.000000e+00> : vector<2x128xf32>
    %10 = tpu.matmul %8, %9, %cst_8 {dimension_numbers = #tpu.dot_dimension_numbers<[1], [0], [0], [1], [0, 0, 1, 1], [], []>} : vector<2x256xbf16>, vector<256x128xbf16>, vector<2x128xf32> -> vector<2x128xf32>
    %c0_9 = arith.constant 0 : index
    %c0_10 = arith.constant 0 : index
    %11 = vector.load %arg4[%c0_9, %c0_10] : memref<1x128xf32, #tpu.memory_space<vmem>>, vector<1x128xf32>
    %12 = vector.broadcast %11 : vector<1x128xf32> to vector<2x128xf32>
    %13 = arith.addf %10, %12 : vector<2x128xf32>
    %cst_11 = arith.constant 0.000000e+00 : f32
    %14 = vector.broadcast %cst_11 : f32 to vector<2x128xf32>
    %15 = arith.maximumf %13, %14 : vector<2x128xf32>
    %16 = arith.truncf %15 : vector<2x128xf32> to vector<2x128xbf16>
    %c0_12 = arith.constant 0 : index
    %c0_13 = arith.constant 0 : index
    %17 = vector.load %arg5[%c0_12, %c0_13] : memref<128x128xbf16, #tpu.memory_space<vmem>>, vector<128x128xbf16>
    %cst_14 = arith.constant dense<0.000000e+00> : vector<2x128xf32>
    %18 = tpu.matmul %16, %17, %cst_14 {dimension_numbers = #tpu.dot_dimension_numbers<[1], [0], [0], [1], [0, 0, 1, 1], [], []>} : vector<2x128xbf16>, vector<128x128xbf16>, vector<2x128xf32> -> vector<2x128xf32>
    %cst_15 = arith.constant dense<0.000000e+00> : vector<128xf32>
    %19 = vector.multi_reduction <add>, %18, %cst_15 [0] : vector<2x128xf32> to vector<128xf32>
    %20 = vector.shape_cast %19 : vector<128xf32> to vector<1x128xf32>
    %cst_16 = arith.constant 2.000000e+00 : f32
    %21 = vector.broadcast %cst_16 : f32 to vector<1x128xf32>
    %22 = arith.divf %20, %21 : vector<1x128xf32>
    %23 = vector.broadcast %22 : vector<1x128xf32> to vector<2x128xf32>
    %24 = arith.subf %18, %23 : vector<2x128xf32>
    %25 = arith.mulf %24, %24 : vector<2x128xf32>
    %cst_17 = arith.constant dense<0.000000e+00> : vector<128xf32>
    %26 = vector.multi_reduction <add>, %25, %cst_17 [0] : vector<2x128xf32> to vector<128xf32>
    %27 = vector.shape_cast %26 : vector<128xf32> to vector<1x128xf32>
    %cst_18 = arith.constant 2.000000e+00 : f32
    %28 = vector.broadcast %cst_18 : f32 to vector<1x128xf32>
    %29 = arith.divf %27, %28 : vector<1x128xf32>
    %30 = vector.broadcast %22 : vector<1x128xf32> to vector<2x128xf32>
    %31 = arith.subf %18, %30 : vector<2x128xf32>
    %cst_19 = arith.constant 9.99999974E-6 : f32
    %32 = vector.broadcast %cst_19 : f32 to vector<1x128xf32>
    %33 = arith.addf %29, %32 : vector<1x128xf32>
    %34 = math.rsqrt %33 : vector<1x128xf32>
    %35 = vector.broadcast %34 : vector<1x128xf32> to vector<2x128xf32>
    %36 = arith.mulf %31, %35 : vector<2x128xf32>
    %c0_20 = arith.constant 0 : index
    %c0_21 = arith.constant 0 : index
    %37 = vector.load %arg6[%c0_20, %c0_21] : memref<1x128xf32, #tpu.memory_space<vmem>>, vector<1x128xf32>
    %38 = vector.broadcast %37 : vector<1x128xf32> to vector<2x128xf32>
    %39 = arith.mulf %36, %38 : vector<2x128xf32>
    %c0_22 = arith.constant 0 : index
    %c0_23 = arith.constant 0 : index
    %40 = vector.load %arg7[%c0_22, %c0_23] : memref<1x128xf32, #tpu.memory_space<vmem>>, vector<1x128xf32>
    %41 = vector.broadcast %40 : vector<1x128xf32> to vector<2x128xf32>
    %42 = arith.addf %39, %41 : vector<2x128xf32>
    %43 = arith.truncf %42 : vector<2x128xf32> to vector<2x128xbf16>
    %c0_24 = arith.constant 0 : index
    %c0_25 = arith.constant 0 : index
    %44 = vector.load %arg8[%c0_24, %c0_25] : memref<128x128xbf16, #tpu.memory_space<vmem>>, vector<128x128xbf16>
    %cst_26 = arith.constant dense<0.000000e+00> : vector<2x128xf32>
    %45 = tpu.matmul %43, %44, %cst_26 {dimension_numbers = #tpu.dot_dimension_numbers<[1], [0], [0], [1], [0, 0, 1, 1], [], []>} : vector<2x128xbf16>, vector<128x128xbf16>, vector<2x128xf32> -> vector<2x128xf32>
    %cst_27 = arith.constant 1.000000e+00 : f32
    %46 = vector.broadcast %cst_27 : f32 to vector<2x128xf32>
    %47 = arith.mulf %45, %46 : vector<2x128xf32>
    %c0_28 = arith.constant 0 : index
    %c0_29 = arith.constant 0 : index
    %48 = vector.load %arg10[%c0_28, %c0_29] : memref<1x128xf32, #tpu.memory_space<vmem>>, vector<1x128xf32>
    %49 = vector.broadcast %48 : vector<1x128xf32> to vector<2x128xf32>
    %50 = arith.addf %47, %49 : vector<2x128xf32>
    %cst_30 = arith.constant dense<0xFF800000> : vector<2xf32>
    %51 = vector.multi_reduction <maximumf>, %50, %cst_30 [1] : vector<2x128xf32> to vector<2xf32>
    %52 = vector.shape_cast %51 : vector<2xf32> to vector<2x1xf32>
    %53 = vector.broadcast %52 : vector<2x1xf32> to vector<2x128xf32>
    %54 = arith.cmpf oge, %50, %53 : vector<2x128xf32>
    %cst_31 = arith.constant -1.000000e+30 : f32
    %55 = vector.broadcast %cst_31 : f32 to vector<2x128xf32>
    %56 = arith.select %54, %55, %50 : vector<2x128xi1>, vector<2x128xf32>
    %cst_32 = arith.constant dense<0xFF800000> : vector<2xf32>
    %57 = vector.multi_reduction <maximumf>, %56, %cst_32 [1] : vector<2x128xf32> to vector<2xf32>
    %58 = vector.shape_cast %57 : vector<2xf32> to vector<2x1xf32>
    %59 = vector.broadcast %58 : vector<2x1xf32> to vector<2x128xf32>
    %60 = arith.cmpf oge, %56, %59 : vector<2x128xf32>
    %cst_33 = arith.constant -1.000000e+30 : f32
    %61 = vector.broadcast %cst_33 : f32 to vector<2x128xf32>
    %62 = arith.select %60, %61, %56 : vector<2x128xi1>, vector<2x128xf32>
    %cst_34 = arith.constant dense<0xFF800000> : vector<2xf32>
    %63 = vector.multi_reduction <maximumf>, %62, %cst_34 [1] : vector<2x128xf32> to vector<2xf32>
    %64 = vector.shape_cast %63 : vector<2xf32> to vector<2x1xf32>
    %65 = vector.broadcast %64 : vector<2x1xf32> to vector<2x128xf32>
    %66 = arith.cmpf oge, %62, %65 : vector<2x128xf32>
    %cst_35 = arith.constant -1.000000e+30 : f32
    %67 = vector.broadcast %cst_35 : f32 to vector<2x128xf32>
    %68 = arith.select %66, %67, %62 : vector<2x128xi1>, vector<2x128xf32>
    %cst_36 = arith.constant dense<0xFF800000> : vector<2xf32>
    %69 = vector.multi_reduction <maximumf>, %68, %cst_36 [1] : vector<2x128xf32> to vector<2xf32>
    %70 = vector.shape_cast %69 : vector<2xf32> to vector<2x1xf32>
    %71 = vector.broadcast %70 : vector<2x1xf32> to vector<2x128xf32>
    %72 = arith.cmpf oge, %68, %71 : vector<2x128xf32>
    %cst_37 = arith.constant -1.000000e+30 : f32
    %73 = vector.broadcast %cst_37 : f32 to vector<2x128xf32>
    %74 = arith.select %72, %73, %68 : vector<2x128xi1>, vector<2x128xf32>
    %cst_38 = arith.constant dense<0xFF800000> : vector<2xf32>
    %75 = vector.multi_reduction <maximumf>, %74, %cst_38 [1] : vector<2x128xf32> to vector<2xf32>
    %76 = vector.shape_cast %75 : vector<2xf32> to vector<2x1xf32>
    %77 = vector.broadcast %76 : vector<2x1xf32> to vector<2x128xf32>
    %78 = arith.cmpf oge, %74, %77 : vector<2x128xf32>
    %cst_39 = arith.constant -1.000000e+30 : f32
    %79 = vector.broadcast %cst_39 : f32 to vector<2x128xf32>
    %80 = arith.select %78, %79, %74 : vector<2x128xi1>, vector<2x128xf32>
    %cst_40 = arith.constant dense<0xFF800000> : vector<2xf32>
    %81 = vector.multi_reduction <maximumf>, %80, %cst_40 [1] : vector<2x128xf32> to vector<2xf32>
    %82 = vector.shape_cast %81 : vector<2xf32> to vector<2x1xf32>
    %83 = vector.broadcast %82 : vector<2x1xf32> to vector<2x128xf32>
    %84 = arith.cmpf oge, %50, %83 : vector<2x128xf32>
    %cst_41 = arith.constant -1.000000e+30 : f32
    %85 = vector.broadcast %cst_41 : f32 to vector<2x128xf32>
    %86 = arith.select %84, %50, %85 : vector<2x128xi1>, vector<2x128xf32>
    %cst_42 = arith.constant dense<0xFF800000> : vector<2xf32>
    %87 = vector.multi_reduction <maximumf>, %86, %cst_42 [1] : vector<2x128xf32> to vector<2xf32>
    %88 = vector.shape_cast %87 : vector<2xf32> to vector<2x1xf32>
    %89 = vector.broadcast %88 : vector<2x1xf32> to vector<2x128xf32>
    %90 = arith.subf %50, %89 : vector<2x128xf32>
    %91 = math.exp %90 : vector<2x128xf32>
    %cst_43 = arith.constant 0.000000e+00 : f32
    %92 = vector.broadcast %cst_43 : f32 to vector<2x128xf32>
    %93 = arith.select %84, %91, %92 : vector<2x128xi1>, vector<2x128xf32>
    %cst_44 = arith.constant dense<0.000000e+00> : vector<2xf32>
    %94 = vector.multi_reduction <add>, %93, %cst_44 [1] : vector<2x128xf32> to vector<2xf32>
    %95 = vector.shape_cast %94 : vector<2xf32> to vector<2x1xf32>
    %96 = tpu.reciprocal %95 {approx = true} : vector<2x1xf32> -> vector<2x1xf32>
    %97 = vector.broadcast %96 : vector<2x1xf32> to vector<2x128xf32>
    %98 = arith.mulf %93, %97 : vector<2x128xf32>
    %99 = arith.truncf %98 : vector<2x128xf32> to vector<2x128xbf16>
    %c0_45 = arith.constant 0 : index
    %c0_46 = arith.constant 0 : index
    %100 = vector.load %arg9[%c0_45, %c0_46] : memref<128x128xbf16, #tpu.memory_space<vmem>>, vector<128x128xbf16>
    %cst_47 = arith.constant dense<0.000000e+00> : vector<2x128xf32>
    %101 = tpu.matmul %99, %100, %cst_47 {dimension_numbers = #tpu.dot_dimension_numbers<[1], [0], [0], [1], [0, 0, 1, 1], [], []>} : vector<2x128xbf16>, vector<128x128xbf16>, vector<2x128xf32> -> vector<2x128xf32>
    %102 = arith.truncf %101 : vector<2x128xf32> to vector<2x128xbf16>
    %c0_48 = arith.constant 0 : index
    %c0_49 = arith.constant 0 : index
    %103 = vector.load %arg11[%c0_48, %c0_49] : memref<128x512xbf16, #tpu.memory_space<vmem>>, vector<128x512xbf16>
    %cst_50 = arith.constant dense<0.000000e+00> : vector<2x512xf32>
    %104 = tpu.matmul %102, %103, %cst_50 {dimension_numbers = #tpu.dot_dimension_numbers<[1], [0], [0], [1], [0, 0, 1, 1], [], []>} : vector<2x128xbf16>, vector<128x512xbf16>, vector<2x512xf32> -> vector<2x512xf32>
    %c0_51 = arith.constant 0 : index
    %c0_52 = arith.constant 0 : index
    %105 = vector.load %arg12[%c0_51, %c0_52] : memref<1x512xf32, #tpu.memory_space<vmem>>, vector<1x512xf32>
    %106 = vector.broadcast %105 : vector<1x512xf32> to vector<2x512xf32>
    %107 = arith.addf %104, %106 : vector<2x512xf32>
    %cst_53 = arith.constant dense<0.000000e+00> : vector<512xf32>
    %108 = vector.multi_reduction <add>, %107, %cst_53 [0] : vector<2x512xf32> to vector<512xf32>
    %109 = vector.shape_cast %108 : vector<512xf32> to vector<1x512xf32>
    %cst_54 = arith.constant 2.000000e+00 : f32
    %110 = vector.broadcast %cst_54 : f32 to vector<1x512xf32>
    %111 = arith.divf %109, %110 : vector<1x512xf32>
    %112 = vector.broadcast %111 : vector<1x512xf32> to vector<2x512xf32>
    %113 = arith.subf %107, %112 : vector<2x512xf32>
    %114 = arith.mulf %113, %113 : vector<2x512xf32>
    %cst_55 = arith.constant dense<0.000000e+00> : vector<512xf32>
    %115 = vector.multi_reduction <add>, %114, %cst_55 [0] : vector<2x512xf32> to vector<512xf32>
    %116 = vector.shape_cast %115 : vector<512xf32> to vector<1x512xf32>
    %cst_56 = arith.constant 2.000000e+00 : f32
    %117 = vector.broadcast %cst_56 : f32 to vector<1x512xf32>
    %118 = arith.divf %116, %117 : vector<1x512xf32>
    %119 = vector.broadcast %111 : vector<1x512xf32> to vector<2x512xf32>
    %120 = arith.subf %107, %119 : vector<2x512xf32>
    %cst_57 = arith.constant 9.99999974E-6 : f32
    %121 = vector.broadcast %cst_57 : f32 to vector<1x512xf32>
    %122 = arith.addf %118, %121 : vector<1x512xf32>
    %123 = math.rsqrt %122 : vector<1x512xf32>
    %124 = vector.broadcast %123 : vector<1x512xf32> to vector<2x512xf32>
    %125 = arith.mulf %120, %124 : vector<2x512xf32>
    %c0_58 = arith.constant 0 : index
    %c0_59 = arith.constant 0 : index
    %126 = vector.load %arg13[%c0_58, %c0_59] : memref<1x512xf32, #tpu.memory_space<vmem>>, vector<1x512xf32>
    %127 = vector.broadcast %126 : vector<1x512xf32> to vector<2x512xf32>
    %128 = arith.mulf %125, %127 : vector<2x512xf32>
    %c0_60 = arith.constant 0 : index
    %c0_61 = arith.constant 0 : index
    %129 = vector.load %arg14[%c0_60, %c0_61] : memref<1x512xf32, #tpu.memory_space<vmem>>, vector<1x512xf32>
    %130 = vector.broadcast %129 : vector<1x512xf32> to vector<2x512xf32>
    %131 = arith.addf %128, %130 : vector<2x512xf32>
    %cst_62 = arith.constant 0.000000e+00 : f32
    %132 = vector.broadcast %cst_62 : f32 to vector<2x512xf32>
    %133 = arith.maximumf %131, %132 : vector<2x512xf32>
    %134 = arith.truncf %133 : vector<2x512xf32> to vector<2x512xbf16>
    %c0_63 = arith.constant 0 : index
    %c0_64 = arith.constant 0 : index
    %135 = vector.load %arg15[%c0_63, %c0_64] : memref<512x128xbf16, #tpu.memory_space<vmem>>, vector<512x128xbf16>
    %cst_65 = arith.constant dense<0.000000e+00> : vector<2x128xf32>
    %136 = tpu.matmul %134, %135, %cst_65 {dimension_numbers = #tpu.dot_dimension_numbers<[1], [0], [0], [1], [0, 0, 1, 1], [], []>} : vector<2x512xbf16>, vector<512x128xbf16>, vector<2x128xf32> -> vector<2x128xf32>
    %c0_66 = arith.constant 0 : index
    %c0_67 = arith.constant 0 : index
    %137 = vector.load %arg16[%c0_66, %c0_67] : memref<1x128xf32, #tpu.memory_space<vmem>>, vector<1x128xf32>
    %138 = vector.broadcast %137 : vector<1x128xf32> to vector<2x128xf32>
    %139 = arith.addf %136, %138 : vector<2x128xf32>
    %140 = arith.truncf %139 : vector<2x128xf32> to vector<2x128xbf16>
    %c0_68 = arith.constant 0 : index
    %c0_69 = arith.constant 0 : index
    %141 = vector.load %arg17[%c0_68, %c0_69] : memref<128x256xbf16, #tpu.memory_space<vmem>>, vector<128x256xbf16>
    %cst_70 = arith.constant dense<0.000000e+00> : vector<2x256xf32>
    %142 = tpu.matmul %140, %141, %cst_70 {dimension_numbers = #tpu.dot_dimension_numbers<[1], [0], [0], [1], [0, 0, 1, 1], [], []>} : vector<2x128xbf16>, vector<128x256xbf16>, vector<2x256xf32> -> vector<2x256xf32>
    %c0_71 = arith.constant 0 : index
    %c0_72 = arith.constant 0 : index
    %143 = vector.load %arg18[%c0_71, %c0_72] : memref<1x256xf32, #tpu.memory_space<vmem>>, vector<1x256xf32>
    %144 = vector.broadcast %143 : vector<1x256xf32> to vector<2x256xf32>
    %145 = arith.addf %142, %144 : vector<2x256xf32>
    %cst_73 = arith.constant 0.000000e+00 : f32
    %146 = vector.broadcast %cst_73 : f32 to vector<2x256xf32>
    %147 = arith.maximumf %145, %146 : vector<2x256xf32>
    %148 = arith.truncf %147 : vector<2x256xf32> to vector<2x256xbf16>
    %c0_74 = arith.constant 0 : index
    %c0_75 = arith.constant 0 : index
    %149 = vector.load %arg19[%c0_74, %c0_75] : memref<256x256xbf16, #tpu.memory_space<vmem>>, vector<256x256xbf16>
    %cst_76 = arith.constant dense<0.000000e+00> : vector<2x256xf32>
    %150 = tpu.matmul %148, %149, %cst_76 {dimension_numbers = #tpu.dot_dimension_numbers<[1], [0], [0], [1], [0, 0, 1, 1], [], []>} : vector<2x256xbf16>, vector<256x256xbf16>, vector<2x256xf32> -> vector<2x256xf32>
    %c0_77 = arith.constant 0 : index
    %c0_78 = arith.constant 0 : index
    %151 = vector.load %arg20[%c0_77, %c0_78] : memref<1x256xf32, #tpu.memory_space<vmem>>, vector<1x256xf32>
    %152 = vector.broadcast %151 : vector<1x256xf32> to vector<2x256xf32>
    %153 = arith.addf %150, %152 : vector<2x256xf32>
    %cst_79 = arith.constant 0.000000e+00 : f32
    %154 = vector.broadcast %cst_79 : f32 to vector<2x256xf32>
    %155 = arith.maximumf %153, %154 : vector<2x256xf32>
    %156 = arith.truncf %155 : vector<2x256xf32> to vector<2x256xbf16>
    %c0_80 = arith.constant 0 : index
    %c0_81 = arith.constant 0 : index
    %157 = vector.load %arg21[%c0_80, %c0_81] : memref<256x2048xbf16, #tpu.memory_space<vmem>>, vector<256x2048xbf16>
    %cst_82 = arith.constant dense<0.000000e+00> : vector<2x2048xf32>
    %158 = tpu.matmul %156, %157, %cst_82 {dimension_numbers = #tpu.dot_dimension_numbers<[1], [0], [0], [1], [0, 0, 1, 1], [], []>} : vector<2x256xbf16>, vector<256x2048xbf16>, vector<2x2048xf32> -> vector<2x2048xf32>
    %c0_83 = arith.constant 0 : index
    %c0_84 = arith.constant 0 : index
    %159 = vector.load %arg22[%c0_83, %c0_84] : memref<1x2048xf32, #tpu.memory_space<vmem>>, vector<1x2048xf32>
    %160 = vector.broadcast %159 : vector<1x2048xf32> to vector<2x2048xf32>
    %161 = arith.addf %158, %160 : vector<2x2048xf32>
    %cst_85 = arith.constant 0.000000e+00 : f32
    %162 = vector.broadcast %cst_85 : f32 to vector<2x2048xf32>
    %163 = arith.maximumf %161, %162 : vector<2x2048xf32>
    %164 = arith.truncf %163 : vector<2x2048xf32> to vector<2x2048xbf16>
    %c0_86 = arith.constant 0 : index
    %c0_87 = arith.constant 0 : index
    %165 = vector.load %arg23[%c0_86, %c0_87] : memref<2x2048xbf16, #tpu.memory_space<vmem>>, vector<2x2048xbf16>
    tpu.vector_store %arg23[%c0_86, %c0_87], %164 {strides = array<i32>} : memref<2x2048xbf16, #tpu.memory_space<vmem>>, vector<2x2048xbf16>,
    return
  }
}

module attributes {stable_mosaic.version = 11 : i64} {
  func.func @_convt_phase_kernel(%arg0: i32, %arg1: memref<1x32x512xbf16, #tpu.memory_space<vmem>>, %arg2: memref<1x512x128xbf16, #tpu.memory_space<vmem>>, %arg3: memref<1x1x128xf32, #tpu.memory_space<vmem>>, %arg4: memref<1x32x128xbf16, #tpu.memory_space<vmem>>) attributes {dimension_semantics = [#tpu.dimension_semantics<parallel>], iteration_bounds = array<i64: 4>, scalar_prefetch = 0 : i64, scratch_operands = 0 : i64, tpu.core_type = #tpu.core_type<tc>, window_params = [{transform_indices = @transform_0, window_bounds = array<i64: 1, 32, 512>}, {transform_indices = @transform_1, window_bounds = array<i64: 1, 512, 128>}, {pipeline_mode = #tpu.pipeline_mode<synchronous>, transform_indices = @transform_2, window_bounds = array<i64: 1, 1, 128>}, {transform_indices = @transform_3, window_bounds = array<i64: 1, 32, 128>}]} {
    %c0 = arith.constant 0 : index
    %c0_0 = arith.constant 0 : index
    %c0_1 = arith.constant 0 : index
    %0 = vector.load %arg1[%c0, %c0_0, %c0_1] : memref<1x32x512xbf16, #tpu.memory_space<vmem>>, vector<1x32x512xbf16>
    %1 = vector.shape_cast %0 : vector<1x32x512xbf16> to vector<32x512xbf16>
    %c0_2 = arith.constant 0 : index
    %c0_3 = arith.constant 0 : index
    %c0_4 = arith.constant 0 : index
    %2 = vector.load %arg2[%c0_2, %c0_3, %c0_4] : memref<1x512x128xbf16, #tpu.memory_space<vmem>>, vector<1x512x128xbf16>
    %3 = vector.shape_cast %2 : vector<1x512x128xbf16> to vector<512x128xbf16>
    %cst = arith.constant dense<0.000000e+00> : vector<32x128xf32>
    %4 = tpu.matmul %1, %3, %cst {dimension_numbers = #tpu.dot_dimension_numbers<[1], [0], [0], [1], [0, 0, 1, 1], [], []>} : vector<32x512xbf16>, vector<512x128xbf16>, vector<32x128xf32> -> vector<32x128xf32>
    %c0_5 = arith.constant 0 : index
    %c0_6 = arith.constant 0 : index
    %c0_7 = arith.constant 0 : index
    %5 = vector.load %arg3[%c0_5, %c0_6, %c0_7] : memref<1x1x128xf32, #tpu.memory_space<vmem>>, vector<1x1x128xf32>
    %6 = vector.shape_cast %5 : vector<1x1x128xf32> to vector<1x128xf32>
    %7 = vector.broadcast %6 : vector<1x128xf32> to vector<32x128xf32>
    %8 = arith.addf %4, %7 : vector<32x128xf32>
    %cst_8 = arith.constant 0.000000e+00 : f32
    %9 = vector.broadcast %cst_8 : f32 to vector<32x128xf32>
    %10 = arith.maximumf %8, %9 : vector<32x128xf32>
    %11 = arith.truncf %10 : vector<32x128xf32> to vector<32x128xbf16>
    %c0_9 = arith.constant 0 : index
    %c0_10 = arith.constant 0 : index
    %c0_11 = arith.constant 0 : index
    %12 = vector.load %arg4[%c0_9, %c0_10, %c0_11] : memref<1x32x128xbf16, #tpu.memory_space<vmem>>, vector<1x32x128xbf16>
    %13 = vector.shape_cast %12 : vector<1x32x128xbf16> to vector<32x128xbf16>
    %14 = vector.shape_cast %11 : vector<32x128xbf16> to vector<1x32x128xbf16>
    tpu.vector_store %arg4[%c0_9, %c0_10, %c0_11], %14 {strides = array<i32>} : memref<1x32x128xbf16, #tpu.memory_space<vmem>>, vector<1x32x128xbf16>,
    return
  }
  func.func @transform_0(%arg0: i32) -> (i32, i32, i32) {
    %c0_i32 = arith.constant 0 : i32
    %c0_i32_0 = arith.constant 0 : i32
    %c0_i32_1 = arith.constant 0 : i32
    return %arg0, %c0_i32, %c0_i32_0 : i32, i32, i32
  }
  func.func @transform_1(%arg0: i32) -> (i32, i32, i32) {
    %c0_i32 = arith.constant 0 : i32
    %c0_i32_0 = arith.constant 0 : i32
    %c0_i32_1 = arith.constant 0 : i32
    return %arg0, %c0_i32, %c0_i32_0 : i32, i32, i32
  }
  func.func @transform_2(%arg0: i32) -> (i32, i32, i32) {
    %c0_i32 = arith.constant 0 : i32
    %c0_i32_0 = arith.constant 0 : i32
    %c0_i32_1 = arith.constant 0 : i32
    %c0_i32_2 = arith.constant 0 : i32
    return %c0_i32, %c0_i32_0, %c0_i32_1 : i32, i32, i32
  }
  func.func @transform_3(%arg0: i32) -> (i32, i32, i32) {
    %c0_i32 = arith.constant 0 : i32
    %c0_i32_0 = arith.constant 0 : i32
    %c0_i32_1 = arith.constant 0 : i32
    return %arg0, %c0_i32, %c0_i32_0 : i32, i32, i32
  }
}

module attributes {stable_mosaic.version = 11 : i64} {
  func.func @_convt_phase_kernel(%arg0: i32, %arg1: memref<1x128x512xbf16, #tpu.memory_space<vmem>>, %arg2: memref<1x512x128xbf16, #tpu.memory_space<vmem>>, %arg3: memref<1x1x128xf32, #tpu.memory_space<vmem>>, %arg4: memref<1x128x128xbf16, #tpu.memory_space<vmem>>) attributes {dimension_semantics = [#tpu.dimension_semantics<parallel>], iteration_bounds = array<i64: 4>, scalar_prefetch = 0 : i64, scratch_operands = 0 : i64, tpu.core_type = #tpu.core_type<tc>, window_params = [{transform_indices = @transform_0, window_bounds = array<i64: 1, 128, 512>}, {transform_indices = @transform_1, window_bounds = array<i64: 1, 512, 128>}, {pipeline_mode = #tpu.pipeline_mode<synchronous>, transform_indices = @transform_2, window_bounds = array<i64: 1, 1, 128>}, {transform_indices = @transform_3, window_bounds = array<i64: 1, 128, 128>}]} {
    %c0 = arith.constant 0 : index
    %c0_0 = arith.constant 0 : index
    %c0_1 = arith.constant 0 : index
    %0 = vector.load %arg1[%c0, %c0_0, %c0_1] : memref<1x128x512xbf16, #tpu.memory_space<vmem>>, vector<1x128x512xbf16>
    %1 = vector.shape_cast %0 : vector<1x128x512xbf16> to vector<128x512xbf16>
    %c0_2 = arith.constant 0 : index
    %c0_3 = arith.constant 0 : index
    %c0_4 = arith.constant 0 : index
    %2 = vector.load %arg2[%c0_2, %c0_3, %c0_4] : memref<1x512x128xbf16, #tpu.memory_space<vmem>>, vector<1x512x128xbf16>
    %3 = vector.shape_cast %2 : vector<1x512x128xbf16> to vector<512x128xbf16>
    %cst = arith.constant dense<0.000000e+00> : vector<128x128xf32>
    %4 = tpu.matmul %1, %3, %cst {dimension_numbers = #tpu.dot_dimension_numbers<[1], [0], [0], [1], [0, 0, 1, 1], [], []>} : vector<128x512xbf16>, vector<512x128xbf16>, vector<128x128xf32> -> vector<128x128xf32>
    %c0_5 = arith.constant 0 : index
    %c0_6 = arith.constant 0 : index
    %c0_7 = arith.constant 0 : index
    %5 = vector.load %arg3[%c0_5, %c0_6, %c0_7] : memref<1x1x128xf32, #tpu.memory_space<vmem>>, vector<1x1x128xf32>
    %6 = vector.shape_cast %5 : vector<1x1x128xf32> to vector<1x128xf32>
    %7 = vector.broadcast %6 : vector<1x128xf32> to vector<128x128xf32>
    %8 = arith.addf %4, %7 : vector<128x128xf32>
    %cst_8 = arith.constant 0.000000e+00 : f32
    %9 = vector.broadcast %cst_8 : f32 to vector<128x128xf32>
    %10 = arith.maximumf %8, %9 : vector<128x128xf32>
    %11 = arith.truncf %10 : vector<128x128xf32> to vector<128x128xbf16>
    %c0_9 = arith.constant 0 : index
    %c0_10 = arith.constant 0 : index
    %c0_11 = arith.constant 0 : index
    %12 = vector.load %arg4[%c0_9, %c0_10, %c0_11] : memref<1x128x128xbf16, #tpu.memory_space<vmem>>, vector<1x128x128xbf16>
    %13 = vector.shape_cast %12 : vector<1x128x128xbf16> to vector<128x128xbf16>
    %14 = vector.shape_cast %11 : vector<128x128xbf16> to vector<1x128x128xbf16>
    tpu.vector_store %arg4[%c0_9, %c0_10, %c0_11], %14 {strides = array<i32>} : memref<1x128x128xbf16, #tpu.memory_space<vmem>>, vector<1x128x128xbf16>,
    return
  }
  func.func @transform_0(%arg0: i32) -> (i32, i32, i32) {
    %c0_i32 = arith.constant 0 : i32
    %c0_i32_0 = arith.constant 0 : i32
    %c0_i32_1 = arith.constant 0 : i32
    return %arg0, %c0_i32, %c0_i32_0 : i32, i32, i32
  }
  func.func @transform_1(%arg0: i32) -> (i32, i32, i32) {
    %c0_i32 = arith.constant 0 : i32
    %c0_i32_0 = arith.constant 0 : i32
    %c0_i32_1 = arith.constant 0 : i32
    return %arg0, %c0_i32, %c0_i32_0 : i32, i32, i32
  }
  func.func @transform_2(%arg0: i32) -> (i32, i32, i32) {
    %c0_i32 = arith.constant 0 : i32
    %c0_i32_0 = arith.constant 0 : i32
    %c0_i32_1 = arith.constant 0 : i32
    %c0_i32_2 = arith.constant 0 : i32
    return %c0_i32, %c0_i32_0, %c0_i32_1 : i32, i32, i32
  }
  func.func @transform_3(%arg0: i32) -> (i32, i32, i32) {
    %c0_i32 = arith.constant 0 : i32
    %c0_i32_0 = arith.constant 0 : i32
    %c0_i32_1 = arith.constant 0 : i32
    return %arg0, %c0_i32, %c0_i32_0 : i32, i32, i32
  }
}

module attributes {stable_mosaic.version = 11 : i64} {
  func.func @_convt_phase_kernel(%arg0: i32, %arg1: memref<1x512x512xbf16, #tpu.memory_space<vmem>>, %arg2: memref<1x512x128xbf16, #tpu.memory_space<vmem>>, %arg3: memref<1x1x128xf32, #tpu.memory_space<vmem>>, %arg4: memref<1x512x128xf32, #tpu.memory_space<vmem>>) attributes {dimension_semantics = [#tpu.dimension_semantics<parallel>], iteration_bounds = array<i64: 4>, scalar_prefetch = 0 : i64, scratch_operands = 0 : i64, tpu.core_type = #tpu.core_type<tc>, window_params = [{transform_indices = @transform_0, window_bounds = array<i64: 1, 512, 512>}, {transform_indices = @transform_1, window_bounds = array<i64: 1, 512, 128>}, {pipeline_mode = #tpu.pipeline_mode<synchronous>, transform_indices = @transform_2, window_bounds = array<i64: 1, 1, 128>}, {transform_indices = @transform_3, window_bounds = array<i64: 1, 512, 128>}]} {
    %c0 = arith.constant 0 : index
    %c0_0 = arith.constant 0 : index
    %c0_1 = arith.constant 0 : index
    %0 = vector.load %arg1[%c0, %c0_0, %c0_1] : memref<1x512x512xbf16, #tpu.memory_space<vmem>>, vector<1x512x512xbf16>
    %1 = vector.shape_cast %0 : vector<1x512x512xbf16> to vector<512x512xbf16>
    %c0_2 = arith.constant 0 : index
    %c0_3 = arith.constant 0 : index
    %c0_4 = arith.constant 0 : index
    %2 = vector.load %arg2[%c0_2, %c0_3, %c0_4] : memref<1x512x128xbf16, #tpu.memory_space<vmem>>, vector<1x512x128xbf16>
    %3 = vector.shape_cast %2 : vector<1x512x128xbf16> to vector<512x128xbf16>
    %cst = arith.constant dense<0.000000e+00> : vector<512x128xf32>
    %4 = tpu.matmul %1, %3, %cst {dimension_numbers = #tpu.dot_dimension_numbers<[1], [0], [0], [1], [0, 0, 1, 1], [], []>} : vector<512x512xbf16>, vector<512x128xbf16>, vector<512x128xf32> -> vector<512x128xf32>
    %c0_5 = arith.constant 0 : index
    %c0_6 = arith.constant 0 : index
    %c0_7 = arith.constant 0 : index
    %5 = vector.load %arg3[%c0_5, %c0_6, %c0_7] : memref<1x1x128xf32, #tpu.memory_space<vmem>>, vector<1x1x128xf32>
    %6 = vector.shape_cast %5 : vector<1x1x128xf32> to vector<1x128xf32>
    %7 = vector.broadcast %6 : vector<1x128xf32> to vector<512x128xf32>
    %8 = arith.addf %4, %7 : vector<512x128xf32>
    %9 = arith.negf %8 : vector<512x128xf32>
    %10 = math.exp %9 : vector<512x128xf32>
    %cst_8 = arith.constant 1.000000e+00 : f32
    %11 = vector.broadcast %cst_8 : f32 to vector<512x128xf32>
    %12 = arith.addf %11, %10 : vector<512x128xf32>
    %13 = arith.divf %11, %12 : vector<512x128xf32>
    %c0_9 = arith.constant 0 : index
    %c0_10 = arith.constant 0 : index
    %c0_11 = arith.constant 0 : index
    %14 = vector.load %arg4[%c0_9, %c0_10, %c0_11] : memref<1x512x128xf32, #tpu.memory_space<vmem>>, vector<1x512x128xf32>
    %15 = vector.shape_cast %14 : vector<1x512x128xf32> to vector<512x128xf32>
    %16 = vector.shape_cast %13 : vector<512x128xf32> to vector<1x512x128xf32>
    tpu.vector_store %arg4[%c0_9, %c0_10, %c0_11], %16 {strides = array<i32>} : memref<1x512x128xf32, #tpu.memory_space<vmem>>, vector<1x512x128xf32>,
    return
  }
  func.func @transform_0(%arg0: i32) -> (i32, i32, i32) {
    %c0_i32 = arith.constant 0 : i32
    %c0_i32_0 = arith.constant 0 : i32
    %c0_i32_1 = arith.constant 0 : i32
    return %arg0, %c0_i32, %c0_i32_0 : i32, i32, i32
  }
  func.func @transform_1(%arg0: i32) -> (i32, i32, i32) {
    %c0_i32 = arith.constant 0 : i32
    %c0_i32_0 = arith.constant 0 : i32
    %c0_i32_1 = arith.constant 0 : i32
    return %arg0, %c0_i32, %c0_i32_0 : i32, i32, i32
  }
  func.func @transform_2(%arg0: i32) -> (i32, i32, i32) {
    %c0_i32 = arith.constant 0 : i32
    %c0_i32_0 = arith.constant 0 : i32
    %c0_i32_1 = arith.constant 0 : i32
    %c0_i32_2 = arith.constant 0 : i32
    return %c0_i32, %c0_i32_0, %c0_i32_1 : i32, i32, i32
  }
  func.func @transform_3(%arg0: i32) -> (i32, i32, i32) {
    %c0_i32 = arith.constant 0 : i32
    %c0_i32_0 = arith.constant 0 : i32
    %c0_i32_1 = arith.constant 0 : i32
    return %arg0, %c0_i32, %c0_i32_0 : i32, i32, i32
  }
}

</mosaic_0001>

<bundles_post_ra>
// kernel: sparse_attn_autoencoder_forward.7
= control target key start
LH: loop header
LB: loop body
LE: loop exit
PB: predicated region body
PF: predicated region fallthrough
CT: control target
= control target key end

     0   :  { %8 = vsyncpa [#allocation3], 0  ;;  %s1369_s0 = inlined_call_operand.vmem [shape: bf16[512,16], index: 0, kind: input, shape index: {}]   ;;  %s1370_s1 = inlined_call_operand.hbm [shape: bf16[16,128], index: 1, kind: input, shape index: {}]   ;;  %s1371_s2 = inlined_call_operand.hbm [shape: f32[1,128], index: 2, kind: input, shape index: {}]   ;;  %s1372_s3 = inlined_call_operand.vmem [shape: bf16[512,128], index: 3, kind: output, shape index: {}]  }
   0x1   :  { %9 = vsyncpa [#allocation5], 0  ;;  %s1211_s12 = smov 0  }
   0x2 LB: > { %s810_s13 = sadd.s32 4294967295, %s1185_s12   ;;  %p812_p0 = scmp.ge.s32.totalorder %s1185_s12, 1  ;;  %s1185_s12 = sphi %s1211_s12, %s15_s12  }
   0x3   : > { %p114_p1 = scmp.lt.s32.totalorder %s1185_s12, 3  ;;  %s1187_s14 = smov [#allocation2]  }
   0x4   : > { %s126_s15 = sshll.u32 %s1187_s14, 4  ;;  %p1225_p3 = scmp.eq.s32.totalorder %s810_s13, 0  ;;  %s127_s15 = int_to_ptr.vmem [resolvable:$true] %s126_s15 }
   0x5   : > { %p1219_p2 = pnand %p812_p0, %p114_p1  ;;  %s1188_s18 = smov [#allocation4]  }
   0x6   : > { %s140_s19 = sshll.u32 %s1188_s18, 4  ;;  %s1130_s21 = scalar_lea.vmem %s127_s15, 128  ;;  %s141_s19 = int_to_ptr.vmem [resolvable:$true] %s140_s19 }
   0x7   : > { %p1079_p4 = pneg %p1219_p2  ;;  %p1131_p7 = scmp.ne.s32.totalorder %s127_s15, %s1130_s21 }
   0x8   : > { %p1138_p10 = scmp.lt.s32.totalorder %s127_s15, %s127_s15  ;;  %p1139_p11 = scmp.lt.s32.totalorder %s1130_s21, %s1130_s21 }
   0x9   : > { %p1233_p5 = pnand %p1225_p3, %p1079_p4 }
   0xa   : > { %p1140_p12 = por %p1139_p11, %p1138_p10 }
   0xb   : > { %p1121_p6 = pneg %p1233_p5 }
   0xd   : > { %p1133_p8 = pnand %p1131_p7, %p1121_p6 }
   0xf   : > { %p1134_p9 = pneg %p1133_p8 }
  0x11   : > { %p1141_p13 = pnand %p1140_p12, %p1134_p9 }
  0x13   : > { %1144 = shalt.err (!%p1141_p13)
}
  0x14   : > { %s1189_s22 = smov 64   ;;  %s1190_s23 = smov 4  }
  0x15   : > { %1082 = dma.hbm_to_vmem [thread:$0]  (!%p1233_p5), %s1370_s1, 128, %s127_s15, [#allocation3], %s1189_s22, %s1189_s22, %s1190_s23  }
  0x16   : > { %s1156_s26 = scalar_lea.vmem %s141_s19, 16  ;;  %s1163_s27 = scalar_lea.vmem %s141_s19, 32 }
  0x17   : > { %p1157_p0 = scmp.ne.s32.totalorder %s141_s19, %s1156_s26  ;;  %p1164_p7 = scmp.lt.s32.totalorder %s141_s19, %s141_s19 }
  0x18   : > { %p1165_p8 = scmp.lt.s32.totalorder %s1163_s27, %s1156_s26 }
  0x19   : > { %p1159_p1 = pnand %p1157_p0, %p1121_p6 }
  0x1a   : > { %p1166_p9 = por %p1165_p8, %p1164_p7 }
  0x1b   : > { %p1160_p4 = pneg %p1159_p1 }
  0x1d   : > { %p1167_p10 = pnand %p1166_p9, %p1160_p4 }
  0x1f   : > { %1170 = shalt.err (!%p1167_p10)
}
  0x20   : > { %1085 = dma.hbm_to_vmem [thread:$0]  (!%p1233_p5), %s1371_s2, 16, %s141_s19, [#allocation5]  }
  0x21   : > { %162 = sbr.rel (%p1219_p2) target bundleno = 280 (0x118), region = 32 }
  0x26   : > { %1176 = dma.done.wait (%p1225_p3), [#allocation3], 128  }
  0x27   : > { %1178 = vsyncadd (%p1225_p3), [#allocation3], 4294967168 }
  0x28   : > { %1180 = dma.done.wait (%p1225_p3), [#allocation5], 16  }
  0x29   : > { %1182 = vsyncadd (%p1225_p3), [#allocation5], 4294967280  ;;  %s819_s30 = sshll.u32 %s810_s13, 5  ;;  %v1102_v0 = vld [vmem:[#allocation2] sm:$0xff]   ;;  %vm330_vm0 = vcmask 130048  }
  0x2a   : > { %p191_p6 = scmp.lt.s32.totalorder %s819_s30, 63  ;;  %1035 = vmatprep.subr.bf16.mxu0 %v1102_v0  ;;  %1069 = vmatprep.subr.bf16.mxu1 %v1102_v0  ;;  %v1309_v17 = vld [vmem:[#allocation4] ss:$0 sm:$0xff] }
  0x2b   : > { %1036 = vmatpush3.bf16.msra.mxu0 %v1102_v0  ;;  %1070 = vmatpush3.bf16.msra.mxu1 %v1102_v0 }
  0x2c   : > { %s1377_s30 = smov (!%p191_p6, %s819_s30), 63 }
  0x2d   : > { %s820_s4 = sshll.u32 %s1377_s30, 2 }
  0x2e   : > { %s1275_s7 = scalar_lea.vmem %s1369_s0, %s820_s4  ;;  %s1324_s10 = scalar_lea.vmem %s1372_s3, %s820_s4 }
  0x2f   : > { %v1103_v1 = vld [vmem:[%s1275_s7] sm:$0xff]   ;;  %v1105_v3 = vld [vmem:[%s1275_s7 + $0x8] sm:$0xff]   ;;  %v1107_v5 = vld [vmem:[%s1275_s7 + $0x10] sm:$0xff]  }
  0x30   : > { %v1104_v2 = vld [vmem:[%s1275_s7 + $0x40] sm:$0xff]   ;;  %1037 = vmatprep.mubr.msk.bf16.mxu0 %vm330_vm0, %v1103_v1  ;;  %v1106_v4 = vld [vmem:[%s1275_s7 + $0x48] sm:$0xff]   ;;  %v1108_v6 = vld [vmem:[%s1275_s7 + $0x50] sm:$0xff]  }
  0x31   : > { %1053 = vmatprep.mubr.msk.bf16.mxu1 %vm330_vm0, %v1104_v2  ;;  %1038 = vmatmul.mubr.msk.bf16.vlgmr.msra.gmra.mxu0 %vm330_vm0, %v1105_v3  ;;  %v1109_v7 = vld [vmem:[%s1275_s7 + $0x18] sm:$0xff]   ;;  %v1111_v9 = vld [vmem:[%s1275_s7 + $0x20] sm:$0xff]   ;;  %v1113_v11 = vld [vmem:[%s1275_s7 + $0x28] sm:$0xff]  }
  0x32   : > { %1054 = vmatmul.mubr.msk.bf16.vlgmr.msra.gmra.mxu1 %vm330_vm0, %v1106_v4  ;;  %1041 = vmatprep.mubr.msk.bf16.mxu0 %vm330_vm0, %v1107_v5  ;;  %v1110_v8 = vld [vmem:[%s1275_s7 + $0x58] sm:$0xff]   ;;  %v1112_v10 = vld [vmem:[%s1275_s7 + $0x60] sm:$0xff]   ;;  %v1114_v12 = vld [vmem:[%s1275_s7 + $0x68] sm:$0xff]  }
  0x33   : > { %1057 = vmatprep.mubr.msk.bf16.mxu1 %vm330_vm0, %v1108_v6  ;;  %v1115_v13 = vld [vmem:[%s1275_s7 + $0x30] sm:$0xff]   ;;  %v1117_v15 = vld [vmem:[%s1275_s7 + $0x38] sm:$0xff]  }
  0x34   : > { %v1116_v14 = vld [vmem:[%s1275_s7 + $0x70] sm:$0xff]   ;;  %v1118_v16 = vld [vmem:[%s1275_s7 + $0x78] sm:$0xff]  }
  0x39   : > { %1042 = vmatmul.mubr.msk.bf16.gmra.mxu0 %vm330_vm0, %v1109_v7 }
  0x3a   : > { %1058 = vmatmul.mubr.msk.bf16.gmra.mxu1 %vm330_vm0, %v1110_v8  ;;  %1045 = vmatprep.mubr.msk.bf16.mxu0 %vm330_vm0, %v1111_v9 }
  0x3b   : > { %1061 = vmatprep.mubr.msk.bf16.mxu1 %vm330_vm0, %v1112_v10 }
  0x41   : > { %1046 = vmatmul.mubr.msk.bf16.gmra.mxu0 %vm330_vm0, %v1113_v11 }
  0x42   : > { %1062 = vmatmul.mubr.msk.bf16.gmra.mxu1 %vm330_vm0, %v1114_v12  ;;  %1049 = vmatprep.mubr.msk.bf16.mxu0 %vm330_vm0, %v1115_v13 }
  0x43   : > { %1065 = vmatprep.mubr.msk.bf16.mxu1 %vm330_vm0, %v1116_v14 }
  0x49   : > { %1050 = vmatmul.mubr.msk.bf16.gmra.mxu0 %vm330_vm0, %v1117_v15 }
  0x4a   : > { %1066 = vmatmul.mubr.msk.bf16.gmra.mxu1 %vm330_vm0, %v1118_v16 }
  0xf1   : > { %v1039_v18 = vpop.f32.mrf.mxu0 }
  0xf2   : > { %v1055_v19 = vpop.f32.mrf.mxu1  ;;  %v422_v20 = vadd.f32 %v1039_v18, %v1309_v17 }
  0xf3   : > { %v486_v21 = vadd.f32 %v1055_v19, %v1309_v17  ;;  %v413_v22 = vpop.f32.mrf.mxu0 }
  0xf4   : > { %v477_v23 = vpop.f32.mrf.mxu1  ;;  %v414_v24 = vadd.f32 %v1309_v17, %v413_v22  ;;  %v542_v30 = vmax.f32 %v422_v20, 0.0 }
  0xf5   : > { %v478_v25 = vadd.f32 %v1309_v17, %v477_v23  ;;  %v1040_v26 = vpop.f32.mrf.mxu0  ;;  %v558_v31 = vmax.f32 %v486_v21, 0.0 }
  0xf6   : > { %v1056_v27 = vpop.f32.mrf.mxu1  ;;  %v425_v28 = vadd.f32 %v1040_v26, %v1309_v17  ;;  %v540_v38 = vmax.f32 %v414_v24, 0.0 }
  0xf7   : > { %v489_v29 = vadd.f32 %v1056_v27, %v1309_v17  ;;  %v416_v32 = vpop.f32.mrf.mxu0  ;;  %v556_v39 = vmax.f32 %v478_v25, 0.0 }
  0xf8   : > { %v480_v33 = vpop.f32.mrf.mxu1  ;;  %v543_v34 = vmax.f32 %v425_v28, 0.0  ;;  %v417_v36 = vadd.f32 %v1309_v17, %v416_v32 }
  0xf9   : > { %v559_v35 = vmax.f32 %v489_v29, 0.0  ;;  %v481_v37 = vadd.f32 %v1309_v17, %v480_v33  ;;  %v1043_v40 = vpop.f32.mrf.mxu0 }
  0xfa   : > { %v1059_v41 = vpop.f32.mrf.mxu1  ;;  %v931_v42 = vpack.c.bf16 %v543_v34, %v542_v30  ;;  %v541_v44 = vmax.f32 %v417_v36, 0.0  ;;  %v438_v46 = vadd.f32 %v1043_v40, %v1309_v17 }
  0xfb   : > { %v971_v43 = vpack.c.bf16 %v559_v35, %v558_v31  ;;  %v557_v45 = vmax.f32 %v481_v37, 0.0  ;;  %v502_v47 = vadd.f32 %v1059_v41, %v1309_v17  ;;  %v429_v48 = vpop.f32.mrf.mxu0 }
  0xfc   : > { %v493_v49 = vpop.f32.mrf.mxu1  ;;  %1003 = vst [vmem:[%s1324_s10 + $0x8] sm:$0xff] %v931_v42   ;;  %v926_v50 = vpack.c.bf16 %v541_v44, %v540_v38  ;;  %v430_v52 = vadd.f32 %v1309_v17, %v429_v48  ;;  %v546_v58 = vmax.f32 %v438_v46, 0.0 }
  0xfd   : > { %1011 = vst [vmem:[%s1324_s10 + $0x48] sm:$0xff] %v971_v43   ;;  %v966_v51 = vpack.c.bf16 %v557_v45, %v556_v39  ;;  %v494_v53 = vadd.f32 %v1309_v17, %v493_v49  ;;  %v1044_v54 = vpop.f32.mrf.mxu0  ;;  %v562_v59 = vmax.f32 %v502_v47, 0.0 }
  0xfe   : > { %v1060_v55 = vpop.f32.mrf.mxu1  ;;  %927 = vst [vmem:[%s1324_s10] sm:$0xff] %v926_v50   ;;  %v441_v56 = vadd.f32 %v1044_v54, %v1309_v17  ;;  %v544_v2 = vmax.f32 %v430_v52, 0.0 }
  0xff   : > { %1010 = vst [vmem:[%s1324_s10 + $0x40] sm:$0xff] %v966_v51   ;;  %v505_v57 = vadd.f32 %v1060_v55, %v1309_v17  ;;  %v432_v60 = vpop.f32.mrf.mxu0  ;;  %v560_v3 = vmax.f32 %v494_v53, 0.0 }
 0x100   : > { %v496_v61 = vpop.f32.mrf.mxu1  ;;  %v547_v62 = vmax.f32 %v441_v56, 0.0  ;;  %v433_v0 = vadd.f32 %v1309_v17, %v432_v60 }
 0x101   : > { %v563_v63 = vmax.f32 %v505_v57, 0.0  ;;  %v497_v1 = vadd.f32 %v1309_v17, %v496_v61  ;;  %v1047_v4 = vpop.f32.mrf.mxu0 }
 0x102   : > { %v1063_v5 = vpop.f32.mrf.mxu1  ;;  %v941_v6 = vpack.c.bf16 %v547_v62, %v546_v58  ;;  %v545_v8 = vmax.f32 %v433_v0, 0.0  ;;  %v454_v10 = vadd.f32 %v1047_v4, %v1309_v17 }
 0x103   : > { %v981_v7 = vpack.c.bf16 %v563_v63, %v562_v59  ;;  %v561_v9 = vmax.f32 %v497_v1, 0.0  ;;  %v518_v11 = vadd.f32 %v1063_v5, %v1309_v17  ;;  %v445_v12 = vpop.f32.mrf.mxu0 }
 0x104   : > { %v509_v13 = vpop.f32.mrf.mxu1  ;;  %1005 = vst [vmem:[%s1324_s10 + $0x18] sm:$0xff] %v941_v6   ;;  %v936_v14 = vpack.c.bf16 %v545_v8, %v544_v2  ;;  %v446_v16 = vadd.f32 %v1309_v17, %v445_v12  ;;  %v550_v23 = vmax.f32 %v454_v10, 0.0 }
 0x105   : > { %1013 = vst [vmem:[%s1324_s10 + $0x58] sm:$0xff] %v981_v7   ;;  %v976_v15 = vpack.c.bf16 %v561_v9, %v560_v3  ;;  %v510_v18 = vadd.f32 %v1309_v17, %v509_v13  ;;  %v1048_v19 = vpop.f32.mrf.mxu0  ;;  %v566_v24 = vmax.f32 %v518_v11, 0.0 }
 0x106   : > { %v1064_v20 = vpop.f32.mrf.mxu1  ;;  %1004 = vst [vmem:[%s1324_s10 + $0x10] sm:$0xff] %v936_v14   ;;  %v457_v21 = vadd.f32 %v1048_v19, %v1309_v17  ;;  %v548_v31 = vmax.f32 %v446_v16, 0.0 }
 0x107   : > { %1012 = vst [vmem:[%s1324_s10 + $0x50] sm:$0xff] %v976_v15   ;;  %v521_v22 = vadd.f32 %v1064_v20, %v1309_v17  ;;  %v448_v25 = vpop.f32.mrf.mxu0  ;;  %v564_v32 = vmax.f32 %v510_v18, 0.0 }
 0x108   : > { %v512_v26 = vpop.f32.mrf.mxu1  ;;  %v551_v27 = vmax.f32 %v457_v21, 0.0  ;;  %v449_v29 = vadd.f32 %v1309_v17, %v448_v25 }
 0x109   : > { %v567_v28 = vmax.f32 %v521_v22, 0.0  ;;  %v513_v30 = vadd.f32 %v1309_v17, %v512_v26  ;;  %v1051_v33 = vpop.f32.mrf.mxu0 }
 0x10a   : > { %v1067_v34 = vpop.f32.mrf.mxu1  ;;  %v951_v35 = vpack.c.bf16 %v551_v27, %v550_v23  ;;  %v549_v37 = vmax.f32 %v449_v29, 0.0  ;;  %v470_v39 = vadd.f32 %v1051_v33, %v1309_v17 }
 0x10b   : > { %v991_v36 = vpack.c.bf16 %v567_v28, %v566_v24  ;;  %v565_v38 = vmax.f32 %v513_v30, 0.0  ;;  %v534_v40 = vadd.f32 %v1067_v34, %v1309_v17  ;;  %v461_v41 = vpop.f32.mrf.mxu0 }
 0x10c   : > { %v525_v42 = vpop.f32.mrf.mxu1  ;;  %1007 = vst [vmem:[%s1324_s10 + $0x28] sm:$0xff] %v951_v35   ;;  %v946_v43 = vpack.c.bf16 %v549_v37, %v548_v31  ;;  %v462_v45 = vadd.f32 %v1309_v17, %v461_v41  ;;  %v554_v51 = vmax.f32 %v470_v39, 0.0 }
 0x10d   : > { %1015 = vst [vmem:[%s1324_s10 + $0x68] sm:$0xff] %v991_v36   ;;  %v986_v44 = vpack.c.bf16 %v565_v38, %v564_v32  ;;  %v526_v46 = vadd.f32 %v1309_v17, %v525_v42  ;;  %v1052_v47 = vpop.f32.mrf.mxu0  ;;  %v570_v52 = vmax.f32 %v534_v40, 0.0 }
 0x10e   : > { %v1068_v48 = vpop.f32.mrf.mxu1  ;;  %1006 = vst [vmem:[%s1324_s10 + $0x20] sm:$0xff] %v946_v43   ;;  %v473_v49 = vadd.f32 %v1052_v47, %v1309_v17  ;;  %v552_v59 = vmax.f32 %v462_v45, 0.0 }
 0x10f   : > { %1014 = vst [vmem:[%s1324_s10 + $0x60] sm:$0xff] %v986_v44   ;;  %v537_v50 = vadd.f32 %v1068_v48, %v1309_v17  ;;  %v464_v53 = vpop.f32.mrf.mxu0  ;;  %v568_v60 = vmax.f32 %v526_v46, 0.0 }
 0x110   : > { %v528_v54 = vpop.f32.mrf.mxu1  ;;  %v555_v55 = vmax.f32 %v473_v49, 0.0  ;;  %v465_v57 = vadd.f32 %v1309_v17, %v464_v53 }
 0x111   : > { %v571_v56 = vmax.f32 %v537_v50, 0.0  ;;  %v529_v58 = vadd.f32 %v1309_v17, %v528_v54 }
 0x112   : > { %v961_v61 = vpack.c.bf16 %v555_v55, %v554_v51  ;;  %v553_v63 = vmax.f32 %v465_v57, 0.0 }
 0x113   : > { %v1001_v62 = vpack.c.bf16 %v571_v56, %v570_v52  ;;  %v569_v0 = vmax.f32 %v529_v58, 0.0 }
 0x114   : > { %1009 = vst [vmem:[%s1324_s10 + $0x38] sm:$0xff] %v961_v61   ;;  %v956_v1 = vpack.c.bf16 %v553_v63, %v552_v59 }
 0x115   : > { %1017 = vst [vmem:[%s1324_s10 + $0x78] sm:$0xff] %v1001_v62   ;;  %v996_v2 = vpack.c.bf16 %v569_v0, %v568_v60 }
 0x116   : > { %1008 = vst [vmem:[%s1324_s10 + $0x30] sm:$0xff] %v956_v1  }
 0x117   : > { %1016 = vst [vmem:[%s1324_s10 + $0x70] sm:$0xff] %v996_v2  }
 0x118 PF: > { %s15_s12 = sadd.s32 1, %s1185_s12  }
 0x119   : > { %p12_p2 = scmp.ge.s32.totalorder %s15_s12, 4  }
 0x11b   :  { %14 = sbr.rel (!%p12_p2) target bundleno = 2 (0x2), region = 71 }
 0x120   :  { %754 = vsyncpa [#allocation3], 1 }
 0x121   :  { %756 = vsyncpa [#allocation3 + $0x1], 1 }
 0x122   :  { %757 = vsyncpa [#allocation5], 1 }

// kernel: sparse_attn_autoencoder_forward.8
= control target key start
LH: loop header
LB: loop body
LE: loop exit
PB: predicated region body
PF: predicated region fallthrough
CT: control target
= control target key end

     0   :  { %s2946_s12 = smov 0   ;;  %s3584_s0 = inlined_call_operand.vmem [shape: bf16[128,2048], index: 0, kind: input, shape index: {}]   ;;  %s3585_s1 = inlined_call_operand.vmem [shape: bf16[2048,128], index: 1, kind: input, shape index: {}]   ;;  %s3586_s2 = inlined_call_operand.vmem [shape: f32[1,128], index: 2, kind: input, shape index: {}]   ;;  %s3587_s3 = inlined_call_operand.vmem [shape: bf16[128,128], index: 3, kind: output, shape index: {}]  }
   0x1 LB: > { %s2217_s13 = sadd.s32 4294967295, %s2924_s12   ;;  %p2221_p0 = scmp.ge.s32.totalorder %s2924_s12, 1  ;;  %s2924_s12 = sphi %s2946_s12, %s13_s12  }
   0x2   : > { %p139_p1 = scmp.lt.s32.totalorder %s2924_s12, 3 }
   0x4   : > { %p140_p2 = pnand %p2221_p0, %p139_p1 }
   0x6   : > { %143 = sbr.rel (%p140_p2) target bundleno = 375 (0x177), region = 32 }
   0xb   : > { %v2790_v0 = vld [vmem:[%s3585_s1 + $0x78] sm:$0xff]   ;;  %v2794_v4 = vld [vmem:[%s3585_s1 + $0x70] sm:$0xff]   ;;  %v2798_v8 = vld [vmem:[%s3585_s1 + $0x68] sm:$0xff]   ;;  %s2222_s21 = sshll.u32 %s2217_s13, 3 }
   0xc   : > { %v2791_v1 = vld [vmem:[%s3585_s1 + $0xf8] sm:$0xff]   ;;  %2462 = vmatprep.subr.bf16.mxu0 %v2790_v0  ;;  %v2795_v5 = vld [vmem:[%s3585_s1 + $0xf0] sm:$0xff]   ;;  %v2799_v9 = vld [vmem:[%s3585_s1 + $0xe8] sm:$0xff]   ;;  %p165_p3 = scmp.lt.s32.totalorder %s2222_s21, 15 }
   0xd   : > { %v2792_v2 = vld [vmem:[%s3585_s1 + $0x38] sm:$0xff]   ;;  %2502 = vmatprep.subr.bf16.mxu1 %v2791_v1  ;;  %v2796_v6 = vld [vmem:[%s3585_s1 + $0x30] sm:$0xff]   ;;  %v2800_v10 = vld [vmem:[%s3585_s1 + $0x28] sm:$0xff]  }
   0xe   : > { %v2793_v3 = vld [vmem:[%s3585_s1 + $0xb8] sm:$0xff]   ;;  %2463 = vmatpush3.bf16.msra.mxu0 %v2792_v2  ;;  %v2797_v7 = vld [vmem:[%s3585_s1 + $0xb0] sm:$0xff]   ;;  %v2801_v11 = vld [vmem:[%s3585_s1 + $0xa8] sm:$0xff]   ;;  %s3621_s21 = smov (!%p165_p3, %s2222_s21), 15 }
   0xf   : > { %2503 = vmatpush3.bf16.msra.mxu1 %v2793_v3  ;;  %2464 = vmatprep.subr.bf16.mxu0 %v2794_v4  ;;  %v2802_v12 = vld [vmem:[%s3585_s1 + $0x60] sm:$0xff]   ;;  %v2806_v16 = vld [vmem:[%s3585_s1 + $0x58] sm:$0xff]   ;;  %v2810_v20 = vld [vmem:[%s3585_s1 + $0x50] sm:$0xff]   ;;  %s2430_s18 = sshll.u32 %s3621_s21, 6 }
  0x10   : > { %2504 = vmatprep.subr.bf16.mxu1 %v2795_v5  ;;  %v2803_v13 = vld [vmem:[%s3585_s1 + $0xe0] sm:$0xff]   ;;  %v2807_v17 = vld [vmem:[%s3585_s1 + $0xd8] sm:$0xff]   ;;  %v2811_v21 = vld [vmem:[%s3585_s1 + $0xd0] sm:$0xff]   ;;  %s3052_s28 = scalar_lea.vmem %s3584_s0, %s2430_s18 }
  0x11   : > { %v2804_v14 = vld [vmem:[%s3585_s1 + $0x20] sm:$0xff]   ;;  %v2808_v18 = vld [vmem:[%s3585_s1 + $0x18] sm:$0xff]   ;;  %v2812_v22 = vld [vmem:[%s3585_s1 + $0x10] sm:$0xff]  }
  0x12   : > { %2465 = vmatpush3.bf16.msra.mxu0 %v2796_v6  ;;  %v2805_v15 = vld [vmem:[%s3585_s1 + $0xa0] sm:$0xff]   ;;  %v2809_v19 = vld [vmem:[%s3585_s1 + $0x98] sm:$0xff]   ;;  %v2813_v23 = vld [vmem:[%s3585_s1 + $0x90] sm:$0xff]  }
  0x13   : > { %2505 = vmatpush3.bf16.msra.mxu1 %v2797_v7  ;;  %2466 = vmatprep.subr.bf16.mxu0 %v2798_v8  ;;  %v2814_v24 = vld [vmem:[%s3585_s1 + $0x48] sm:$0xff]   ;;  %v2818_v28 = vld [vmem:[%s3585_s1 + $0x40] sm:$0xff]   ;;  %v2822_v40 = vld [vmem:[%s3585_s1 + $0x178] sm:$0xff]  }
  0x14   : > { %2506 = vmatprep.subr.bf16.mxu1 %v2799_v9  ;;  %v2815_v25 = vld [vmem:[%s3585_s1 + $0xc8] sm:$0xff]   ;;  %v2819_v29 = vld [vmem:[%s3585_s1 + $0xc0] sm:$0xff]   ;;  %v2823_v41 = vld [vmem:[%s3585_s1 + $0x1f8] sm:$0xff]  }
  0x15   : > { %v2816_v26 = vld [vmem:[%s3585_s1 + $0x8] sm:$0xff]   ;;  %v2820_v30 = vld [vmem:[%s3585_s1] sm:$0xff]   ;;  %v2824_v42 = vld [vmem:[%s3585_s1 + $0x138] sm:$0xff]  }
  0x16   : > { %2467 = vmatpush3.bf16.msra.mxu0 %v2800_v10  ;;  %v2817_v27 = vld [vmem:[%s3585_s1 + $0x88] sm:$0xff]   ;;  %v2821_v31 = vld [vmem:[%s3585_s1 + $0x80] sm:$0xff]   ;;  %v2825_v43 = vld [vmem:[%s3585_s1 + $0x1b8] sm:$0xff]  }
  0x17   : > { %2507 = vmatpush3.bf16.msra.mxu1 %v2801_v11  ;;  %2468 = vmatprep.subr.bf16.mxu0 %v2802_v12  ;;  %v178_v32 = vld [vmem:[%s3052_s28] sm:$0xff]  ;;  %v179_v34 = vld [vmem:[%s3052_s28 + $0x8] sm:$0xff]  ;;  %v2826_v44 = vld [vmem:[%s3585_s1 + $0x170] sm:$0xff]  }
  0x18   : > { %2508 = vmatprep.subr.bf16.mxu1 %v2803_v13  ;;  %v186_v33 = vld [vmem:[%s3052_s28 + $0x40] sm:$0xff]  ;;  %v187_v37 = vld [vmem:[%s3052_s28 + $0x48] sm:$0xff]  ;;  %v2827_v45 = vld [vmem:[%s3585_s1 + $0x1f0] sm:$0xff]  }
  0x19   : > { %v2228_v35 = vcombine.low %v178_v32, %v186_v33  ;;  %v2229_v36 = vcombine.high %v178_v32, %v186_v33  ;;  %v2230_v38 = vcombine.low %v179_v34, %v187_v37  ;;  %v2231_v39 = vcombine.high %v179_v34, %v187_v37  ;;  %v2828_v46 = vld [vmem:[%s3585_s1 + $0x130] sm:$0xff]   ;;  %v194_v48 = vld [vmem:[%s3052_s28 + $0x80] sm:$0xff]  ;;  %v195_v51 = vld [vmem:[%s3052_s28 + $0x88] sm:$0xff] }
  0x1a   : > { %2469 = vmatpush3.bf16.msra.mxu0 %v2804_v14  ;;  %v2829_v47 = vld [vmem:[%s3585_s1 + $0x1b0] sm:$0xff]   ;;  %v202_v49 = vld [vmem:[%s3052_s28 + $0xc0] sm:$0xff]  ;;  %v203_v52 = vld [vmem:[%s3052_s28 + $0xc8] sm:$0xff] }
  0x1b   : > { %2509 = vmatpush3.bf16.msra.mxu1 %v2805_v15  ;;  %2470 = vmatprep.subr.bf16.mxu0 %v2806_v16  ;;  %v2245_v50 = vcombine.high %v194_v48, %v202_v49  ;;  %v2244_v53 = vcombine.low %v194_v48, %v202_v49  ;;  %v2247_v54 = vcombine.high %v195_v51, %v203_v52  ;;  %v2830_v56 = vld [vmem:[%s3585_s1 + $0x168] sm:$0xff]   ;;  %v2834_v60 = vld [vmem:[%s3585_s1 + $0x160] sm:$0xff]   ;;  %v2838_v8 = vld [vmem:[%s3585_s1 + $0x158] sm:$0xff]  }
  0x1c   : > { %2510 = vmatprep.subr.bf16.mxu1 %v2807_v17  ;;  %1625 = vmatprep.mubr.bf16.mxu0 %v2229_v36  ;;  %v2246_v55 = vcombine.low %v195_v51, %v203_v52  ;;  %v2831_v57 = vld [vmem:[%s3585_s1 + $0x1e8] sm:$0xff]   ;;  %v2835_v61 = vld [vmem:[%s3585_s1 + $0x1e0] sm:$0xff]   ;;  %v2839_v9 = vld [vmem:[%s3585_s1 + $0x1d8] sm:$0xff]  }
  0x1d   : > { %1690 = vmatprep.mubr.bf16.mxu1 %v2231_v39  ;;  %v2832_v58 = vld [vmem:[%s3585_s1 + $0x128] sm:$0xff]   ;;  %v2836_v62 = vld [vmem:[%s3585_s1 + $0x120] sm:$0xff]   ;;  %v2840_v10 = vld [vmem:[%s3585_s1 + $0x118] sm:$0xff]  }
  0x1e   : > { %2471 = vmatpush3.bf16.msra.mxu0 %v2808_v18  ;;  %v2833_v59 = vld [vmem:[%s3585_s1 + $0x1a8] sm:$0xff]   ;;  %v2837_v63 = vld [vmem:[%s3585_s1 + $0x1a0] sm:$0xff]   ;;  %v2841_v11 = vld [vmem:[%s3585_s1 + $0x198] sm:$0xff]  }
  0x1f   : > { %2511 = vmatpush3.bf16.msra.mxu1 %v2809_v19  ;;  %2472 = vmatprep.subr.bf16.mxu0 %v2810_v20  ;;  %v210_v0 = vld [vmem:[%s3052_s28 + $0x100] sm:$0xff]  ;;  %v211_v2 = vld [vmem:[%s3052_s28 + $0x108] sm:$0xff]  ;;  %v2842_v12 = vld [vmem:[%s3585_s1 + $0x150] sm:$0xff]  }
  0x20   : > { %2512 = vmatprep.subr.bf16.mxu1 %v2811_v21  ;;  %v218_v1 = vld [vmem:[%s3052_s28 + $0x140] sm:$0xff]  ;;  %v219_v3 = vld [vmem:[%s3052_s28 + $0x148] sm:$0xff]  ;;  %v2843_v13 = vld [vmem:[%s3585_s1 + $0x1d0] sm:$0xff]  }
  0x21   : > { %v2261_v4 = vcombine.high %v210_v0, %v218_v1  ;;  %v2263_v5 = vcombine.high %v211_v2, %v219_v3  ;;  %v2260_v6 = vcombine.low %v210_v0, %v218_v1  ;;  %v2262_v7 = vcombine.low %v211_v2, %v219_v3  ;;  %v2844_v14 = vld [vmem:[%s3585_s1 + $0x110] sm:$0xff]   ;;  %v226_v16 = vld [vmem:[%s3052_s28 + $0x180] sm:$0xff]  ;;  %v227_v18 = vld [vmem:[%s3052_s28 + $0x188] sm:$0xff] }
  0x22   : > { %2473 = vmatpush3.bf16.msra.mxu0 %v2812_v22  ;;  %v2845_v15 = vld [vmem:[%s3585_s1 + $0x190] sm:$0xff]   ;;  %v234_v17 = vld [vmem:[%s3052_s28 + $0x1c0] sm:$0xff]  ;;  %v235_v20 = vld [vmem:[%s3052_s28 + $0x1c8] sm:$0xff] }
  0x23   : > { %2513 = vmatpush3.bf16.msra.mxu1 %v2813_v23  ;;  %2474 = vmatprep.subr.bf16.mxu0 %v2814_v24  ;;  %v2277_v19 = vcombine.high %v226_v16, %v234_v17  ;;  %v2276_v21 = vcombine.low %v226_v16, %v234_v17  ;;  %v2279_v22 = vcombine.high %v227_v18, %v235_v20  ;;  %v2846_v24 = vld [vmem:[%s3585_s1 + $0x148] sm:$0xff]   ;;  %v180_v32 = vld [vmem:[%s3052_s28 + $0x10] sm:$0xff]  ;;  %v181_v36 = vld [vmem:[%s3052_s28 + $0x18] sm:$0xff] }
  0x24   : > { %2514 = vmatprep.subr.bf16.mxu1 %v2815_v25  ;;  %v2278_v23 = vcombine.low %v227_v18, %v235_v20  ;;  %v2847_v25 = vld [vmem:[%s3585_s1 + $0x1c8] sm:$0xff]   ;;  %v188_v33 = vld [vmem:[%s3052_s28 + $0x50] sm:$0xff]  ;;  %v189_v37 = vld [vmem:[%s3052_s28 + $0x58] sm:$0xff] }
  0x25   : > { %v2232_v34 = vcombine.low %v180_v32, %v188_v33  ;;  %v2235_v39 = vcombine.high %v181_v36, %v189_v37  ;;  %v196_v48 = vld [vmem:[%s3052_s28 + $0x90] sm:$0xff]  ;;  %v205_v51 = vld [vmem:[%s3052_s28 + $0xd8] sm:$0xff] }
  0x26   : > { %2475 = vmatpush3.bf16.msra.mxu0 %v2816_v26  ;;  %v2848_v26 = vld [vmem:[%s3585_s1 + $0x108] sm:$0xff]   ;;  %v204_v49 = vld [vmem:[%s3052_s28 + $0xd0] sm:$0xff]  ;;  %v213_v2 = vld [vmem:[%s3052_s28 + $0x118] sm:$0xff] }
  0x27   : > { %2515 = vmatpush3.bf16.msra.mxu1 %v2817_v27  ;;  %2476 = vmatprep.subr.bf16.mxu0 %v2818_v28  ;;  %v2849_v27 = vld [vmem:[%s3585_s1 + $0x188] sm:$0xff]   ;;  %v2850_v28 = vld [vmem:[%s3585_s1 + $0x140] sm:$0xff]   ;;  %v2249_v52 = vcombine.high %v196_v48, %v204_v49  ;;  %v212_v0 = vld [vmem:[%s3052_s28 + $0x110] sm:$0xff] }
  0x28   : > { %2516 = vmatprep.subr.bf16.mxu1 %v2819_v29  ;;  %v2851_v29 = vld [vmem:[%s3585_s1 + $0x1c0] sm:$0xff]   ;;  %v220_v1 = vld [vmem:[%s3052_s28 + $0x150] sm:$0xff]  ;;  %v237_v20 = vld [vmem:[%s3052_s28 + $0x1d8] sm:$0xff] }
  0x29   : > { %v2265_v3 = vcombine.high %v212_v0, %v220_v1  ;;  %v228_v16 = vld [vmem:[%s3052_s28 + $0x190] sm:$0xff] }
  0x2a   : > { %2477 = vmatpush3.bf16.msra.mxu0 %v2820_v30  ;;  %v2852_v30 = vld [vmem:[%s3585_s1 + $0x100] sm:$0xff]   ;;  %v236_v17 = vld [vmem:[%s3052_s28 + $0x1d0] sm:$0xff] }
  0x2b   : > { %2517 = vmatpush3.bf16.msra.mxu1 %v2821_v31  ;;  %2542 = vmatprep.subr.bf16.mxu0 %v2822_v40  ;;  %v2853_v31 = vld [vmem:[%s3585_s1 + $0x180] sm:$0xff]   ;;  %v2854_v40 = vld [vmem:[%s3585_s1 + $0x278] sm:$0xff]   ;;  %v2281_v18 = vcombine.high %v228_v16, %v236_v17 }
  0x2c   : > { %2582 = vmatprep.subr.bf16.mxu1 %v2823_v41  ;;  %v2855_v41 = vld [vmem:[%s3585_s1 + $0x2f8] sm:$0xff]  }
  0x2d   : > { %1626 = vmatmul.mubr.bf16.vlgmr.msra.gmra.mxu0 %v2228_v35  ;;  %v2233_v35 = vcombine.high %v180_v32, %v188_v33  ;;  %v182_v32 = vld [vmem:[%s3052_s28 + $0x20] sm:$0xff] }
  0x2e   : > { %1691 = vmatmul.mubr.bf16.vlgmr.msra.gmra.mxu1 %v2230_v38  ;;  %2543 = vmatpush3.bf16.msra.mxu0 %v2824_v42  ;;  %v2234_v38 = vcombine.low %v181_v36, %v189_v37  ;;  %v2856_v42 = vld [vmem:[%s3585_s1 + $0x238] sm:$0xff]   ;;  %v190_v33 = vld [vmem:[%s3052_s28 + $0x60] sm:$0xff] }
  0x2f   : > { %2583 = vmatpush3.bf16.msra.mxu1 %v2825_v43  ;;  %2544 = vmatprep.subr.bf16.mxu0 %v2826_v44  ;;  %v2857_v43 = vld [vmem:[%s3585_s1 + $0x2b8] sm:$0xff]   ;;  %v2858_v44 = vld [vmem:[%s3585_s1 + $0x270] sm:$0xff]   ;;  %v2236_v36 = vcombine.low %v182_v32, %v190_v33  ;;  %v2237_v37 = vcombine.high %v182_v32, %v190_v33 }
  0x30   : > { %2584 = vmatprep.subr.bf16.mxu1 %v2827_v45  ;;  %1633 = vmatprep.mubr.bf16.mxu0 %v2245_v50  ;;  %v2859_v45 = vld [vmem:[%s3585_s1 + $0x2f0] sm:$0xff]   ;;  %v197_v50 = vld [vmem:[%s3052_s28 + $0x98] sm:$0xff] }
  0x31   : > { %1698 = vmatprep.mubr.bf16.mxu1 %v2247_v54  ;;  %v2248_v54 = vcombine.low %v196_v48, %v204_v49  ;;  %v198_v48 = vld [vmem:[%s3052_s28 + $0xa0] sm:$0xff]  ;;  %v184_v32 = vld [vmem:[%s3052_s28 + $0x30] sm:$0xff] }
  0x32   : > { %2545 = vmatpush3.bf16.msra.mxu0 %v2828_v46  ;;  %v2860_v46 = vld [vmem:[%s3585_s1 + $0x230] sm:$0xff]   ;;  %v206_v49 = vld [vmem:[%s3052_s28 + $0xe0] sm:$0xff] }
  0x33   : > { %2585 = vmatpush3.bf16.msra.mxu1 %v2829_v47  ;;  %2546 = vmatprep.subr.bf16.mxu0 %v2830_v56  ;;  %v2861_v47 = vld [vmem:[%s3585_s1 + $0x2b0] sm:$0xff]   ;;  %v2862_v56 = vld [vmem:[%s3585_s1 + $0x268] sm:$0xff]  }
  0x34   : > { %2586 = vmatprep.subr.bf16.mxu1 %v2831_v57  ;;  %v2863_v57 = vld [vmem:[%s3585_s1 + $0x2e8] sm:$0xff]   ;;  %v192_v33 = vld [vmem:[%s3052_s28 + $0x70] sm:$0xff] }
  0x35   : > { %1634 = vmatmul.mubr.bf16.gmra.mxu0 %v2244_v53  ;;  %v2251_v53 = vcombine.high %v197_v50, %v205_v51 }
  0x36   : > { %1699 = vmatmul.mubr.bf16.gmra.mxu1 %v2246_v55  ;;  %2547 = vmatpush3.bf16.msra.mxu0 %v2832_v58  ;;  %v2250_v55 = vcombine.low %v197_v50, %v205_v51  ;;  %v2864_v58 = vld [vmem:[%s3585_s1 + $0x228] sm:$0xff]   ;;  %v2253_v51 = vcombine.high %v198_v48, %v206_v49 }
  0x37   : > { %2587 = vmatpush3.bf16.msra.mxu1 %v2833_v59  ;;  %2548 = vmatprep.subr.bf16.mxu0 %v2834_v60  ;;  %v2865_v59 = vld [vmem:[%s3585_s1 + $0x2a8] sm:$0xff]   ;;  %v2866_v60 = vld [vmem:[%s3585_s1 + $0x260] sm:$0xff]  }
  0x38   : > { %2588 = vmatprep.subr.bf16.mxu1 %v2835_v61  ;;  %1641 = vmatprep.mubr.bf16.mxu0 %v2261_v4  ;;  %v2867_v61 = vld [vmem:[%s3585_s1 + $0x2e0] sm:$0xff]   ;;  %v221_v4 = vld [vmem:[%s3052_s28 + $0x158] sm:$0xff]  ;;  %v199_v50 = vld [vmem:[%s3052_s28 + $0xa8] sm:$0xff] }
  0x39   : > { %1706 = vmatprep.mubr.bf16.mxu1 %v2263_v5  ;;  %v2264_v5 = vcombine.low %v212_v0, %v220_v1  ;;  %v214_v0 = vld [vmem:[%s3052_s28 + $0x120] sm:$0xff] }
  0x3a   : > { %2549 = vmatpush3.bf16.msra.mxu0 %v2836_v62  ;;  %v2868_v62 = vld [vmem:[%s3585_s1 + $0x220] sm:$0xff]  }
  0x3b   : > { %2589 = vmatpush3.bf16.msra.mxu1 %v2837_v63  ;;  %2550 = vmatprep.subr.bf16.mxu0 %v2838_v8  ;;  %v2869_v63 = vld [vmem:[%s3585_s1 + $0x2a0] sm:$0xff]   ;;  %v2870_v8 = vld [vmem:[%s3585_s1 + $0x258] sm:$0xff]  }
  0x3c   : > { %2590 = vmatprep.subr.bf16.mxu1 %v2839_v9  ;;  %v2871_v9 = vld [vmem:[%s3585_s1 + $0x2d8] sm:$0xff]   ;;  %v222_v1 = vld [vmem:[%s3052_s28 + $0x160] sm:$0xff] }
  0x3d   : > { %1642 = vmatmul.mubr.bf16.gmra.mxu0 %v2260_v6  ;;  %v2267_v6 = vcombine.high %v213_v2, %v221_v4 }
  0x3e   : > { %1707 = vmatmul.mubr.bf16.gmra.mxu1 %v2262_v7  ;;  %2551 = vmatpush3.bf16.msra.mxu0 %v2840_v10  ;;  %v2266_v7 = vcombine.low %v213_v2, %v221_v4  ;;  %v2872_v10 = vld [vmem:[%s3585_s1 + $0x218] sm:$0xff]   ;;  %v2269_v2 = vcombine.high %v214_v0, %v222_v1  ;;  %v223_v4 = vld [vmem:[%s3052_s28 + $0x168] sm:$0xff] }
  0x3f   : > { %2591 = vmatpush3.bf16.msra.mxu1 %v2841_v11  ;;  %2552 = vmatprep.subr.bf16.mxu0 %v2842_v12  ;;  %v2873_v11 = vld [vmem:[%s3585_s1 + $0x298] sm:$0xff]   ;;  %v2874_v12 = vld [vmem:[%s3585_s1 + $0x250] sm:$0xff]  }
  0x40   : > { %2592 = vmatprep.subr.bf16.mxu1 %v2843_v13  ;;  %1649 = vmatprep.mubr.bf16.mxu0 %v2277_v19  ;;  %v2875_v13 = vld [vmem:[%s3585_s1 + $0x2d0] sm:$0xff]   ;;  %v229_v19 = vld [vmem:[%s3052_s28 + $0x198] sm:$0xff] }
  0x41   : > { %1714 = vmatprep.mubr.bf16.mxu1 %v2279_v22  ;;  %v2283_v22 = vcombine.high %v229_v19, %v237_v20 }
  0x42   : > { %2553 = vmatpush3.bf16.msra.mxu0 %v2844_v14  ;;  %v2876_v14 = vld [vmem:[%s3585_s1 + $0x210] sm:$0xff]  }
  0x43   : > { %2593 = vmatpush3.bf16.msra.mxu1 %v2845_v15  ;;  %2554 = vmatprep.subr.bf16.mxu0 %v2846_v24  ;;  %v2877_v15 = vld [vmem:[%s3585_s1 + $0x290] sm:$0xff]   ;;  %v2878_v24 = vld [vmem:[%s3585_s1 + $0x248] sm:$0xff]  }
  0x44   : > { %2594 = vmatprep.subr.bf16.mxu1 %v2847_v25  ;;  %v2879_v25 = vld [vmem:[%s3585_s1 + $0x2c8] sm:$0xff]  }
  0x45   : > { %1650 = vmatmul.mubr.bf16.gmra.mxu0 %v2276_v21  ;;  %v2280_v21 = vcombine.low %v228_v16, %v236_v17  ;;  %v230_v16 = vld [vmem:[%s3052_s28 + $0x1a0] sm:$0xff] }
  0x46   : > { %1715 = vmatmul.mubr.bf16.gmra.mxu1 %v2278_v23  ;;  %2555 = vmatpush3.bf16.msra.mxu0 %v2848_v26  ;;  %v2282_v23 = vcombine.low %v229_v19, %v237_v20  ;;  %v2880_v26 = vld [vmem:[%s3585_s1 + $0x208] sm:$0xff]   ;;  %v238_v17 = vld [vmem:[%s3052_s28 + $0x1e0] sm:$0xff] }
  0x47   : > { %2595 = vmatpush3.bf16.msra.mxu1 %v2849_v27  ;;  %2556 = vmatprep.subr.bf16.mxu0 %v2850_v28  ;;  %v2881_v27 = vld [vmem:[%s3585_s1 + $0x288] sm:$0xff]   ;;  %v2882_v28 = vld [vmem:[%s3585_s1 + $0x240] sm:$0xff]   ;;  %v2285_v20 = vcombine.high %v230_v16, %v238_v17 }
  0x48   : > { %2596 = vmatprep.subr.bf16.mxu1 %v2851_v29  ;;  %1755 = vmatprep.mubr.bf16.mxu0 %v2233_v35  ;;  %v2883_v29 = vld [vmem:[%s3585_s1 + $0x2c0] sm:$0xff]   ;;  %v191_v35 = vld [vmem:[%s3052_s28 + $0x68] sm:$0xff] }
  0x49   : > { %1820 = vmatprep.mubr.bf16.mxu1 %v2235_v39  ;;  %v239_v19 = vld [vmem:[%s3052_s28 + $0x1e8] sm:$0xff] }
  0x4a   : > { %2557 = vmatpush3.bf16.msra.mxu0 %v2852_v30  ;;  %v2884_v30 = vld [vmem:[%s3585_s1 + $0x200] sm:$0xff]  }
  0x4b   : > { %2597 = vmatpush3.bf16.msra.mxu1 %v2853_v31  ;;  %2622 = vmatprep.subr.bf16.mxu0 %v2854_v40  ;;  %v2885_v31 = vld [vmem:[%s3585_s1 + $0x280] sm:$0xff]   ;;  %v2886_v40 = vld [vmem:[%s3585_s1 + $0x378] sm:$0xff]  }
  0x4c   : > { %2662 = vmatprep.subr.bf16.mxu1 %v2855_v41  ;;  %v2887_v41 = vld [vmem:[%s3585_s1 + $0x3f8] sm:$0xff]  }
  0x4d   : > { %1756 = vmatmul.mubr.bf16.vlgmr.msra.gmra.mxu0 %v2232_v34  ;;  %v183_v34 = vld [vmem:[%s3052_s28 + $0x28] sm:$0xff] }
  0x4e   : > { %1821 = vmatmul.mubr.bf16.vlgmr.msra.gmra.mxu1 %v2234_v38  ;;  %2623 = vmatpush3.bf16.msra.mxu0 %v2856_v42  ;;  %v2238_v38 = vcombine.low %v183_v34, %v191_v35  ;;  %v2239_v39 = vcombine.high %v183_v34, %v191_v35  ;;  %v2888_v42 = vld [vmem:[%s3585_s1 + $0x338] sm:$0xff]   ;;  %v2240_v35 = vcombine.low %v184_v32, %v192_v33 }
  0x4f   : > { %2663 = vmatpush3.bf16.msra.mxu1 %v2857_v43  ;;  %2624 = vmatprep.subr.bf16.mxu0 %v2858_v44  ;;  %v2889_v43 = vld [vmem:[%s3585_s1 + $0x3b8] sm:$0xff]   ;;  %v2890_v44 = vld [vmem:[%s3585_s1 + $0x370] sm:$0xff]  }
  0x50   : > { %2664 = vmatprep.subr.bf16.mxu1 %v2859_v45  ;;  %1763 = vmatprep.mubr.bf16.mxu0 %v2249_v52  ;;  %v2891_v45 = vld [vmem:[%s3585_s1 + $0x3f0] sm:$0xff]   ;;  %v207_v52 = vld [vmem:[%s3052_s28 + $0xe8] sm:$0xff]  ;;  %v185_v34 = vld [vmem:[%s3052_s28 + $0x38] sm:$0xff] }
  0x51   : > { %1828 = vmatprep.mubr.bf16.mxu1 %v2251_v53  ;;  %v2252_v53 = vcombine.low %v198_v48, %v206_v49  ;;  %v217_v48 = vld [vmem:[%s3052_s28 + $0x138] sm:$0xff] }
  0x52   : > { %2625 = vmatpush3.bf16.msra.mxu0 %v2860_v46  ;;  %v2892_v46 = vld [vmem:[%s3585_s1 + $0x330] sm:$0xff]   ;;  %v225_v49 = vld [vmem:[%s3052_s28 + $0x178] sm:$0xff] }
  0x53   : > { %2665 = vmatpush3.bf16.msra.mxu1 %v2861_v47  ;;  %2626 = vmatprep.subr.bf16.mxu0 %v2862_v56  ;;  %v2893_v47 = vld [vmem:[%s3585_s1 + $0x3b0] sm:$0xff]   ;;  %v2894_v56 = vld [vmem:[%s3585_s1 + $0x368] sm:$0xff]  }
  0x54   : > { %2666 = vmatprep.subr.bf16.mxu1 %v2863_v57  ;;  %v2895_v57 = vld [vmem:[%s3585_s1 + $0x3e8] sm:$0xff]  }
  0x55   : > { %1764 = vmatmul.mubr.bf16.gmra.mxu0 %v2248_v54  ;;  %v2255_v54 = vcombine.high %v199_v50, %v207_v52 }
  0x56   : > { %1829 = vmatmul.mubr.bf16.gmra.mxu1 %v2250_v55  ;;  %2627 = vmatpush3.bf16.msra.mxu0 %v2864_v58  ;;  %v2254_v55 = vcombine.low %v199_v50, %v207_v52  ;;  %v2896_v58 = vld [vmem:[%s3585_s1 + $0x328] sm:$0xff]  }
  0x57   : > { %2667 = vmatpush3.bf16.msra.mxu1 %v2865_v59  ;;  %2628 = vmatprep.subr.bf16.mxu0 %v2866_v60  ;;  %v2897_v59 = vld [vmem:[%s3585_s1 + $0x3a8] sm:$0xff]   ;;  %v2898_v60 = vld [vmem:[%s3585_s1 + $0x360] sm:$0xff]  }
  0x58   : > { %2668 = vmatprep.subr.bf16.mxu1 %v2867_v61  ;;  %1771 = vmatprep.mubr.bf16.mxu0 %v2265_v3  ;;  %v2899_v61 = vld [vmem:[%s3585_s1 + $0x3e0] sm:$0xff]   ;;  %v215_v3 = vld [vmem:[%s3052_s28 + $0x128] sm:$0xff] }
  0x59   : > { %1836 = vmatprep.mubr.bf16.mxu1 %v2267_v6  ;;  %v2271_v6 = vcombine.high %v215_v3, %v223_v4 }
  0x5a   : > { %2629 = vmatpush3.bf16.msra.mxu0 %v2868_v62  ;;  %v2900_v62 = vld [vmem:[%s3585_s1 + $0x320] sm:$0xff]  }
  0x5b   : > { %2669 = vmatpush3.bf16.msra.mxu1 %v2869_v63  ;;  %2630 = vmatprep.subr.bf16.mxu0 %v2870_v8  ;;  %v2901_v63 = vld [vmem:[%s3585_s1 + $0x3a0] sm:$0xff]   ;;  %v2902_v8 = vld [vmem:[%s3585_s1 + $0x358] sm:$0xff]  }
  0x5c   : > { %2670 = vmatprep.subr.bf16.mxu1 %v2871_v9  ;;  %v2903_v9 = vld [vmem:[%s3585_s1 + $0x3d8] sm:$0xff]  }
  0x5d   : > { %1772 = vmatmul.mubr.bf16.gmra.mxu0 %v2264_v5  ;;  %v2268_v5 = vcombine.low %v214_v0, %v222_v1 }
  0x5e   : > { %1837 = vmatmul.mubr.bf16.gmra.mxu1 %v2266_v7  ;;  %2631 = vmatpush3.bf16.msra.mxu0 %v2872_v10  ;;  %v2270_v7 = vcombine.low %v215_v3, %v223_v4  ;;  %v2904_v10 = vld [vmem:[%s3585_s1 + $0x318] sm:$0xff]  }
  0x5f   : > { %2671 = vmatpush3.bf16.msra.mxu1 %v2873_v11  ;;  %2632 = vmatprep.subr.bf16.mxu0 %v2874_v12  ;;  %v2905_v11 = vld [vmem:[%s3585_s1 + $0x398] sm:$0xff]   ;;  %v2906_v12 = vld [vmem:[%s3585_s1 + $0x350] sm:$0xff]  }
  0x60   : > { %2672 = vmatprep.subr.bf16.mxu1 %v2875_v13  ;;  %1779 = vmatprep.mubr.bf16.mxu0 %v2281_v18  ;;  %v2907_v13 = vld [vmem:[%s3585_s1 + $0x3d0] sm:$0xff]   ;;  %v231_v18 = vld [vmem:[%s3052_s28 + $0x1a8] sm:$0xff] }
  0x61   : > { %1844 = vmatprep.mubr.bf16.mxu1 %v2283_v22  ;;  %v2284_v22 = vcombine.low %v230_v16, %v238_v17 }
  0x62   : > { %2633 = vmatpush3.bf16.msra.mxu0 %v2876_v14  ;;  %v2908_v14 = vld [vmem:[%s3585_s1 + $0x310] sm:$0xff]  }
  0x63   : > { %2673 = vmatpush3.bf16.msra.mxu1 %v2877_v15  ;;  %2634 = vmatprep.subr.bf16.mxu0 %v2878_v24  ;;  %v2909_v15 = vld [vmem:[%s3585_s1 + $0x390] sm:$0xff]   ;;  %v2910_v24 = vld [vmem:[%s3585_s1 + $0x348] sm:$0xff]  }
  0x64   : > { %2674 = vmatprep.subr.bf16.mxu1 %v2879_v25  ;;  %v2911_v25 = vld [vmem:[%s3585_s1 + $0x3c8] sm:$0xff]  }
  0x65   : > { %1780 = vmatmul.mubr.bf16.gmra.mxu0 %v2280_v21  ;;  %v2287_v21 = vcombine.high %v231_v18, %v239_v19 }
  0x66   : > { %1845 = vmatmul.mubr.bf16.gmra.mxu1 %v2282_v23  ;;  %2635 = vmatpush3.bf16.msra.mxu0 %v2880_v26  ;;  %v2286_v23 = vcombine.low %v231_v18, %v239_v19  ;;  %v2912_v26 = vld [vmem:[%s3585_s1 + $0x308] sm:$0xff]  }
  0x67   : > { %2675 = vmatpush3.bf16.msra.mxu1 %v2881_v27  ;;  %2636 = vmatprep.subr.bf16.mxu0 %v2882_v28  ;;  %v2913_v27 = vld [vmem:[%s3585_s1 + $0x388] sm:$0xff]   ;;  %v2914_v28 = vld [vmem:[%s3585_s1 + $0x340] sm:$0xff]  }
  0x68   : > { %2676 = vmatprep.subr.bf16.mxu1 %v2883_v29  ;;  %1885 = vmatprep.mubr.bf16.mxu0 %v2237_v37  ;;  %v2915_v29 = vld [vmem:[%s3585_s1 + $0x3c0] sm:$0xff]   ;;  %v193_v37 = vld [vmem:[%s3052_s28 + $0x78] sm:$0xff] }
  0x69   : > { %1950 = vmatprep.mubr.bf16.mxu1 %v2239_v39  ;;  %v208_v39 = vld [vmem:[%s3052_s28 + $0xf0] sm:$0xff] }
  0x6a   : > { %2637 = vmatpush3.bf16.msra.mxu0 %v2884_v30  ;;  %v2916_v30 = vld [vmem:[%s3585_s1 + $0x300] sm:$0xff]  }
  0x6b   : > { %2677 = vmatpush3.bf16.msra.mxu1 %v2885_v31  ;;  %2702 = vmatprep.subr.bf16.mxu0 %v2886_v40  ;;  %v2917_v31 = vld [vmem:[%s3585_s1 + $0x380] sm:$0xff]   ;;  %v2242_v40 = vcombine.low %v185_v34, %v193_v37 }
  0x6c   : > { %2742 = vmatprep.subr.bf16.mxu1 %v2887_v41  ;;  %v2243_v41 = vcombine.high %v185_v34, %v193_v37 }
  0x6d   : > { %1886 = vmatmul.mubr.bf16.vlgmr.msra.gmra.mxu0 %v2236_v36  ;;  %v2241_v36 = vcombine.high %v184_v32, %v192_v33 }
  0x6e   : > { %1951 = vmatmul.mubr.bf16.vlgmr.msra.gmra.mxu1 %v2238_v38  ;;  %2703 = vmatpush3.bf16.msra.mxu0 %v2888_v42  ;;  %v200_v38 = vld [vmem:[%s3052_s28 + $0xb0] sm:$0xff] }
  0x6f   : > { %2743 = vmatpush3.bf16.msra.mxu1 %v2889_v43  ;;  %2704 = vmatprep.subr.bf16.mxu0 %v2890_v44  ;;  %v2257_v42 = vcombine.high %v200_v38, %v208_v39  ;;  %v201_v43 = vld [vmem:[%s3052_s28 + $0xb8] sm:$0xff]  ;;  %v2256_v50 = vcombine.low %v200_v38, %v208_v39 }
  0x70   : > { %2744 = vmatprep.subr.bf16.mxu1 %v2891_v45  ;;  %1893 = vmatprep.mubr.bf16.mxu0 %v2253_v51  ;;  %v209_v44 = vld [vmem:[%s3052_s28 + $0xf8] sm:$0xff] }
  0x71   : > { %1958 = vmatprep.mubr.bf16.mxu1 %v2255_v54  ;;  %v2259_v45 = vcombine.high %v201_v43, %v209_v44  ;;  %v2258_v51 = vcombine.low %v201_v43, %v209_v44  ;;  %v232_v54 = vld [vmem:[%s3052_s28 + $0x1b0] sm:$0xff] }
  0x72   : > { %2705 = vmatpush3.bf16.msra.mxu0 %v2892_v46  ;;  %v216_v46 = vld [vmem:[%s3052_s28 + $0x130] sm:$0xff] }
  0x73   : > { %2745 = vmatpush3.bf16.msra.mxu1 %v2893_v47  ;;  %2706 = vmatprep.subr.bf16.mxu0 %v2894_v56  ;;  %v224_v47 = vld [vmem:[%s3052_s28 + $0x170] sm:$0xff]  ;;  %v233_v56 = vld [vmem:[%s3052_s28 + $0x1b8] sm:$0xff] }
  0x74   : > { %2746 = vmatprep.subr.bf16.mxu1 %v2895_v57  ;;  %v2273_v52 = vcombine.high %v216_v46, %v224_v47  ;;  %v241_v57 = vld [vmem:[%s3052_s28 + $0x1f8] sm:$0xff] }
  0x75   : > { %1894 = vmatmul.mubr.bf16.gmra.mxu0 %v2252_v53  ;;  %v2275_v53 = vcombine.high %v217_v48, %v225_v49 }
  0x76   : > { %1959 = vmatmul.mubr.bf16.gmra.mxu1 %v2254_v55  ;;  %2707 = vmatpush3.bf16.msra.mxu0 %v2896_v58  ;;  %v240_v55 = vld [vmem:[%s3052_s28 + $0x1f0] sm:$0xff]  ;;  %v2272_v58 = vcombine.low %v216_v46, %v224_v47  ;;  %s2226_s28 = sshll.u32 %s3621_s21, 2 }
  0x77   : > { %2747 = vmatpush3.bf16.msra.mxu1 %v2897_v59  ;;  %2708 = vmatprep.subr.bf16.mxu0 %v2898_v60  ;;  %v2274_v59 = vcombine.low %v217_v48, %v225_v49  ;;  %v2289_v60 = vcombine.high %v232_v54, %v240_v55  ;;  %s3555_s8 = scalar_lea.vmem %s3587_s3, %s2226_s28 }
  0x78   : > { %2748 = vmatprep.subr.bf16.mxu1 %v2899_v61  ;;  %1901 = vmatprep.mubr.bf16.mxu0 %v2269_v2  ;;  %v2291_v61 = vcombine.high %v233_v56, %v241_v57  ;;  %v2227_v2 = vld [vmem:[%s3586_s2] ss:$0 sm:$0xff] }
  0x79   : > { %1966 = vmatprep.mubr.bf16.mxu1 %v2271_v6 }
  0x7a   : > { %2709 = vmatpush3.bf16.msra.mxu0 %v2900_v62  ;;  %v2288_v62 = vcombine.low %v232_v54, %v240_v55 }
  0x7b   : > { %2749 = vmatpush3.bf16.msra.mxu1 %v2901_v63  ;;  %2710 = vmatprep.subr.bf16.mxu0 %v2902_v8  ;;  %v2290_v63 = vcombine.low %v233_v56, %v241_v57 }
  0x7c   : > { %2750 = vmatprep.subr.bf16.mxu1 %v2903_v9 }
  0x7d   : > { %1902 = vmatmul.mubr.bf16.gmra.mxu0 %v2268_v5 }
  0x7e   : > { %1967 = vmatmul.mubr.bf16.gmra.mxu1 %v2270_v7  ;;  %2711 = vmatpush3.bf16.msra.mxu0 %v2904_v10 }
  0x7f   : > { %2751 = vmatpush3.bf16.msra.mxu1 %v2905_v11  ;;  %2712 = vmatprep.subr.bf16.mxu0 %v2906_v12 }
  0x80   : > { %2752 = vmatprep.subr.bf16.mxu1 %v2907_v13  ;;  %1909 = vmatprep.mubr.bf16.mxu0 %v2285_v20 }
  0x81   : > { %1974 = vmatprep.mubr.bf16.mxu1 %v2287_v21 }
  0x82   : > { %2713 = vmatpush3.bf16.msra.mxu0 %v2908_v14 }
  0x83   : > { %2753 = vmatpush3.bf16.msra.mxu1 %v2909_v15  ;;  %2714 = vmatprep.subr.bf16.mxu0 %v2910_v24 }
  0x84   : > { %2754 = vmatprep.subr.bf16.mxu1 %v2911_v25 }
  0x85   : > { %1910 = vmatmul.mubr.bf16.gmra.mxu0 %v2284_v22 }
  0x86   : > { %1975 = vmatmul.mubr.bf16.gmra.mxu1 %v2286_v23  ;;  %2715 = vmatpush3.bf16.msra.mxu0 %v2912_v26 }
  0x87   : > { %2755 = vmatpush3.bf16.msra.mxu1 %v2913_v27  ;;  %2716 = vmatprep.subr.bf16.mxu0 %v2914_v28 }
  0x88   : > { %2756 = vmatprep.subr.bf16.mxu1 %v2915_v29  ;;  %2015 = vmatprep.mubr.bf16.mxu0 %v2241_v36 }
  0x89   : > { %2080 = vmatprep.mubr.bf16.mxu1 %v2243_v41 }
  0x8a   : > { %2717 = vmatpush3.bf16.msra.mxu0 %v2916_v30 }
  0x8b   : > { %2757 = vmatpush3.bf16.msra.mxu1 %v2917_v31 }
  0x8d   : > { %2016 = vmatmul.mubr.bf16.vlgmr.msra.gmra.mxu0 %v2240_v35 }
  0x8e   : > { %2081 = vmatmul.mubr.bf16.vlgmr.msra.gmra.mxu1 %v2242_v40  ;;  %2023 = vmatprep.mubr.bf16.mxu0 %v2257_v42 }
  0x8f   : > { %2088 = vmatprep.mubr.bf16.mxu1 %v2259_v45 }
  0x95   : > { %2024 = vmatmul.mubr.bf16.gmra.mxu0 %v2256_v50 }
  0x96   : > { %2089 = vmatmul.mubr.bf16.gmra.mxu1 %v2258_v51  ;;  %2031 = vmatprep.mubr.bf16.mxu0 %v2273_v52 }
  0x97   : > { %2096 = vmatprep.mubr.bf16.mxu1 %v2275_v53 }
  0x9d   : > { %2032 = vmatmul.mubr.bf16.gmra.mxu0 %v2272_v58 }
  0x9e   : > { %2097 = vmatmul.mubr.bf16.gmra.mxu1 %v2274_v59  ;;  %2039 = vmatprep.mubr.bf16.mxu0 %v2289_v60 }
  0x9f   : > { %2104 = vmatprep.mubr.bf16.mxu1 %v2291_v61 }
  0xa5   : > { %2040 = vmatmul.mubr.bf16.gmra.mxu0 %v2288_v62 }
  0xa6   : > { %2105 = vmatmul.mubr.bf16.gmra.mxu1 %v2290_v63 }
  0xed   : > { %v2478_v0 = vpop.f32.mrf.mxu0 }
  0xee   : > { %v2518_v1 = vpop.f32.mrf.mxu1 }
  0xef   : > { %v2479_v3 = vpop.f32.mrf.mxu0 }
  0xf0   : > { %v2480_v4 = vadd.f32 %v2479_v3, %v2478_v0  ;;  %v2519_v5 = vpop.f32.mrf.mxu1 }
  0xf1   : > { %v2520_v6 = vadd.f32 %v2519_v5, %v2518_v1  ;;  %v2481_v7 = vpop.f32.mrf.mxu0 }
  0xf2   : > { %v1628_v8 = vadd.f32 %v2480_v4, %v2227_v2  ;;  %v2521_v9 = vpop.f32.mrf.mxu1 }
  0xf3   : > { %v2482_v10 = vpop.f32.mrf.mxu0 }
  0xf4   : > { %v3415_v11 = vadd.f32 %v2520_v6, %v1628_v8  ;;  %v2483_v12 = vadd.f32 %v2482_v10, %v2481_v7  ;;  %v2522_v13 = vpop.f32.mrf.mxu1 }
  0xf5   : > { %v2523_v14 = vadd.f32 %v2522_v13, %v2521_v9  ;;  %v2484_v16 = vpop.f32.mrf.mxu0 }
  0xf6   : > { %v1631_v15 = vadd.f32 %v2483_v12, %v2227_v2  ;;  %v2524_v17 = vpop.f32.mrf.mxu1 }
  0xf7   : > { %v2485_v19 = vpop.f32.mrf.mxu0 }
  0xf8   : > { %v3417_v18 = vadd.f32 %v2523_v14, %v1631_v15  ;;  %v2486_v20 = vadd.f32 %v2485_v19, %v2484_v16  ;;  %v2525_v21 = vpop.f32.mrf.mxu1 }
  0xf9   : > { %v2526_v22 = vadd.f32 %v2525_v21, %v2524_v17  ;;  %v2487_v23 = vpop.f32.mrf.mxu0 }
  0xfa   : > { %v1636_v24 = vadd.f32 %v2486_v20, %v2227_v2  ;;  %v2527_v25 = vpop.f32.mrf.mxu1 }
  0xfb   : > { %v2488_v26 = vpop.f32.mrf.mxu0 }
  0xfc   : > { %v3419_v27 = vadd.f32 %v2526_v22, %v1636_v24  ;;  %v2489_v28 = vadd.f32 %v2488_v26, %v2487_v23  ;;  %v2528_v29 = vpop.f32.mrf.mxu1 }
  0xfd   : > { %v2529_v30 = vadd.f32 %v2528_v29, %v2527_v25  ;;  %v2490_v32 = vpop.f32.mrf.mxu0 }
  0xfe   : > { %v1639_v31 = vadd.f32 %v2489_v28, %v2227_v2  ;;  %v2530_v33 = vpop.f32.mrf.mxu1 }
  0xff   : > { %v2491_v35 = vpop.f32.mrf.mxu0 }
 0x100   : > { %v3421_v34 = vadd.f32 %v2529_v30, %v1639_v31  ;;  %v2531_v36 = vpop.f32.mrf.mxu1  ;;  %v2492_v37 = vadd.f32 %v2491_v35, %v2490_v32 }
 0x101   : > { %v2532_v38 = vadd.f32 %v2531_v36, %v2530_v33  ;;  %v2493_v39 = vpop.f32.mrf.mxu0 }
 0x102   : > { %v2533_v40 = vpop.f32.mrf.mxu1  ;;  %v1644_v41 = vadd.f32 %v2492_v37, %v2227_v2 }
 0x103   : > { %v2494_v42 = vpop.f32.mrf.mxu0 }
 0x104   : > { %v2534_v43 = vpop.f32.mrf.mxu1  ;;  %v3423_v44 = vadd.f32 %v2532_v38, %v1644_v41  ;;  %v2495_v45 = vadd.f32 %v2494_v42, %v2493_v39 }
 0x105   : > { %v2535_v46 = vadd.f32 %v2534_v43, %v2533_v40  ;;  %v2496_v48 = vpop.f32.mrf.mxu0 }
 0x106   : > { %v1647_v47 = vadd.f32 %v2495_v45, %v2227_v2  ;;  %v2536_v49 = vpop.f32.mrf.mxu1 }
 0x107   : > { %v2497_v51 = vpop.f32.mrf.mxu0 }
 0x108   : > { %v3425_v50 = vadd.f32 %v2535_v46, %v1647_v47  ;;  %v2498_v52 = vadd.f32 %v2497_v51, %v2496_v48  ;;  %v2537_v53 = vpop.f32.mrf.mxu1 }
 0x109   : > { %v2538_v54 = vadd.f32 %v2537_v53, %v2536_v49  ;;  %v2499_v55 = vpop.f32.mrf.mxu0 }
 0x10a   : > { %v1652_v56 = vadd.f32 %v2498_v52, %v2227_v2  ;;  %v2539_v57 = vpop.f32.mrf.mxu1 }
 0x10b   : > { %v2500_v58 = vpop.f32.mrf.mxu0 }
 0x10c   : > { %v3427_v59 = vadd.f32 %v2538_v54, %v1652_v56  ;;  %v2501_v60 = vadd.f32 %v2500_v58, %v2499_v55  ;;  %v2540_v61 = vpop.f32.mrf.mxu1 }
 0x10d   : > { %v2541_v62 = vadd.f32 %v2540_v61, %v2539_v57  ;;  %v2558_v0 = vpop.f32.mrf.mxu0 }
 0x10e   : > { %3588 = vst [vmem:[#allocation2_spill] sm:$0xff] %v3427_v59  ;;  %v1655_v63 = vadd.f32 %v2501_v60, %v2227_v2  ;;  %v3429_v1 = vpop.f32.mrf.mxu1 }
 0x10f   : > { %v2559_v4 = vpop.f32.mrf.mxu0 }
 0x110   : > { %v3431_v3 = vadd.f32 %v2541_v62, %v1655_v63  ;;  %v2599_v5 = vpop.f32.mrf.mxu1 }
 0x111   : > { %v2561_v6 = vpop.f32.mrf.mxu0 }
 0x112   : > { %3589 = vst [vmem:[#allocation3_spill] sm:$0xff] %v3431_v3  ;;  %v3433_v7 = vpop.f32.mrf.mxu1 }
 0x113   : > { %v2562_v8 = vpop.f32.mrf.mxu0 }
 0x114   : > { %v3435_v9 = vpop.f32.mrf.mxu1 }
 0x115   : > { %v2564_v10 = vpop.f32.mrf.mxu0 }
 0x116   : > { %v3437_v12 = vpop.f32.mrf.mxu1 }
 0x117   : > { %v2565_v13 = vpop.f32.mrf.mxu0 }
 0x118   : > { %v3439_v14 = vpop.f32.mrf.mxu1 }
 0x119   : > { %v3441_v2 = vpop.f32.mrf.mxu0 }
 0x11a   : > { %v3443_v15 = vpop.f32.mrf.mxu1 }
 0x11b   : > { %v2568_v16 = vpop.f32.mrf.mxu0 }
 0x11c   : > { %v3445_v17 = vpop.f32.mrf.mxu1 }
 0x11d   : > { %v3447_v19 = vpop.f32.mrf.mxu0 }
 0x11e   : > { %v3449_v20 = vpop.f32.mrf.mxu1 }
 0x11f   : > { %v3451_v21 = vpop.f32.mrf.mxu0 }
 0x120   : > { %v3453_v22 = vpop.f32.mrf.mxu1 }
 0x121   : > { %v3455_v23 = vpop.f32.mrf.mxu0 }
 0x122   : > { %v3457_v24 = vpop.f32.mrf.mxu1 }
 0x123   : > { %v3459_v25 = vpop.f32.mrf.mxu0 }
 0x124   : > { %v3461_v26 = vpop.f32.mrf.mxu1 }
 0x125   : > { %v3463_v28 = vpop.f32.mrf.mxu0 }
 0x126   : > { %v3465_v29 = vpop.f32.mrf.mxu1 }
 0x127   : > { %3590 = vst [vmem:[#allocation4_spill] sm:$0xff] %v3465_v29  ;;  %v3467_v30 = vpop.f32.mrf.mxu0  ;;  %v2563_v29 = vadd.f32 %v2562_v8, %v2561_v6 }
 0x128   : > { %v3469_v31 = vpop.f32.mrf.mxu1 }
 0x129   : > { %3591 = vst [vmem:[#allocation5_spill] sm:$0xff] %v3469_v31  ;;  %v3471_v32 = vpop.f32.mrf.mxu0 }
 0x12a   : > { %3592 = vst [vmem:[#allocation6_spill] sm:$0xff] %v3471_v32  ;;  %v3473_v33 = vpop.f32.mrf.mxu1 }
 0x12b   : > { %3593 = vst [vmem:[#allocation7_spill] sm:$0xff] %v3473_v33  ;;  %v3475_v35 = vpop.f32.mrf.mxu0 }
 0x12c   : > { %3594 = vst [vmem:[#allocation8_spill] sm:$0xff] %v3475_v35  ;;  %v3477_v36 = vpop.f32.mrf.mxu1 }
 0x12d   : > { %3595 = vst [vmem:[#allocation9_spill] sm:$0xff] %v3477_v36  ;;  %v2638_v37 = vpop.f32.mrf.mxu0  ;;  %v2560_v36 = vadd.f32 %v2559_v4, %v2558_v0  ;;  %v1761_v0 = vadd.f32 %v2563_v29, %v3417_v18  ;;  %v2566_v4 = vadd.f32 %v2565_v13, %v2564_v10  ;;  %v2606_v18 = vadd.f32 %v3439_v14, %v3437_v12 }
 0x12e   : > { %v2678_v38 = vpop.f32.mrf.mxu1 }
 0x12f   : > { %v2639_v39 = vpop.f32.mrf.mxu0  ;;  %v1758_v31 = vadd.f32 %v2560_v36, %v3415_v11  ;;  %v2603_v11 = vadd.f32 %v3435_v9, %v3433_v7  ;;  %v2572_v9 = vadd.f32 %v3451_v21, %v3447_v19  ;;  %v2575_v19 = vadd.f32 %v3459_v25, %v3455_v23 }
 0x130   : > { %v2679_v40 = vpop.f32.mrf.mxu1  ;;  %v2640_v32 = vadd.f32 %v2639_v39, %v2638_v37  ;;  %v1766_v37 = vadd.f32 %v2566_v4, %v3419_v27 }
 0x131   : > { %v2641_v41 = vpop.f32.mrf.mxu0  ;;  %v1826_v36 = vadd.f32 %v2603_v11, %v1761_v0  ;;  %v2680_v39 = vadd.f32 %v2679_v40, %v2678_v38  ;;  %v2609_v40 = vadd.f32 %v3445_v17, %v3443_v15  ;;  %v1774_v0 = vadd.f32 %v2572_v9, %v3423_v44 }
 0x132   : > { %v2681_v42 = vpop.f32.mrf.mxu1 }
 0x133   : > { %v2642_v43 = vpop.f32.mrf.mxu0 }
 0x134   : > { %v2682_v45 = vpop.f32.mrf.mxu1  ;;  %v2643_v8 = vadd.f32 %v2642_v43, %v2641_v41 }
 0x135   : > { %v2644_v46 = vpop.f32.mrf.mxu0 }
 0x136   : > { %v3479_v47 = vpop.f32.mrf.mxu1  ;;  %v1891_v29 = vadd.f32 %v2643_v8, %v1826_v36 }
 0x137   : > { %v2645_v48 = vpop.f32.mrf.mxu0 }
 0x138   : > { %v3481_v49 = vpop.f32.mrf.mxu1 }
 0x139   : > { %v2647_v51 = vpop.f32.mrf.mxu0 }
 0x13a   : > { %v3483_v52 = vpop.f32.mrf.mxu1 }
 0x13b   : > { %v2648_v53 = vpop.f32.mrf.mxu0 }
 0x13c   : > { %v3485_v54 = vpop.f32.mrf.mxu1  ;;  %v2649_v12 = vadd.f32 %v2648_v53, %v2647_v51 }
 0x13d   : > { %v3487_v55 = vpop.f32.mrf.mxu0 }
 0x13e   : > { %v3489_v56 = vpop.f32.mrf.mxu1 }
 0x13f   : > { %3596 = vst [vmem:[#allocation10_spill] sm:$0xff] %v3489_v56  ;;  %v3491_v57 = vpop.f32.mrf.mxu0 }
 0x140   : > { %v3493_v58 = vpop.f32.mrf.mxu1  ;;  %v2652_v44 = vadd.f32 %v3491_v57, %v3487_v55  ;;  %v2615_v55 = vadd.f32 %v3461_v26, %v3457_v24  ;;  %v3605_v24 = vld [vmem:[#allocation6_spill] sm:$0xff]  ;;  %v3606_v26 = vld [vmem:[#allocation8_spill] sm:$0xff] }
 0x141   : > { %3597 = vst [vmem:[#allocation11_spill] sm:$0xff] %v3493_v58  ;;  %v3495_v60 = vpop.f32.mrf.mxu0  ;;  %v2600_v58 = vadd.f32 %v2599_v5, %v3429_v1  ;;  %v2569_v1 = vadd.f32 %v2568_v16, %v3441_v2  ;;  %v1831_v16 = vadd.f32 %v2606_v18, %v1766_v37  ;;  %v3604_v18 = vld [vmem:[#allocation2_spill] sm:$0xff] }
 0x142   : > { %v3497_v61 = vpop.f32.mrf.mxu1 }
 0x143   : > { %3598 = vst [vmem:[#allocation12_spill] sm:$0xff] %v3497_v61  ;;  %v3499_v62 = vpop.f32.mrf.mxu0  ;;  %v1769_v7 = vadd.f32 %v2569_v1, %v3421_v34 }
 0x144   : > { %v3501_v63 = vpop.f32.mrf.mxu1  ;;  %v2655_v37 = vadd.f32 %v3499_v62, %v3495_v60 }
 0x145   : > { %3599 = vst [vmem:[#allocation13_spill] sm:$0xff] %v3501_v63  ;;  %v3503_v33 = vpop.f32.mrf.mxu0  ;;  %v1823_v63 = vadd.f32 %v2600_v58, %v1758_v31  ;;  %v2646_v58 = vadd.f32 %v2645_v48, %v2644_v46  ;;  %v1834_v34 = vadd.f32 %v2609_v40, %v1769_v7 }
 0x146   : > { %3600 = vst [vmem:[#allocation14_spill] sm:$0xff] %v3503_v33  ;;  %v3505_v3 = vpop.f32.mrf.mxu1  ;;  %v3607_v60 = vld [vmem:[#allocation10_spill] sm:$0xff] }
 0x147   : > { %3601 = vst [vmem:[#allocation15_spill] sm:$0xff] %v3505_v3  ;;  %v3508_v56 = vpop.f32.mrf.mxu0  ;;  %v1888_v6 = vadd.f32 %v2640_v32, %v1823_v63  ;;  %v2683_v32 = vadd.f32 %v2682_v45, %v2681_v42  ;;  %v1896_v43 = vadd.f32 %v2646_v58, %v1831_v16  ;;  %v1899_v51 = vadd.f32 %v2649_v12, %v1834_v34 }
 0x148   : > { %v3510_v35 = vpop.f32.mrf.mxu1  ;;  %v3608_v62 = vld [vmem:[#allocation11_spill] sm:$0xff] }
 0x149   : > { %v3513_v61 = vpop.f32.mrf.mxu0  ;;  %v1953_v13 = vadd.f32 %v2680_v39, %v1888_v6  ;;  %v1956_v41 = vadd.f32 %v2683_v32, %v1891_v29  ;;  %v1777_v6 = vadd.f32 %v2575_v19, %v3425_v50  ;;  %v2692_v58 = vadd.f32 %v3608_v62, %v3607_v60  ;;  %v3609_v32 = vld [vmem:[#allocation4_spill] sm:$0xff] }
 0x14a   : > { %v3515_v59 = vpop.f32.mrf.mxu1 }
 0x14b   : > { %3602 = vst [vmem:[#allocation16_spill] sm:$0xff] %v3515_v59  ;;  %v3518_v33 = vpop.f32.mrf.mxu0 }
 0x14c   : > { %v3520_v3 = vpop.f32.mrf.mxu1 }
 0x14d   : > { %3603 = vst [vmem:[#allocation17_spill] sm:$0xff] %v3520_v3  ;;  %v2718_v5 = vpop.f32.mrf.mxu0  ;;  %v3611_v12 = vld [vmem:[#allocation14_spill] sm:$0xff] }
 0x14e   : > { %v2758_v31 = vpop.f32.mrf.mxu1 }
 0x14f   : > { %v2719_v10 = vpop.f32.mrf.mxu0 }
 0x150   : > { %v2720_v3 = vadd.f32 %v2719_v10, %v2718_v5  ;;  %v2759_v59 = vpop.f32.mrf.mxu1 }
 0x151   : > { %v2721_v2 = vpop.f32.mrf.mxu0  ;;  %v2760_v46 = vadd.f32 %v2759_v59, %v2758_v31  ;;  %v2612_v59 = vadd.f32 %v3453_v22, %v3449_v20  ;;  %v1842_v31 = vadd.f32 %v2615_v55, %v1777_v6 }
 0x152   : > { %v2018_v27 = vadd.f32 %v2720_v3, %v1953_v13  ;;  %v2761_v38 = vpop.f32.mrf.mxu1  ;;  %v2686_v3 = vadd.f32 %v3481_v49, %v3479_v47  ;;  %v2578_v47 = vadd.f32 %v3467_v30, %v3463_v28  ;;  %v2689_v49 = vadd.f32 %v3485_v54, %v3483_v52 }
 0x153   : > { %v2722_v14 = vpop.f32.mrf.mxu0  ;;  %v1839_v20 = vadd.f32 %v2612_v59, %v1774_v0  ;;  %v2581_v13 = vadd.f32 %v3606_v26, %v3605_v24  ;;  %v1907_v40 = vadd.f32 %v2655_v37, %v1842_v31  ;;  %v3612_v0 = vld [vmem:[#allocation3_spill] sm:$0xff] }
 0x154   : > { %v2723_v48 = vadd.f32 %v2722_v14, %v2721_v2  ;;  %v2762_v63 = vpop.f32.mrf.mxu1  ;;  %v2083_v42 = vadd.f32 %v2760_v46, %v2018_v27  ;;  %v1961_v4 = vadd.f32 %v2686_v3, %v1896_v43  ;;  %v1964_v57 = vadd.f32 %v2689_v49, %v1899_v51  ;;  %v3610_v27 = vld [vmem:[#allocation5_spill] sm:$0xff] }
 0x155   : > { %v2724_v21 = vpop.f32.mrf.mxu0  ;;  %v2763_v17 = vadd.f32 %v2762_v63, %v2761_v38  ;;  %v1904_v28 = vadd.f32 %v2652_v44, %v1839_v20  ;;  %v1782_v10 = vadd.f32 %v2578_v47, %v3604_v18  ;;  %v2618_v38 = vadd.f32 %v3610_v27, %v3609_v32  ;;  %v3614_v3 = vld [vmem:[#allocation13_spill] sm:$0xff] }
 0x156   : > { %v2021_v15 = vadd.f32 %v2723_v48, %v1956_v41  ;;  %v2764_v45 = vpop.f32.mrf.mxu1  ;;  %v2113_v22 = vmax.f32 %v2083_v42, 0.0  ;;  %v2658_v14 = vadd.f32 %v3508_v56, %v3611_v12  ;;  %v1785_v19 = vadd.f32 %v2581_v13, %v3612_v0  ;;  %v3619_v31 = vld [vmem:[#allocation17_spill] sm:$0xff] }
 0x157   : > { %v2725_v53 = vpop.f32.mrf.mxu0  ;;  %v1969_v43 = vadd.f32 %v2692_v58, %v1904_v28  ;;  %v1847_v34 = vadd.f32 %v2618_v38, %v1782_v10 }
 0x158   : > { %v2086_v11 = vadd.f32 %v2763_v17, %v2021_v15  ;;  %v2726_v23 = vadd.f32 %v2725_v53, %v2724_v21  ;;  %v2765_v25 = vpop.f32.mrf.mxu1  ;;  %v3613_v21 = vld [vmem:[#allocation12_spill] sm:$0xff]  ;;  %v3615_v53 = vld [vmem:[#allocation7_spill] sm:$0xff] }
 0x159   : > { %v2727_v8 = vpop.f32.mrf.mxu0  ;;  %v2766_v52 = vadd.f32 %v2765_v25, %v2764_v45  ;;  %v2695_v42 = vadd.f32 %v3614_v3, %v3613_v21  ;;  %v2661_v25 = vadd.f32 %v3518_v33, %v3513_v61 }
 0x15a   : > { %v2114_v1 = vmax.f32 %v2086_v11, 0.0  ;;  %v2026_v5 = vadd.f32 %v2726_v23, %v1961_v4  ;;  %v2767_v36 = vpop.f32.mrf.mxu1  ;;  %v3616_v4 = vld [vmem:[#allocation9_spill] sm:$0xff]  ;;  %v1912_v11 = vadd.f32 %v2658_v14, %v1847_v34 }
 0x15b   : > { %v2728_v50 = vpop.f32.mrf.mxu0  ;;  %v2621_v56 = vadd.f32 %v3616_v4, %v3615_v53  ;;  %v1972_v44 = vadd.f32 %v2695_v42, %v1907_v40 }
 0x15c   : > { %v2442_v30 = vpack.c.bf16 %v2114_v1, %v2113_v22  ;;  %v2729_v54 = vadd.f32 %v2728_v50, %v2727_v8  ;;  %v2768_v39 = vpop.f32.mrf.mxu1  ;;  %v2091_v7 = vadd.f32 %v2766_v52, %v2026_v5  ;;  %v3617_v1 = vld [vmem:[#allocation15_spill] sm:$0xff] }
 0x15d   : > { %v2730_v29 = vpop.f32.mrf.mxu0  ;;  %v2769_v2 = vadd.f32 %v2768_v39, %v2767_v36  ;;  %v1850_v20 = vadd.f32 %v2621_v56, %v1785_v19  ;;  %v2698_v5 = vadd.f32 %v3510_v35, %v3617_v1  ;;  %v3618_v39 = vld [vmem:[#allocation16_spill] sm:$0xff] }
 0x15e   : > { %2443 = vst [vmem:[%s3555_s8] sm:$0xff] %v2442_v30   ;;  %v2029_v9 = vadd.f32 %v2729_v54, %v1964_v57  ;;  %v2770_v16 = vpop.f32.mrf.mxu1  ;;  %v2115_v17 = vmax.f32 %v2091_v7, 0.0  ;;  %v2701_v18 = vadd.f32 %v3619_v31, %v3618_v39 }
 0x15f   : > { %v2731_v41 = vpop.f32.mrf.mxu0  ;;  %v1977_v28 = vadd.f32 %v2698_v5, %v1912_v11  ;;  %v1915_v30 = vadd.f32 %v2661_v25, %v1850_v20 }
 0x160   : > { %v2094_v46 = vadd.f32 %v2769_v2, %v2029_v9  ;;  %v2732_v48 = vadd.f32 %v2731_v41, %v2730_v29  ;;  %v2771_v63 = vpop.f32.mrf.mxu1 }
 0x161   : > { %v2733_v15 = vpop.f32.mrf.mxu0  ;;  %v2772_v47 = vadd.f32 %v2771_v63, %v2770_v16  ;;  %v1980_v29 = vadd.f32 %v2701_v18, %v1915_v30 }
 0x162   : > { %v2116_v45 = vmax.f32 %v2094_v46, 0.0  ;;  %v2034_v59 = vadd.f32 %v2732_v48, %v1969_v43  ;;  %v2773_v51 = vpop.f32.mrf.mxu1 }
 0x163   : > { %v2734_v23 = vpop.f32.mrf.mxu0 }
 0x164   : > { %v2447_v6 = vpack.c.bf16 %v2116_v45, %v2115_v17  ;;  %v2735_v49 = vadd.f32 %v2734_v23, %v2733_v15  ;;  %v2774_v8 = vpop.f32.mrf.mxu1  ;;  %v2099_v36 = vadd.f32 %v2772_v47, %v2034_v59 }
 0x165   : > { %v2736_v22 = vpop.f32.mrf.mxu0  ;;  %v2775_v57 = vadd.f32 %v2774_v8, %v2773_v51 }
 0x166   : > { %2459 = vst [vmem:[%s3555_s8 + $0x8] sm:$0xff] %v2447_v6   ;;  %v2037_v55 = vadd.f32 %v2735_v49, %v1972_v44  ;;  %v2776_v37 = vpop.f32.mrf.mxu1  ;;  %v2117_v10 = vmax.f32 %v2099_v36, 0.0 }
 0x167   : > { %v2737_v50 = vpop.f32.mrf.mxu0 }
 0x168   : > { %v2102_v52 = vadd.f32 %v2775_v57, %v2037_v55  ;;  %v2738_v33 = vadd.f32 %v2737_v50, %v2736_v22  ;;  %v2777_v61 = vpop.f32.mrf.mxu1 }
 0x169   : > { %v2739_v54 = vpop.f32.mrf.mxu0  ;;  %v2778_v62 = vadd.f32 %v2777_v61, %v2776_v37 }
 0x16a   : > { %v2118_v24 = vmax.f32 %v2102_v52, 0.0  ;;  %v2042_v26 = vadd.f32 %v2738_v33, %v1977_v28  ;;  %v2779_v35 = vpop.f32.mrf.mxu1 }
 0x16b   : > { %v2740_v13 = vpop.f32.mrf.mxu0 }
 0x16c   : > { %v2452_v60 = vpack.c.bf16 %v2118_v24, %v2117_v10  ;;  %v2741_v58 = vadd.f32 %v2740_v13, %v2739_v54  ;;  %v2780_v7 = vpop.f32.mrf.mxu1  ;;  %v2107_v9 = vadd.f32 %v2778_v62, %v2042_v26 }
 0x16d   : > { %v2781_v16 = vadd.f32 %v2780_v7, %v2779_v35 }
 0x16e   : > { %2460 = vst [vmem:[%s3555_s8 + $0x10] sm:$0xff] %v2452_v60   ;;  %v2045_v2 = vadd.f32 %v2741_v58, %v1980_v29  ;;  %v2119_v27 = vmax.f32 %v2107_v9, 0.0 }
 0x170   : > { %v2110_v32 = vadd.f32 %v2781_v16, %v2045_v2 }
 0x172   : > { %v2120_v38 = vmax.f32 %v2110_v32, 0.0 }
 0x174   : > { %v2457_v40 = vpack.c.bf16 %v2120_v38, %v2119_v27 }
 0x176   : > { %2461 = vst [vmem:[%s3555_s8 + $0x18] sm:$0xff] %v2457_v40  }
 0x177 PF: > { %s13_s12 = sadd.s32 1, %s2924_s12  }
 0x178   : > { %p10_p4 = scmp.ge.s32.totalorder %s13_s12, 4  }
 0x17a   :  { %12 = sbr.rel (!%p10_p4) target bundleno = 1 (0x1), region = 62 }

// kernel: sparse_attn_autoencoder_forward.9
= control target key start
LH: loop header
LB: loop body
LE: loop exit
PB: predicated region body
PF: predicated region fallthrough
CT: control target
= control target key end

     0   :  { %s2208_s12 = smov 0   ;;  %s2636_s0 = inlined_call_operand.vmem [shape: bf16[32,2048], index: 0, kind: input, shape index: {}]   ;;  %s2637_s1 = inlined_call_operand.vmem [shape: bf16[2048,128], index: 1, kind: input, shape index: {}]   ;;  %s2638_s2 = inlined_call_operand.vmem [shape: f32[1,128], index: 2, kind: input, shape index: {}]   ;;  %s2639_s3 = inlined_call_operand.vmem [shape: bf16[32,128], index: 3, kind: output, shape index: {}]  }
   0x1 LB: > { %s1701_s13 = sadd.s32 4294967295, %s2186_s12   ;;  %p1705_p0 = scmp.ge.s32.totalorder %s2186_s12, 1  ;;  %s2186_s12 = sphi %s2208_s12, %s13_s12  }
   0x2   : > { %p139_p1 = scmp.lt.s32.totalorder %s2186_s12, 3 }
   0x4   : > { %p140_p2 = pnand %p1705_p0, %p139_p1 }
   0x5   : > { %s1706_s21 = sshll.u32 (!%p140_p2), %s1701_s13, 1 }
   0x6   : > { %143 = sbr.rel (%p140_p2) target bundleno = 351 (0x15f), region = 32  ;;  %p165_p3 = scmp.lt.s32.totalorder (!%p140_p2), %s1706_s21, 3 }
   0xb   : > { %v2052_v0 = vld [vmem:[%s2637_s1 + $0x78] sm:$0xff]   ;;  %v2056_v4 = vld [vmem:[%s2637_s1 + $0x70] sm:$0xff]   ;;  %v2060_v8 = vld [vmem:[%s2637_s1 + $0x68] sm:$0xff]   ;;  %s2641_s21 = smov (!%p165_p3, %s1706_s21), 3 }
   0xc   : > { %v2053_v1 = vld [vmem:[%s2637_s1 + $0xf8] sm:$0xff]   ;;  %1868 = vmatprep.subr.bf16.mxu0 %v2052_v0  ;;  %v2057_v5 = vld [vmem:[%s2637_s1 + $0xf0] sm:$0xff]   ;;  %v2061_v9 = vld [vmem:[%s2637_s1 + $0xe8] sm:$0xff]   ;;  %s1860_s18 = sshll.u32 %s2641_s21, 6  ;;  %s1710_s6 = sshll.u32 %s2641_s21, 2 }
   0xd   : > { %v2054_v2 = vld [vmem:[%s2637_s1 + $0x38] sm:$0xff]   ;;  %1890 = vmatprep.subr.bf16.mxu1 %v2053_v1  ;;  %v2058_v6 = vld [vmem:[%s2637_s1 + $0x30] sm:$0xff]   ;;  %v2062_v10 = vld [vmem:[%s2637_s1 + $0x28] sm:$0xff]   ;;  %s2314_s28 = scalar_lea.vmem %s2636_s0, %s1860_s18  ;;  %s175_s9 = scalar_lea.vmem %s2639_s3, %s1710_s6 }
   0xe   : > { %v2055_v3 = vld [vmem:[%s2637_s1 + $0xb8] sm:$0xff]   ;;  %1869 = vmatpush3.bf16.msra.mxu0 %v2054_v2  ;;  %v2059_v7 = vld [vmem:[%s2637_s1 + $0xb0] sm:$0xff]   ;;  %v2063_v11 = vld [vmem:[%s2637_s1 + $0xa8] sm:$0xff]  }
   0xf   : > { %1891 = vmatpush3.bf16.msra.mxu1 %v2055_v3  ;;  %1870 = vmatprep.subr.bf16.mxu0 %v2056_v4  ;;  %v2064_v12 = vld [vmem:[%s2637_s1 + $0x60] sm:$0xff]   ;;  %v2068_v16 = vld [vmem:[%s2637_s1 + $0x58] sm:$0xff]   ;;  %v2072_v20 = vld [vmem:[%s2637_s1 + $0x50] sm:$0xff]  }
  0x10   : > { %1892 = vmatprep.subr.bf16.mxu1 %v2057_v5  ;;  %v2065_v13 = vld [vmem:[%s2637_s1 + $0xe0] sm:$0xff]   ;;  %v2069_v17 = vld [vmem:[%s2637_s1 + $0xd8] sm:$0xff]   ;;  %v2073_v21 = vld [vmem:[%s2637_s1 + $0xd0] sm:$0xff]  }
  0x11   : > { %v2066_v14 = vld [vmem:[%s2637_s1 + $0x20] sm:$0xff]   ;;  %v2070_v18 = vld [vmem:[%s2637_s1 + $0x18] sm:$0xff]   ;;  %v2074_v22 = vld [vmem:[%s2637_s1 + $0x10] sm:$0xff]  }
  0x12   : > { %1871 = vmatpush3.bf16.msra.mxu0 %v2058_v6  ;;  %v2067_v15 = vld [vmem:[%s2637_s1 + $0xa0] sm:$0xff]   ;;  %v2071_v19 = vld [vmem:[%s2637_s1 + $0x98] sm:$0xff]   ;;  %v2075_v23 = vld [vmem:[%s2637_s1 + $0x90] sm:$0xff]  }
  0x13   : > { %1893 = vmatpush3.bf16.msra.mxu1 %v2059_v7  ;;  %1872 = vmatprep.subr.bf16.mxu0 %v2060_v8  ;;  %v2076_v24 = vld [vmem:[%s2637_s1 + $0x48] sm:$0xff]   ;;  %v2080_v28 = vld [vmem:[%s2637_s1 + $0x40] sm:$0xff]   ;;  %v2084_v40 = vld [vmem:[%s2637_s1 + $0x178] sm:$0xff]  }
  0x14   : > { %1894 = vmatprep.subr.bf16.mxu1 %v2061_v9  ;;  %v2077_v25 = vld [vmem:[%s2637_s1 + $0xc8] sm:$0xff]   ;;  %v2081_v29 = vld [vmem:[%s2637_s1 + $0xc0] sm:$0xff]   ;;  %v2085_v41 = vld [vmem:[%s2637_s1 + $0x1f8] sm:$0xff]  }
  0x15   : > { %v2078_v26 = vld [vmem:[%s2637_s1 + $0x8] sm:$0xff]   ;;  %v2082_v30 = vld [vmem:[%s2637_s1] sm:$0xff]   ;;  %v2086_v42 = vld [vmem:[%s2637_s1 + $0x138] sm:$0xff]  }
  0x16   : > { %1873 = vmatpush3.bf16.msra.mxu0 %v2062_v10  ;;  %v2079_v27 = vld [vmem:[%s2637_s1 + $0x88] sm:$0xff]   ;;  %v2083_v31 = vld [vmem:[%s2637_s1 + $0x80] sm:$0xff]   ;;  %v2087_v43 = vld [vmem:[%s2637_s1 + $0x1b8] sm:$0xff]  }
  0x17   : > { %1895 = vmatpush3.bf16.msra.mxu1 %v2063_v11  ;;  %1874 = vmatprep.subr.bf16.mxu0 %v2064_v12  ;;  %v178_v32 = vld [vmem:[%s2314_s28] sm:$0xff]  ;;  %v179_v34 = vld [vmem:[%s2314_s28 + $0x8] sm:$0xff]  ;;  %v2088_v44 = vld [vmem:[%s2637_s1 + $0x170] sm:$0xff]  }
  0x18   : > { %1896 = vmatprep.subr.bf16.mxu1 %v2065_v13  ;;  %v186_v33 = vld [vmem:[%s2314_s28 + $0x40] sm:$0xff]  ;;  %v187_v37 = vld [vmem:[%s2314_s28 + $0x48] sm:$0xff]  ;;  %v2089_v45 = vld [vmem:[%s2637_s1 + $0x1f0] sm:$0xff]  }
  0x19   : > { %v1712_v35 = vcombine.low %v178_v32, %v186_v33  ;;  %v1713_v36 = vcombine.high %v178_v32, %v186_v33  ;;  %v1714_v38 = vcombine.low %v179_v34, %v187_v37  ;;  %v1715_v39 = vcombine.high %v179_v34, %v187_v37  ;;  %v2090_v46 = vld [vmem:[%s2637_s1 + $0x130] sm:$0xff]   ;;  %v2092_v48 = vld [vmem:[%s2637_s1 + $0x168] sm:$0xff]   ;;  %v2096_v52 = vld [vmem:[%s2637_s1 + $0x160] sm:$0xff]  }
  0x1a   : > { %1875 = vmatpush3.bf16.msra.mxu0 %v2066_v14  ;;  %v2091_v47 = vld [vmem:[%s2637_s1 + $0x1b0] sm:$0xff]   ;;  %v2093_v49 = vld [vmem:[%s2637_s1 + $0x1e8] sm:$0xff]   ;;  %v2097_v53 = vld [vmem:[%s2637_s1 + $0x1e0] sm:$0xff]  }
  0x1b   : > { %1897 = vmatpush3.bf16.msra.mxu1 %v2067_v15  ;;  %1876 = vmatprep.subr.bf16.mxu0 %v2068_v16  ;;  %v2094_v50 = vld [vmem:[%s2637_s1 + $0x128] sm:$0xff]   ;;  %v2098_v54 = vld [vmem:[%s2637_s1 + $0x120] sm:$0xff]   ;;  %v2100_v56 = vld [vmem:[%s2637_s1 + $0x158] sm:$0xff]  }
  0x1c   : > { %1898 = vmatprep.subr.bf16.mxu1 %v2069_v17  ;;  %1337 = vmatprep.mubr.bf16.mxu0 %v1713_v36  ;;  %v2095_v51 = vld [vmem:[%s2637_s1 + $0x1a8] sm:$0xff]   ;;  %v2099_v55 = vld [vmem:[%s2637_s1 + $0x1a0] sm:$0xff]   ;;  %v2101_v57 = vld [vmem:[%s2637_s1 + $0x1d8] sm:$0xff]  }
  0x1d   : > { %1378 = vmatprep.mubr.bf16.mxu1 %v1715_v39  ;;  %v2102_v58 = vld [vmem:[%s2637_s1 + $0x118] sm:$0xff]   ;;  %v2104_v60 = vld [vmem:[%s2637_s1 + $0x150] sm:$0xff]   ;;  %v2108_v0 = vld [vmem:[%s2637_s1 + $0x148] sm:$0xff]  }
  0x1e   : > { %1877 = vmatpush3.bf16.msra.mxu0 %v2070_v18  ;;  %v2103_v59 = vld [vmem:[%s2637_s1 + $0x198] sm:$0xff]   ;;  %v2105_v61 = vld [vmem:[%s2637_s1 + $0x1d0] sm:$0xff]   ;;  %v2109_v1 = vld [vmem:[%s2637_s1 + $0x1c8] sm:$0xff]  }
  0x1f   : > { %1899 = vmatpush3.bf16.msra.mxu1 %v2071_v19  ;;  %1878 = vmatprep.subr.bf16.mxu0 %v2072_v20  ;;  %v2106_v62 = vld [vmem:[%s2637_s1 + $0x110] sm:$0xff]   ;;  %v2110_v2 = vld [vmem:[%s2637_s1 + $0x108] sm:$0xff]   ;;  %v2112_v4 = vld [vmem:[%s2637_s1 + $0x140] sm:$0xff]  }
  0x20   : > { %1900 = vmatprep.subr.bf16.mxu1 %v2073_v21  ;;  %v2107_v63 = vld [vmem:[%s2637_s1 + $0x190] sm:$0xff]   ;;  %v2111_v3 = vld [vmem:[%s2637_s1 + $0x188] sm:$0xff]   ;;  %v2113_v5 = vld [vmem:[%s2637_s1 + $0x1c0] sm:$0xff]  }
  0x21   : > { %v2114_v6 = vld [vmem:[%s2637_s1 + $0x100] sm:$0xff]   ;;  %v180_v8 = vld [vmem:[%s2314_s28 + $0x10] sm:$0xff]  ;;  %v181_v12 = vld [vmem:[%s2314_s28 + $0x18] sm:$0xff] }
  0x22   : > { %1879 = vmatpush3.bf16.msra.mxu0 %v2074_v22  ;;  %v2115_v7 = vld [vmem:[%s2637_s1 + $0x180] sm:$0xff]   ;;  %v188_v9 = vld [vmem:[%s2314_s28 + $0x50] sm:$0xff]  ;;  %v189_v13 = vld [vmem:[%s2314_s28 + $0x58] sm:$0xff] }
  0x23   : > { %1901 = vmatpush3.bf16.msra.mxu1 %v2075_v23  ;;  %1880 = vmatprep.subr.bf16.mxu0 %v2076_v24  ;;  %v1716_v10 = vcombine.low %v180_v8, %v188_v9  ;;  %v1717_v11 = vcombine.high %v180_v8, %v188_v9  ;;  %v1718_v14 = vcombine.low %v181_v12, %v189_v13  ;;  %v2116_v16 = vld [vmem:[%s2637_s1 + $0x278] sm:$0xff]   ;;  %v2120_v20 = vld [vmem:[%s2637_s1 + $0x270] sm:$0xff]   ;;  %v2124_v24 = vld [vmem:[%s2637_s1 + $0x268] sm:$0xff]  }
  0x24   : > { %1902 = vmatprep.subr.bf16.mxu1 %v2077_v25  ;;  %v1719_v15 = vcombine.high %v181_v12, %v189_v13  ;;  %v2117_v17 = vld [vmem:[%s2637_s1 + $0x2f8] sm:$0xff]   ;;  %v2121_v21 = vld [vmem:[%s2637_s1 + $0x2f0] sm:$0xff]   ;;  %v2125_v25 = vld [vmem:[%s2637_s1 + $0x2e8] sm:$0xff]  }
  0x25   : > { %v2118_v18 = vld [vmem:[%s2637_s1 + $0x238] sm:$0xff]   ;;  %v2122_v22 = vld [vmem:[%s2637_s1 + $0x230] sm:$0xff]  }
  0x26   : > { %1881 = vmatpush3.bf16.msra.mxu0 %v2078_v26  ;;  %v2119_v19 = vld [vmem:[%s2637_s1 + $0x2b8] sm:$0xff]   ;;  %v2123_v23 = vld [vmem:[%s2637_s1 + $0x2b0] sm:$0xff]   ;;  %v2126_v26 = vld [vmem:[%s2637_s1 + $0x228] sm:$0xff]  }
  0x27   : > { %1903 = vmatpush3.bf16.msra.mxu1 %v2079_v27  ;;  %1882 = vmatprep.subr.bf16.mxu0 %v2080_v28  ;;  %v2127_v27 = vld [vmem:[%s2637_s1 + $0x2a8] sm:$0xff]   ;;  %v2128_v28 = vld [vmem:[%s2637_s1 + $0x260] sm:$0xff]   ;;  %v2132_v32 = vld [vmem:[%s2637_s1 + $0x258] sm:$0xff]  }
  0x28   : > { %1904 = vmatprep.subr.bf16.mxu1 %v2081_v29  ;;  %v2129_v29 = vld [vmem:[%s2637_s1 + $0x2e0] sm:$0xff]   ;;  %v2133_v33 = vld [vmem:[%s2637_s1 + $0x2d8] sm:$0xff]   ;;  %v2136_v36 = vld [vmem:[%s2637_s1 + $0x250] sm:$0xff]  }
  0x29   : > { %v2134_v34 = vld [vmem:[%s2637_s1 + $0x218] sm:$0xff]   ;;  %v2137_v37 = vld [vmem:[%s2637_s1 + $0x2d0] sm:$0xff]  }
  0x2a   : > { %1883 = vmatpush3.bf16.msra.mxu0 %v2082_v30  ;;  %v2130_v30 = vld [vmem:[%s2637_s1 + $0x220] sm:$0xff]   ;;  %v2139_v39 = vld [vmem:[%s2637_s1 + $0x290] sm:$0xff]   ;;  %v2164_v8 = vld [vmem:[%s2637_s1 + $0x358] sm:$0xff]  }
  0x2b   : > { %1905 = vmatpush3.bf16.msra.mxu1 %v2083_v31  ;;  %1912 = vmatprep.subr.bf16.mxu0 %v2084_v40  ;;  %v2131_v31 = vld [vmem:[%s2637_s1 + $0x2a0] sm:$0xff]   ;;  %v2140_v40 = vld [vmem:[%s2637_s1 + $0x248] sm:$0xff]   ;;  %v2165_v9 = vld [vmem:[%s2637_s1 + $0x3d8] sm:$0xff]  }
  0x2c   : > { %1934 = vmatprep.subr.bf16.mxu1 %v2085_v41  ;;  %v2141_v41 = vld [vmem:[%s2637_s1 + $0x2c8] sm:$0xff]   ;;  %v2168_v12 = vld [vmem:[%s2637_s1 + $0x350] sm:$0xff]  }
  0x2d   : > { %1338 = vmatmul.mubr.bf16.vlgmr.msra.gmra.mxu0 %v1712_v35  ;;  %v2135_v35 = vld [vmem:[%s2637_s1 + $0x298] sm:$0xff]   ;;  %v2169_v13 = vld [vmem:[%s2637_s1 + $0x3d0] sm:$0xff]  }
  0x2e   : > { %1379 = vmatmul.mubr.bf16.vlgmr.msra.gmra.mxu1 %v1714_v38  ;;  %1913 = vmatpush3.bf16.msra.mxu0 %v2086_v42  ;;  %v2138_v38 = vld [vmem:[%s2637_s1 + $0x210] sm:$0xff]   ;;  %v2142_v42 = vld [vmem:[%s2637_s1 + $0x208] sm:$0xff]  }
  0x2f   : > { %1935 = vmatpush3.bf16.msra.mxu1 %v2087_v43  ;;  %1914 = vmatprep.subr.bf16.mxu0 %v2088_v44  ;;  %v2143_v43 = vld [vmem:[%s2637_s1 + $0x288] sm:$0xff]   ;;  %v2144_v44 = vld [vmem:[%s2637_s1 + $0x240] sm:$0xff]  }
  0x30   : > { %1936 = vmatprep.subr.bf16.mxu1 %v2089_v45  ;;  %1419 = vmatprep.mubr.bf16.mxu0 %v1717_v11  ;;  %v2145_v45 = vld [vmem:[%s2637_s1 + $0x2c0] sm:$0xff]   ;;  %v2167_v11 = vld [vmem:[%s2637_s1 + $0x398] sm:$0xff]  }
  0x31   : > { %1460 = vmatprep.mubr.bf16.mxu1 %v1719_v15  ;;  %v2171_v15 = vld [vmem:[%s2637_s1 + $0x390] sm:$0xff]  }
  0x32   : > { %1915 = vmatpush3.bf16.msra.mxu0 %v2090_v46  ;;  %v2146_v46 = vld [vmem:[%s2637_s1 + $0x200] sm:$0xff]  }
  0x33   : > { %1937 = vmatpush3.bf16.msra.mxu1 %v2091_v47  ;;  %1916 = vmatprep.subr.bf16.mxu0 %v2092_v48  ;;  %v2147_v47 = vld [vmem:[%s2637_s1 + $0x280] sm:$0xff]  }
  0x34   : > { %1938 = vmatprep.subr.bf16.mxu1 %v2093_v49  ;;  %v182_v48 = vld [vmem:[%s2314_s28 + $0x20] sm:$0xff] }
  0x35   : > { %v190_v49 = vld [vmem:[%s2314_s28 + $0x60] sm:$0xff] }
  0x36   : > { %1917 = vmatpush3.bf16.msra.mxu0 %v2094_v50  ;;  %v183_v50 = vld [vmem:[%s2314_s28 + $0x28] sm:$0xff] }
  0x37   : > { %1939 = vmatpush3.bf16.msra.mxu1 %v2095_v51  ;;  %1918 = vmatprep.subr.bf16.mxu0 %v2096_v52  ;;  %v191_v51 = vld [vmem:[%s2314_s28 + $0x68] sm:$0xff]  ;;  %v1720_v52 = vcombine.low %v182_v48, %v190_v49 }
  0x38   : > { %1940 = vmatprep.subr.bf16.mxu1 %v2097_v53  ;;  %v1721_v53 = vcombine.high %v182_v48, %v190_v49  ;;  %v1711_v48 = vld [vmem:[%s2638_s2] ss:$0 sm:$0xff] }
  0x3a   : > { %1919 = vmatpush3.bf16.msra.mxu0 %v2098_v54  ;;  %v1722_v54 = vcombine.low %v183_v50, %v191_v51 }
  0x3b   : > { %1941 = vmatpush3.bf16.msra.mxu1 %v2099_v55  ;;  %1920 = vmatprep.subr.bf16.mxu0 %v2100_v56  ;;  %v1723_v55 = vcombine.high %v183_v50, %v191_v51  ;;  %v2148_v56 = vld [vmem:[%s2637_s1 + $0x378] sm:$0xff]  }
  0x3c   : > { %1942 = vmatprep.subr.bf16.mxu1 %v2101_v57  ;;  %v2149_v57 = vld [vmem:[%s2637_s1 + $0x3f8] sm:$0xff]  }
  0x3e   : > { %1921 = vmatpush3.bf16.msra.mxu0 %v2102_v58  ;;  %v2150_v58 = vld [vmem:[%s2637_s1 + $0x338] sm:$0xff]  }
  0x3f   : > { %1943 = vmatpush3.bf16.msra.mxu1 %v2103_v59  ;;  %1922 = vmatprep.subr.bf16.mxu0 %v2104_v60  ;;  %v2151_v59 = vld [vmem:[%s2637_s1 + $0x3b8] sm:$0xff]   ;;  %v2152_v60 = vld [vmem:[%s2637_s1 + $0x370] sm:$0xff]  }
  0x40   : > { %1944 = vmatprep.subr.bf16.mxu1 %v2105_v61  ;;  %v2153_v61 = vld [vmem:[%s2637_s1 + $0x3f0] sm:$0xff]  }
  0x42   : > { %1923 = vmatpush3.bf16.msra.mxu0 %v2106_v62  ;;  %v2154_v62 = vld [vmem:[%s2637_s1 + $0x330] sm:$0xff]  }
  0x43   : > { %1945 = vmatpush3.bf16.msra.mxu1 %v2107_v63  ;;  %1924 = vmatprep.subr.bf16.mxu0 %v2108_v0  ;;  %v2155_v63 = vld [vmem:[%s2637_s1 + $0x3b0] sm:$0xff]   ;;  %v2156_v0 = vld [vmem:[%s2637_s1 + $0x368] sm:$0xff]  }
  0x44   : > { %1946 = vmatprep.subr.bf16.mxu1 %v2109_v1  ;;  %v2157_v1 = vld [vmem:[%s2637_s1 + $0x3e8] sm:$0xff]  }
  0x46   : > { %1925 = vmatpush3.bf16.msra.mxu0 %v2110_v2  ;;  %v2158_v2 = vld [vmem:[%s2637_s1 + $0x328] sm:$0xff]  }
  0x47   : > { %1947 = vmatpush3.bf16.msra.mxu1 %v2111_v3  ;;  %1926 = vmatprep.subr.bf16.mxu0 %v2112_v4  ;;  %v2159_v3 = vld [vmem:[%s2637_s1 + $0x3a8] sm:$0xff]   ;;  %v2160_v4 = vld [vmem:[%s2637_s1 + $0x360] sm:$0xff]  }
  0x48   : > { %1948 = vmatprep.subr.bf16.mxu1 %v2113_v5  ;;  %v2161_v5 = vld [vmem:[%s2637_s1 + $0x3e0] sm:$0xff]  }
  0x4a   : > { %1927 = vmatpush3.bf16.msra.mxu0 %v2114_v6  ;;  %v2162_v6 = vld [vmem:[%s2637_s1 + $0x320] sm:$0xff]  }
  0x4b   : > { %1949 = vmatpush3.bf16.msra.mxu1 %v2115_v7  ;;  %1956 = vmatprep.subr.bf16.mxu0 %v2116_v16  ;;  %v2163_v7 = vld [vmem:[%s2637_s1 + $0x3a0] sm:$0xff]   ;;  %v2172_v16 = vld [vmem:[%s2637_s1 + $0x348] sm:$0xff]  }
  0x4c   : > { %1978 = vmatprep.subr.bf16.mxu1 %v2117_v17  ;;  %v2173_v17 = vld [vmem:[%s2637_s1 + $0x3c8] sm:$0xff]  }
  0x4d   : > { %1420 = vmatmul.mubr.bf16.vlgmr.msra.gmra.mxu0 %v1716_v10  ;;  %v2166_v10 = vld [vmem:[%s2637_s1 + $0x318] sm:$0xff]  }
  0x4e   : > { %1461 = vmatmul.mubr.bf16.vlgmr.msra.gmra.mxu1 %v1718_v14  ;;  %1957 = vmatpush3.bf16.msra.mxu0 %v2118_v18  ;;  %v2170_v14 = vld [vmem:[%s2637_s1 + $0x310] sm:$0xff]   ;;  %v2174_v18 = vld [vmem:[%s2637_s1 + $0x308] sm:$0xff]  }
  0x4f   : > { %1979 = vmatpush3.bf16.msra.mxu1 %v2119_v19  ;;  %1958 = vmatprep.subr.bf16.mxu0 %v2120_v20  ;;  %v2175_v19 = vld [vmem:[%s2637_s1 + $0x388] sm:$0xff]   ;;  %v2176_v20 = vld [vmem:[%s2637_s1 + $0x340] sm:$0xff]  }
  0x50   : > { %1980 = vmatprep.subr.bf16.mxu1 %v2121_v21  ;;  %1501 = vmatprep.mubr.bf16.mxu0 %v1721_v53  ;;  %v2177_v21 = vld [vmem:[%s2637_s1 + $0x3c0] sm:$0xff]  }
  0x51   : > { %1542 = vmatprep.mubr.bf16.mxu1 %v1723_v55 }
  0x52   : > { %1959 = vmatpush3.bf16.msra.mxu0 %v2122_v22  ;;  %v2178_v22 = vld [vmem:[%s2637_s1 + $0x300] sm:$0xff]  }
  0x53   : > { %1981 = vmatpush3.bf16.msra.mxu1 %v2123_v23  ;;  %1960 = vmatprep.subr.bf16.mxu0 %v2124_v24  ;;  %v2179_v23 = vld [vmem:[%s2637_s1 + $0x380] sm:$0xff]   ;;  %v184_v24 = vld [vmem:[%s2314_s28 + $0x30] sm:$0xff] }
  0x54   : > { %1982 = vmatprep.subr.bf16.mxu1 %v2125_v25  ;;  %v192_v25 = vld [vmem:[%s2314_s28 + $0x70] sm:$0xff] }
  0x56   : > { %1961 = vmatpush3.bf16.msra.mxu0 %v2126_v26  ;;  %v185_v26 = vld [vmem:[%s2314_s28 + $0x38] sm:$0xff] }
  0x57   : > { %1983 = vmatpush3.bf16.msra.mxu1 %v2127_v27  ;;  %1962 = vmatprep.subr.bf16.mxu0 %v2128_v28  ;;  %v1724_v27 = vcombine.low %v184_v24, %v192_v25  ;;  %v1725_v28 = vcombine.high %v184_v24, %v192_v25 }
  0x58   : > { %1984 = vmatprep.subr.bf16.mxu1 %v2129_v29  ;;  %v193_v29 = vld [vmem:[%s2314_s28 + $0x78] sm:$0xff] }
  0x5a   : > { %1963 = vmatpush3.bf16.msra.mxu0 %v2130_v30  ;;  %v1726_v30 = vcombine.low %v185_v26, %v193_v29 }
  0x5b   : > { %1985 = vmatpush3.bf16.msra.mxu1 %v2131_v31  ;;  %1964 = vmatprep.subr.bf16.mxu0 %v2132_v32  ;;  %v1727_v31 = vcombine.high %v185_v26, %v193_v29 }
  0x5c   : > { %1986 = vmatprep.subr.bf16.mxu1 %v2133_v33 }
  0x5e   : > { %1965 = vmatpush3.bf16.msra.mxu0 %v2134_v34 }
  0x5f   : > { %1987 = vmatpush3.bf16.msra.mxu1 %v2135_v35  ;;  %1966 = vmatprep.subr.bf16.mxu0 %v2136_v36 }
  0x60   : > { %1988 = vmatprep.subr.bf16.mxu1 %v2137_v37 }
  0x62   : > { %1967 = vmatpush3.bf16.msra.mxu0 %v2138_v38 }
  0x63   : > { %1989 = vmatpush3.bf16.msra.mxu1 %v2139_v39  ;;  %1968 = vmatprep.subr.bf16.mxu0 %v2140_v40 }
  0x64   : > { %1990 = vmatprep.subr.bf16.mxu1 %v2141_v41 }
  0x66   : > { %1969 = vmatpush3.bf16.msra.mxu0 %v2142_v42 }
  0x67   : > { %1991 = vmatpush3.bf16.msra.mxu1 %v2143_v43  ;;  %1970 = vmatprep.subr.bf16.mxu0 %v2144_v44 }
  0x68   : > { %1992 = vmatprep.subr.bf16.mxu1 %v2145_v45 }
  0x6a   : > { %1971 = vmatpush3.bf16.msra.mxu0 %v2146_v46 }
  0x6b   : > { %1993 = vmatpush3.bf16.msra.mxu1 %v2147_v47  ;;  %2000 = vmatprep.subr.bf16.mxu0 %v2148_v56 }
  0x6c   : > { %2022 = vmatprep.subr.bf16.mxu1 %v2149_v57 }
  0x6d   : > { %1502 = vmatmul.mubr.bf16.vlgmr.msra.gmra.mxu0 %v1720_v52 }
  0x6e   : > { %1543 = vmatmul.mubr.bf16.vlgmr.msra.gmra.mxu1 %v1722_v54  ;;  %2001 = vmatpush3.bf16.msra.mxu0 %v2150_v58 }
  0x6f   : > { %2023 = vmatpush3.bf16.msra.mxu1 %v2151_v59  ;;  %2002 = vmatprep.subr.bf16.mxu0 %v2152_v60 }
  0x70   : > { %2024 = vmatprep.subr.bf16.mxu1 %v2153_v61  ;;  %1583 = vmatprep.mubr.bf16.mxu0 %v1725_v28 }
  0x71   : > { %1624 = vmatprep.mubr.bf16.mxu1 %v1727_v31 }
  0x72   : > { %2003 = vmatpush3.bf16.msra.mxu0 %v2154_v62 }
  0x73   : > { %2025 = vmatpush3.bf16.msra.mxu1 %v2155_v63  ;;  %2004 = vmatprep.subr.bf16.mxu0 %v2156_v0 }
  0x74   : > { %2026 = vmatprep.subr.bf16.mxu1 %v2157_v1 }
  0x76   : > { %2005 = vmatpush3.bf16.msra.mxu0 %v2158_v2 }
  0x77   : > { %2027 = vmatpush3.bf16.msra.mxu1 %v2159_v3  ;;  %2006 = vmatprep.subr.bf16.mxu0 %v2160_v4 }
  0x78   : > { %2028 = vmatprep.subr.bf16.mxu1 %v2161_v5 }
  0x7a   : > { %2007 = vmatpush3.bf16.msra.mxu0 %v2162_v6 }
  0x7b   : > { %2029 = vmatpush3.bf16.msra.mxu1 %v2163_v7  ;;  %2008 = vmatprep.subr.bf16.mxu0 %v2164_v8 }
  0x7c   : > { %2030 = vmatprep.subr.bf16.mxu1 %v2165_v9 }
  0x7e   : > { %2009 = vmatpush3.bf16.msra.mxu0 %v2166_v10 }
  0x7f   : > { %2031 = vmatpush3.bf16.msra.mxu1 %v2167_v11  ;;  %2010 = vmatprep.subr.bf16.mxu0 %v2168_v12 }
  0x80   : > { %2032 = vmatprep.subr.bf16.mxu1 %v2169_v13 }
  0x82   : > { %2011 = vmatpush3.bf16.msra.mxu0 %v2170_v14 }
  0x83   : > { %2033 = vmatpush3.bf16.msra.mxu1 %v2171_v15  ;;  %2012 = vmatprep.subr.bf16.mxu0 %v2172_v16 }
  0x84   : > { %2034 = vmatprep.subr.bf16.mxu1 %v2173_v17 }
  0x86   : > { %2013 = vmatpush3.bf16.msra.mxu0 %v2174_v18 }
  0x87   : > { %2035 = vmatpush3.bf16.msra.mxu1 %v2175_v19  ;;  %2014 = vmatprep.subr.bf16.mxu0 %v2176_v20 }
  0x88   : > { %2036 = vmatprep.subr.bf16.mxu1 %v2177_v21 }
  0x8a   : > { %2015 = vmatpush3.bf16.msra.mxu0 %v2178_v22 }
  0x8b   : > { %2037 = vmatpush3.bf16.msra.mxu1 %v2179_v23 }
  0x8d   : > { %1584 = vmatmul.mubr.bf16.vlgmr.msra.gmra.mxu0 %v1724_v27 }
  0x8e   : > { %1625 = vmatmul.mubr.bf16.vlgmr.msra.gmra.mxu1 %v1726_v30 }
  0xed   : > { %v1884_v32 = vpop.f32.mrf.mxu0 }
  0xee   : > { %v1906_v33 = vpop.f32.mrf.mxu1 }
  0xef   : > { %v1885_v34 = vpop.f32.mrf.mxu0 }
  0xf0   : > { %v1907_v35 = vpop.f32.mrf.mxu1  ;;  %v1886_v47 = vadd.f32 %v1885_v34, %v1884_v32 }
  0xf1   : > { %v1887_v36 = vpop.f32.mrf.mxu0  ;;  %v1908_v52 = vadd.f32 %v1907_v35, %v1906_v33 }
  0xf2   : > { %v1909_v37 = vpop.f32.mrf.mxu1  ;;  %v1340_v51 = vadd.f32 %v1886_v47, %v1711_v48 }
  0xf3   : > { %v1888_v38 = vpop.f32.mrf.mxu0 }
  0xf4   : > { %v1910_v40 = vpop.f32.mrf.mxu1  ;;  %v1889_v53 = vadd.f32 %v1888_v38, %v1887_v36  ;;  %v1381_v57 = vadd.f32 %v1908_v52, %v1340_v51 }
  0xf5   : > { %v1911_v61 = vadd.f32 %v1910_v40, %v1909_v37 }
  0xf6   : > { %v1343_v58 = vadd.f32 %v1889_v53, %v1711_v48 }
  0xf8   : > { %v1384_v1 = vadd.f32 %v1911_v61, %v1343_v58 }
 0x10d   : > { %v1928_v39 = vpop.f32.mrf.mxu0 }
 0x10e   : > { %v1950_v41 = vpop.f32.mrf.mxu1 }
 0x10f   : > { %v1929_v42 = vpop.f32.mrf.mxu0 }
 0x110   : > { %v1951_v43 = vpop.f32.mrf.mxu1  ;;  %v1930_v56 = vadd.f32 %v1929_v42, %v1928_v39 }
 0x111   : > { %v1931_v44 = vpop.f32.mrf.mxu0  ;;  %v1952_v63 = vadd.f32 %v1951_v43, %v1950_v41 }
 0x112   : > { %v1953_v45 = vpop.f32.mrf.mxu1  ;;  %v1422_v62 = vadd.f32 %v1930_v56, %v1381_v57 }
 0x113   : > { %v1932_v46 = vpop.f32.mrf.mxu0 }
 0x114   : > { %v1954_v50 = vpop.f32.mrf.mxu1  ;;  %v1933_v0 = vadd.f32 %v1932_v46, %v1931_v44  ;;  %v1463_v5 = vadd.f32 %v1952_v63, %v1422_v62 }
 0x115   : > { %v1955_v7 = vadd.f32 %v1954_v50, %v1953_v45 }
 0x116   : > { %v1425_v6 = vadd.f32 %v1933_v0, %v1384_v1 }
 0x118   : > { %v1466_v13 = vadd.f32 %v1955_v7, %v1425_v6 }
 0x12d   : > { %v1972_v49 = vpop.f32.mrf.mxu0 }
 0x12e   : > { %v1994_v54 = vpop.f32.mrf.mxu1 }
 0x12f   : > { %v1973_v55 = vpop.f32.mrf.mxu0 }
 0x130   : > { %v1995_v59 = vpop.f32.mrf.mxu1  ;;  %v1974_v2 = vadd.f32 %v1973_v55, %v1972_v49 }
 0x131   : > { %v1975_v60 = vpop.f32.mrf.mxu0  ;;  %v1996_v9 = vadd.f32 %v1995_v59, %v1994_v54 }
 0x132   : > { %v1997_v3 = vpop.f32.mrf.mxu1  ;;  %v1504_v8 = vadd.f32 %v1974_v2, %v1463_v5 }
 0x133   : > { %v1976_v4 = vpop.f32.mrf.mxu0 }
 0x134   : > { %v1977_v10 = vadd.f32 %v1976_v4, %v1975_v60  ;;  %v1998_v11 = vpop.f32.mrf.mxu1  ;;  %v1545_v16 = vadd.f32 %v1996_v9, %v1504_v8 }
 0x135   : > { %v1999_v21 = vadd.f32 %v1998_v11, %v1997_v3 }
 0x136   : > { %v1507_v17 = vadd.f32 %v1977_v10, %v1466_v13 }
 0x138   : > { %v1548_v25 = vadd.f32 %v1999_v21, %v1507_v17 }
 0x14d   : > { %v2016_v12 = vpop.f32.mrf.mxu0 }
 0x14e   : > { %v2038_v14 = vpop.f32.mrf.mxu1 }
 0x14f   : > { %v2017_v15 = vpop.f32.mrf.mxu0 }
 0x150   : > { %v2018_v18 = vadd.f32 %v2017_v15, %v2016_v12  ;;  %v2039_v19 = vpop.f32.mrf.mxu1 }
 0x151   : > { %v2019_v20 = vpop.f32.mrf.mxu0  ;;  %v2040_v26 = vadd.f32 %v2039_v19, %v2038_v14 }
 0x152   : > { %v1586_v22 = vadd.f32 %v2018_v18, %v1545_v16  ;;  %v2041_v23 = vpop.f32.mrf.mxu1 }
 0x153   : > { %v2020_v24 = vpop.f32.mrf.mxu0 }
 0x154   : > { %v2021_v27 = vadd.f32 %v2020_v24, %v2019_v20  ;;  %v2042_v28 = vpop.f32.mrf.mxu1  ;;  %v1627_v29 = vadd.f32 %v2040_v26, %v1586_v22 }
 0x155   : > { %v2043_v31 = vadd.f32 %v2042_v28, %v2041_v23 }
 0x156   : > { %v1589_v30 = vadd.f32 %v2021_v27, %v1548_v25  ;;  %v1633_v33 = vmax.f32 %v1627_v29, 0.0 }
 0x158   : > { %v1630_v32 = vadd.f32 %v2043_v31, %v1589_v30 }
 0x15a   : > { %v1634_v34 = vmax.f32 %v1630_v32, 0.0 }
 0x15c   : > { %v1866_v35 = vpack.c.bf16 %v1634_v34, %v1633_v33 }
 0x15e   : > { %1867 = vst [vmem:[%s175_s9] sm:$0xff] %v1866_v35  }
 0x15f PF: > { %s13_s12 = sadd.s32 1, %s2186_s12  }
 0x160   : > { %p10_p4 = scmp.ge.s32.totalorder %s13_s12, 4  }
 0x162   :  { %12 = sbr.rel (!%p10_p4) target bundleno = 1 (0x1), region = 62 }

// kernel: sparse_attn_autoencoder_forward.11
= control target key start
LH: loop header
LB: loop body
LE: loop exit
PB: predicated region body
PF: predicated region fallthrough
CT: control target
= control target key end

     0   :  { %s904_s12 = smov 0   ;;  %s966_s0 = inlined_call_operand.vmem [shape: bf16[4,32,512], index: 0, kind: input, shape index: {}]   ;;  %s967_s1 = inlined_call_operand.vmem [shape: bf16[4,512,128], index: 1, kind: input, shape index: {}]   ;;  %s968_s2 = inlined_call_operand.vmem [shape: f32[1,1,128], index: 2, kind: input, shape index: {}]   ;;  %s969_s3 = inlined_call_operand.vmem [shape: bf16[4,32,128], index: 3, kind: output, shape index: {}]  }
   0x1 LB: > { %s692_s13 = sadd.s32 4294967295, %s882_s12   ;;  %p696_p0 = scmp.ge.s32.totalorder %s882_s12, 1  ;;  %s882_s12 = sphi %s904_s12, %s13_s12  }
   0x2   : > { %p147_p1 = scmp.lt.s32.totalorder %s882_s12, 5 }
   0x4   : > { %p148_p2 = pnand %p696_p0, %p147_p1 }
   0x5   : > { %p176_p3 = scmp.lt.s32.totalorder (!%p148_p2), %s692_s13, 3 }
   0x6   : > { %151 = sbr.rel (%p148_p2) target bundleno = 266 (0x10a), region = 32 }
   0xb   : > { %s971_s13 = smov (!%p176_p3, %s692_s13), 3  ;;  %v703_v42 = vld [vmem:[%s968_s2] ss:$0 sm:$0xff] }
   0xc   : > { %s751_s14 = sshll.u32 %s971_s13, 8  ;;  %s750_s18 = sshll.u32 %s971_s13, 6 }
   0xd   : > { %s918_s17 = scalar_lea.vmem %s967_s1, %s751_s14  ;;  %s180_s21 = scalar_lea.vmem %s966_s0, %s750_s18 }
   0xe   : > { %v832_v0 = vld [vmem:[%s918_s17 + $0x78] sm:$0xff]   ;;  %v836_v4 = vld [vmem:[%s918_s17 + $0x70] sm:$0xff]   ;;  %v840_v8 = vld [vmem:[%s918_s17 + $0x68] sm:$0xff]   ;;  %s752_s24 = sshll.u32 %s971_s13, 4 }
   0xf   : > { %v833_v1 = vld [vmem:[%s918_s17 + $0xf8] sm:$0xff]   ;;  %768 = vmatprep.subr.bf16.mxu0 %v832_v0  ;;  %v837_v5 = vld [vmem:[%s918_s17 + $0xf0] sm:$0xff]   ;;  %v841_v9 = vld [vmem:[%s918_s17 + $0xe8] sm:$0xff]   ;;  %s190_s27 = scalar_lea.vmem %s969_s3, %s752_s24 }
  0x10   : > { %v834_v2 = vld [vmem:[%s918_s17 + $0x38] sm:$0xff]   ;;  %796 = vmatprep.subr.bf16.mxu1 %v833_v1  ;;  %v838_v6 = vld [vmem:[%s918_s17 + $0x30] sm:$0xff]   ;;  %v842_v10 = vld [vmem:[%s918_s17 + $0x28] sm:$0xff]  }
  0x11   : > { %v835_v3 = vld [vmem:[%s918_s17 + $0xb8] sm:$0xff]   ;;  %769 = vmatpush3.bf16.msra.mxu0 %v834_v2  ;;  %v839_v7 = vld [vmem:[%s918_s17 + $0xb0] sm:$0xff]   ;;  %v843_v11 = vld [vmem:[%s918_s17 + $0xa8] sm:$0xff]  }
  0x12   : > { %797 = vmatpush3.bf16.msra.mxu1 %v835_v3  ;;  %770 = vmatprep.subr.bf16.mxu0 %v836_v4  ;;  %v844_v12 = vld [vmem:[%s918_s17 + $0x60] sm:$0xff]   ;;  %v848_v16 = vld [vmem:[%s918_s17 + $0x58] sm:$0xff]   ;;  %v852_v20 = vld [vmem:[%s918_s17 + $0x50] sm:$0xff]  }
  0x13   : > { %798 = vmatprep.subr.bf16.mxu1 %v837_v5  ;;  %v845_v13 = vld [vmem:[%s918_s17 + $0xe0] sm:$0xff]   ;;  %v849_v17 = vld [vmem:[%s918_s17 + $0xd8] sm:$0xff]   ;;  %v853_v21 = vld [vmem:[%s918_s17 + $0xd0] sm:$0xff]  }
  0x14   : > { %v846_v14 = vld [vmem:[%s918_s17 + $0x20] sm:$0xff]   ;;  %v850_v18 = vld [vmem:[%s918_s17 + $0x18] sm:$0xff]   ;;  %v854_v22 = vld [vmem:[%s918_s17 + $0x10] sm:$0xff]  }
  0x15   : > { %771 = vmatpush3.bf16.msra.mxu0 %v838_v6  ;;  %v847_v15 = vld [vmem:[%s918_s17 + $0xa0] sm:$0xff]   ;;  %v851_v19 = vld [vmem:[%s918_s17 + $0x98] sm:$0xff]   ;;  %v855_v23 = vld [vmem:[%s918_s17 + $0x90] sm:$0xff]  }
  0x16   : > { %799 = vmatpush3.bf16.msra.mxu1 %v839_v7  ;;  %772 = vmatprep.subr.bf16.mxu0 %v840_v8  ;;  %v856_v24 = vld [vmem:[%s918_s17 + $0x48] sm:$0xff]   ;;  %v860_v28 = vld [vmem:[%s918_s17 + $0x40] sm:$0xff]  }
  0x17   : > { %800 = vmatprep.subr.bf16.mxu1 %v841_v9  ;;  %v857_v25 = vld [vmem:[%s918_s17 + $0xc8] sm:$0xff]   ;;  %v861_v29 = vld [vmem:[%s918_s17 + $0xc0] sm:$0xff]  }
  0x18   : > { %v858_v26 = vld [vmem:[%s918_s17 + $0x8] sm:$0xff]   ;;  %v862_v30 = vld [vmem:[%s918_s17] sm:$0xff]  }
  0x19   : > { %773 = vmatpush3.bf16.msra.mxu0 %v842_v10  ;;  %v859_v27 = vld [vmem:[%s918_s17 + $0x88] sm:$0xff]   ;;  %v863_v31 = vld [vmem:[%s918_s17 + $0x80] sm:$0xff]  }
  0x1a   : > { %801 = vmatpush3.bf16.msra.mxu1 %v843_v11  ;;  %774 = vmatprep.subr.bf16.mxu0 %v844_v12  ;;  %v864_v32 = vld [vmem:[%s180_s21] ss:$16 sps:$4 sm:$0xff]   ;;  %v866_v33 = vld [vmem:[%s180_s21 + $0x4] ss:$16 sps:$4 sm:$0xff]   ;;  %v867_v34 = vld [vmem:[%s180_s21 + $0x8] ss:$16 sps:$4 sm:$0xff]  }
  0x1b   : > { %802 = vmatprep.subr.bf16.mxu1 %v845_v13  ;;  %v869_v35 = vld [vmem:[%s180_s21 + $0xc] ss:$16 sps:$4 sm:$0xff]   ;;  %535 = vmatprep.mubr.bf16.mxu0 %v866_v33  ;;  %v870_v36 = vld [vmem:[%s180_s21 + $0x24] ss:$16 sps:$4 sm:$0xff]   ;;  %v874_v38 = vld [vmem:[%s180_s21 + $0x20] ss:$16 sps:$4 sm:$0xff]  }
  0x1c   : > { %584 = vmatprep.mubr.bf16.mxu1 %v869_v35  ;;  %v872_v37 = vld [vmem:[%s180_s21 + $0x2c] ss:$16 sps:$4 sm:$0xff]   ;;  %v875_v39 = vld [vmem:[%s180_s21 + $0x28] ss:$16 sps:$4 sm:$0xff]  }
  0x1d   : > { %775 = vmatpush3.bf16.msra.mxu0 %v846_v14 }
  0x1e   : > { %803 = vmatpush3.bf16.msra.mxu1 %v847_v15  ;;  %776 = vmatprep.subr.bf16.mxu0 %v848_v16 }
  0x1f   : > { %804 = vmatprep.subr.bf16.mxu1 %v849_v17 }
  0x21   : > { %777 = vmatpush3.bf16.msra.mxu0 %v850_v18 }
  0x22   : > { %805 = vmatpush3.bf16.msra.mxu1 %v851_v19  ;;  %778 = vmatprep.subr.bf16.mxu0 %v852_v20 }
  0x23   : > { %806 = vmatprep.subr.bf16.mxu1 %v853_v21 }
  0x25   : > { %779 = vmatpush3.bf16.msra.mxu0 %v854_v22 }
  0x26   : > { %807 = vmatpush3.bf16.msra.mxu1 %v855_v23  ;;  %780 = vmatprep.subr.bf16.mxu0 %v856_v24 }
  0x27   : > { %808 = vmatprep.subr.bf16.mxu1 %v857_v25 }
  0x29   : > { %781 = vmatpush3.bf16.msra.mxu0 %v858_v26 }
  0x2a   : > { %809 = vmatpush3.bf16.msra.mxu1 %v859_v27  ;;  %782 = vmatprep.subr.bf16.mxu0 %v860_v28 }
  0x2b   : > { %810 = vmatprep.subr.bf16.mxu1 %v861_v29 }
  0x2d   : > { %783 = vmatpush3.bf16.msra.mxu0 %v862_v30 }
  0x2e   : > { %811 = vmatpush3.bf16.msra.mxu1 %v863_v31 }
  0x30   : > { %536 = vmatmul.mubr.bf16.vlgmr.msra.gmra.mxu0 %v864_v32 }
  0x31   : > { %585 = vmatmul.mubr.bf16.vlgmr.msra.gmra.mxu1 %v867_v34  ;;  %543 = vmatprep.mubr.bf16.mxu0 %v870_v36 }
  0x32   : > { %592 = vmatprep.mubr.bf16.mxu1 %v872_v37 }
  0x38   : > { %544 = vmatmul.mubr.bf16.gmra.mxu0 %v874_v38 }
  0x39   : > { %593 = vmatmul.mubr.bf16.gmra.mxu1 %v875_v39 }
  0xf0   : > { %v784_v40 = vpop.f32.mrf.mxu0 }
  0xf1   : > { %v812_v41 = vpop.f32.mrf.mxu1 }
  0xf2   : > { %v785_v43 = vpop.f32.mrf.mxu0 }
  0xf3   : > { %v786_v44 = vadd.f32 %v785_v43, %v784_v40  ;;  %v813_v45 = vpop.f32.mrf.mxu1 }
  0xf4   : > { %v787_v46 = vpop.f32.mrf.mxu0  ;;  %v814_v50 = vadd.f32 %v813_v45, %v812_v41 }
  0xf5   : > { %v538_v47 = vadd.f32 %v786_v44, %v703_v42  ;;  %v815_v48 = vpop.f32.mrf.mxu1 }
  0xf6   : > { %v788_v49 = vpop.f32.mrf.mxu0 }
  0xf7   : > { %v789_v51 = vadd.f32 %v788_v49, %v787_v46  ;;  %v816_v52 = vpop.f32.mrf.mxu1  ;;  %v587_v54 = vadd.f32 %v814_v50, %v538_v47 }
  0xf8   : > { %v790_v53 = vpop.f32.mrf.mxu0  ;;  %v817_v56 = vadd.f32 %v816_v52, %v815_v48 }
  0xf9   : > { %v541_v55 = vadd.f32 %v789_v51, %v703_v42  ;;  %v818_v57 = vpop.f32.mrf.mxu1  ;;  %v601_v63 = vmax.f32 %v587_v54, 0.0 }
  0xfa   : > { %v791_v58 = vpop.f32.mrf.mxu0 }
  0xfb   : > { %v590_v59 = vadd.f32 %v817_v56, %v541_v55  ;;  %v792_v60 = vadd.f32 %v791_v58, %v790_v53  ;;  %v819_v61 = vpop.f32.mrf.mxu1 }
  0xfc   : > { %v793_v62 = vpop.f32.mrf.mxu0  ;;  %v820_v5 = vadd.f32 %v819_v61, %v818_v57 }
  0xfd   : > { %v602_v0 = vmax.f32 %v590_v59, 0.0  ;;  %v546_v1 = vadd.f32 %v792_v60, %v703_v42  ;;  %v821_v2 = vpop.f32.mrf.mxu1 }
  0xfe   : > { %v794_v3 = vpop.f32.mrf.mxu0 }
  0xff   : > { %v760_v4 = vpack.c.bf16 %v602_v0, %v601_v63  ;;  %v795_v6 = vadd.f32 %v794_v3, %v793_v62  ;;  %v822_v7 = vpop.f32.mrf.mxu1  ;;  %v595_v8 = vadd.f32 %v820_v5, %v546_v1 }
 0x100   : > { %v823_v10 = vadd.f32 %v822_v7, %v821_v2 }
 0x101   : > { %761 = vst [vmem:[%s190_s27] sm:$0xff] %v760_v4   ;;  %v549_v9 = vadd.f32 %v795_v6, %v703_v42  ;;  %v603_v12 = vmax.f32 %v595_v8, 0.0 }
 0x103   : > { %v598_v11 = vadd.f32 %v823_v10, %v549_v9 }
 0x105   : > { %v604_v13 = vmax.f32 %v598_v11, 0.0 }
 0x107   : > { %v765_v14 = vpack.c.bf16 %v604_v13, %v603_v12 }
 0x109   : > { %767 = vst [vmem:[%s190_s27 + $0x8] sm:$0xff] %v765_v14  }
 0x10a PF: > { %s13_s12 = sadd.s32 1, %s882_s12  }
 0x10b   : > { %p10_p4 = scmp.ge.s32.totalorder %s13_s12, 6  }
 0x10d   :  { %12 = sbr.rel (!%p10_p4) target bundleno = 1 (0x1), region = 65 }

// kernel: sparse_attn_autoencoder_forward.12
= control target key start
LH: loop header
LB: loop body
LE: loop exit
PB: predicated region body
PF: predicated region fallthrough
CT: control target
= control target key end

     0   :  { %s1408_s12 = smov 0   ;;  %s1535_s0 = inlined_call_operand.vmem [shape: bf16[4,128,512], index: 0, kind: input, shape index: {}]   ;;  %s1536_s1 = inlined_call_operand.vmem [shape: bf16[4,512,128], index: 1, kind: input, shape index: {}]   ;;  %s1537_s2 = inlined_call_operand.vmem [shape: f32[1,1,128], index: 2, kind: input, shape index: {}]   ;;  %s1538_s3 = inlined_call_operand.vmem [shape: bf16[4,128,128], index: 3, kind: output, shape index: {}]  }
   0x1 LB: > { %s1004_s13 = sadd.s32 4294967295, %s1386_s12   ;;  %p1008_p0 = scmp.ge.s32.totalorder %s1386_s12, 1  ;;  %s1386_s12 = sphi %s1408_s12, %s13_s12  }
   0x2   : > { %p147_p1 = scmp.lt.s32.totalorder %s1386_s12, 5 }
   0x4   : > { %p148_p2 = pnand %p1008_p0, %p147_p1 }
   0x5   : > { %p176_p3 = scmp.lt.s32.totalorder (!%p148_p2), %s1004_s13, 3 }
   0x6   : > { %151 = sbr.rel (%p148_p2) target bundleno = 314 (0x13a), region = 32 }
   0xb   : > { %s1540_s13 = smov (!%p176_p3, %s1004_s13), 3 }
   0xc   : > { %s1098_s14 = sshll.u32 %s1540_s13, 8  ;;  %s1100_s23 = sshll.u32 %s1540_s13, 6 }
   0xd   : > { %s1424_s17 = scalar_lea.vmem %s1536_s1, %s1098_s14  ;;  %s1461_s20 = scalar_lea.vmem %s1535_s0, %s1098_s14 }
   0xe   : > { %v1300_v0 = vld [vmem:[%s1424_s17 + $0x78] sm:$0xff]   ;;  %v1304_v4 = vld [vmem:[%s1424_s17 + $0x70] sm:$0xff]   ;;  %v1308_v8 = vld [vmem:[%s1424_s17 + $0x68] sm:$0xff]   ;;  %s1509_s26 = scalar_lea.vmem %s1538_s3, %s1100_s23 }
   0xf   : > { %v1301_v1 = vld [vmem:[%s1424_s17 + $0xf8] sm:$0xff]   ;;  %1164 = vmatprep.subr.bf16.mxu0 %v1300_v0  ;;  %v1305_v5 = vld [vmem:[%s1424_s17 + $0xf0] sm:$0xff]   ;;  %v1309_v9 = vld [vmem:[%s1424_s17 + $0xe8] sm:$0xff]  }
  0x10   : > { %v1302_v2 = vld [vmem:[%s1424_s17 + $0x38] sm:$0xff]   ;;  %1228 = vmatprep.subr.bf16.mxu1 %v1301_v1  ;;  %v1306_v6 = vld [vmem:[%s1424_s17 + $0x30] sm:$0xff]   ;;  %v1310_v10 = vld [vmem:[%s1424_s17 + $0x28] sm:$0xff]  }
  0x11   : > { %v1303_v3 = vld [vmem:[%s1424_s17 + $0xb8] sm:$0xff]   ;;  %1165 = vmatpush3.bf16.msra.mxu0 %v1302_v2  ;;  %v1307_v7 = vld [vmem:[%s1424_s17 + $0xb0] sm:$0xff]   ;;  %v1311_v11 = vld [vmem:[%s1424_s17 + $0xa8] sm:$0xff]  }
  0x12   : > { %1229 = vmatpush3.bf16.msra.mxu1 %v1303_v3  ;;  %1166 = vmatprep.subr.bf16.mxu0 %v1304_v4  ;;  %v1312_v12 = vld [vmem:[%s1424_s17 + $0x60] sm:$0xff]   ;;  %v1316_v16 = vld [vmem:[%s1424_s17 + $0x58] sm:$0xff]   ;;  %v1320_v20 = vld [vmem:[%s1424_s17 + $0x50] sm:$0xff]  }
  0x13   : > { %1230 = vmatprep.subr.bf16.mxu1 %v1305_v5  ;;  %v1313_v13 = vld [vmem:[%s1424_s17 + $0xe0] sm:$0xff]   ;;  %v1317_v17 = vld [vmem:[%s1424_s17 + $0xd8] sm:$0xff]   ;;  %v1321_v21 = vld [vmem:[%s1424_s17 + $0xd0] sm:$0xff]  }
  0x14   : > { %v1314_v14 = vld [vmem:[%s1424_s17 + $0x20] sm:$0xff]   ;;  %v1318_v18 = vld [vmem:[%s1424_s17 + $0x18] sm:$0xff]   ;;  %v1322_v22 = vld [vmem:[%s1424_s17 + $0x10] sm:$0xff]  }
  0x15   : > { %1167 = vmatpush3.bf16.msra.mxu0 %v1306_v6  ;;  %v1315_v15 = vld [vmem:[%s1424_s17 + $0xa0] sm:$0xff]   ;;  %v1319_v19 = vld [vmem:[%s1424_s17 + $0x98] sm:$0xff]   ;;  %v1323_v23 = vld [vmem:[%s1424_s17 + $0x90] sm:$0xff]  }
  0x16   : > { %1231 = vmatpush3.bf16.msra.mxu1 %v1307_v7  ;;  %1168 = vmatprep.subr.bf16.mxu0 %v1308_v8  ;;  %v1324_v24 = vld [vmem:[%s1424_s17 + $0x48] sm:$0xff]   ;;  %v1328_v28 = vld [vmem:[%s1424_s17 + $0x40] sm:$0xff]  }
  0x17   : > { %1232 = vmatprep.subr.bf16.mxu1 %v1309_v9  ;;  %v1325_v25 = vld [vmem:[%s1424_s17 + $0xc8] sm:$0xff]   ;;  %v1329_v29 = vld [vmem:[%s1424_s17 + $0xc0] sm:$0xff]  }
  0x18   : > { %v1326_v26 = vld [vmem:[%s1424_s17 + $0x8] sm:$0xff]   ;;  %v1330_v30 = vld [vmem:[%s1424_s17] sm:$0xff]  }
  0x19   : > { %1169 = vmatpush3.bf16.msra.mxu0 %v1310_v10  ;;  %v1327_v27 = vld [vmem:[%s1424_s17 + $0x88] sm:$0xff]   ;;  %v1331_v31 = vld [vmem:[%s1424_s17 + $0x80] sm:$0xff]  }
  0x1a   : > { %1233 = vmatpush3.bf16.msra.mxu1 %v1311_v11  ;;  %1170 = vmatprep.subr.bf16.mxu0 %v1312_v12  ;;  %v1332_v32 = vld [vmem:[%s1461_s20] ss:$16 sps:$4 sm:$0xff]   ;;  %v1334_v33 = vld [vmem:[%s1461_s20 + $0x4] ss:$16 sps:$4 sm:$0xff]   ;;  %v1335_v34 = vld [vmem:[%s1461_s20 + $0x8] ss:$16 sps:$4 sm:$0xff]  }
  0x1b   : > { %1234 = vmatprep.subr.bf16.mxu1 %v1313_v13  ;;  %v1337_v35 = vld [vmem:[%s1461_s20 + $0xc] ss:$16 sps:$4 sm:$0xff]   ;;  %679 = vmatprep.mubr.bf16.mxu0 %v1334_v33  ;;  %v1338_v36 = vld [vmem:[%s1461_s20 + $0x24] ss:$16 sps:$4 sm:$0xff]   ;;  %v1342_v38 = vld [vmem:[%s1461_s20 + $0x20] ss:$16 sps:$4 sm:$0xff]  }
  0x1c   : > { %776 = vmatprep.mubr.bf16.mxu1 %v1337_v35  ;;  %v1340_v37 = vld [vmem:[%s1461_s20 + $0x2c] ss:$16 sps:$4 sm:$0xff]   ;;  %v1343_v39 = vld [vmem:[%s1461_s20 + $0x28] ss:$16 sps:$4 sm:$0xff]   ;;  %v1344_v40 = vld [vmem:[%s1461_s20 + $0x44] ss:$16 sps:$4 sm:$0xff]  }
  0x1d   : > { %1171 = vmatpush3.bf16.msra.mxu0 %v1314_v14  ;;  %v1346_v41 = vld [vmem:[%s1461_s20 + $0x4c] ss:$16 sps:$4 sm:$0xff]   ;;  %v1348_v42 = vld [vmem:[%s1461_s20 + $0x40] ss:$16 sps:$4 sm:$0xff]   ;;  %v1349_v43 = vld [vmem:[%s1461_s20 + $0x48] ss:$16 sps:$4 sm:$0xff]  }
  0x1e   : > { %1235 = vmatpush3.bf16.msra.mxu1 %v1315_v15  ;;  %1172 = vmatprep.subr.bf16.mxu0 %v1316_v16  ;;  %v1350_v44 = vld [vmem:[%s1461_s20 + $0x64] ss:$16 sps:$4 sm:$0xff]   ;;  %v1352_v45 = vld [vmem:[%s1461_s20 + $0x6c] ss:$16 sps:$4 sm:$0xff]   ;;  %v1354_v46 = vld [vmem:[%s1461_s20 + $0x60] ss:$16 sps:$4 sm:$0xff]  }
  0x1f   : > { %1236 = vmatprep.subr.bf16.mxu1 %v1317_v17  ;;  %v1355_v47 = vld [vmem:[%s1461_s20 + $0x68] ss:$16 sps:$4 sm:$0xff]   ;;  %v1356_v48 = vld [vmem:[%s1461_s20 + $0x84] ss:$16 sps:$4 sm:$0xff]   ;;  %v1358_v49 = vld [vmem:[%s1461_s20 + $0x8c] ss:$16 sps:$4 sm:$0xff]  }
  0x20   : > { %v1360_v50 = vld [vmem:[%s1461_s20 + $0x80] ss:$16 sps:$4 sm:$0xff]   ;;  %v1361_v51 = vld [vmem:[%s1461_s20 + $0x88] ss:$16 sps:$4 sm:$0xff]   ;;  %v1362_v52 = vld [vmem:[%s1461_s20 + $0xa4] ss:$16 sps:$4 sm:$0xff]  }
  0x21   : > { %1173 = vmatpush3.bf16.msra.mxu0 %v1318_v18  ;;  %v1364_v53 = vld [vmem:[%s1461_s20 + $0xac] ss:$16 sps:$4 sm:$0xff]   ;;  %v1366_v54 = vld [vmem:[%s1461_s20 + $0xa0] ss:$16 sps:$4 sm:$0xff]   ;;  %v1367_v55 = vld [vmem:[%s1461_s20 + $0xa8] ss:$16 sps:$4 sm:$0xff]  }
  0x22   : > { %1237 = vmatpush3.bf16.msra.mxu1 %v1319_v19  ;;  %1174 = vmatprep.subr.bf16.mxu0 %v1320_v20  ;;  %v1368_v56 = vld [vmem:[%s1461_s20 + $0xc4] ss:$16 sps:$4 sm:$0xff]   ;;  %v1370_v57 = vld [vmem:[%s1461_s20 + $0xcc] ss:$16 sps:$4 sm:$0xff]   ;;  %v1372_v58 = vld [vmem:[%s1461_s20 + $0xc0] ss:$16 sps:$4 sm:$0xff]  }
  0x23   : > { %1238 = vmatprep.subr.bf16.mxu1 %v1321_v21  ;;  %v1373_v59 = vld [vmem:[%s1461_s20 + $0xc8] ss:$16 sps:$4 sm:$0xff]   ;;  %v1374_v60 = vld [vmem:[%s1461_s20 + $0xe4] ss:$16 sps:$4 sm:$0xff]   ;;  %v1376_v61 = vld [vmem:[%s1461_s20 + $0xec] ss:$16 sps:$4 sm:$0xff]  }
  0x24   : > { %v1378_v62 = vld [vmem:[%s1461_s20 + $0xe0] ss:$16 sps:$4 sm:$0xff]   ;;  %v1379_v63 = vld [vmem:[%s1461_s20 + $0xe8] ss:$16 sps:$4 sm:$0xff]  }
  0x25   : > { %1175 = vmatpush3.bf16.msra.mxu0 %v1322_v22  ;;  %v1500_v2 = vld [vmem:[%s1537_s2] ss:$0 sm:$0xff] }
  0x26   : > { %1239 = vmatpush3.bf16.msra.mxu1 %v1323_v23  ;;  %1176 = vmatprep.subr.bf16.mxu0 %v1324_v24 }
  0x27   : > { %1240 = vmatprep.subr.bf16.mxu1 %v1325_v25 }
  0x29   : > { %1177 = vmatpush3.bf16.msra.mxu0 %v1326_v26 }
  0x2a   : > { %1241 = vmatpush3.bf16.msra.mxu1 %v1327_v27  ;;  %1178 = vmatprep.subr.bf16.mxu0 %v1328_v28 }
  0x2b   : > { %1242 = vmatprep.subr.bf16.mxu1 %v1329_v29 }
  0x2d   : > { %1179 = vmatpush3.bf16.msra.mxu0 %v1330_v30 }
  0x2e   : > { %1243 = vmatpush3.bf16.msra.mxu1 %v1331_v31 }
  0x30   : > { %680 = vmatmul.mubr.bf16.vlgmr.msra.gmra.mxu0 %v1332_v32 }
  0x31   : > { %777 = vmatmul.mubr.bf16.vlgmr.msra.gmra.mxu1 %v1335_v34  ;;  %687 = vmatprep.mubr.bf16.mxu0 %v1338_v36 }
  0x32   : > { %784 = vmatprep.mubr.bf16.mxu1 %v1340_v37 }
  0x38   : > { %688 = vmatmul.mubr.bf16.gmra.mxu0 %v1342_v38 }
  0x39   : > { %785 = vmatmul.mubr.bf16.gmra.mxu1 %v1343_v39  ;;  %695 = vmatprep.mubr.bf16.mxu0 %v1344_v40 }
  0x3a   : > { %792 = vmatprep.mubr.bf16.mxu1 %v1346_v41 }
  0x40   : > { %696 = vmatmul.mubr.bf16.gmra.mxu0 %v1348_v42 }
  0x41   : > { %793 = vmatmul.mubr.bf16.gmra.mxu1 %v1349_v43  ;;  %703 = vmatprep.mubr.bf16.mxu0 %v1350_v44 }
  0x42   : > { %800 = vmatprep.mubr.bf16.mxu1 %v1352_v45 }
  0x48   : > { %704 = vmatmul.mubr.bf16.gmra.mxu0 %v1354_v46 }
  0x49   : > { %801 = vmatmul.mubr.bf16.gmra.mxu1 %v1355_v47  ;;  %711 = vmatprep.mubr.bf16.mxu0 %v1356_v48 }
  0x4a   : > { %808 = vmatprep.mubr.bf16.mxu1 %v1358_v49 }
  0x50   : > { %712 = vmatmul.mubr.bf16.gmra.mxu0 %v1360_v50 }
  0x51   : > { %809 = vmatmul.mubr.bf16.gmra.mxu1 %v1361_v51  ;;  %719 = vmatprep.mubr.bf16.mxu0 %v1362_v52 }
  0x52   : > { %816 = vmatprep.mubr.bf16.mxu1 %v1364_v53 }
  0x58   : > { %720 = vmatmul.mubr.bf16.gmra.mxu0 %v1366_v54 }
  0x59   : > { %817 = vmatmul.mubr.bf16.gmra.mxu1 %v1367_v55  ;;  %727 = vmatprep.mubr.bf16.mxu0 %v1368_v56 }
  0x5a   : > { %824 = vmatprep.mubr.bf16.mxu1 %v1370_v57 }
  0x60   : > { %728 = vmatmul.mubr.bf16.gmra.mxu0 %v1372_v58 }
  0x61   : > { %825 = vmatmul.mubr.bf16.gmra.mxu1 %v1373_v59  ;;  %735 = vmatprep.mubr.bf16.mxu0 %v1374_v60 }
  0x62   : > { %832 = vmatprep.mubr.bf16.mxu1 %v1376_v61 }
  0x68   : > { %736 = vmatmul.mubr.bf16.gmra.mxu0 %v1378_v62 }
  0x69   : > { %833 = vmatmul.mubr.bf16.gmra.mxu1 %v1379_v63 }
  0xf0   : > { %v1180_v0 = vpop.f32.mrf.mxu0 }
  0xf1   : > { %v1244_v1 = vpop.f32.mrf.mxu1 }
  0xf2   : > { %v1181_v3 = vpop.f32.mrf.mxu0 }
  0xf3   : > { %v1182_v4 = vadd.f32 %v1181_v3, %v1180_v0  ;;  %v1245_v5 = vpop.f32.mrf.mxu1 }
  0xf4   : > { %v1183_v6 = vpop.f32.mrf.mxu0  ;;  %v1246_v10 = vadd.f32 %v1245_v5, %v1244_v1 }
  0xf5   : > { %v682_v7 = vadd.f32 %v1182_v4, %v1500_v2  ;;  %v1247_v8 = vpop.f32.mrf.mxu1 }
  0xf6   : > { %v1184_v9 = vpop.f32.mrf.mxu0 }
  0xf7   : > { %v1185_v11 = vadd.f32 %v1184_v9, %v1183_v6  ;;  %v1248_v12 = vpop.f32.mrf.mxu1  ;;  %v779_v14 = vadd.f32 %v1246_v10, %v682_v7 }
  0xf8   : > { %v1186_v13 = vpop.f32.mrf.mxu0  ;;  %v1249_v16 = vadd.f32 %v1248_v12, %v1247_v8 }
  0xf9   : > { %v685_v15 = vadd.f32 %v1185_v11, %v1500_v2  ;;  %v1250_v17 = vpop.f32.mrf.mxu1  ;;  %v841_v23 = vmax.f32 %v779_v14, 0.0 }
  0xfa   : > { %v1187_v18 = vpop.f32.mrf.mxu0 }
  0xfb   : > { %v782_v19 = vadd.f32 %v1249_v16, %v685_v15  ;;  %v1188_v20 = vadd.f32 %v1187_v18, %v1186_v13  ;;  %v1251_v21 = vpop.f32.mrf.mxu1 }
  0xfc   : > { %v1189_v22 = vpop.f32.mrf.mxu0  ;;  %v1252_v29 = vadd.f32 %v1251_v21, %v1250_v17 }
  0xfd   : > { %v842_v24 = vmax.f32 %v782_v19, 0.0  ;;  %v690_v25 = vadd.f32 %v1188_v20, %v1500_v2  ;;  %v1253_v26 = vpop.f32.mrf.mxu1 }
  0xfe   : > { %v1190_v27 = vpop.f32.mrf.mxu0 }
  0xff   : > { %v1120_v28 = vpack.c.bf16 %v842_v24, %v841_v23  ;;  %v1191_v30 = vadd.f32 %v1190_v27, %v1189_v22  ;;  %v1254_v31 = vpop.f32.mrf.mxu1  ;;  %v787_v33 = vadd.f32 %v1252_v29, %v690_v25 }
 0x100   : > { %v1192_v32 = vpop.f32.mrf.mxu0  ;;  %v1255_v35 = vadd.f32 %v1254_v31, %v1253_v26 }
 0x101   : > { %1121 = vst [vmem:[%s1509_s26] sm:$0xff] %v1120_v28   ;;  %v693_v34 = vadd.f32 %v1191_v30, %v1500_v2  ;;  %v1256_v36 = vpop.f32.mrf.mxu1  ;;  %v843_v42 = vmax.f32 %v787_v33, 0.0 }
 0x102   : > { %v1193_v37 = vpop.f32.mrf.mxu0 }
 0x103   : > { %v790_v38 = vadd.f32 %v1255_v35, %v693_v34  ;;  %v1194_v39 = vadd.f32 %v1193_v37, %v1192_v32  ;;  %v1257_v40 = vpop.f32.mrf.mxu1 }
 0x104   : > { %v1195_v41 = vpop.f32.mrf.mxu0  ;;  %v1258_v48 = vadd.f32 %v1257_v40, %v1256_v36 }
 0x105   : > { %v844_v43 = vmax.f32 %v790_v38, 0.0  ;;  %v698_v44 = vadd.f32 %v1194_v39, %v1500_v2  ;;  %v1259_v45 = vpop.f32.mrf.mxu1 }
 0x106   : > { %v1196_v46 = vpop.f32.mrf.mxu0 }
 0x107   : > { %v1125_v47 = vpack.c.bf16 %v844_v43, %v843_v42  ;;  %v1197_v49 = vadd.f32 %v1196_v46, %v1195_v41  ;;  %v1260_v50 = vpop.f32.mrf.mxu1  ;;  %v795_v52 = vadd.f32 %v1258_v48, %v698_v44 }
 0x108   : > { %v1198_v51 = vpop.f32.mrf.mxu0  ;;  %v1261_v54 = vadd.f32 %v1260_v50, %v1259_v45 }
 0x109   : > { %1157 = vst [vmem:[%s1509_s26 + $0x8] sm:$0xff] %v1125_v47   ;;  %v701_v53 = vadd.f32 %v1197_v49, %v1500_v2  ;;  %v1262_v55 = vpop.f32.mrf.mxu1  ;;  %v845_v61 = vmax.f32 %v795_v52, 0.0 }
 0x10a   : > { %v1199_v56 = vpop.f32.mrf.mxu0 }
 0x10b   : > { %v798_v57 = vadd.f32 %v1261_v54, %v701_v53  ;;  %v1200_v58 = vadd.f32 %v1199_v56, %v1198_v51  ;;  %v1263_v59 = vpop.f32.mrf.mxu1 }
 0x10c   : > { %v1201_v60 = vpop.f32.mrf.mxu0  ;;  %v1264_v4 = vadd.f32 %v1263_v59, %v1262_v55 }
 0x10d   : > { %v846_v62 = vmax.f32 %v798_v57, 0.0  ;;  %v706_v63 = vadd.f32 %v1200_v58, %v1500_v2  ;;  %v1265_v0 = vpop.f32.mrf.mxu1 }
 0x10e   : > { %v1202_v1 = vpop.f32.mrf.mxu0 }
 0x10f   : > { %v1130_v3 = vpack.c.bf16 %v846_v62, %v845_v61  ;;  %v1203_v5 = vadd.f32 %v1202_v1, %v1201_v60  ;;  %v1266_v6 = vpop.f32.mrf.mxu1  ;;  %v803_v8 = vadd.f32 %v1264_v4, %v706_v63 }
 0x110   : > { %v1204_v7 = vpop.f32.mrf.mxu0  ;;  %v1267_v10 = vadd.f32 %v1266_v6, %v1265_v0 }
 0x111   : > { %1158 = vst [vmem:[%s1509_s26 + $0x10] sm:$0xff] %v1130_v3   ;;  %v709_v9 = vadd.f32 %v1203_v5, %v1500_v2  ;;  %v1268_v11 = vpop.f32.mrf.mxu1  ;;  %v847_v17 = vmax.f32 %v803_v8, 0.0 }
 0x112   : > { %v1205_v12 = vpop.f32.mrf.mxu0 }
 0x113   : > { %v806_v13 = vadd.f32 %v1267_v10, %v709_v9  ;;  %v1206_v14 = vadd.f32 %v1205_v12, %v1204_v7  ;;  %v1269_v15 = vpop.f32.mrf.mxu1 }
 0x114   : > { %v1207_v16 = vpop.f32.mrf.mxu0  ;;  %v1270_v23 = vadd.f32 %v1269_v15, %v1268_v11 }
 0x115   : > { %v848_v18 = vmax.f32 %v806_v13, 0.0  ;;  %v714_v19 = vadd.f32 %v1206_v14, %v1500_v2  ;;  %v1271_v20 = vpop.f32.mrf.mxu1 }
 0x116   : > { %v1208_v21 = vpop.f32.mrf.mxu0 }
 0x117   : > { %v1135_v22 = vpack.c.bf16 %v848_v18, %v847_v17  ;;  %v1209_v24 = vadd.f32 %v1208_v21, %v1207_v16  ;;  %v1272_v25 = vpop.f32.mrf.mxu1  ;;  %v811_v27 = vadd.f32 %v1270_v23, %v714_v19 }
 0x118   : > { %v1210_v26 = vpop.f32.mrf.mxu0  ;;  %v1273_v29 = vadd.f32 %v1272_v25, %v1271_v20 }
 0x119   : > { %1159 = vst [vmem:[%s1509_s26 + $0x18] sm:$0xff] %v1135_v22   ;;  %v717_v28 = vadd.f32 %v1209_v24, %v1500_v2  ;;  %v1274_v30 = vpop.f32.mrf.mxu1  ;;  %v849_v36 = vmax.f32 %v811_v27, 0.0 }
 0x11a   : > { %v1211_v31 = vpop.f32.mrf.mxu0 }
 0x11b   : > { %v814_v32 = vadd.f32 %v1273_v29, %v717_v28  ;;  %v1212_v33 = vadd.f32 %v1211_v31, %v1210_v26  ;;  %v1275_v34 = vpop.f32.mrf.mxu1 }
 0x11c   : > { %v1213_v35 = vpop.f32.mrf.mxu0  ;;  %v1276_v42 = vadd.f32 %v1275_v34, %v1274_v30 }
 0x11d   : > { %v850_v37 = vmax.f32 %v814_v32, 0.0  ;;  %v722_v38 = vadd.f32 %v1212_v33, %v1500_v2  ;;  %v1277_v39 = vpop.f32.mrf.mxu1 }
 0x11e   : > { %v1214_v40 = vpop.f32.mrf.mxu0 }
 0x11f   : > { %v1140_v41 = vpack.c.bf16 %v850_v37, %v849_v36  ;;  %v1215_v43 = vadd.f32 %v1214_v40, %v1213_v35  ;;  %v1278_v44 = vpop.f32.mrf.mxu1  ;;  %v819_v46 = vadd.f32 %v1276_v42, %v722_v38 }
 0x120   : > { %v1216_v45 = vpop.f32.mrf.mxu0  ;;  %v1279_v48 = vadd.f32 %v1278_v44, %v1277_v39 }
 0x121   : > { %1160 = vst [vmem:[%s1509_s26 + $0x20] sm:$0xff] %v1140_v41   ;;  %v725_v47 = vadd.f32 %v1215_v43, %v1500_v2  ;;  %v1280_v49 = vpop.f32.mrf.mxu1  ;;  %v851_v55 = vmax.f32 %v819_v46, 0.0 }
 0x122   : > { %v1217_v50 = vpop.f32.mrf.mxu0 }
 0x123   : > { %v822_v51 = vadd.f32 %v1279_v48, %v725_v47  ;;  %v1218_v52 = vadd.f32 %v1217_v50, %v1216_v45  ;;  %v1281_v53 = vpop.f32.mrf.mxu1 }
 0x124   : > { %v1219_v54 = vpop.f32.mrf.mxu0  ;;  %v1282_v61 = vadd.f32 %v1281_v53, %v1280_v49 }
 0x125   : > { %v852_v56 = vmax.f32 %v822_v51, 0.0  ;;  %v730_v57 = vadd.f32 %v1218_v52, %v1500_v2  ;;  %v1283_v58 = vpop.f32.mrf.mxu1 }
 0x126   : > { %v1220_v59 = vpop.f32.mrf.mxu0 }
 0x127   : > { %v1145_v60 = vpack.c.bf16 %v852_v56, %v851_v55  ;;  %v1221_v62 = vadd.f32 %v1220_v59, %v1219_v54  ;;  %v1284_v63 = vpop.f32.mrf.mxu1  ;;  %v827_v1 = vadd.f32 %v1282_v61, %v730_v57 }
 0x128   : > { %v1222_v0 = vpop.f32.mrf.mxu0  ;;  %v1285_v4 = vadd.f32 %v1284_v63, %v1283_v58 }
 0x129   : > { %1161 = vst [vmem:[%s1509_s26 + $0x28] sm:$0xff] %v1145_v60   ;;  %v733_v3 = vadd.f32 %v1221_v62, %v1500_v2  ;;  %v1286_v5 = vpop.f32.mrf.mxu1  ;;  %v853_v11 = vmax.f32 %v827_v1, 0.0 }
 0x12a   : > { %v1223_v6 = vpop.f32.mrf.mxu0 }
 0x12b   : > { %v830_v7 = vadd.f32 %v1285_v4, %v733_v3  ;;  %v1224_v8 = vadd.f32 %v1223_v6, %v1222_v0  ;;  %v1287_v9 = vpop.f32.mrf.mxu1 }
 0x12c   : > { %v1225_v10 = vpop.f32.mrf.mxu0  ;;  %v1288_v17 = vadd.f32 %v1287_v9, %v1286_v5 }
 0x12d   : > { %v854_v12 = vmax.f32 %v830_v7, 0.0  ;;  %v738_v13 = vadd.f32 %v1224_v8, %v1500_v2  ;;  %v1289_v14 = vpop.f32.mrf.mxu1 }
 0x12e   : > { %v1226_v15 = vpop.f32.mrf.mxu0 }
 0x12f   : > { %v1150_v16 = vpack.c.bf16 %v854_v12, %v853_v11  ;;  %v1227_v18 = vadd.f32 %v1226_v15, %v1225_v10  ;;  %v1290_v19 = vpop.f32.mrf.mxu1  ;;  %v835_v20 = vadd.f32 %v1288_v17, %v738_v13 }
 0x130   : > { %v1291_v22 = vadd.f32 %v1290_v19, %v1289_v14 }
 0x131   : > { %1162 = vst [vmem:[%s1509_s26 + $0x30] sm:$0xff] %v1150_v16   ;;  %v741_v21 = vadd.f32 %v1227_v18, %v1500_v2  ;;  %v855_v24 = vmax.f32 %v835_v20, 0.0 }
 0x133   : > { %v838_v23 = vadd.f32 %v1291_v22, %v741_v21 }
 0x135   : > { %v856_v25 = vmax.f32 %v838_v23, 0.0 }
 0x137   : > { %v1155_v26 = vpack.c.bf16 %v856_v25, %v855_v24 }
 0x139   : > { %1163 = vst [vmem:[%s1509_s26 + $0x38] sm:$0xff] %v1155_v26  }
 0x13a PF: > { %s13_s12 = sadd.s32 1, %s1386_s12  }
 0x13b   : > { %p10_p4 = scmp.ge.s32.totalorder %s13_s12, 6  }
 0x13d   :  { %12 = sbr.rel (!%p10_p4) target bundleno = 1 (0x1), region = 65 }

// kernel: sparse_attn_autoencoder_forward.10
= control target key start
LH: loop header
LB: loop body
LE: loop exit
PB: predicated region body
PF: predicated region fallthrough
CT: control target
= control target key end

     0   :  { %v335_v36 = vlaneseq  ;;  %v7367_v37 = vmov 1966171168   ;;  %vm7369_vm0 = vmmov 0   ;;  %vm2354_vm1 = vcmask 1041408   ;;  %s9711_s1 = inlined_call_operand.vmem [shape: bf16[2048,256], index: 1, kind: input, shape index: {}]   ;;  %s9712_s0 = inlined_call_operand.vmem [shape: bf16[2,2048], index: 0, kind: input, shape index: {}]   ;;  %s9713_s2 = inlined_call_operand.vmem [shape: f32[1,256], index: 2, kind: input, shape index: {}]   ;;  %s9714_s3 = inlined_call_operand.vmem [shape: bf16[256,128], index: 3, kind: input, shape index: {}]   ;;  %s9715_s5 = inlined_call_operand.vmem [shape: bf16[128,128], index: 5, kind: input, shape index: {}]   ;;  %s9716_s4 = inlined_call_operand.vmem [shape: f32[1,128], index: 4, kind: input, shape index: {}]   ;;  %s9717_s8 = inlined_call_operand.vmem [shape: bf16[128,128], index: 8, kind: input, shape index: {}]   ;;  %s9718_s6 = inlined_call_operand.vmem [shape: f32[1,128], index: 6, kind: input, shape index: {}]   ;;  %s9719_s7 = inlined_call_operand.vmem [shape: f32[1,128], index: 7, kind: input, shape index: {}]   ;;  %s9720_s10 = inlined_call_operand.vmem [shape: f32[1,128], index: 10, kind: input, shape index: {}]   ;;  %s9721_s9 = inlined_call_operand.vmem [shape: bf16[128,128], index: 9, kind: input, shape index: {}]   ;;  %s9722_s11 = inlined_call_operand.vmem [shape: bf16[128,512], index: 11, kind: input, shape index: {}]   ;;  %s9723_s15 = inlined_call_operand.vmem [shape: bf16[512,128], index: 15, kind: input, shape index: {}]   ;;  %s9724_s17 = inlined_call_operand.vmem [shape: bf16[128,256], index: 17, kind: input, shape index: {}]   ;;  %s9725_s12 = inlined_call_operand.vmem [shape: f32[1,512], index: 12, kind: input, shape index: {}]   ;;  %s9726_s13 = inlined_call_operand.vmem [shape: f32[1,512], index: 13, kind: input, shape index: {}]   ;;  %s9727_s14 = inlined_call_operand.vmem [shape: f32[1,512], index: 14, kind: input, shape index: {}]   ;;  %s9728_s19 = inlined_call_operand.vmem [shape: bf16[256,256], index: 19, kind: input, shape index: {}]   ;;  %s9729_s16 = inlined_call_operand.vmem [shape: f32[1,128], index: 16, kind: input, shape index: {}]   ;;  %s9730_s21 = inlined_call_operand.vmem [shape: bf16[256,2048], index: 21, kind: input, shape index: {}]   ;;  %s9731_s18 = inlined_call_operand.vmem [shape: f32[1,256], index: 18, kind: input, shape index: {}]   ;;  %s9732_s20 = inlined_call_operand.vmem [shape: f32[1,256], index: 20, kind: input, shape index: {}]   ;;  %s9733_s22 = inlined_call_operand.vmem [shape: f32[1,2048], index: 22, kind: input, shape index: {}]   ;;  %s9734_s23 = inlined_call_operand.vmem [shape: bf16[2,2048], index: 23, kind: output, shape index: {}]  }
   0x1   :  { %9740 = sst [smem:[#allocation2_spill]] %s9711_s1  ;;  %v349_v38 = vunpack.c.l.s4 %v7367_v37 }
   0x2   :  { %9741 = sst [smem:[#allocation3_spill]] %s9712_s0  ;;  %v7608_v42 = vshrl.u32 %v335_v36, 7 }
   0x3   :  { %9742 = sst [smem:[#allocation4_spill]] %s9713_s2  ;;  %v350_v43 = vunpack.c.0.s8 %v349_v38 }
   0x4   :  { %9743 = sst [smem:[#allocation5_spill]] %s9714_s3 }
   0x5   :  { %9744 = sst [smem:[#allocation6_spill]] %s9715_s5  ;;  %v7626_v49 = vsub.s32 %v350_v43, %v7608_v42 }
   0x6   :  { %9745 = sst [smem:[#allocation7_spill]] %s9716_s4 }
   0x7   :  { %9746 = sst [smem:[#allocation8_spill]] %s9717_s8 }
   0x8   :  { %9747 = sst [smem:[#allocation9_spill]] %s9718_s6 }
   0x9   :  { %s9748_s24 = sld [smem:[#allocation2_spill]] }
   0xa   :  { %s9749_s28 = sld [smem:[#allocation3_spill]] }
   0xb   :  { %s9750_s3 = sld [smem:[#allocation4_spill]] }
   0xc   :  { %s9751_s5 = sld [smem:[#allocation5_spill]] }
   0xd   :  { %s9752_s26 = sld [smem:[#allocation6_spill]] }
   0xe   :  { %s9754_s27 = sld [smem:[#allocation8_spill]] }
   0xf   :  { %v6775_v0 = vld [vmem:[%s9748_s24 + $0x74] ss:$8 sps:$4 sm:$0xff]   ;;  %v6779_v2 = vld [vmem:[%s9748_s24 + $0x70] ss:$8 sps:$4 sm:$0xff]   ;;  %v6781_v4 = vld [vmem:[%s9748_s24 + $0x64] ss:$8 sps:$4 sm:$0xff]  }
  0x10   :  { %v6777_v1 = vld [vmem:[%s9748_s24 + $0x174] ss:$8 sps:$4 sm:$0xff]   ;;  %1741 = vmatprep.subr.bf16.mxu0 %v6775_v0  ;;  %v6780_v3 = vld [vmem:[%s9748_s24 + $0x170] ss:$8 sps:$4 sm:$0xff]   ;;  %v6783_v5 = vld [vmem:[%s9748_s24 + $0x164] ss:$8 sps:$4 sm:$0xff]  }
  0x11   :  { %1782 = vmatprep.subr.bf16.mxu1 %v6777_v1  ;;  %1742 = vmatpush1.bf16.msra.mxu0 %v6779_v2  ;;  %v6785_v6 = vld [vmem:[%s9748_s24 + $0x60] ss:$8 sps:$4 sm:$0xff]   ;;  %v6787_v8 = vld [vmem:[%s9748_s24 + $0x54] ss:$8 sps:$4 sm:$0xff]   ;;  %v6791_v10 = vld [vmem:[%s9748_s24 + $0x50] ss:$8 sps:$4 sm:$0xff]  }
  0x12   :  { %1783 = vmatpush1.bf16.msra.mxu1 %v6780_v3  ;;  %1743 = vmatprep.subr.bf16.mxu0 %v6781_v4  ;;  %v6786_v7 = vld [vmem:[%s9748_s24 + $0x160] ss:$8 sps:$4 sm:$0xff]   ;;  %v6789_v9 = vld [vmem:[%s9748_s24 + $0x154] ss:$8 sps:$4 sm:$0xff]   ;;  %v6792_v11 = vld [vmem:[%s9748_s24 + $0x150] ss:$8 sps:$4 sm:$0xff]  }
  0x13   :  { %1784 = vmatprep.subr.bf16.mxu1 %v6783_v5  ;;  %v6793_v12 = vld [vmem:[%s9748_s24 + $0x44] ss:$8 sps:$4 sm:$0xff]   ;;  %v6797_v14 = vld [vmem:[%s9748_s24 + $0x40] ss:$8 sps:$4 sm:$0xff]   ;;  %v6799_v16 = vld [vmem:[%s9748_s24 + $0x34] ss:$8 sps:$4 sm:$0xff]  }
  0x14   :  { %v6795_v13 = vld [vmem:[%s9748_s24 + $0x144] ss:$8 sps:$4 sm:$0xff]   ;;  %v6798_v15 = vld [vmem:[%s9748_s24 + $0x140] ss:$8 sps:$4 sm:$0xff]   ;;  %v6801_v17 = vld [vmem:[%s9748_s24 + $0x134] ss:$8 sps:$4 sm:$0xff]  }
  0x15   :  { %1744 = vmatpush1.bf16.msra.mxu0 %v6785_v6  ;;  %v6803_v18 = vld [vmem:[%s9748_s24 + $0x30] ss:$8 sps:$4 sm:$0xff]   ;;  %v6805_v20 = vld [vmem:[%s9748_s24 + $0x24] ss:$8 sps:$4 sm:$0xff]   ;;  %v6809_v22 = vld [vmem:[%s9748_s24 + $0x20] ss:$8 sps:$4 sm:$0xff]  }
  0x16   :  { %1785 = vmatpush1.bf16.msra.mxu1 %v6786_v7  ;;  %1745 = vmatprep.subr.bf16.mxu0 %v6787_v8  ;;  %v6804_v19 = vld [vmem:[%s9748_s24 + $0x130] ss:$8 sps:$4 sm:$0xff]   ;;  %v6807_v21 = vld [vmem:[%s9748_s24 + $0x124] ss:$8 sps:$4 sm:$0xff]   ;;  %v6810_v23 = vld [vmem:[%s9748_s24 + $0x120] ss:$8 sps:$4 sm:$0xff]  }
  0x17   :  { %1786 = vmatprep.subr.bf16.mxu1 %v6789_v9  ;;  %v6811_v24 = vld [vmem:[%s9748_s24 + $0x14] ss:$8 sps:$4 sm:$0xff]   ;;  %v6815_v26 = vld [vmem:[%s9748_s24 + $0x10] ss:$8 sps:$4 sm:$0xff]   ;;  %v6817_v28 = vld [vmem:[%s9748_s24 + $0x4] ss:$8 sps:$4 sm:$0xff]  }
  0x18   :  { %v6813_v25 = vld [vmem:[%s9748_s24 + $0x114] ss:$8 sps:$4 sm:$0xff]   ;;  %v6816_v27 = vld [vmem:[%s9748_s24 + $0x110] ss:$8 sps:$4 sm:$0xff]   ;;  %v6819_v29 = vld [vmem:[%s9748_s24 + $0x104] ss:$8 sps:$4 sm:$0xff]  }
  0x19   :  { %1746 = vmatpush1.bf16.msra.mxu0 %v6791_v10  ;;  %v6821_v30 = vld [vmem:[%s9748_s24] ss:$8 sps:$4 sm:$0xff]   ;;  %v6823_v32 = vld [vmem:[%s9748_s24 + $0xf4] ss:$8 sps:$4 sm:$0xff]   ;;  %v6827_v34 = vld [vmem:[%s9748_s24 + $0xf0] ss:$8 sps:$4 sm:$0xff]  }
  0x1a   :  { %1787 = vmatpush1.bf16.msra.mxu1 %v6792_v11  ;;  %1747 = vmatprep.subr.bf16.mxu0 %v6793_v12  ;;  %v6822_v31 = vld [vmem:[%s9748_s24 + $0x100] ss:$8 sps:$4 sm:$0xff]   ;;  %v6825_v33 = vld [vmem:[%s9748_s24 + $0x1f4] ss:$8 sps:$4 sm:$0xff]   ;;  %v6828_v35 = vld [vmem:[%s9748_s24 + $0x1f0] ss:$8 sps:$4 sm:$0xff]  }
  0x1b   :  { %1788 = vmatprep.subr.bf16.mxu1 %v6795_v13  ;;  %v6829_v39 = vld [vmem:[%s9748_s24 + $0xe4] ss:$8 sps:$4 sm:$0xff]   ;;  %v6833_v41 = vld [vmem:[%s9748_s24 + $0xe0] ss:$8 sps:$4 sm:$0xff]   ;;  %v6835_v45 = vld [vmem:[%s9748_s24 + $0xd4] ss:$8 sps:$4 sm:$0xff]  }
  0x1c   :  { %v6831_v40 = vld [vmem:[%s9748_s24 + $0x1e4] ss:$8 sps:$4 sm:$0xff]   ;;  %v6834_v44 = vld [vmem:[%s9748_s24 + $0x1e0] ss:$8 sps:$4 sm:$0xff]   ;;  %v6837_v46 = vld [vmem:[%s9748_s24 + $0x1d4] ss:$8 sps:$4 sm:$0xff]  }
  0x1d   :  { %1748 = vmatpush1.bf16.msra.mxu0 %v6797_v14  ;;  %v6839_v47 = vld [vmem:[%s9748_s24 + $0xd0] ss:$8 sps:$4 sm:$0xff]   ;;  %v6841_v50 = vld [vmem:[%s9748_s24 + $0xc4] ss:$8 sps:$4 sm:$0xff]   ;;  %v6845_v54 = vld [vmem:[%s9748_s24 + $0xc0] ss:$8 sps:$4 sm:$0xff]  }
  0x1e   :  { %1789 = vmatpush1.bf16.msra.mxu1 %v6798_v15  ;;  %1749 = vmatprep.subr.bf16.mxu0 %v6799_v16  ;;  %v6840_v48 = vld [vmem:[%s9748_s24 + $0x1d0] ss:$8 sps:$4 sm:$0xff]   ;;  %v6843_v51 = vld [vmem:[%s9748_s24 + $0x1c4] ss:$8 sps:$4 sm:$0xff]   ;;  %v6846_v55 = vld [vmem:[%s9748_s24 + $0x1c0] ss:$8 sps:$4 sm:$0xff]  }
  0x1f   :  { %1790 = vmatprep.subr.bf16.mxu1 %v6801_v17  ;;  %v75_v52 = vld [vmem:[%s9749_s28] sm:$0xff]  ;;  %v6847_v56 = vld [vmem:[%s9748_s24 + $0xb4] ss:$8 sps:$4 sm:$0xff]   ;;  %v6851_v60 = vld [vmem:[%s9748_s24 + $0xb0] ss:$8 sps:$4 sm:$0xff]   ;;  %s9755_s29 = sld [smem:[#allocation9_spill]] }
  0x20   :  { %v354_v53 = vrot.slane %v75_v52, %v7626_v49  ;;  %v6849_v57 = vld [vmem:[%s9748_s24 + $0x1b4] ss:$8 sps:$4 sm:$0xff]   ;;  %v6852_v61 = vld [vmem:[%s9748_s24 + $0x1b0] ss:$8 sps:$4 sm:$0xff]   ;;  %v6853_v62 = vld [vmem:[%s9748_s24 + $0xa4] ss:$8 sps:$4 sm:$0xff]   ;;  %v347_v1 = vcombine.high %v75_v52, %v75_v52 }
  0x21   :  { %1750 = vmatpush1.bf16.msra.mxu0 %v6803_v18  ;;  %v6855_v63 = vld [vmem:[%s9748_s24 + $0x1a4] ss:$8 sps:$4 sm:$0xff]   ;;  %v6857_v2 = vld [vmem:[%s9748_s24 + $0xa0] ss:$8 sps:$4 sm:$0xff]   ;;  %v6859_v4 = vld [vmem:[%s9748_s24 + $0x94] ss:$8 sps:$4 sm:$0xff]  }
  0x22   :  { %1791 = vmatpush1.bf16.msra.mxu1 %v6804_v19  ;;  %1751 = vmatprep.subr.bf16.mxu0 %v6805_v20  ;;  %v362_v58 = vcombine.high %v354_v53, %v354_v53  ;;  %v6858_v3 = vld [vmem:[%s9748_s24 + $0x1a0] ss:$8 sps:$4 sm:$0xff]   ;;  %v6861_v5 = vld [vmem:[%s9748_s24 + $0x194] ss:$8 sps:$4 sm:$0xff]   ;;  %v7676_v6 = vrot.slane %v347_v1, %v7626_v49  ;;  %v6863_v7 = vld [vmem:[%s9748_s24 + $0x90] ss:$8 sps:$4 sm:$0xff]   ;;  %v370_v12 = vrot.slane %v354_v53, %v7626_v49 }
  0x23   :  { %1792 = vmatprep.subr.bf16.mxu1 %v6807_v21  ;;  %v6864_v8 = vld [vmem:[%s9748_s24 + $0x190] ss:$8 sps:$4 sm:$0xff]   ;;  %v6865_v9 = vld [vmem:[%s9748_s24 + $0x84] ss:$8 sps:$4 sm:$0xff]   ;;  %v6869_v13 = vld [vmem:[%s9748_s24 + $0x80] ss:$8 sps:$4 sm:$0xff]  }
  0x24   :  { %v384_v59 = vrot.slane %v362_v58, %v7626_v49  ;;  %v6867_v10 = vld [vmem:[%s9748_s24 + $0x184] ss:$8 sps:$4 sm:$0xff]   ;;  %v363_v11 = vcombine.high %v7676_v6, %v7676_v6  ;;  %v6870_v14 = vld [vmem:[%s9748_s24 + $0x180] ss:$8 sps:$4 sm:$0xff]   ;;  %v6875_v15 = vld [vmem:[%s9748_s24 + $0x274] ss:$8 sps:$4 sm:$0xff]   ;;  %v392_v18 = vcombine.high %v370_v12, %v370_v12 }
  0x25   :  { %1752 = vmatpush1.bf16.msra.mxu0 %v6809_v22  ;;  %v6878_v16 = vld [vmem:[%s9748_s24 + $0x374] ss:$8 sps:$4 sm:$0xff]   ;;  %v6873_v19 = vld [vmem:[%s9748_s24 + $0x270] ss:$8 sps:$4 sm:$0xff]   ;;  %v6881_v21 = vld [vmem:[%s9748_s24 + $0x264] ss:$8 sps:$4 sm:$0xff]  }
  0x26   :  { %1793 = vmatpush1.bf16.msra.mxu1 %v6810_v23  ;;  %1753 = vmatprep.subr.bf16.mxu0 %v6811_v24  ;;  %v394_v0 = vcombine.high %v384_v59, %v384_v59  ;;  %v391_v17 = vrot.slane %v363_v11, %v7626_v49  ;;  %v6876_v20 = vld [vmem:[%s9748_s24 + $0x370] ss:$8 sps:$4 sm:$0xff]   ;;  %v6884_v22 = vld [vmem:[%s9748_s24 + $0x364] ss:$8 sps:$4 sm:$0xff]   ;;  %v6879_v24 = vld [vmem:[%s9748_s24 + $0x260] ss:$8 sps:$4 sm:$0xff]  }
  0x27   :  { %1794 = vmatprep.subr.bf16.mxu1 %v6813_v25  ;;  %1773 = vmatprep.mubr.bf16.mxu0 %v384_v59  ;;  %v6882_v25 = vld [vmem:[%s9748_s24 + $0x360] ss:$8 sps:$4 sm:$0xff]   ;;  %v6897_v36 = vld [vmem:[%s9748_s24 + $0x230] ss:$8 sps:$4 sm:$0xff]   ;;  %v6905_v38 = vld [vmem:[%s9748_s24 + $0x224] ss:$8 sps:$4 sm:$0xff]  }
  0x28   :  { %1814 = vmatprep.mubr.bf16.mxu1 %v394_v0  ;;  %v395_v23 = vcombine.high %v391_v17, %v391_v17  ;;  %v6900_v37 = vld [vmem:[%s9748_s24 + $0x330] ss:$8 sps:$4 sm:$0xff]   ;;  %v6911_v43 = vld [vmem:[%s9748_s24 + $0x214] ss:$8 sps:$4 sm:$0xff]   ;;  %v6927_v58 = vld [vmem:[%s9748_s24 + $0x2e0] ss:$8 sps:$4 sm:$0xff]  }
  0x29   :  { %1754 = vmatpush1.bf16.msra.mxu0 %v6815_v26  ;;  %v6887_v26 = vld [vmem:[%s9748_s24 + $0x254] ss:$8 sps:$4 sm:$0xff]   ;;  %v6930_v59 = vld [vmem:[%s9748_s24 + $0x3e0] ss:$8 sps:$4 sm:$0xff]   ;;  %v6941_v0 = vld [vmem:[%s9748_s24 + $0x2c4] ss:$8 sps:$4 sm:$0xff]  }
  0x2a   :  { %1795 = vmatpush1.bf16.msra.mxu1 %v6816_v27  ;;  %1755 = vmatprep.subr.bf16.mxu0 %v6817_v28  ;;  %v6890_v27 = vld [vmem:[%s9748_s24 + $0x354] ss:$8 sps:$4 sm:$0xff]   ;;  %v6885_v28 = vld [vmem:[%s9748_s24 + $0x250] ss:$8 sps:$4 sm:$0xff]   ;;  %v6944_v1 = vld [vmem:[%s9748_s24 + $0x3c4] ss:$8 sps:$4 sm:$0xff]  }
  0x2b   :  { %1796 = vmatprep.subr.bf16.mxu1 %v6819_v29  ;;  %v6888_v29 = vld [vmem:[%s9748_s24 + $0x350] ss:$8 sps:$4 sm:$0xff]   ;;  %v6923_v52 = vld [vmem:[%s9748_s24 + $0x2f4] ss:$8 sps:$4 sm:$0xff]   ;;  %v7865_v11 = vld [vmem:[%s9749_s28 + $0x8] sm:$0xff]  ;;  %s9753_s28 = sld [smem:[#allocation7_spill]] }
  0x2c   :  { %v6926_v53 = vld [vmem:[%s9748_s24 + $0x3f4] ss:$8 sps:$4 sm:$0xff]  }
  0x2d   :  { %1756 = vmatpush1.bf16.msra.mxu0 %v6821_v30  ;;  %v6893_v30 = vld [vmem:[%s9748_s24 + $0x244] ss:$8 sps:$4 sm:$0xff]  }
  0x2e   :  { %1797 = vmatpush1.bf16.msra.mxu1 %v6822_v31  ;;  %1757 = vmatprep.subr.bf16.mxu0 %v6823_v32  ;;  %v6896_v31 = vld [vmem:[%s9748_s24 + $0x344] ss:$8 sps:$4 sm:$0xff]   ;;  %v6891_v32 = vld [vmem:[%s9748_s24 + $0x240] ss:$8 sps:$4 sm:$0xff]  }
  0x2f   :  { %1798 = vmatprep.subr.bf16.mxu1 %v6825_v33  ;;  %v6894_v33 = vld [vmem:[%s9748_s24 + $0x340] ss:$8 sps:$4 sm:$0xff]  }
  0x31   :  { %1758 = vmatpush2.bf16.msra.mxu0 %v6827_v34  ;;  %v6899_v34 = vld [vmem:[%s9748_s24 + $0x234] ss:$8 sps:$4 sm:$0xff]  }
  0x32   :  { %1799 = vmatpush2.bf16.msra.mxu1 %v6828_v35  ;;  %1759 = vmatprep.subr.bf16.mxu0 %v6829_v39  ;;  %v6902_v35 = vld [vmem:[%s9748_s24 + $0x334] ss:$8 sps:$4 sm:$0xff]   ;;  %v6908_v39 = vld [vmem:[%s9748_s24 + $0x324] ss:$8 sps:$4 sm:$0xff]  }
  0x33   :  { %1800 = vmatprep.subr.bf16.mxu1 %v6831_v40  ;;  %v6903_v40 = vld [vmem:[%s9748_s24 + $0x220] ss:$8 sps:$4 sm:$0xff]  }
  0x35   :  { %1760 = vmatpush2.bf16.msra.mxu0 %v6833_v41  ;;  %v6906_v41 = vld [vmem:[%s9748_s24 + $0x320] ss:$8 sps:$4 sm:$0xff]  }
  0x36   :  { %1801 = vmatpush2.bf16.msra.mxu1 %v6834_v44  ;;  %1761 = vmatprep.subr.bf16.mxu0 %v6835_v45  ;;  %v6914_v44 = vld [vmem:[%s9748_s24 + $0x314] ss:$8 sps:$4 sm:$0xff]   ;;  %v6909_v45 = vld [vmem:[%s9748_s24 + $0x210] ss:$8 sps:$4 sm:$0xff]  }
  0x37   :  { %1802 = vmatprep.subr.bf16.mxu1 %v6837_v46  ;;  %v6912_v46 = vld [vmem:[%s9748_s24 + $0x310] ss:$8 sps:$4 sm:$0xff]  }
  0x39   :  { %1762 = vmatpush2.bf16.msra.mxu0 %v6839_v47  ;;  %v6917_v47 = vld [vmem:[%s9748_s24 + $0x204] ss:$8 sps:$4 sm:$0xff]  }
  0x3a   :  { %1803 = vmatpush2.bf16.msra.mxu1 %v6840_v48  ;;  %1763 = vmatprep.subr.bf16.mxu0 %v6841_v50  ;;  %v6920_v48 = vld [vmem:[%s9748_s24 + $0x304] ss:$8 sps:$4 sm:$0xff]   ;;  %v6915_v50 = vld [vmem:[%s9748_s24 + $0x200] ss:$8 sps:$4 sm:$0xff]  }
  0x3b   :  { %1804 = vmatprep.subr.bf16.mxu1 %v6843_v51  ;;  %v6918_v51 = vld [vmem:[%s9748_s24 + $0x300] ss:$8 sps:$4 sm:$0xff]  }
  0x3d   :  { %1764 = vmatpush2.bf16.msra.mxu0 %v6845_v54  ;;  %v6921_v54 = vld [vmem:[%s9748_s24 + $0x2f0] ss:$8 sps:$4 sm:$0xff]  }
  0x3e   :  { %1805 = vmatpush2.bf16.msra.mxu1 %v6846_v55  ;;  %1765 = vmatprep.subr.bf16.mxu0 %v6847_v56  ;;  %v6924_v55 = vld [vmem:[%s9748_s24 + $0x3f0] ss:$8 sps:$4 sm:$0xff]   ;;  %v6929_v56 = vld [vmem:[%s9748_s24 + $0x2e4] ss:$8 sps:$4 sm:$0xff]  }
  0x3f   :  { %1806 = vmatprep.subr.bf16.mxu1 %v6849_v57  ;;  %v6932_v57 = vld [vmem:[%s9748_s24 + $0x3e4] ss:$8 sps:$4 sm:$0xff]  }
  0x41   :  { %1766 = vmatpush2.bf16.msra.mxu0 %v6851_v60  ;;  %v6935_v60 = vld [vmem:[%s9748_s24 + $0x2d4] ss:$8 sps:$4 sm:$0xff]  }
  0x42   :  { %1807 = vmatpush2.bf16.msra.mxu1 %v6852_v61  ;;  %1767 = vmatprep.subr.bf16.mxu0 %v6853_v62  ;;  %v6938_v61 = vld [vmem:[%s9748_s24 + $0x3d4] ss:$8 sps:$4 sm:$0xff]   ;;  %v6933_v62 = vld [vmem:[%s9748_s24 + $0x2d0] ss:$8 sps:$4 sm:$0xff]  }
  0x43   :  { %1808 = vmatprep.subr.bf16.mxu1 %v6855_v63  ;;  %v6936_v63 = vld [vmem:[%s9748_s24 + $0x3d0] ss:$8 sps:$4 sm:$0xff]  }
  0x45   :  { %1768 = vmatpush2.bf16.msra.mxu0 %v6857_v2  ;;  %v6939_v2 = vld [vmem:[%s9748_s24 + $0x2c0] ss:$8 sps:$4 sm:$0xff]  }
  0x46   :  { %1809 = vmatpush2.bf16.msra.mxu1 %v6858_v3  ;;  %1769 = vmatprep.subr.bf16.mxu0 %v6859_v4  ;;  %v6942_v3 = vld [vmem:[%s9748_s24 + $0x3c0] ss:$8 sps:$4 sm:$0xff]   ;;  %v6947_v4 = vld [vmem:[%s9748_s24 + $0x2b4] ss:$8 sps:$4 sm:$0xff]  }
  0x47   :  { %1810 = vmatprep.subr.bf16.mxu1 %v6861_v5  ;;  %v6950_v5 = vld [vmem:[%s9748_s24 + $0x3b4] ss:$8 sps:$4 sm:$0xff]  }
  0x49   :  { %1770 = vmatpush2.bf16.msra.mxu0 %v6863_v7  ;;  %v6945_v7 = vld [vmem:[%s9748_s24 + $0x2b0] ss:$8 sps:$4 sm:$0xff]  }
  0x4a   :  { %1811 = vmatpush2.bf16.msra.mxu1 %v6864_v8  ;;  %1771 = vmatprep.subr.bf16.mxu0 %v6865_v9  ;;  %v6948_v8 = vld [vmem:[%s9748_s24 + $0x3b0] ss:$8 sps:$4 sm:$0xff]   ;;  %v6953_v9 = vld [vmem:[%s9748_s24 + $0x2a4] ss:$8 sps:$4 sm:$0xff]  }
  0x4b   :  { %1812 = vmatprep.subr.bf16.mxu1 %v6867_v10  ;;  %v6956_v10 = vld [vmem:[%s9748_s24 + $0x3a4] ss:$8 sps:$4 sm:$0xff]  }
  0x4d   :  { %1772 = vmatpush2.bf16.msra.mxu0 %v6869_v13  ;;  %v6954_v13 = vld [vmem:[%s9748_s24 + $0x3a0] ss:$8 sps:$4 sm:$0xff]  }
  0x4e   :  { %1813 = vmatpush2.bf16.msra.mxu1 %v6870_v14  ;;  %1823 = vmatprep.subr.bf16.mxu0 %v6875_v15  ;;  %v6959_v14 = vld [vmem:[%s9748_s24 + $0x294] ss:$8 sps:$4 sm:$0xff]  }
  0x4f   :  { %1864 = vmatprep.subr.bf16.mxu1 %v6878_v16  ;;  %v6962_v15 = vld [vmem:[%s9748_s24 + $0x394] ss:$8 sps:$4 sm:$0xff]   ;;  %v7881_v16 = vrot.slane %v7865_v11, %v7626_v49 }
  0x50   :  { %1774 = vmatmul.mubr.bf16.vlgmr.msra.gmra.mxu0 %v370_v12  ;;  %v6951_v12 = vld [vmem:[%s9748_s24 + $0x2a0] ss:$8 sps:$4 sm:$0xff]  }
  0x51   :  { %1815 = vmatmul.mubr.bf16.vlgmr.msra.gmra.mxu1 %v392_v18  ;;  %1824 = vmatpush1.bf16.msra.mxu0 %v6873_v19  ;;  %v6960_v18 = vld [vmem:[%s9748_s24 + $0x390] ss:$8 sps:$4 sm:$0xff]   ;;  %v6965_v19 = vld [vmem:[%s9748_s24 + $0x284] ss:$8 sps:$4 sm:$0xff]  }
  0x52   :  { %1865 = vmatpush1.bf16.msra.mxu1 %v6876_v20  ;;  %1825 = vmatprep.subr.bf16.mxu0 %v6881_v21  ;;  %v6968_v20 = vld [vmem:[%s9748_s24 + $0x384] ss:$8 sps:$4 sm:$0xff]   ;;  %v411_v21 = vcombine.high %v7881_v16, %v7881_v16 }
  0x53   :  { %1866 = vmatprep.subr.bf16.mxu1 %v6884_v22  ;;  %1855 = vmatprep.mubr.bf16.mxu0 %v391_v17  ;;  %v6957_v17 = vld [vmem:[%s9748_s24 + $0x290] ss:$8 sps:$4 sm:$0xff]   ;;  %v377_v22 = vrot.slane %v7676_v6, %v7626_v49  ;;  %v6974_v6 = vld [vmem:[%s9748_s24 + $0x574] ss:$8 sps:$4 sm:$0xff]  }
  0x54   :  { %1896 = vmatprep.mubr.bf16.mxu1 %v395_v23  ;;  %v6963_v23 = vld [vmem:[%s9748_s24 + $0x280] ss:$8 sps:$4 sm:$0xff]  }
  0x55   :  { %1826 = vmatpush1.bf16.msra.mxu0 %v6879_v24  ;;  %v6966_v24 = vld [vmem:[%s9748_s24 + $0x380] ss:$8 sps:$4 sm:$0xff]  }
  0x56   :  { %1867 = vmatpush1.bf16.msra.mxu1 %v6882_v25  ;;  %1827 = vmatprep.subr.bf16.mxu0 %v6887_v26  ;;  %v6971_v25 = vld [vmem:[%s9748_s24 + $0x474] ss:$8 sps:$4 sm:$0xff]   ;;  %v433_v26 = vrot.slane %v411_v21, %v7626_v49  ;;  %v7052_v21 = vld [vmem:[%s9748_s24 + $0x5a4] ss:$8 sps:$4 sm:$0xff]  }
  0x57   :  { %1868 = vmatprep.subr.bf16.mxu1 %v6890_v27  ;;  %v393_v27 = vcombine.high %v377_v22, %v377_v22 }
  0x59   :  { %1828 = vmatpush1.bf16.msra.mxu0 %v6885_v28  ;;  %v6969_v28 = vld [vmem:[%s9748_s24 + $0x470] ss:$8 sps:$4 sm:$0xff]  }
  0x5a   :  { %1869 = vmatpush1.bf16.msra.mxu1 %v6888_v29  ;;  %1829 = vmatprep.subr.bf16.mxu0 %v6893_v30  ;;  %v6972_v29 = vld [vmem:[%s9748_s24 + $0x570] ss:$8 sps:$4 sm:$0xff]   ;;  %v6977_v30 = vld [vmem:[%s9748_s24 + $0x464] ss:$8 sps:$4 sm:$0xff]  }
  0x5b   :  { %1870 = vmatprep.subr.bf16.mxu1 %v6896_v31  ;;  %v6980_v31 = vld [vmem:[%s9748_s24 + $0x564] ss:$8 sps:$4 sm:$0xff]  }
  0x5d   :  { %1830 = vmatpush1.bf16.msra.mxu0 %v6891_v32  ;;  %v443_v32 = vcombine.high %v433_v26, %v433_v26 }
  0x5e   :  { %1871 = vmatpush1.bf16.msra.mxu1 %v6894_v33  ;;  %1831 = vmatprep.subr.bf16.mxu0 %v6899_v34  ;;  %v6975_v33 = vld [vmem:[%s9748_s24 + $0x460] ss:$8 sps:$4 sm:$0xff]  }
  0x5f   :  { %1872 = vmatprep.subr.bf16.mxu1 %v6902_v35  ;;  %v6978_v34 = vld [vmem:[%s9748_s24 + $0x560] ss:$8 sps:$4 sm:$0xff]   ;;  %v6983_v35 = vld [vmem:[%s9748_s24 + $0x454] ss:$8 sps:$4 sm:$0xff]  }
  0x61   :  { %1832 = vmatpush1.bf16.msra.mxu0 %v6897_v36  ;;  %v6986_v36 = vld [vmem:[%s9748_s24 + $0x554] ss:$8 sps:$4 sm:$0xff]  }
  0x62   :  { %1873 = vmatpush1.bf16.msra.mxu1 %v6900_v37  ;;  %1833 = vmatprep.subr.bf16.mxu0 %v6905_v38  ;;  %v6981_v37 = vld [vmem:[%s9748_s24 + $0x450] ss:$8 sps:$4 sm:$0xff]  }
  0x63   :  { %1874 = vmatprep.subr.bf16.mxu1 %v6908_v39  ;;  %v6984_v38 = vld [vmem:[%s9748_s24 + $0x550] ss:$8 sps:$4 sm:$0xff]   ;;  %v6989_v39 = vld [vmem:[%s9748_s24 + $0x444] ss:$8 sps:$4 sm:$0xff]  }
  0x65   :  { %1834 = vmatpush1.bf16.msra.mxu0 %v6903_v40  ;;  %v6992_v40 = vld [vmem:[%s9748_s24 + $0x544] ss:$8 sps:$4 sm:$0xff]  }
  0x66   :  { %1875 = vmatpush1.bf16.msra.mxu1 %v6906_v41  ;;  %1835 = vmatprep.subr.bf16.mxu0 %v6911_v43  ;;  %v6987_v41 = vld [vmem:[%s9748_s24 + $0x440] ss:$8 sps:$4 sm:$0xff]  }
  0x67   :  { %1876 = vmatprep.subr.bf16.mxu1 %v6914_v44  ;;  %v6990_v43 = vld [vmem:[%s9748_s24 + $0x540] ss:$8 sps:$4 sm:$0xff]   ;;  %v6995_v44 = vld [vmem:[%s9748_s24 + $0x434] ss:$8 sps:$4 sm:$0xff]  }
  0x69   :  { %1836 = vmatpush1.bf16.msra.mxu0 %v6909_v45  ;;  %v6998_v45 = vld [vmem:[%s9748_s24 + $0x534] ss:$8 sps:$4 sm:$0xff]  }
  0x6a   :  { %1877 = vmatpush1.bf16.msra.mxu1 %v6912_v46  ;;  %1837 = vmatprep.subr.bf16.mxu0 %v6917_v47  ;;  %v6993_v46 = vld [vmem:[%s9748_s24 + $0x430] ss:$8 sps:$4 sm:$0xff]  }
  0x6b   :  { %1878 = vmatprep.subr.bf16.mxu1 %v6920_v48  ;;  %v6996_v47 = vld [vmem:[%s9748_s24 + $0x530] ss:$8 sps:$4 sm:$0xff]   ;;  %v7001_v48 = vld [vmem:[%s9748_s24 + $0x424] ss:$8 sps:$4 sm:$0xff]  }
  0x6d   :  { %1838 = vmatpush1.bf16.msra.mxu0 %v6915_v50  ;;  %v7004_v50 = vld [vmem:[%s9748_s24 + $0x524] ss:$8 sps:$4 sm:$0xff]  }
  0x6e   :  { %1879 = vmatpush1.bf16.msra.mxu1 %v6918_v51  ;;  %1839 = vmatprep.subr.bf16.mxu0 %v6923_v52  ;;  %v6999_v51 = vld [vmem:[%s9748_s24 + $0x420] ss:$8 sps:$4 sm:$0xff]  }
  0x6f   :  { %1880 = vmatprep.subr.bf16.mxu1 %v6926_v53  ;;  %v7002_v52 = vld [vmem:[%s9748_s24 + $0x520] ss:$8 sps:$4 sm:$0xff]   ;;  %v7007_v53 = vld [vmem:[%s9748_s24 + $0x414] ss:$8 sps:$4 sm:$0xff]  }
  0x71   :  { %1840 = vmatpush2.bf16.msra.mxu0 %v6921_v54  ;;  %v7010_v54 = vld [vmem:[%s9748_s24 + $0x514] ss:$8 sps:$4 sm:$0xff]  }
  0x72   :  { %1881 = vmatpush2.bf16.msra.mxu1 %v6924_v55  ;;  %1841 = vmatprep.subr.bf16.mxu0 %v6929_v56  ;;  %v7005_v55 = vld [vmem:[%s9748_s24 + $0x410] ss:$8 sps:$4 sm:$0xff]  }
  0x73   :  { %1882 = vmatprep.subr.bf16.mxu1 %v6932_v57  ;;  %v7008_v56 = vld [vmem:[%s9748_s24 + $0x510] ss:$8 sps:$4 sm:$0xff]   ;;  %v7013_v57 = vld [vmem:[%s9748_s24 + $0x404] ss:$8 sps:$4 sm:$0xff]  }
  0x75   :  { %1842 = vmatpush2.bf16.msra.mxu0 %v6927_v58  ;;  %v7016_v58 = vld [vmem:[%s9748_s24 + $0x504] ss:$8 sps:$4 sm:$0xff]  }
  0x76   :  { %1883 = vmatpush2.bf16.msra.mxu1 %v6930_v59  ;;  %1843 = vmatprep.subr.bf16.mxu0 %v6935_v60  ;;  %v7011_v59 = vld [vmem:[%s9748_s24 + $0x400] ss:$8 sps:$4 sm:$0xff]  }
  0x77   :  { %1884 = vmatprep.subr.bf16.mxu1 %v6938_v61  ;;  %v7014_v60 = vld [vmem:[%s9748_s24 + $0x500] ss:$8 sps:$4 sm:$0xff]   ;;  %v7019_v61 = vld [vmem:[%s9748_s24 + $0x4f4] ss:$8 sps:$4 sm:$0xff]  }
  0x79   :  { %1844 = vmatpush2.bf16.msra.mxu0 %v6933_v62  ;;  %v7022_v62 = vld [vmem:[%s9748_s24 + $0x5f4] ss:$8 sps:$4 sm:$0xff]  }
  0x7a   :  { %1885 = vmatpush2.bf16.msra.mxu1 %v6936_v63  ;;  %1845 = vmatprep.subr.bf16.mxu0 %v6941_v0  ;;  %v7017_v63 = vld [vmem:[%s9748_s24 + $0x4f0] ss:$8 sps:$4 sm:$0xff]  }
  0x7b   :  { %1886 = vmatprep.subr.bf16.mxu1 %v6944_v1  ;;  %v7020_v0 = vld [vmem:[%s9748_s24 + $0x5f0] ss:$8 sps:$4 sm:$0xff]   ;;  %v7025_v1 = vld [vmem:[%s9748_s24 + $0x4e4] ss:$8 sps:$4 sm:$0xff]  }
  0x7d   :  { %1846 = vmatpush2.bf16.msra.mxu0 %v6939_v2  ;;  %v7028_v2 = vld [vmem:[%s9748_s24 + $0x5e4] ss:$8 sps:$4 sm:$0xff]  }
  0x7e   :  { %1887 = vmatpush2.bf16.msra.mxu1 %v6942_v3  ;;  %1847 = vmatprep.subr.bf16.mxu0 %v6947_v4  ;;  %v7023_v3 = vld [vmem:[%s9748_s24 + $0x4e0] ss:$8 sps:$4 sm:$0xff]  }
  0x7f   :  { %1888 = vmatprep.subr.bf16.mxu1 %v6950_v5  ;;  %v7026_v4 = vld [vmem:[%s9748_s24 + $0x5e0] ss:$8 sps:$4 sm:$0xff]   ;;  %v7031_v5 = vld [vmem:[%s9748_s24 + $0x4d4] ss:$8 sps:$4 sm:$0xff]  }
  0x81   :  { %1848 = vmatpush2.bf16.msra.mxu0 %v6945_v7  ;;  %v7034_v7 = vld [vmem:[%s9748_s24 + $0x5d4] ss:$8 sps:$4 sm:$0xff]  }
  0x82   :  { %1889 = vmatpush2.bf16.msra.mxu1 %v6948_v8  ;;  %1849 = vmatprep.subr.bf16.mxu0 %v6953_v9  ;;  %v7029_v8 = vld [vmem:[%s9748_s24 + $0x4d0] ss:$8 sps:$4 sm:$0xff]  }
  0x83   :  { %1890 = vmatprep.subr.bf16.mxu1 %v6956_v10  ;;  %v7032_v9 = vld [vmem:[%s9748_s24 + $0x5d0] ss:$8 sps:$4 sm:$0xff]   ;;  %v7037_v10 = vld [vmem:[%s9748_s24 + $0x4c4] ss:$8 sps:$4 sm:$0xff]  }
  0x85   :  { %1850 = vmatpush2.bf16.msra.mxu0 %v6951_v12  ;;  %v7040_v12 = vld [vmem:[%s9748_s24 + $0x5c4] ss:$8 sps:$4 sm:$0xff]  }
  0x86   :  { %1891 = vmatpush2.bf16.msra.mxu1 %v6954_v13  ;;  %1851 = vmatprep.subr.bf16.mxu0 %v6959_v14  ;;  %v7035_v13 = vld [vmem:[%s9748_s24 + $0x4c0] ss:$8 sps:$4 sm:$0xff]  }
  0x87   :  { %1892 = vmatprep.subr.bf16.mxu1 %v6962_v15  ;;  %v7038_v14 = vld [vmem:[%s9748_s24 + $0x5c0] ss:$8 sps:$4 sm:$0xff]   ;;  %v7043_v15 = vld [vmem:[%s9748_s24 + $0x4b4] ss:$8 sps:$4 sm:$0xff]  }
  0x89   :  { %1852 = vmatpush2.bf16.msra.mxu0 %v6957_v17  ;;  %v7046_v17 = vld [vmem:[%s9748_s24 + $0x5b4] ss:$8 sps:$4 sm:$0xff]  }
  0x8a   :  { %1893 = vmatpush2.bf16.msra.mxu1 %v6960_v18  ;;  %1853 = vmatprep.subr.bf16.mxu0 %v6965_v19  ;;  %v7041_v18 = vld [vmem:[%s9748_s24 + $0x4b0] ss:$8 sps:$4 sm:$0xff]  }
  0x8b   :  { %1894 = vmatprep.subr.bf16.mxu1 %v6968_v20  ;;  %v7044_v19 = vld [vmem:[%s9748_s24 + $0x5b0] ss:$8 sps:$4 sm:$0xff]   ;;  %v7049_v20 = vld [vmem:[%s9748_s24 + $0x4a4] ss:$8 sps:$4 sm:$0xff]  }
  0x8d   :  { %1854 = vmatpush2.bf16.msra.mxu0 %v6963_v23  ;;  %v7047_v23 = vld [vmem:[%s9748_s24 + $0x4a0] ss:$8 sps:$4 sm:$0xff]  }
  0x8e   :  { %1895 = vmatpush2.bf16.msra.mxu1 %v6966_v24  ;;  %1905 = vmatprep.subr.bf16.mxu0 %v6971_v25  ;;  %v7050_v24 = vld [vmem:[%s9748_s24 + $0x5a0] ss:$8 sps:$4 sm:$0xff]   ;;  %v7055_v25 = vld [vmem:[%s9748_s24 + $0x494] ss:$8 sps:$4 sm:$0xff]  }
  0x8f   :  { %1946 = vmatprep.subr.bf16.mxu1 %v6974_v6 }
  0x90   :  { %1856 = vmatmul.mubr.bf16.vlgmr.msra.gmra.mxu0 %v377_v22  ;;  %v396_v22 = vcombine.high %v7865_v11, %v7865_v11  ;;  %v7058_v11 = vld [vmem:[%s9748_s24 + $0x594] ss:$8 sps:$4 sm:$0xff]  }
  0x91   :  { %1897 = vmatmul.mubr.bf16.vlgmr.msra.gmra.mxu1 %v393_v27  ;;  %1906 = vmatpush1.bf16.msra.mxu0 %v6969_v28  ;;  %v7056_v27 = vld [vmem:[%s9748_s24 + $0x590] ss:$8 sps:$4 sm:$0xff]   ;;  %v7061_v28 = vld [vmem:[%s9748_s24 + $0x484] ss:$8 sps:$4 sm:$0xff]  }
  0x92   :  { %1947 = vmatpush1.bf16.msra.mxu1 %v6972_v29  ;;  %1907 = vmatprep.subr.bf16.mxu0 %v6977_v30  ;;  %v8083_v6 = vrot.slane %v396_v22, %v7626_v49  ;;  %v7064_v29 = vld [vmem:[%s9748_s24 + $0x584] ss:$8 sps:$4 sm:$0xff]  }
  0x93   :  { %1948 = vmatprep.subr.bf16.mxu1 %v6980_v31  ;;  %1937 = vmatprep.mubr.bf16.mxu0 %v433_v26  ;;  %v7053_v26 = vld [vmem:[%s9748_s24 + $0x490] ss:$8 sps:$4 sm:$0xff]   ;;  %v419_v31 = vrot.slane %v7881_v16, %v7626_v49  ;;  %v7070_v16 = vld [vmem:[%s9748_s24 + $0x774] ss:$8 sps:$4 sm:$0xff]   ;;  %v7136_v22 = vld [vmem:[%s9748_s24 + $0x7c4] ss:$8 sps:$4 sm:$0xff]  }
  0x94   :  { %1978 = vmatprep.mubr.bf16.mxu1 %v443_v32  ;;  %v412_v30 = vcombine.high %v8083_v6, %v8083_v6  ;;  %v7059_v32 = vld [vmem:[%s9748_s24 + $0x480] ss:$8 sps:$4 sm:$0xff]  }
  0x95   :  { %1908 = vmatpush1.bf16.msra.mxu0 %v6975_v33  ;;  %v7062_v33 = vld [vmem:[%s9748_s24 + $0x580] ss:$8 sps:$4 sm:$0xff]  }
  0x96   :  { %1949 = vmatpush1.bf16.msra.mxu1 %v6978_v34  ;;  %1909 = vmatprep.subr.bf16.mxu0 %v6983_v35  ;;  %v7067_v34 = vld [vmem:[%s9748_s24 + $0x674] ss:$8 sps:$4 sm:$0xff]   ;;  %v440_v35 = vrot.slane %v412_v30, %v7626_v49  ;;  %v7143_v30 = vld [vmem:[%s9748_s24 + $0x6a0] ss:$8 sps:$4 sm:$0xff]  }
  0x97   :  { %1950 = vmatprep.subr.bf16.mxu1 %v6986_v36  ;;  %v441_v36 = vcombine.high %v419_v31, %v419_v31 }
  0x99   :  { %1910 = vmatpush1.bf16.msra.mxu0 %v6981_v37  ;;  %v7065_v37 = vld [vmem:[%s9748_s24 + $0x670] ss:$8 sps:$4 sm:$0xff]  }
  0x9a   :  { %1951 = vmatpush1.bf16.msra.mxu1 %v6984_v38  ;;  %1911 = vmatprep.subr.bf16.mxu0 %v6989_v39  ;;  %v7068_v38 = vld [vmem:[%s9748_s24 + $0x770] ss:$8 sps:$4 sm:$0xff]   ;;  %v7073_v39 = vld [vmem:[%s9748_s24 + $0x664] ss:$8 sps:$4 sm:$0xff]  }
  0x9b   :  { %1952 = vmatprep.subr.bf16.mxu1 %v6992_v40  ;;  %v7076_v40 = vld [vmem:[%s9748_s24 + $0x764] ss:$8 sps:$4 sm:$0xff]  }
  0x9d   :  { %1912 = vmatpush1.bf16.msra.mxu0 %v6987_v41  ;;  %v444_v41 = vcombine.high %v440_v35, %v440_v35 }
  0x9e   :  { %1953 = vmatpush1.bf16.msra.mxu1 %v6990_v43  ;;  %1913 = vmatprep.subr.bf16.mxu0 %v6995_v44  ;;  %v7071_v43 = vld [vmem:[%s9748_s24 + $0x660] ss:$8 sps:$4 sm:$0xff]  }
  0x9f   :  { %1954 = vmatprep.subr.bf16.mxu1 %v6998_v45  ;;  %v7074_v44 = vld [vmem:[%s9748_s24 + $0x760] ss:$8 sps:$4 sm:$0xff]   ;;  %v7079_v45 = vld [vmem:[%s9748_s24 + $0x654] ss:$8 sps:$4 sm:$0xff]  }
  0xa1   :  { %1914 = vmatpush1.bf16.msra.mxu0 %v6993_v46  ;;  %v7082_v46 = vld [vmem:[%s9748_s24 + $0x754] ss:$8 sps:$4 sm:$0xff]  }
  0xa2   :  { %1955 = vmatpush1.bf16.msra.mxu1 %v6996_v47  ;;  %1915 = vmatprep.subr.bf16.mxu0 %v7001_v48  ;;  %v7077_v47 = vld [vmem:[%s9748_s24 + $0x650] ss:$8 sps:$4 sm:$0xff]  }
  0xa3   :  { %1956 = vmatprep.subr.bf16.mxu1 %v7004_v50  ;;  %v7080_v48 = vld [vmem:[%s9748_s24 + $0x750] ss:$8 sps:$4 sm:$0xff]   ;;  %v7085_v50 = vld [vmem:[%s9748_s24 + $0x644] ss:$8 sps:$4 sm:$0xff]  }
  0xa5   :  { %1916 = vmatpush1.bf16.msra.mxu0 %v6999_v51  ;;  %v7088_v51 = vld [vmem:[%s9748_s24 + $0x744] ss:$8 sps:$4 sm:$0xff]  }
  0xa6   :  { %1957 = vmatpush1.bf16.msra.mxu1 %v7002_v52  ;;  %1917 = vmatprep.subr.bf16.mxu0 %v7007_v53  ;;  %v7083_v52 = vld [vmem:[%s9748_s24 + $0x640] ss:$8 sps:$4 sm:$0xff]  }
  0xa7   :  { %1958 = vmatprep.subr.bf16.mxu1 %v7010_v54  ;;  %v7086_v53 = vld [vmem:[%s9748_s24 + $0x740] ss:$8 sps:$4 sm:$0xff]   ;;  %v7091_v54 = vld [vmem:[%s9748_s24 + $0x634] ss:$8 sps:$4 sm:$0xff]  }
  0xa9   :  { %1918 = vmatpush1.bf16.msra.mxu0 %v7005_v55  ;;  %v7094_v55 = vld [vmem:[%s9748_s24 + $0x734] ss:$8 sps:$4 sm:$0xff]  }
  0xaa   :  { %1959 = vmatpush1.bf16.msra.mxu1 %v7008_v56  ;;  %1919 = vmatprep.subr.bf16.mxu0 %v7013_v57  ;;  %v7089_v56 = vld [vmem:[%s9748_s24 + $0x630] ss:$8 sps:$4 sm:$0xff]  }
  0xab   :  { %1960 = vmatprep.subr.bf16.mxu1 %v7016_v58  ;;  %v7092_v57 = vld [vmem:[%s9748_s24 + $0x730] ss:$8 sps:$4 sm:$0xff]   ;;  %v7097_v58 = vld [vmem:[%s9748_s24 + $0x624] ss:$8 sps:$4 sm:$0xff]  }
  0xad   :  { %1920 = vmatpush1.bf16.msra.mxu0 %v7011_v59  ;;  %v7100_v59 = vld [vmem:[%s9748_s24 + $0x724] ss:$8 sps:$4 sm:$0xff]  }
  0xae   :  { %1961 = vmatpush1.bf16.msra.mxu1 %v7014_v60  ;;  %1921 = vmatprep.subr.bf16.mxu0 %v7019_v61  ;;  %v7095_v60 = vld [vmem:[%s9748_s24 + $0x620] ss:$8 sps:$4 sm:$0xff]  }
  0xaf   :  { %1962 = vmatprep.subr.bf16.mxu1 %v7022_v62  ;;  %v7098_v61 = vld [vmem:[%s9748_s24 + $0x720] ss:$8 sps:$4 sm:$0xff]   ;;  %v7103_v62 = vld [vmem:[%s9748_s24 + $0x614] ss:$8 sps:$4 sm:$0xff]  }
  0xb1   :  { %1922 = vmatpush2.bf16.msra.mxu0 %v7017_v63  ;;  %v7106_v63 = vld [vmem:[%s9748_s24 + $0x714] ss:$8 sps:$4 sm:$0xff]  }
  0xb2   :  { %1963 = vmatpush2.bf16.msra.mxu1 %v7020_v0  ;;  %1923 = vmatprep.subr.bf16.mxu0 %v7025_v1  ;;  %v7101_v0 = vld [vmem:[%s9748_s24 + $0x610] ss:$8 sps:$4 sm:$0xff]  }
  0xb3   :  { %1964 = vmatprep.subr.bf16.mxu1 %v7028_v2  ;;  %v7104_v1 = vld [vmem:[%s9748_s24 + $0x710] ss:$8 sps:$4 sm:$0xff]   ;;  %v7109_v2 = vld [vmem:[%s9748_s24 + $0x604] ss:$8 sps:$4 sm:$0xff]  }
  0xb5   :  { %1924 = vmatpush2.bf16.msra.mxu0 %v7023_v3  ;;  %v7112_v3 = vld [vmem:[%s9748_s24 + $0x704] ss:$8 sps:$4 sm:$0xff]  }
  0xb6   :  { %1965 = vmatpush2.bf16.msra.mxu1 %v7026_v4  ;;  %1925 = vmatprep.subr.bf16.mxu0 %v7031_v5  ;;  %v7107_v4 = vld [vmem:[%s9748_s24 + $0x600] ss:$8 sps:$4 sm:$0xff]  }
  0xb7   :  { %1966 = vmatprep.subr.bf16.mxu1 %v7034_v7  ;;  %v7110_v5 = vld [vmem:[%s9748_s24 + $0x700] ss:$8 sps:$4 sm:$0xff]   ;;  %v7115_v7 = vld [vmem:[%s9748_s24 + $0x6f4] ss:$8 sps:$4 sm:$0xff]  }
  0xb9   :  { %1926 = vmatpush2.bf16.msra.mxu0 %v7029_v8  ;;  %v7118_v8 = vld [vmem:[%s9748_s24 + $0x7f4] ss:$8 sps:$4 sm:$0xff]  }
  0xba   :  { %1967 = vmatpush2.bf16.msra.mxu1 %v7032_v9  ;;  %1927 = vmatprep.subr.bf16.mxu0 %v7037_v10  ;;  %v7113_v9 = vld [vmem:[%s9748_s24 + $0x6f0] ss:$8 sps:$4 sm:$0xff]  }
  0xbb   :  { %1968 = vmatprep.subr.bf16.mxu1 %v7040_v12  ;;  %v7116_v10 = vld [vmem:[%s9748_s24 + $0x7f0] ss:$8 sps:$4 sm:$0xff]   ;;  %v7121_v12 = vld [vmem:[%s9748_s24 + $0x6e4] ss:$8 sps:$4 sm:$0xff]  }
  0xbd   :  { %1928 = vmatpush2.bf16.msra.mxu0 %v7035_v13  ;;  %v7124_v13 = vld [vmem:[%s9748_s24 + $0x7e4] ss:$8 sps:$4 sm:$0xff]  }
  0xbe   :  { %1969 = vmatpush2.bf16.msra.mxu1 %v7038_v14  ;;  %1929 = vmatprep.subr.bf16.mxu0 %v7043_v15  ;;  %v7119_v14 = vld [vmem:[%s9748_s24 + $0x6e0] ss:$8 sps:$4 sm:$0xff]  }
  0xbf   :  { %1970 = vmatprep.subr.bf16.mxu1 %v7046_v17  ;;  %v7122_v15 = vld [vmem:[%s9748_s24 + $0x7e0] ss:$8 sps:$4 sm:$0xff]   ;;  %v7127_v17 = vld [vmem:[%s9748_s24 + $0x6d4] ss:$8 sps:$4 sm:$0xff]  }
  0xc1   :  { %1930 = vmatpush2.bf16.msra.mxu0 %v7041_v18  ;;  %v7130_v18 = vld [vmem:[%s9748_s24 + $0x7d4] ss:$8 sps:$4 sm:$0xff]  }
  0xc2   :  { %1971 = vmatpush2.bf16.msra.mxu1 %v7044_v19  ;;  %1931 = vmatprep.subr.bf16.mxu0 %v7049_v20  ;;  %v7125_v19 = vld [vmem:[%s9748_s24 + $0x6d0] ss:$8 sps:$4 sm:$0xff]  }
  0xc3   :  { %1972 = vmatprep.subr.bf16.mxu1 %v7052_v21  ;;  %v7128_v20 = vld [vmem:[%s9748_s24 + $0x7d0] ss:$8 sps:$4 sm:$0xff]   ;;  %v7133_v21 = vld [vmem:[%s9748_s24 + $0x6c4] ss:$8 sps:$4 sm:$0xff]  }
  0xc5   :  { %1932 = vmatpush2.bf16.msra.mxu0 %v7047_v23  ;;  %v7131_v23 = vld [vmem:[%s9748_s24 + $0x6c0] ss:$8 sps:$4 sm:$0xff]  }
  0xc6   :  { %1973 = vmatpush2.bf16.msra.mxu1 %v7050_v24  ;;  %1933 = vmatprep.subr.bf16.mxu0 %v7055_v25  ;;  %v7134_v24 = vld [vmem:[%s9748_s24 + $0x7c0] ss:$8 sps:$4 sm:$0xff]   ;;  %v7139_v25 = vld [vmem:[%s9748_s24 + $0x6b4] ss:$8 sps:$4 sm:$0xff]  }
  0xc7   :  { %1974 = vmatprep.subr.bf16.mxu1 %v7058_v11  ;;  %v7142_v11 = vld [vmem:[%s9748_s24 + $0x7b4] ss:$8 sps:$4 sm:$0xff]  }
  0xc9   :  { %1934 = vmatpush2.bf16.msra.mxu0 %v7053_v26  ;;  %v7137_v26 = vld [vmem:[%s9748_s24 + $0x6b0] ss:$8 sps:$4 sm:$0xff]  }
  0xca   :  { %1975 = vmatpush2.bf16.msra.mxu1 %v7056_v27  ;;  %1935 = vmatprep.subr.bf16.mxu0 %v7061_v28  ;;  %v7140_v27 = vld [vmem:[%s9748_s24 + $0x7b0] ss:$8 sps:$4 sm:$0xff]   ;;  %v7145_v28 = vld [vmem:[%s9748_s24 + $0x6a4] ss:$8 sps:$4 sm:$0xff]  }
  0xcb   :  { %1976 = vmatprep.subr.bf16.mxu1 %v7064_v29  ;;  %v7148_v29 = vld [vmem:[%s9748_s24 + $0x7a4] ss:$8 sps:$4 sm:$0xff]  }
  0xcd   :  { %1936 = vmatpush2.bf16.msra.mxu0 %v7059_v32  ;;  %v7151_v32 = vld [vmem:[%s9748_s24 + $0x694] ss:$8 sps:$4 sm:$0xff]  }
  0xce   :  { %1977 = vmatpush2.bf16.msra.mxu1 %v7062_v33  ;;  %1987 = vmatprep.subr.bf16.mxu0 %v7067_v34  ;;  %v7154_v33 = vld [vmem:[%s9748_s24 + $0x794] ss:$8 sps:$4 sm:$0xff]   ;;  %v7149_v34 = vld [vmem:[%s9748_s24 + $0x690] ss:$8 sps:$4 sm:$0xff]  }
  0xcf   :  { %2028 = vmatprep.subr.bf16.mxu1 %v7070_v16  ;;  %v7152_v16 = vld [vmem:[%s9748_s24 + $0x790] ss:$8 sps:$4 sm:$0xff]  }
  0xd0   :  { %1938 = vmatmul.mubr.bf16.vlgmr.msra.gmra.mxu0 %v419_v31  ;;  %v7146_v31 = vld [vmem:[%s9748_s24 + $0x7a0] ss:$8 sps:$4 sm:$0xff]  }
  0xd1   :  { %1979 = vmatmul.mubr.bf16.vlgmr.msra.gmra.mxu1 %v441_v36  ;;  %1988 = vmatpush1.bf16.msra.mxu0 %v7065_v37  ;;  %v7160_v36 = vld [vmem:[%s9748_s24 + $0x784] ss:$8 sps:$4 sm:$0xff]   ;;  %v426_v37 = vrot.slane %v8083_v6, %v7626_v49  ;;  %v8309_v6 = vsub.s32 1, %v7608_v42 }
  0xd2   :  { %2029 = vmatpush1.bf16.msra.mxu1 %v7068_v38  ;;  %1989 = vmatprep.subr.bf16.mxu0 %v7073_v39  ;;  %v7155_v38 = vld [vmem:[%s9748_s24 + $0x680] ss:$8 sps:$4 sm:$0xff]  }
  0xd3   :  { %2030 = vmatprep.subr.bf16.mxu1 %v7076_v40  ;;  %2019 = vmatprep.mubr.bf16.mxu0 %v440_v35  ;;  %v7157_v35 = vld [vmem:[%s9748_s24 + $0x684] ss:$8 sps:$4 sm:$0xff]   ;;  %v7158_v39 = vld [vmem:[%s9748_s24 + $0x780] ss:$8 sps:$4 sm:$0xff]   ;;  %v8303_v40 = vsub.s32 0, %v7608_v42 }
  0xd4   :  { %2060 = vmatprep.mubr.bf16.mxu1 %v444_v41  ;;  %v333_v41 = vld [vmem:[%s9750_s3] sm:$0x3] }
  0xd5   :  { %1990 = vmatpush1.bf16.msra.mxu0 %v7071_v43  ;;  %v442_v43 = vcombine.high %v426_v37, %v426_v37 }
  0xd6   :  { %2031 = vmatpush1.bf16.msra.mxu1 %v7074_v44  ;;  %1991 = vmatprep.subr.bf16.mxu0 %v7079_v45  ;;  %v338_v44 = vrot.slane %v333_v41, %v8303_v40  ;;  %v342_v45 = vrot.slane %v333_v41, %v8309_v6 }
  0xd7   :  { %2032 = vmatprep.subr.bf16.mxu1 %v7082_v46 }
  0xd9   :  { %1992 = vmatpush1.bf16.msra.mxu0 %v7077_v47 }
  0xda   :  { %2033 = vmatpush1.bf16.msra.mxu1 %v7080_v48  ;;  %1993 = vmatprep.subr.bf16.mxu0 %v7085_v50 }
  0xdb   :  { %2034 = vmatprep.subr.bf16.mxu1 %v7088_v51 }
  0xdd   :  { %1994 = vmatpush1.bf16.msra.mxu0 %v7083_v52 }
  0xde   :  { %2035 = vmatpush1.bf16.msra.mxu1 %v7086_v53  ;;  %1995 = vmatprep.subr.bf16.mxu0 %v7091_v54 }
  0xdf   :  { %2036 = vmatprep.subr.bf16.mxu1 %v7094_v55 }
  0xe1   :  { %1996 = vmatpush1.bf16.msra.mxu0 %v7089_v56 }
  0xe2   :  { %2037 = vmatpush1.bf16.msra.mxu1 %v7092_v57  ;;  %1997 = vmatprep.subr.bf16.mxu0 %v7097_v58 }
  0xe3   :  { %2038 = vmatprep.subr.bf16.mxu1 %v7100_v59  ;;  %v7161_v59 = vld [vmem:[%s9751_s5 + $0x78] sm:$0xff]  }
  0xe5   :  { %1998 = vmatpush1.bf16.msra.mxu0 %v7095_v60  ;;  %v7162_v60 = vld [vmem:[%s9751_s5 + $0x38] sm:$0xff]  }
  0xe6   :  { %2039 = vmatpush1.bf16.msra.mxu1 %v7098_v61  ;;  %1999 = vmatprep.subr.bf16.mxu0 %v7103_v62  ;;  %v7163_v61 = vld [vmem:[%s9751_s5 + $0x70] sm:$0xff]  }
  0xe7   :  { %2040 = vmatprep.subr.bf16.mxu1 %v7106_v63  ;;  %v7164_v62 = vld [vmem:[%s9751_s5 + $0x30] sm:$0xff]   ;;  %v7165_v63 = vld [vmem:[%s9751_s5 + $0x68] sm:$0xff]  }
  0xe9   :  { %2000 = vmatpush1.bf16.msra.mxu0 %v7101_v0  ;;  %v7166_v0 = vld [vmem:[%s9751_s5 + $0x28] sm:$0xff]  }
  0xea   :  { %2041 = vmatpush1.bf16.msra.mxu1 %v7104_v1  ;;  %2001 = vmatprep.subr.bf16.mxu0 %v7109_v2  ;;  %v7167_v1 = vld [vmem:[%s9751_s5 + $0x60] sm:$0xff]  }
  0xeb   :  { %2042 = vmatprep.subr.bf16.mxu1 %v7112_v3  ;;  %v7168_v2 = vld [vmem:[%s9751_s5 + $0x20] sm:$0xff]   ;;  %v7169_v3 = vld [vmem:[%s9751_s5 + $0x58] sm:$0xff]  }
  0xed   :  { %2002 = vmatpush1.bf16.msra.mxu0 %v7107_v4  ;;  %v7170_v4 = vld [vmem:[%s9751_s5 + $0x18] sm:$0xff]  }
  0xee   :  { %2043 = vmatpush1.bf16.msra.mxu1 %v7110_v5  ;;  %2003 = vmatprep.subr.bf16.mxu0 %v7115_v7  ;;  %v7171_v5 = vld [vmem:[%s9751_s5 + $0x50] sm:$0xff]  }
  0xef   :  { %2044 = vmatprep.subr.bf16.mxu1 %v7118_v8  ;;  %v7172_v7 = vld [vmem:[%s9751_s5 + $0x10] sm:$0xff]  }
  0xf1   :  { %2004 = vmatpush2.bf16.msra.mxu0 %v7113_v9 }
  0xf2   :  { %2045 = vmatpush2.bf16.msra.mxu1 %v7116_v10  ;;  %2005 = vmatprep.subr.bf16.mxu0 %v7121_v12 }
  0xf3   :  { %2046 = vmatprep.subr.bf16.mxu1 %v7124_v13 }
  0xf5   :  { %2006 = vmatpush2.bf16.msra.mxu0 %v7119_v14  ;;  %v7173_v14 = vld [vmem:[%s9751_s5 + $0x48] sm:$0xff]  }
  0xf6   :  { %2047 = vmatpush2.bf16.msra.mxu1 %v7122_v15  ;;  %2007 = vmatprep.subr.bf16.mxu0 %v7127_v17 }
  0xf7   :  { %2048 = vmatprep.subr.bf16.mxu1 %v7130_v18  ;;  %v7174_v18 = vld [vmem:[%s9751_s5 + $0x8] sm:$0xff]  }
  0xf9   :  { %2008 = vmatpush2.bf16.msra.mxu0 %v7125_v19 }
  0xfa   :  { %2049 = vmatpush2.bf16.msra.mxu1 %v7128_v20  ;;  %2009 = vmatprep.subr.bf16.mxu0 %v7133_v21 }
  0xfb   :  { %2050 = vmatprep.subr.bf16.mxu1 %v7136_v22 }
  0xfd   :  { %2010 = vmatpush2.bf16.msra.mxu0 %v7131_v23 }
  0xfe   :  { %2051 = vmatpush2.bf16.msra.mxu1 %v7134_v24  ;;  %2011 = vmatprep.subr.bf16.mxu0 %v7139_v25  ;;  %v7175_v24 = vld [vmem:[%s9751_s5 + $0x40] sm:$0xff]  }
  0xff   :  { %2052 = vmatprep.subr.bf16.mxu1 %v7142_v11  ;;  %v7176_v25 = vld [vmem:[%s9751_s5] sm:$0xff]   ;;  %v7368_v11 = vmov 0.0  }
 0x101   :  { %2012 = vmatpush2.bf16.msra.mxu0 %v7137_v26  ;;  %v7177_v26 = vld [vmem:[%s9752_s26 + $0x38] sm:$0xff]  }
 0x102   :  { %2053 = vmatpush2.bf16.msra.mxu1 %v7140_v27  ;;  %2013 = vmatprep.subr.bf16.mxu0 %v7145_v28  ;;  %v7178_v27 = vld [vmem:[%s9752_s26 + $0x30] sm:$0xff]   ;;  %v7179_v28 = vld [vmem:[%s9752_s26 + $0x28] sm:$0xff]  }
 0x103   :  { %2054 = vmatprep.subr.bf16.mxu1 %v7148_v29  ;;  %v7180_v29 = vld [vmem:[%s9752_s26 + $0x20] sm:$0xff]  }
 0x105   :  { %2014 = vmatpush2.bf16.msra.mxu0 %v7143_v30  ;;  %v7181_v30 = vld [vmem:[%s9752_s26 + $0x18] sm:$0xff]  }
 0x106   :  { %2055 = vmatpush2.bf16.msra.mxu1 %v7146_v31  ;;  %2015 = vmatprep.subr.bf16.mxu0 %v7151_v32 }
 0x107   :  { %2056 = vmatprep.subr.bf16.mxu1 %v7154_v33 }
 0x109   :  { %2016 = vmatpush2.bf16.msra.mxu0 %v7149_v34 }
 0x10a   :  { %2057 = vmatpush2.bf16.msra.mxu1 %v7152_v16  ;;  %2017 = vmatprep.subr.bf16.mxu0 %v7157_v35 }
 0x10b   :  { %2058 = vmatprep.subr.bf16.mxu1 %v7160_v36 }
 0x10d   :  { %2018 = vmatpush2.bf16.msra.mxu0 %v7155_v38 }
 0x10e   :  { %2059 = vmatpush2.bf16.msra.mxu1 %v7158_v39  ;;  %6618 = vmatprep.subr.bf16.mxu0 %v7161_v59 }
 0x10f   :  { %6711 = vmatprep.subr.bf16.mxu1 %v7368_v11 }
 0x110   :  { %v1775_v46 = vpop.f32.mrf.mxu0  ;;  %2020 = vmatmul.mubr.bf16.vlgmr.msra.gmra.mxu0 %v426_v37 }
 0x111   :  { %v1816_v47 = vpop.f32.mrf.mxu1  ;;  %2061 = vmatmul.mubr.bf16.vlgmr.msra.gmra.mxu1 %v442_v43  ;;  %v1776_v48 = vadd.f32 %v1775_v46, %v338_v44  ;;  %6619 = vmatpush3.bf16.msra.mxu0 %v7162_v60 }
 0x112   :  { %v1777_v50 = vpop.f32.mrf.mxu0  ;;  %6620 = vmatprep.subr.bf16.mxu0 %v7163_v61  ;;  %6712 = vmatpush3.bf16.msra.mxu1 %v7177_v26  ;;  %v7182_v61 = vld [vmem:[%s9752_s26 + $0x10] sm:$0xff]  }
 0x113   :  { %v1818_v51 = vpop.f32.mrf.mxu1  ;;  %v1817_v52 = vadd.f32 %v1816_v47, %v1776_v48  ;;  %v1778_v53 = vadd.f32 %v1777_v50, %v342_v45  ;;  %6713 = vmatprep.subr.bf16.mxu1 %v7368_v11  ;;  %6727 = vmatprep.mubr.msk.bf16.mxu1 %vm7369_vm0, %v7368_v11 }
 0x114   :  { %v1779_v54 = vpop.f32.mrf.mxu0 }
 0x115   :  { %v1820_v55 = vpop.f32.mrf.mxu1  ;;  %v1819_v56 = vadd.f32 %v1818_v51, %v1778_v53  ;;  %6621 = vmatpush3.bf16.msra.mxu0 %v7164_v62  ;;  %v7183_v62 = vld [vmem:[%s9752_s26 + $0x8] sm:$0xff]  }
 0x116   :  { %v1780_v57 = vpop.f32.mrf.mxu0  ;;  %6622 = vmatprep.subr.bf16.mxu0 %v7165_v63  ;;  %6714 = vmatpush3.bf16.msra.mxu1 %v7178_v27  ;;  %v7184_v63 = vld [vmem:[%s9752_s26] sm:$0xff]  }
 0x117   :  { %v1821_v58 = vpop.f32.mrf.mxu1  ;;  %6715 = vmatprep.subr.bf16.mxu1 %v7368_v11 }
 0x119   :  { %6623 = vmatpush3.bf16.msra.mxu0 %v7166_v0 }
 0x11a   :  { %6624 = vmatprep.subr.bf16.mxu0 %v7167_v1  ;;  %6716 = vmatpush3.bf16.msra.mxu1 %v7179_v28  ;;  %v6197_v1 = vld [vmem:[%s9753_s28] ss:$0 sm:$0xff] }
 0x11b   :  { %6717 = vmatprep.subr.bf16.mxu1 %v7368_v11 }
 0x11d   :  { %6625 = vmatpush3.bf16.msra.mxu0 %v7168_v2 }
 0x11e   :  { %6626 = vmatprep.subr.bf16.mxu0 %v7169_v3  ;;  %6718 = vmatpush3.bf16.msra.mxu1 %v7180_v29 }
 0x11f   :  { %6719 = vmatprep.subr.bf16.mxu1 %v7368_v11 }
 0x121   :  { %6627 = vmatpush3.bf16.msra.mxu0 %v7170_v4 }
 0x122   :  { %6628 = vmatprep.subr.bf16.mxu0 %v7171_v5  ;;  %6720 = vmatpush3.bf16.msra.mxu1 %v7181_v30 }
 0x123   :  { %6721 = vmatprep.subr.bf16.mxu1 %v7368_v11 }
 0x125   :  { %6629 = vmatpush3.bf16.msra.mxu0 %v7172_v7 }
 0x126   :  { %6630 = vmatprep.subr.bf16.mxu0 %v7173_v14  ;;  %6722 = vmatpush3.bf16.msra.mxu1 %v7182_v61  ;;  %v7188_v14 = vld [vmem:[%s9754_s27 + $0x20] sm:$0xff]  }
 0x127   :  { %6723 = vmatprep.subr.bf16.mxu1 %v7368_v11 }
 0x129   :  { %6631 = vmatpush3.bf16.msra.mxu0 %v7174_v18  ;;  %v7191_v18 = vld [vmem:[%s9754_s27 + $0x8] sm:$0xff]  }
 0x12a   :  { %6632 = vmatprep.subr.bf16.mxu0 %v7175_v24  ;;  %6724 = vmatpush3.bf16.msra.mxu1 %v7183_v62 }
 0x12b   :  { %6725 = vmatprep.subr.bf16.mxu1 %v7368_v11 }
 0x12d   :  { %6633 = vmatpush3.bf16.msra.mxu0 %v7176_v25 }
 0x12e   :  { %6731 = vmatprep.subr.bf16.mxu0 %v7368_v11  ;;  %6726 = vmatpush3.bf16.msra.mxu1 %v7184_v63 }
 0x12f   :  { %6751 = vmatprep.subr.bf16.mxu1 %v7368_v11 }
 0x150   :  { %v1857_v8 = vpop.f32.mrf.mxu0 }
 0x151   :  { %v1898_v9 = vpop.f32.mrf.mxu1  ;;  %v1858_v10 = vadd.f32 %v1857_v8, %v1817_v52 }
 0x152   :  { %v1859_v12 = vpop.f32.mrf.mxu0 }
 0x153   :  { %v1900_v13 = vpop.f32.mrf.mxu1  ;;  %v1899_v15 = vadd.f32 %v1898_v9, %v1858_v10  ;;  %v1860_v17 = vadd.f32 %v1859_v12, %v1819_v56  ;;  %v7185_v10 = vld [vmem:[%s9754_s27 + $0x38] sm:$0xff]   ;;  %v7186_v12 = vld [vmem:[%s9754_s27 + $0x30] sm:$0xff]  }
 0x154   :  { %v1861_v19 = vpop.f32.mrf.mxu0 }
 0x155   :  { %v1902_v20 = vpop.f32.mrf.mxu1  ;;  %v1901_v21 = vadd.f32 %v1900_v13, %v1860_v17  ;;  %v7187_v13 = vld [vmem:[%s9754_s27 + $0x28] sm:$0xff]   ;;  %v7190_v17 = vld [vmem:[%s9754_s27 + $0x10] sm:$0xff]   ;;  %v7192_v19 = vld [vmem:[%s9754_s27] sm:$0xff]  }
 0x156   :  { %v1862_v22 = vpop.f32.mrf.mxu0 }
 0x157   :  { %v1903_v23 = vpop.f32.mrf.mxu1 }
 0x190   :  { %v1939_v31 = vpop.f32.mrf.mxu0 }
 0x191   :  { %v1980_v32 = vpop.f32.mrf.mxu1  ;;  %v1940_v33 = vadd.f32 %v1939_v31, %v1899_v15  ;;  %v7189_v15 = vld [vmem:[%s9754_s27 + $0x18] sm:$0xff]  }
 0x192   :  { %v1941_v34 = vpop.f32.mrf.mxu0 }
 0x193   :  { %v1982_v16 = vpop.f32.mrf.mxu1  ;;  %v1981_v35 = vadd.f32 %v1980_v32, %v1940_v33  ;;  %v1942_v41 = vadd.f32 %v1941_v34, %v1901_v21 }
 0x194   :  { %v1943_v36 = vpop.f32.mrf.mxu0 }
 0x195   :  { %v1984_v37 = vpop.f32.mrf.mxu1  ;;  %v1983_v45 = vadd.f32 %v1982_v16, %v1942_v41 }
 0x196   :  { %v1944_v38 = vpop.f32.mrf.mxu0 }
 0x197   :  { %v1985_v39 = vpop.f32.mrf.mxu1 }
 0x1d0   :  { %v2021_v43 = vpop.f32.mrf.mxu0 }
 0x1d1   :  { %v2062_v44 = vpop.f32.mrf.mxu1  ;;  %v2022_v46 = vadd.f32 %v2021_v43, %v1981_v35 }
 0x1d2   :  { %v2023_v47 = vpop.f32.mrf.mxu0 }
 0x1d3   :  { %v2064_v48 = vpop.f32.mrf.mxu1  ;;  %v2063_v50 = vadd.f32 %v2062_v44, %v2022_v46  ;;  %v2024_v51 = vadd.f32 %v2023_v47, %v1983_v45  ;;  %v6222_v45 = vld [vmem:[%s9755_s29] ss:$0 sm:$0xff] }
 0x1d4   :  { %v2025_v52 = vpop.f32.mrf.mxu0  ;;  %v6223_v47 = vld [vmem:[%s9719_s7] ss:$0 sm:$0xff] }
 0x1d5   :  { %v2066_v53 = vpop.f32.mrf.mxu1  ;;  %v2065_v54 = vadd.f32 %v2064_v48, %v2024_v51  ;;  %v2069_v55 = vmax.f32 %v2063_v50, 0.0  ;;  %v6224_v52 = vld [vmem:[%s9720_s10] ss:$0 sm:$0xff] }
 0x1d6   :  { %v2026_v56 = vpop.f32.mrf.mxu0 }
 0x1d7   :  { %v2067_v57 = vpop.f32.mrf.mxu1  ;;  %v2070_v58 = vmax.f32 %v2065_v54, 0.0  ;;  %v2071_v60 = vpack.c.bf16 %v2069_v55, %v2069_v55 }
 0x1d9   :  { %v2072_v59 = vpack.c.bf16 %v2070_v58, %v2070_v58 }
 0x1db   :  { %2240 = vmatprep.mubr.bf16.mxu0 %v2072_v59 }
 0x1dc   :  { %2241 = vmatmul.mubr.bf16.vlgmr.msra.gmra.mxu0 %v2071_v60 }
 0x1dd   :  { %6747 = vmatprep.mubr.msk.bf16.mxu0 %vm7369_vm0, %v7368_v11  ;;  %6732 = vmatpush3.bf16.msra.mxu0 %v7185_v10 }
 0x1de   :  { %6733 = vmatprep.subr.bf16.mxu0 %v7368_v11 }
 0x1e1   :  { %6734 = vmatpush3.bf16.msra.mxu0 %v7186_v12 }
 0x1e2   :  { %6735 = vmatprep.subr.bf16.mxu0 %v7368_v11 }
 0x1e5   :  { %6736 = vmatpush3.bf16.msra.mxu0 %v7187_v13 }
 0x1e6   :  { %6737 = vmatprep.subr.bf16.mxu0 %v7368_v11 }
 0x1e9   :  { %6738 = vmatpush3.bf16.msra.mxu0 %v7188_v14 }
 0x1ea   :  { %6739 = vmatprep.subr.bf16.mxu0 %v7368_v11 }
 0x1ed   :  { %6740 = vmatpush3.bf16.msra.mxu0 %v7189_v15  ;;  %v7193_v15 = vld [vmem:[%s9721_s9 + $0x38] sm:$0xff]  }
 0x1ee   :  { %6741 = vmatprep.subr.bf16.mxu0 %v7368_v11 }
 0x1f1   :  { %6742 = vmatpush3.bf16.msra.mxu0 %v7190_v17  ;;  %v7194_v17 = vld [vmem:[%s9721_s9 + $0x30] sm:$0xff]  }
 0x1f2   :  { %6743 = vmatprep.subr.bf16.mxu0 %v7368_v11 }
 0x1f5   :  { %6744 = vmatpush3.bf16.msra.mxu0 %v7191_v18  ;;  %v7195_v18 = vld [vmem:[%s9721_s9 + $0x28] sm:$0xff]  }
 0x1f6   :  { %6745 = vmatprep.subr.bf16.mxu0 %v7368_v11 }
 0x1f9   :  { %6746 = vmatpush3.bf16.msra.mxu0 %v7192_v19  ;;  %v7196_v19 = vld [vmem:[%s9721_s9 + $0x20] sm:$0xff]  }
 0x29c   :  { %v6634_v0 = vpop.f32.mrf.mxu0 }
 0x29e   :  { %v6635_v2 = vpop.f32.mrf.mxu0 }
 0x29f   :  { %v6636_v3 = vadd.f32 %v6635_v2, %v6634_v0 }
 0x2a0   :  { %v6637_v4 = vpop.f32.mrf.mxu0 }
 0x2a1   :  { %v2243_v5 = vadd.f32 %v6636_v3, %v6197_v1 }
 0x2a2   :  { %v6638_v7 = vpop.f32.mrf.mxu0 }
 0x2a3   :  { %v2248_v8 = vmax.f32 %v2243_v5, 0.0 }
 0x2a5   :  { %v2249_v9 = vpack.c.bf16 %v2248_v8, %v2248_v8 }
 0x2a7   :  { %6728 = vmatmul.mubr.bf16.vlgmr.msra.gmra.mxu1 %v2249_v9 }
 0x2a8   :  { %6767 = vmatprep.mubr.msk.bf16.mxu1 %vm7369_vm0, %v7368_v11  ;;  %6752 = vmatpush3.bf16.msra.mxu1 %v7193_v15  ;;  %v7253_v15 = vld [vmem:[%s9723_s15 + $0x70] sm:$0xff]  }
 0x2a9   :  { %6753 = vmatprep.subr.bf16.mxu1 %v7368_v11 }
 0x2ac   :  { %6754 = vmatpush3.bf16.msra.mxu1 %v7194_v17  ;;  %v7254_v17 = vld [vmem:[%s9723_s15 + $0xf0] sm:$0xff]  }
 0x2ad   :  { %6755 = vmatprep.subr.bf16.mxu1 %v7368_v11 }
 0x2b0   :  { %6756 = vmatpush3.bf16.msra.mxu1 %v7195_v18  ;;  %v7255_v18 = vld [vmem:[%s9723_s15 + $0x30] sm:$0xff]  }
 0x2b1   :  { %6757 = vmatprep.subr.bf16.mxu1 %v7368_v11 }
 0x2b4   :  { %6758 = vmatpush3.bf16.msra.mxu1 %v7196_v19  ;;  %v7256_v19 = vld [vmem:[%s9723_s15 + $0xb0] sm:$0xff]  }
 0x2b5   :  { %6759 = vmatprep.subr.bf16.mxu1 %v7368_v11 }
 0x367   :  { %v2348_v20 = vpop.f32.mrf.mxu1 }
 0x368   :  { %v2355_v21 = vsel %vm2354_vm1, %v2348_v20, 0.0 }
 0x369   :  { %v2356_v22 = vrot.slane %v2355_v21, 4  ;;  %v6729_v23 = vpop.f32.mrf.mxu1 }
 0x36b   :  { %v2357_v24 = vadd.f32 %v2356_v22, %v2355_v21  ;;  %v2351_v25 = vpop.f32.mrf.mxu1 }
 0x36d   :  { %v2358_v26 = vrot.slane %v2357_v24, 2  ;;  %v6730_v27 = vpop.f32.mrf.mxu1 }
 0x36e   :  { %v7198_v27 = vld [vmem:[%s9721_s9 + $0x10] sm:$0xff]  }
 0x36f   :  { %v2359_v28 = vadd.f32 %v2358_v26, %v2357_v24  ;;  %v7197_v26 = vld [vmem:[%s9721_s9 + $0x18] sm:$0xff]  }
 0x370   :  { %6760 = vmatpush3.bf16.msra.mxu1 %v7197_v26  ;;  %v7263_v26 = vld [vmem:[%s9723_s15 + $0x20] sm:$0xff]  }
 0x371   :  { %v2360_v29 = vrot.slane %v2359_v28, 1  ;;  %6761 = vmatprep.subr.bf16.mxu1 %v7368_v11 }
 0x373   :  { %v2361_v30 = vadd.f32 %v2360_v29, %v2359_v28  ;;  %v7199_v28 = vld [vmem:[%s9721_s9 + $0x8] sm:$0xff]   ;;  %v7200_v29 = vld [vmem:[%s9721_s9] sm:$0xff]  }
 0x374   :  { %6762 = vmatpush3.bf16.msra.mxu1 %v7198_v27  ;;  %v7264_v27 = vld [vmem:[%s9723_s15 + $0xa0] sm:$0xff]  }
 0x375   :  { %v2363_v31 = vmul.f32 0.5, %v2361_v30  ;;  %6763 = vmatprep.subr.bf16.mxu1 %v7368_v11  ;;  %v7201_v30 = vld [vmem:[%s9722_s11 + $0xe0] ss:$16 sps:$4 sm:$0xff]  }
 0x377   :  { %v2364_v32 = vsub.f32 %v2348_v20, %v2363_v31  ;;  %v7203_v31 = vld [vmem:[%s9722_s11 + $0xe4] ss:$16 sps:$4 sm:$0xff]  }
 0x378   :  { %6764 = vmatpush3.bf16.msra.mxu1 %v7199_v28  ;;  %2867 = vmatprep.subr.bf16.mxu0 %v7203_v31  ;;  %v7265_v28 = vld [vmem:[%s9723_s15 + $0x58] sm:$0xff]  }
 0x379   :  { %v2365_v33 = vmul.f32 %v2364_v32, %v2364_v32  ;;  %6765 = vmatprep.subr.bf16.mxu1 %v7368_v11  ;;  %v7207_v11 = vld [vmem:[%s9722_s11 + $0xc0] ss:$16 sps:$4 sm:$0xff]   ;;  %v7268_v31 = vld [vmem:[%s9723_s15 + $0x98] sm:$0xff]  }
 0x37b   :  { %v2366_v34 = vsel %vm2354_vm1, %v2365_v33, 0.0  ;;  %v7209_v33 = vld [vmem:[%s9722_s11 + $0xc4] ss:$16 sps:$4 sm:$0xff]  }
 0x37c   :  { %v2367_v16 = vrot.slane %v2366_v34, 4  ;;  %6766 = vmatpush3.bf16.msra.mxu1 %v7200_v29  ;;  %v7266_v29 = vld [vmem:[%s9723_s15 + $0xd8] sm:$0xff]  }
 0x37e   :  { %v2368_v35 = vadd.f32 %v2367_v16, %v2366_v34  ;;  %v7215_v34 = vld [vmem:[%s9722_s11 + $0xa4] ss:$16 sps:$4 sm:$0xff]   ;;  %v7213_v16 = vld [vmem:[%s9722_s11 + $0xa0] ss:$16 sps:$4 sm:$0xff]  }
 0x380   :  { %v2369_v36 = vrot.slane %v2368_v35, 2 }
 0x382   :  { %v2370_v37 = vadd.f32 %v2369_v36, %v2368_v35  ;;  %v7221_v35 = vld [vmem:[%s9722_s11 + $0x84] ss:$16 sps:$4 sm:$0xff]   ;;  %v7219_v36 = vld [vmem:[%s9722_s11 + $0x80] ss:$16 sps:$4 sm:$0xff]  }
 0x384   :  { %v2371_v38 = vrot.slane %v2370_v37, 1 }
 0x386   :  { %v2372_v39 = vadd.f32 %v2371_v38, %v2370_v37  ;;  %v7227_v37 = vld [vmem:[%s9722_s11 + $0x64] ss:$16 sps:$4 sm:$0xff]   ;;  %v7225_v38 = vld [vmem:[%s9722_s11 + $0x60] ss:$16 sps:$4 sm:$0xff]  }
 0x388   :  { %v2373_v41 = vmul.f32 0.5, %v2372_v39  ;;  %v7233_v39 = vld [vmem:[%s9722_s11 + $0x44] ss:$16 sps:$4 sm:$0xff]  }
 0x38a   :  { %v2374_v43 = vadd.f32 1e-05, %v2373_v41  ;;  %v7231_v41 = vld [vmem:[%s9722_s11 + $0x40] ss:$16 sps:$4 sm:$0xff]  }
 0x38c   :  { %7353 = vrsqrt.f32 %v2374_v43  ;;  %v7239_v43 = vld [vmem:[%s9722_s11 + $0x24] ss:$16 sps:$4 sm:$0xff]  }
 0x399   :  { %v7354_v44 = vpop.eup %7353 }
 0x39a   :  { %v2376_v46 = vmul.f32 %v7354_v44, %v2364_v32  ;;  %v7206_v32 = vld [vmem:[%s9722_s11 + $0xec] ss:$16 sps:$4 sm:$0xff]   ;;  %v7237_v44 = vld [vmem:[%s9722_s11 + $0x20] ss:$16 sps:$4 sm:$0xff]  }
 0x39b   :  { %2908 = vmatprep.subr.bf16.mxu1 %v7206_v32  ;;  %v7269_v32 = vld [vmem:[%s9723_s15 + $0x50] sm:$0xff]  }
 0x39c   :  { %v2384_v48 = vmul.f32 %v6222_v45, %v2376_v46  ;;  %v7245_v45 = vld [vmem:[%s9722_s11 + $0x4] ss:$16 sps:$4 sm:$0xff]   ;;  %v7243_v46 = vld [vmem:[%s9722_s11] ss:$16 sps:$4 sm:$0xff]  }
 0x39e   :  { %v2392_v50 = vadd.f32 %v6223_v47, %v2384_v48 }
 0x3a0   :  { %v2393_v51 = vpack.c.bf16 %v2392_v50, %v2392_v50 }
 0x3a2   :  { %6748 = vmatmul.mubr.bf16.vlgmr.msra.gmra.mxu0 %v2393_v51  ;;  %v7204_v51 = vld [vmem:[%s9722_s11 + $0xe8] ss:$16 sps:$4 sm:$0xff]  }
 0x3a3   :  { %2868 = vmatpush1.bf16.msra.mxu0 %v7201_v30  ;;  %v7267_v30 = vld [vmem:[%s9723_s15 + $0x18] sm:$0xff]  }
 0x3a4   :  { %2869 = vmatprep.subr.bf16.mxu0 %v7209_v33  ;;  %v7270_v33 = vld [vmem:[%s9723_s15 + $0xd0] sm:$0xff]  }
 0x3a7   :  { %2870 = vmatpush1.bf16.msra.mxu0 %v7207_v11  ;;  %v7271_v11 = vld [vmem:[%s9723_s15 + $0x10] sm:$0xff]  }
 0x3a8   :  { %2871 = vmatprep.subr.bf16.mxu0 %v7215_v34  ;;  %v7272_v34 = vld [vmem:[%s9723_s15 + $0x90] sm:$0xff]  }
 0x3ab   :  { %2872 = vmatpush1.bf16.msra.mxu0 %v7213_v16  ;;  %v7273_v16 = vld [vmem:[%s9723_s15 + $0x48] sm:$0xff]  }
 0x3ac   :  { %2873 = vmatprep.subr.bf16.mxu0 %v7221_v35  ;;  %v7274_v35 = vld [vmem:[%s9723_s15 + $0xc8] sm:$0xff]  }
 0x3af   :  { %2874 = vmatpush1.bf16.msra.mxu0 %v7219_v36  ;;  %v7275_v36 = vld [vmem:[%s9723_s15 + $0x8] sm:$0xff]  }
 0x3b0   :  { %2875 = vmatprep.subr.bf16.mxu0 %v7227_v37  ;;  %v7276_v37 = vld [vmem:[%s9723_s15 + $0x88] sm:$0xff]  }
 0x3b3   :  { %2876 = vmatpush1.bf16.msra.mxu0 %v7225_v38  ;;  %v7277_v38 = vld [vmem:[%s9723_s15 + $0x40] sm:$0xff]  }
 0x3b4   :  { %2877 = vmatprep.subr.bf16.mxu0 %v7233_v39  ;;  %v7278_v39 = vld [vmem:[%s9723_s15 + $0xc0] sm:$0xff]  }
 0x3b7   :  { %2878 = vmatpush1.bf16.msra.mxu0 %v7231_v41  ;;  %v7279_v41 = vld [vmem:[%s9723_s15] sm:$0xff]  }
 0x3b8   :  { %2879 = vmatprep.subr.bf16.mxu0 %v7239_v43  ;;  %v7280_v43 = vld [vmem:[%s9723_s15 + $0x80] sm:$0xff]  }
 0x3bb   :  { %2880 = vmatpush1.bf16.msra.mxu0 %v7237_v44  ;;  %v7283_v44 = vld [vmem:[%s9724_s17 + $0x74] ss:$8 sps:$4 sm:$0xff]  }
 0x3bc   :  { %2881 = vmatprep.subr.bf16.mxu0 %v7245_v45  ;;  %v8682_v45 = vsub.s32 2, %v7608_v42 }
 0x3bf   :  { %2882 = vmatpush1.bf16.msra.mxu0 %v7243_v46  ;;  %v2685_v46 = vld [vmem:[%s9725_s12] sm:$0xf] }
 0x462   :  { %v2499_v53 = vpop.f32.mrf.mxu0 }
 0x463   :  { %v2500_v54 = vadd.f32 %v6224_v52, %v2499_v53  ;;  %v7212_v53 = vld [vmem:[%s9722_s11 + $0xcc] ss:$16 sps:$4 sm:$0xff]  }
 0x464   :  { %v6749_v55 = vpop.f32.mrf.mxu0 }
 0x465   :  { %v2505_v56 = vsel %vm2354_vm1, %v2500_v54, -inf  ;;  %v7218_v55 = vld [vmem:[%s9722_s11 + $0xac] ss:$16 sps:$4 sm:$0xff]  }
 0x466   :  { %2506 = vmax.xlane.f32.xlu0 %v2505_v56  ;;  %v2502_v57 = vpop.f32.mrf.mxu0  ;;  %v7216_v56 = vld [vmem:[%s9722_s11 + $0xa8] ss:$16 sps:$4 sm:$0xff]  }
 0x467   :  { %v7224_v57 = vld [vmem:[%s9722_s11 + $0x8c] ss:$16 sps:$4 sm:$0xff]  }
 0x468   :  { %v6750_v58 = vpop.f32.mrf.mxu0 }
 0x469   :  { %v7222_v58 = vld [vmem:[%s9722_s11 + $0x88] ss:$16 sps:$4 sm:$0xff]  }
 0x4ef   :  { %v2507_v59 = vpop.xlane.xlu0 %2506 }
 0x4f0   :  { %vm2508_vm2 = vcmp.ge.f32.partialorder %v2500_v54, %v2507_v59  ;;  %v7230_v59 = vld [vmem:[%s9722_s11 + $0x6c] ss:$16 sps:$4 sm:$0xff]  }
 0x4f1   :  { %v2509_v60 = vsel %vm2508_vm2, -1e+30, %v2500_v54 }
 0x4f2   :  { %v2510_v61 = vsel %vm2354_vm1, %v2509_v60, -inf }
 0x4f3   :  { %2511 = vmax.xlane.f32.xlu0 %v2510_v61  ;;  %v7236_v61 = vld [vmem:[%s9722_s11 + $0x4c] ss:$16 sps:$4 sm:$0xff]  }
 0x57c   :  { %v2512_v62 = vpop.xlane.xlu0 %2511 }
 0x57d   :  { %vm2513_vm3 = vcmp.ge.f32.partialorder %v2509_v60, %v2512_v62  ;;  %v7234_v62 = vld [vmem:[%s9722_s11 + $0x48] ss:$16 sps:$4 sm:$0xff]  }
 0x57e   :  { %v2514_v63 = vsel %vm2513_vm3, -1e+30, %v2509_v60  ;;  %v7228_v60 = vld [vmem:[%s9722_s11 + $0x68] ss:$16 sps:$4 sm:$0xff]  }
 0x57f   :  { %v2515_v0 = vsel %vm2354_vm1, %v2514_v63, -inf }
 0x580   :  { %2516 = vmax.xlane.f32.xlu1 %v2515_v0  ;;  %v7240_v0 = vld [vmem:[%s9722_s11 + $0x28] ss:$16 sps:$4 sm:$0xff]  }
 0x609   :  { %v2517_v1 = vpop.xlane.xlu1 %2516 }
 0x60a   :  { %vm2518_vm4 = vcmp.ge.f32.partialorder %v2514_v63, %v2517_v1  ;;  %v7248_v1 = vld [vmem:[%s9722_s11 + $0xc] ss:$16 sps:$4 sm:$0xff]  }
 0x60b   :  { %v2519_v2 = vsel %vm2518_vm4, -1e+30, %v2514_v63  ;;  %v7242_v63 = vld [vmem:[%s9722_s11 + $0x2c] ss:$16 sps:$4 sm:$0xff]  }
 0x60c   :  { %v2520_v3 = vsel %vm2354_vm1, %v2519_v2, -inf }
 0x60d   :  { %2521 = vmax.xlane.f32.xlu1 %v2520_v3  ;;  %v7370_v3 = vmov 0  }
 0x60e   :  { %2899 = vmatprep.mubr.bf16.mxu0 %v7370_v3 }
 0x696   :  { %v2522_v4 = vpop.xlane.xlu1 %2521 }
 0x697   :  { %vm2523_vm5 = vcmp.ge.f32.partialorder %v2519_v2, %v2522_v4 }
 0x698   :  { %v2524_v5 = vsel %vm2523_vm5, -1e+30, %v2519_v2  ;;  %v7246_v2 = vld [vmem:[%s9722_s11 + $0x8] ss:$16 sps:$4 sm:$0xff]  }
 0x699   :  { %v2525_v7 = vsel %vm2354_vm1, %v2524_v5, -inf }
 0x69a   :  { %2526 = vmax.xlane.f32.xlu0 %v2525_v7 }
 0x723   :  { %v2527_v8 = vpop.xlane.xlu0 %2526 }
 0x724   :  { %vm2528_vm6 = vcmp.ge.f32.partialorder %v2524_v5, %v2527_v8 }
 0x725   :  { %v2529_v9 = vsel %vm2528_vm6, -1e+30, %v2524_v5 }
 0x726   :  { %v2530_v10 = vsel %vm2354_vm1, %v2529_v9, -inf }
 0x727   :  { %2531 = vmax.xlane.f32.xlu1 %v2530_v10  ;;  %v7249_v10 = vld [vmem:[%s9723_s15 + $0x78] sm:$0xff]  }
 0x728   :  { %6667 = vmatprep.subr.bf16.mxu0 %v7249_v10 }
 0x7b0   :  { %v2532_v12 = vpop.xlane.xlu1 %2531 }
 0x7b1   :  { %vm2533_vm7 = vcmp.ge.f32.partialorder %v2500_v54, %v2532_v12  ;;  %v7250_v12 = vld [vmem:[%s9723_s15 + $0xf8] sm:$0xff]  }
 0x7b2   :  { %v2534_v13 = vsel %vm2533_vm7, %v2500_v54, -1e+30 }
 0x7b3   :  { %v2535_v14 = vsel %vm2354_vm1, %v2534_v13, -inf  ;;  %v7251_v13 = vld [vmem:[%s9723_s15 + $0x38] sm:$0xff]  }
 0x7b4   :  { %2536 = vmax.xlane.f32.xlu0 %v2535_v14  ;;  %v7252_v14 = vld [vmem:[%s9723_s15 + $0xb8] sm:$0xff]  }
 0x83d   :  { %v2537_v20 = vpop.xlane.xlu0 %2536 }
 0x83e   :  { %v2538_v21 = vsub.f32 %v2500_v54, %v2537_v20  ;;  %v7210_v54 = vld [vmem:[%s9722_s11 + $0xc8] ss:$16 sps:$4 sm:$0xff]  }
 0x83f   :  { %v7257_v20 = vld [vmem:[%s9723_s15 + $0x68] sm:$0xff]  }
 0x840   :  { %v2539_v22 = vmul.f32 1.442695, %v2538_v21  ;;  %v7258_v21 = vld [vmem:[%s9723_s15 + $0xe8] sm:$0xff]  }
 0x842   :  { %7355 = vpow2.f32 %v2539_v22  ;;  %v7259_v22 = vld [vmem:[%s9723_s15 + $0x28] sm:$0xff]  }
 0x84f   :  { %v7356_v23 = vpop.eup %7355 }
 0x850   :  { %v2541_v24 = vsel %vm2533_vm7, %v7356_v23, 0.0  ;;  %v7260_v23 = vld [vmem:[%s9723_s15 + $0xa8] sm:$0xff]  }
 0x851   :  { %v2542_v25 = vsel %vm2354_vm1, %v2541_v24, 0.0 }
 0x852   :  { %2543 = vadd.xlane.f32.xlu1 %v2542_v25  ;;  %v7262_v25 = vld [vmem:[%s9723_s15 + $0xe0] sm:$0xff]  }
 0x8db   :  { %v2544_v47 = vpop.xlane.xlu1 %2543 }
 0x8dc   :  { %7357 = vrcp.f32 %v2544_v47  ;;  %v8688_v47 = vsub.s32 3, %v7608_v42 }
 0x8e9   :  { %v7358_v48 = vpop.eup %7357 }
 0x8ea   :  { %v2546_v50 = vmul.f32 %v7358_v48, %v2541_v24  ;;  %v7261_v24 = vld [vmem:[%s9723_s15 + $0x60] sm:$0xff]   ;;  %v2690_v48 = vrot.slane %v2685_v46, %v8303_v40 }
 0x8ec   :  { %v2547_v52 = vpack.c.bf16 %v2546_v50, %v2546_v50  ;;  %v2698_v50 = vrot.slane %v2685_v46, %v8682_v45 }
 0x8ee   :  { %6768 = vmatmul.mubr.bf16.vlgmr.msra.gmra.mxu1 %v2547_v52  ;;  %v2702_v52 = vrot.slane %v2685_v46, %v8688_v47 }
 0x8ef   :  { %2909 = vmatpush1.bf16.msra.mxu1 %v7204_v51  ;;  %2940 = vmatprep.mubr.bf16.mxu1 %v7370_v3  ;;  %v2694_v51 = vrot.slane %v2685_v46, %v8309_v6 }
 0x8f0   :  { %2910 = vmatprep.subr.bf16.mxu1 %v7212_v53 }
 0x8f3   :  { %2911 = vmatpush1.bf16.msra.mxu1 %v7210_v54 }
 0x8f4   :  { %2912 = vmatprep.subr.bf16.mxu1 %v7218_v55 }
 0x8f7   :  { %2913 = vmatpush1.bf16.msra.mxu1 %v7216_v56 }
 0x8f8   :  { %2914 = vmatprep.subr.bf16.mxu1 %v7224_v57 }
 0x8fb   :  { %2915 = vmatpush1.bf16.msra.mxu1 %v7222_v58 }
 0x8fc   :  { %2916 = vmatprep.subr.bf16.mxu1 %v7230_v59 }
 0x8ff   :  { %2917 = vmatpush1.bf16.msra.mxu1 %v7228_v60 }
 0x900   :  { %2918 = vmatprep.subr.bf16.mxu1 %v7236_v61 }
 0x903   :  { %2919 = vmatpush1.bf16.msra.mxu1 %v7234_v62 }
 0x904   :  { %2920 = vmatprep.subr.bf16.mxu1 %v7242_v63 }
 0x907   :  { %2921 = vmatpush1.bf16.msra.mxu1 %v7240_v0 }
 0x908   :  { %2922 = vmatprep.subr.bf16.mxu1 %v7248_v1 }
 0x90b   :  { %2923 = vmatpush1.bf16.msra.mxu1 %v7246_v2 }
 0x90c   :  { %6689 = vmatprep.subr.bf16.mxu1 %v7250_v12 }
 0x9ae   :  { %v2646_v4 = vpop.f32.mrf.mxu1 }
 0x9af   :  { %v2652_v5 = vpack.c.bf16 %v2646_v4, %v2646_v4 }
 0x9b0   :  { %v6769_v7 = vpop.f32.mrf.mxu1 }
 0x9b1   :  { %2900 = vmatmul.mubr.bf16.vlgmr.msra.gmra.mxu0 %v2652_v5  ;;  %2941 = vmatmul.mubr.bf16.vlgmr.msra.gmra.mxu1 %v2652_v5 }
 0x9b2   :  { %v2649_v8 = vpop.f32.mrf.mxu1  ;;  %6668 = vmatpush3.bf16.msra.mxu0 %v7251_v13  ;;  %6690 = vmatpush3.bf16.msra.mxu1 %v7252_v14 }
 0x9b3   :  { %6669 = vmatprep.subr.bf16.mxu0 %v7253_v15  ;;  %6691 = vmatprep.subr.bf16.mxu1 %v7254_v17 }
 0x9b4   :  { %v6770_v9 = vpop.f32.mrf.mxu1 }
 0x9b6   :  { %6670 = vmatpush3.bf16.msra.mxu0 %v7255_v18  ;;  %6692 = vmatpush3.bf16.msra.mxu1 %v7256_v19 }
 0x9b7   :  { %6671 = vmatprep.subr.bf16.mxu0 %v7257_v20  ;;  %6693 = vmatprep.subr.bf16.mxu1 %v7258_v21 }
 0x9ba   :  { %6672 = vmatpush3.bf16.msra.mxu0 %v7259_v22  ;;  %6694 = vmatpush3.bf16.msra.mxu1 %v7260_v23 }
 0x9bb   :  { %6673 = vmatprep.subr.bf16.mxu0 %v7261_v24  ;;  %6695 = vmatprep.subr.bf16.mxu1 %v7262_v25 }
 0x9be   :  { %6674 = vmatpush3.bf16.msra.mxu0 %v7263_v26  ;;  %6696 = vmatpush3.bf16.msra.mxu1 %v7264_v27 }
 0x9bf   :  { %6675 = vmatprep.subr.bf16.mxu0 %v7265_v28  ;;  %6697 = vmatprep.subr.bf16.mxu1 %v7266_v29 }
 0x9c2   :  { %6676 = vmatpush3.bf16.msra.mxu0 %v7267_v30  ;;  %6698 = vmatpush3.bf16.msra.mxu1 %v7268_v31 }
 0x9c3   :  { %6677 = vmatprep.subr.bf16.mxu0 %v7269_v32  ;;  %6699 = vmatprep.subr.bf16.mxu1 %v7270_v33 }
 0x9c6   :  { %6678 = vmatpush3.bf16.msra.mxu0 %v7271_v11  ;;  %6700 = vmatpush3.bf16.msra.mxu1 %v7272_v34 }
 0x9c7   :  { %6679 = vmatprep.subr.bf16.mxu0 %v7273_v16  ;;  %6701 = vmatprep.subr.bf16.mxu1 %v7274_v35 }
 0x9ca   :  { %6680 = vmatpush3.bf16.msra.mxu0 %v7275_v36  ;;  %6702 = vmatpush3.bf16.msra.mxu1 %v7276_v37 }
 0x9cb   :  { %6681 = vmatprep.subr.bf16.mxu0 %v7277_v38  ;;  %6703 = vmatprep.subr.bf16.mxu1 %v7278_v39 }
 0x9ce   :  { %6682 = vmatpush3.bf16.msra.mxu0 %v7279_v41  ;;  %6704 = vmatpush3.bf16.msra.mxu1 %v7280_v43 }
 0x9cf   :  { %3545 = vmatprep.subr.bf16.mxu0 %v7283_v44 }
 0xa71   :  { %v2901_v53 = vpop.f32.mrf.mxu0  ;;  %v2942_v54 = vpop.f32.mrf.mxu1 }
 0xa72   :  { %v2902_v55 = vadd.f32 %v2901_v53, %v2690_v48  ;;  %v2943_v56 = vadd.f32 %v2942_v54, %v2698_v50 }
 0xa73   :  { %v2903_v57 = vpop.f32.mrf.mxu0  ;;  %v2944_v58 = vpop.f32.mrf.mxu1 }
 0xa74   :  { %v2949_v59 = vsel %vm2354_vm1, %v2902_v55, 0.0  ;;  %v2963_v60 = vsel %vm2354_vm1, %v2943_v56, 0.0  ;;  %v2904_v61 = vadd.f32 %v2903_v57, %v2694_v51  ;;  %v2945_v62 = vadd.f32 %v2944_v58, %v2702_v52 }
 0xa75   :  { %v2950_v63 = vrot.slane %v2949_v59, 4  ;;  %v2964_v0 = vrot.slane %v2963_v60, 4  ;;  %v2905_v1 = vpop.f32.mrf.mxu0  ;;  %v2946_v2 = vpop.f32.mrf.mxu1 }
 0xa76   :  { %v2956_v4 = vsel %vm2354_vm1, %v2904_v61, 0.0  ;;  %v2970_v5 = vsel %vm2354_vm1, %v2945_v62, 0.0 }
 0xa77   :  { %v2951_v7 = vadd.f32 %v2950_v63, %v2949_v59  ;;  %v2965_v8 = vadd.f32 %v2964_v0, %v2963_v60  ;;  %v2957_v9 = vrot.slane %v2956_v4, 4  ;;  %v2971_v10 = vrot.slane %v2970_v5, 4  ;;  %v2906_v12 = vpop.f32.mrf.mxu0  ;;  %v2947_v13 = vpop.f32.mrf.mxu1 }
 0xa79   :  { %v2952_v14 = vrot.slane %v2951_v7, 2  ;;  %v2966_v15 = vrot.slane %v2965_v8, 2  ;;  %v2958_v17 = vadd.f32 %v2957_v9, %v2956_v4  ;;  %v2972_v18 = vadd.f32 %v2971_v10, %v2970_v5 }
 0xa7b   :  { %v2953_v19 = vadd.f32 %v2952_v14, %v2951_v7  ;;  %v2967_v20 = vadd.f32 %v2966_v15, %v2965_v8  ;;  %v2959_v21 = vrot.slane %v2958_v17, 2  ;;  %v2973_v22 = vrot.slane %v2972_v18, 2 }
 0xa7d   :  { %v2954_v23 = vrot.slane %v2953_v19, 1  ;;  %v2968_v24 = vrot.slane %v2967_v20, 1  ;;  %v2960_v25 = vadd.f32 %v2959_v21, %v2958_v17  ;;  %v2974_v26 = vadd.f32 %v2973_v22, %v2972_v18 }
 0xa7f   :  { %v2955_v27 = vadd.f32 %v2954_v23, %v2953_v19  ;;  %v2969_v28 = vadd.f32 %v2968_v24, %v2967_v20  ;;  %v2961_v29 = vrot.slane %v2960_v25, 1  ;;  %v2975_v30 = vrot.slane %v2974_v26, 1  ;;  %v3033_v24 = vld [vmem:[%s9726_s13] sm:$0xf] }
 0xa81   :  { %v2977_v31 = vmul.f32 0.5, %v2955_v27  ;;  %v2979_v32 = vmul.f32 0.5, %v2969_v28  ;;  %v2962_v33 = vadd.f32 %v2961_v29, %v2960_v25  ;;  %v2976_v11 = vadd.f32 %v2975_v30, %v2974_v26  ;;  %v3059_v25 = vld [vmem:[%s9727_s14] sm:$0xf] }
 0xa82   :  { %v3038_v26 = vrot.slane %v3033_v24, %v8303_v40  ;;  %v3046_v28 = vrot.slane %v3033_v24, %v8682_v45 }
 0xa83   :  { %v2981_v34 = vsub.f32 %v2902_v55, %v2977_v31  ;;  %v2983_v16 = vsub.f32 %v2943_v56, %v2979_v32  ;;  %v2978_v35 = vmul.f32 0.5, %v2962_v33  ;;  %v2980_v36 = vmul.f32 0.5, %v2976_v11 }
 0xa84   :  { %v3042_v31 = vrot.slane %v3033_v24, %v8309_v6  ;;  %v3064_v32 = vrot.slane %v3059_v25, %v8303_v40 }
 0xa85   :  { %v2985_v37 = vmul.f32 %v2981_v34, %v2981_v34  ;;  %v2987_v38 = vmul.f32 %v2983_v16, %v2983_v16  ;;  %v2982_v39 = vsub.f32 %v2904_v61, %v2978_v35  ;;  %v8698_v41 = vsub.f32 %v2945_v62, %v2980_v36 }
 0xa86   :  { %v3050_v35 = vrot.slane %v3033_v24, %v8688_v47  ;;  %v3072_v36 = vrot.slane %v3059_v25, %v8682_v45  ;;  %v7317_v24 = vld [vmem:[%s9728_s19 + $0x30] ss:$8 sps:$4 sm:$0xff]  }
 0xa87   :  { %v2989_v43 = vsel %vm2354_vm1, %v2985_v37, 0.0  ;;  %v3003_v44 = vsel %vm2354_vm1, %v2987_v38, 0.0  ;;  %v2986_v46 = vmul.f32 %v2982_v39, %v2982_v39  ;;  %v2988_v48 = vmul.f32 %v8698_v41, %v8698_v41 }
 0xa88   :  { %v2990_v50 = vrot.slane %v2989_v43, 4  ;;  %v3004_v51 = vrot.slane %v3003_v44, 4 }
 0xa89   :  { %v2996_v52 = vsel %vm2354_vm1, %v2986_v46, 0.0  ;;  %v3010_v53 = vsel %vm2354_vm1, %v2988_v48, 0.0 }
 0xa8a   :  { %v2991_v54 = vadd.f32 %v2990_v50, %v2989_v43  ;;  %v3005_v55 = vadd.f32 %v3004_v51, %v3003_v44  ;;  %v2997_v56 = vrot.slane %v2996_v52, 4  ;;  %v3011_v57 = vrot.slane %v3010_v53, 4 }
 0xa8b   :  { %v3068_v44 = vrot.slane %v3059_v25, %v8309_v6 }
 0xa8c   :  { %v2992_v58 = vrot.slane %v2991_v54, 2  ;;  %v3006_v59 = vrot.slane %v3005_v55, 2  ;;  %v2998_v60 = vadd.f32 %v2997_v56, %v2996_v52  ;;  %v3012_v61 = vadd.f32 %v3011_v57, %v3010_v53 }
 0xa8e   :  { %v2993_v62 = vadd.f32 %v2992_v58, %v2991_v54  ;;  %v3007_v63 = vadd.f32 %v3006_v59, %v3005_v55  ;;  %v2999_v0 = vrot.slane %v2998_v60, 2  ;;  %v3013_v1 = vrot.slane %v3012_v61, 2 }
 0xa90   :  { %v2994_v2 = vrot.slane %v2993_v62, 1  ;;  %v3008_v4 = vrot.slane %v3007_v63, 1  ;;  %v3000_v5 = vadd.f32 %v2999_v0, %v2998_v60  ;;  %v3014_v7 = vadd.f32 %v3013_v1, %v3012_v61  ;;  %v7289_v0 = vld [vmem:[%s9724_s17 + $0x54] ss:$8 sps:$4 sm:$0xff]   ;;  %v7287_v1 = vld [vmem:[%s9724_s17 + $0x50] ss:$8 sps:$4 sm:$0xff]  }
 0xa92   :  { %v2995_v8 = vadd.f32 %v2994_v2, %v2993_v62  ;;  %v3009_v9 = vadd.f32 %v3008_v4, %v3007_v63  ;;  %v3001_v10 = vrot.slane %v3000_v5, 1  ;;  %v3015_v12 = vrot.slane %v3014_v7, 1  ;;  %v7284_v63 = vld [vmem:[%s9724_s17 + $0x60] ss:$8 sps:$4 sm:$0xff]   ;;  %v7292_v2 = vld [vmem:[%s9724_s17 + $0x44] ss:$8 sps:$4 sm:$0xff]  }
 0xa93   :  { %v7290_v4 = vld [vmem:[%s9724_s17 + $0x40] ss:$8 sps:$4 sm:$0xff]  }
 0xa94   :  { %v3017_v13 = vmul.f32 0.5, %v2995_v8  ;;  %v3019_v14 = vmul.f32 0.5, %v3009_v9  ;;  %v3002_v15 = vadd.f32 %v3001_v10, %v3000_v5  ;;  %v3016_v17 = vadd.f32 %v3015_v12, %v3014_v7  ;;  %v7293_v5 = vld [vmem:[%s9724_s17 + $0x30] ss:$8 sps:$4 sm:$0xff]   ;;  %v7298_v7 = vld [vmem:[%s9724_s17 + $0x24] ss:$8 sps:$4 sm:$0xff]  }
 0xa95   :  { %v7296_v8 = vld [vmem:[%s9724_s17 + $0x20] ss:$8 sps:$4 sm:$0xff]   ;;  %v7301_v9 = vld [vmem:[%s9724_s17 + $0x14] ss:$8 sps:$4 sm:$0xff]   ;;  %v7299_v10 = vld [vmem:[%s9724_s17 + $0x10] ss:$8 sps:$4 sm:$0xff]  }
 0xa96   :  { %v3021_v18 = vadd.f32 1e-05, %v3017_v13  ;;  %v3023_v19 = vadd.f32 1e-05, %v3019_v14  ;;  %v3018_v20 = vmul.f32 0.5, %v3002_v15  ;;  %v3020_v21 = vmul.f32 0.5, %v3016_v17 }
 0xa97   :  { %v7304_v12 = vld [vmem:[%s9724_s17 + $0x4] ss:$8 sps:$4 sm:$0xff]   ;;  %v7302_v13 = vld [vmem:[%s9724_s17] ss:$8 sps:$4 sm:$0xff]   ;;  %v7305_v14 = vld [vmem:[%s9728_s19 + $0x70] ss:$8 sps:$4 sm:$0xff]  }
 0xa98   :  { %7359 = vrsqrt.f32 %v3021_v18  ;;  %v3022_v22 = vadd.f32 1e-05, %v3018_v20  ;;  %v3024_v23 = vadd.f32 1e-05, %v3020_v21  ;;  %v7307_v15 = vld [vmem:[%s9728_s19 + $0x74] ss:$8 sps:$4 sm:$0xff]  }
 0xa99   :  { %7361 = vrsqrt.f32 %v3023_v19  ;;  %v7310_v17 = vld [vmem:[%s9728_s19 + $0x64] ss:$8 sps:$4 sm:$0xff]   ;;  %3794 = vmatprep.subr.bf16.mxu1 %v7307_v15  ;;  %v7308_v18 = vld [vmem:[%s9728_s19 + $0x60] ss:$8 sps:$4 sm:$0xff]   ;;  %v7313_v19 = vld [vmem:[%s9728_s19 + $0x54] ss:$8 sps:$4 sm:$0xff]  }
 0xa9a   :  { %7363 = vrsqrt.f32 %v3022_v22  ;;  %v7311_v20 = vld [vmem:[%s9728_s19 + $0x50] ss:$8 sps:$4 sm:$0xff]   ;;  %v7316_v21 = vld [vmem:[%s9728_s19 + $0x44] ss:$8 sps:$4 sm:$0xff]   ;;  %v7314_v22 = vld [vmem:[%s9728_s19 + $0x40] ss:$8 sps:$4 sm:$0xff]  }
 0xa9b   :  { %7365 = vrsqrt.f32 %v3024_v23  ;;  %v7319_v23 = vld [vmem:[%s9728_s19 + $0x34] ss:$8 sps:$4 sm:$0xff]   ;;  %v3927_v15 = vld [vmem:[%s9730_s21 + $0x2c0] sm:$0xff] }
 0xaa5   :  { %v7360_v27 = vpop.eup %7359 }
 0xaa6   :  { %v7362_v29 = vpop.eup %7361  ;;  %v3029_v30 = vmul.f32 %v7360_v27, %v2981_v34  ;;  %v3076_v34 = vrot.slane %v3059_v25, %v8688_v47  ;;  %v7322_v25 = vld [vmem:[%s9728_s19 + $0x24] ss:$8 sps:$4 sm:$0xff]   ;;  %v7325_v27 = vld [vmem:[%s9728_s19 + $0x14] ss:$8 sps:$4 sm:$0xff]  }
 0xaa7   :  { %v7364_v33 = vpop.eup %7363  ;;  %v3031_v11 = vmul.f32 %v7362_v29, %v2983_v16  ;;  %v7328_v29 = vld [vmem:[%s9728_s19 + $0x4] ss:$8 sps:$4 sm:$0xff]  }
 0xaa8   :  { %v7366_v37 = vpop.eup %7365  ;;  %v3055_v38 = vmul.f32 %v3038_v26, %v3029_v30  ;;  %v3030_v43 = vmul.f32 %v7364_v33, %v2982_v39  ;;  %v7281_v39 = vld [vmem:[%s9724_s17 + $0x70] ss:$8 sps:$4 sm:$0xff]   ;;  %v7320_v26 = vld [vmem:[%s9728_s19 + $0x20] ss:$8 sps:$4 sm:$0xff]   ;;  %v7334_v33 = vld [vmem:[%s9728_s19 + $0xe4] ss:$8 sps:$4 sm:$0xff]  }
 0xaa9   :  { %v3057_v46 = vmul.f32 %v3046_v28, %v3031_v11  ;;  %v3032_v48 = vmul.f32 %v7366_v37, %v8698_v41  ;;  %v7286_v41 = vld [vmem:[%s9724_s17 + $0x64] ss:$8 sps:$4 sm:$0xff]   ;;  %v7323_v28 = vld [vmem:[%s9728_s19 + $0x10] ss:$8 sps:$4 sm:$0xff]   ;;  %v7326_v30 = vld [vmem:[%s9728_s19] ss:$8 sps:$4 sm:$0xff]  }
 0xaaa   :  { %v3056_v50 = vmul.f32 %v3042_v31, %v3030_v43  ;;  %v3081_v51 = vadd.f32 %v3064_v32, %v3055_v38  ;;  %v7331_v31 = vld [vmem:[%s9728_s19 + $0xf4] ss:$8 sps:$4 sm:$0xff]   ;;  %v7329_v32 = vld [vmem:[%s9728_s19 + $0xf0] ss:$8 sps:$4 sm:$0xff]   ;;  %v7332_v11 = vld [vmem:[%s9728_s19 + $0xe0] ss:$8 sps:$4 sm:$0xff]  }
 0xaab   :  { %v3058_v52 = vmul.f32 %v3050_v35, %v3032_v48  ;;  %v3083_v53 = vadd.f32 %v3072_v36, %v3057_v46  ;;  %v7337_v35 = vld [vmem:[%s9728_s19 + $0xd4] ss:$8 sps:$4 sm:$0xff]   ;;  %v7335_v36 = vld [vmem:[%s9728_s19 + $0xd0] ss:$8 sps:$4 sm:$0xff]   ;;  %v7340_v37 = vld [vmem:[%s9728_s19 + $0xc4] ss:$8 sps:$4 sm:$0xff]  }
 0xaac   :  { %v3082_v54 = vadd.f32 %v3068_v44, %v3056_v50  ;;  %v3085_v55 = vmax.f32 %v3081_v51, 0.0  ;;  %v7338_v38 = vld [vmem:[%s9728_s19 + $0xc0] ss:$8 sps:$4 sm:$0xff]   ;;  %v7343_v43 = vld [vmem:[%s9728_s19 + $0xb4] ss:$8 sps:$4 sm:$0xff]  }
 0xaad   :  { %v3084_v16 = vadd.f32 %v3076_v34, %v3058_v52  ;;  %v3087_v57 = vmax.f32 %v3083_v53, 0.0  ;;  %v7341_v44 = vld [vmem:[%s9728_s19 + $0xb0] ss:$8 sps:$4 sm:$0xff]   ;;  %v7346_v46 = vld [vmem:[%s9728_s19 + $0xa4] ss:$8 sps:$4 sm:$0xff]  }
 0xaae   :  { %v3086_v56 = vmax.f32 %v3082_v54, 0.0  ;;  %v3089_v61 = vpack.c.bf16 %v3085_v55, %v3085_v55  ;;  %v7344_v48 = vld [vmem:[%s9728_s19 + $0xa0] ss:$8 sps:$4 sm:$0xff]  }
 0xaaf   :  { %v3088_v58 = vmax.f32 %v3084_v16, 0.0  ;;  %v3091_v62 = vpack.c.bf16 %v3087_v57, %v3087_v57  ;;  %v6273_v51 = vld [vmem:[%s9729_s16] ss:$0 sm:$0xff] }
 0xab0   :  { %v3090_v59 = vpack.c.bf16 %v3086_v56, %v3086_v56 }
 0xab1   :  { %v3092_v60 = vpack.c.bf16 %v3088_v58, %v3088_v58 }
 0xab2   :  { %3388 = vmatprep.mubr.bf16.mxu0 %v3090_v59 }
 0xab3   :  { %3428 = vmatprep.mubr.bf16.mxu1 %v3092_v60  ;;  %3389 = vmatmul.mubr.bf16.vlgmr.msra.gmra.mxu0 %v3089_v61  ;;  %v7349_v61 = vld [vmem:[%s9728_s19 + $0x94] ss:$8 sps:$4 sm:$0xff]  }
 0xab4   :  { %3429 = vmatmul.mubr.bf16.vlgmr.msra.gmra.mxu1 %v3091_v62  ;;  %3546 = vmatpush1.bf16.msra.mxu0 %v7281_v39  ;;  %v7352_v62 = vld [vmem:[%s9728_s19 + $0x84] ss:$8 sps:$4 sm:$0xff]  }
 0xab5   :  { %3547 = vmatprep.subr.bf16.mxu0 %v7286_v41  ;;  %3577 = vmatprep.mubr.bf16.mxu0 %v7370_v3  ;;  %v7295_v3 = vld [vmem:[%s9724_s17 + $0x34] ss:$8 sps:$4 sm:$0xff]   ;;  %v7347_v41 = vld [vmem:[%s9728_s19 + $0x90] ss:$8 sps:$4 sm:$0xff]  }
 0xab6   :  { %3795 = vmatpush1.bf16.msra.mxu1 %v7305_v14  ;;  %v3919_v14 = vld [vmem:[%s9730_s21 + $0x280] sm:$0xff] }
 0xab7   :  { %3796 = vmatprep.subr.bf16.mxu1 %v7310_v17  ;;  %v6435_v17 = vcombine.high %v3919_v14, %v3927_v15 }
 0xab8   :  { %3548 = vmatpush1.bf16.msra.mxu0 %v7284_v63  ;;  %v7350_v63 = vld [vmem:[%s9728_s19 + $0x80] ss:$8 sps:$4 sm:$0xff]  }
 0xab9   :  { %3549 = vmatprep.subr.bf16.mxu0 %v7289_v0  ;;  %v3951_v0 = vld [vmem:[%s9730_s21 + $0x380] sm:$0xff] }
 0xaba   :  { %3797 = vmatpush1.bf16.msra.mxu1 %v7308_v18  ;;  %v6434_v18 = vcombine.low %v3919_v14, %v3927_v15 }
 0xabb   :  { %3798 = vmatprep.subr.bf16.mxu1 %v7313_v19  ;;  %v3903_v19 = vld [vmem:[%s9730_s21 + $0x200] sm:$0xff] }
 0xabc   :  { %3550 = vmatpush1.bf16.msra.mxu0 %v7287_v1  ;;  %v3959_v1 = vld [vmem:[%s9730_s21 + $0x3c0] sm:$0xff] }
 0xabd   :  { %3551 = vmatprep.subr.bf16.mxu0 %v7292_v2  ;;  %v8875_v2 = vld [vmem:[%s9730_s21 + $0x388] sm:$0xff] }
 0xabe   :  { %3799 = vmatpush1.bf16.msra.mxu1 %v7311_v20  ;;  %v3911_v20 = vld [vmem:[%s9730_s21 + $0x240] sm:$0xff] }
 0xabf   :  { %3800 = vmatprep.subr.bf16.mxu1 %v7316_v21  ;;  %v6419_v21 = vcombine.high %v3903_v19, %v3911_v20 }
 0xac0   :  { %3552 = vmatpush1.bf16.msra.mxu0 %v7290_v4  ;;  %v6466_v4 = vcombine.low %v3951_v0, %v3959_v1 }
 0xac1   :  { %3553 = vmatprep.subr.bf16.mxu0 %v7295_v3  ;;  %v6467_v3 = vcombine.high %v3951_v0, %v3959_v1 }
 0xac2   :  { %3801 = vmatpush1.bf16.msra.mxu1 %v7314_v22  ;;  %v6418_v22 = vcombine.low %v3903_v19, %v3911_v20  ;;  %v3944_v19 = vld [vmem:[%s9730_s21 + $0x348] sm:$0xff] }
 0xac3   :  { %3802 = vmatprep.subr.bf16.mxu1 %v7319_v23  ;;  %v3887_v23 = vld [vmem:[%s9730_s21 + $0x180] sm:$0xff] }
 0xac4   :  { %3554 = vmatpush1.bf16.msra.mxu0 %v7293_v5  ;;  %v8880_v5 = vld [vmem:[%s9730_s21 + $0x3c8] sm:$0xff] }
 0xac5   :  { %3555 = vmatprep.subr.bf16.mxu0 %v7298_v7  ;;  %v3935_v7 = vld [vmem:[%s9730_s21 + $0x300] sm:$0xff] }
 0xac6   :  { %3803 = vmatpush1.bf16.msra.mxu1 %v7317_v24  ;;  %v3895_v24 = vld [vmem:[%s9730_s21 + $0x1c0] sm:$0xff] }
 0xac7   :  { %3804 = vmatprep.subr.bf16.mxu1 %v7322_v25  ;;  %v6403_v25 = vcombine.high %v3887_v23, %v3895_v24 }
 0xac8   :  { %3556 = vmatpush1.bf16.msra.mxu0 %v7296_v8  ;;  %v3943_v8 = vld [vmem:[%s9730_s21 + $0x340] sm:$0xff] }
 0xac9   :  { %3557 = vmatprep.subr.bf16.mxu0 %v7301_v9  ;;  %v6468_v9 = vcombine.low %v8875_v2, %v8880_v5 }
 0xaca   :  { %3805 = vmatpush1.bf16.msra.mxu1 %v7320_v26  ;;  %v6402_v26 = vcombine.low %v3887_v23, %v3895_v24  ;;  %v3920_v24 = vld [vmem:[%s9730_s21 + $0x288] sm:$0xff] }
 0xacb   :  { %3806 = vmatprep.subr.bf16.mxu1 %v7325_v27  ;;  %v3871_v27 = vld [vmem:[%s9730_s21 + $0x100] sm:$0xff] }
 0xacc   :  { %3558 = vmatpush1.bf16.msra.mxu0 %v7299_v10  ;;  %v6469_v10 = vcombine.high %v8875_v2, %v8880_v5  ;;  %v3888_v2 = vld [vmem:[%s9730_s21 + $0x188] sm:$0xff] }
 0xacd   :  { %3559 = vmatprep.subr.bf16.mxu0 %v7304_v12  ;;  %v6451_v12 = vcombine.high %v3935_v7, %v3943_v8  ;;  %v3896_v5 = vld [vmem:[%s9730_s21 + $0x1c8] sm:$0xff] }
 0xace   :  { %3807 = vmatpush1.bf16.msra.mxu1 %v7323_v28  ;;  %v3879_v28 = vld [vmem:[%s9730_s21 + $0x140] sm:$0xff] }
 0xacf   :  { %3808 = vmatprep.subr.bf16.mxu1 %v7328_v29  ;;  %v6387_v29 = vcombine.high %v3871_v27, %v3879_v28 }
 0xad0   :  { %3560 = vmatpush1.bf16.msra.mxu0 %v7302_v13  ;;  %v6450_v13 = vcombine.low %v3935_v7, %v3943_v8 }
 0xad1   :  { %5459 = vmatprep.subr.bf16.mxu0 %v6467_v3 }
 0xad2   :  { %3809 = vmatpush1.bf16.msra.mxu1 %v7326_v30  ;;  %v6386_v30 = vcombine.low %v3871_v27, %v3879_v28  ;;  %v3904_v28 = vld [vmem:[%s9730_s21 + $0x208] sm:$0xff] }
 0xad3   :  { %3810 = vmatprep.subr.bf16.mxu1 %v7331_v31  ;;  %v3855_v31 = vld [vmem:[%s9730_s21 + $0x80] sm:$0xff] }
 0xad6   :  { %3811 = vmatpush2.bf16.msra.mxu1 %v7329_v32  ;;  %v3863_v32 = vld [vmem:[%s9730_s21 + $0xc0] sm:$0xff] }
 0xad7   :  { %3812 = vmatprep.subr.bf16.mxu1 %v7334_v33  ;;  %v6371_v33 = vcombine.high %v3855_v31, %v3863_v32 }
 0xada   :  { %3813 = vmatpush2.bf16.msra.mxu1 %v7332_v11  ;;  %v6370_v11 = vcombine.low %v3855_v31, %v3863_v32  ;;  %v6405_v32 = vcombine.high %v3888_v2, %v3896_v5 }
 0xadb   :  { %3814 = vmatprep.subr.bf16.mxu1 %v7337_v35  ;;  %v3839_v35 = vld [vmem:[%s9730_s21] sm:$0xff] }
 0xade   :  { %3815 = vmatpush2.bf16.msra.mxu1 %v7335_v36  ;;  %v3847_v36 = vld [vmem:[%s9730_s21 + $0x40] sm:$0xff] }
 0xadf   :  { %3816 = vmatprep.subr.bf16.mxu1 %v7340_v37  ;;  %v6355_v37 = vcombine.high %v3839_v35, %v3847_v36 }
 0xae2   :  { %3817 = vmatpush2.bf16.msra.mxu1 %v7338_v38  ;;  %v6354_v38 = vcombine.low %v3839_v35, %v3847_v36  ;;  %v6404_v35 = vcombine.low %v3888_v2, %v3896_v5  ;;  %v3961_v2 = vld [vmem:[%s9730_s21 + $0x3d0] sm:$0xff]  ;;  %v3954_v5 = vld [vmem:[%s9730_s21 + $0x398] sm:$0xff] }
 0xae3   :  { %3818 = vmatprep.subr.bf16.mxu1 %v7343_v43  ;;  %v4079_v43 = vld [vmem:[%s9730_s21 + $0x780] sm:$0xff] }
 0xae6   :  { %3819 = vmatpush2.bf16.msra.mxu1 %v7341_v44  ;;  %v4087_v44 = vld [vmem:[%s9730_s21 + $0x7c0] sm:$0xff] }
 0xae7   :  { %3820 = vmatprep.subr.bf16.mxu1 %v7346_v46  ;;  %v6595_v46 = vcombine.high %v4079_v43, %v4087_v44 }
 0xaea   :  { %3821 = vmatpush2.bf16.msra.mxu1 %v7344_v48  ;;  %v6594_v48 = vcombine.low %v4079_v43, %v4087_v44 }
 0xaeb   :  { %3822 = vmatprep.subr.bf16.mxu1 %v7349_v61 }
 0xaee   :  { %3823 = vmatpush2.bf16.msra.mxu1 %v7347_v41 }
 0xaef   :  { %3824 = vmatprep.subr.bf16.mxu1 %v7352_v62  ;;  %v3999_v62 = vld [vmem:[%s9730_s21 + $0x500] sm:$0xff] }
 0xaf2   :  { %3825 = vmatpush2.bf16.msra.mxu1 %v7350_v63  ;;  %v4007_v63 = vld [vmem:[%s9730_s21 + $0x540] sm:$0xff] }
 0xaf3   :  { %5500 = vmatprep.subr.bf16.mxu1 %v6469_v10  ;;  %v6515_v0 = vcombine.high %v3999_v62, %v4007_v63  ;;  %v6514_v1 = vcombine.low %v3999_v62, %v4007_v63 }
 0xb73   :  { %v6683_v34 = vpop.f32.mrf.mxu0 }
 0xb74   :  { %v6705_v50 = vpop.f32.mrf.mxu1 }
 0xb75   :  { %v6684_v52 = vpop.f32.mrf.mxu0 }
 0xb76   :  { %v6685_v53 = vadd.f32 %v6684_v52, %v6683_v34  ;;  %v6706_v54 = vpop.f32.mrf.mxu1  ;;  %v4063_v34 = vld [vmem:[%s9730_s21 + $0x700] sm:$0xff] }
 0xb77   :  { %v6686_v16 = vpop.f32.mrf.mxu0  ;;  %v6707_v56 = vadd.f32 %v6706_v54, %v6705_v50  ;;  %v4071_v50 = vld [vmem:[%s9730_s21 + $0x740] sm:$0xff] }
 0xb78   :  { %v3391_v55 = vadd.f32 %v6685_v53, %v6273_v51  ;;  %v6708_v57 = vpop.f32.mrf.mxu1  ;;  %v6579_v51 = vcombine.high %v4063_v34, %v4071_v50  ;;  %v6578_v52 = vcombine.low %v4063_v34, %v4071_v50  ;;  %v4047_v53 = vld [vmem:[%s9730_s21 + $0x680] sm:$0xff] }
 0xb79   :  { %v6687_v58 = vpop.f32.mrf.mxu0  ;;  %v4055_v54 = vld [vmem:[%s9730_s21 + $0x6c0] sm:$0xff] }
 0xb7a   :  { %v3431_v59 = vadd.f32 %v6707_v56, %v3391_v55  ;;  %v6709_v39 = vpop.f32.mrf.mxu1  ;;  %v6563_v16 = vcombine.high %v4047_v53, %v4055_v54  ;;  %v6562_v55 = vcombine.low %v4047_v53, %v4055_v54  ;;  %v4031_v56 = vld [vmem:[%s9730_s21 + $0x600] sm:$0xff] }
 0xb7b   :  { %v4039_v57 = vld [vmem:[%s9730_s21 + $0x640] sm:$0xff] }
 0xb7c   :  { %v3436_v60 = vpack.c.bf16 %v3431_v59, %v3431_v59  ;;  %v6547_v58 = vcombine.high %v4031_v56, %v4039_v57  ;;  %v6546_v59 = vcombine.low %v4031_v56, %v4039_v57  ;;  %v4015_v39 = vld [vmem:[%s9730_s21 + $0x580] sm:$0xff] }
 0xb7e   :  { %3578 = vmatmul.mubr.bf16.vlgmr.msra.gmra.mxu0 %v3436_v60  ;;  %v4023_v60 = vld [vmem:[%s9730_s21 + $0x5c0] sm:$0xff] }
 0xb7f   :  { %5460 = vmatpush1.bf16.msra.mxu0 %v6466_v4  ;;  %v6531_v61 = vcombine.high %v4015_v39, %v4023_v60  ;;  %v6530_v41 = vcombine.low %v4015_v39, %v4023_v60  ;;  %v3453_v4 = vld [vmem:[%s9731_s18] sm:$0x3] }
 0xb80   :  { %5461 = vmatprep.subr.bf16.mxu0 %v6451_v12  ;;  %v3458_v3 = vrot.slane %v3453_v4, %v8303_v40  ;;  %v3462_v7 = vrot.slane %v3453_v4, %v8309_v6 }
 0xb83   :  { %5462 = vmatpush1.bf16.msra.mxu0 %v6450_v13 }
 0xb84   :  { %5463 = vmatprep.subr.bf16.mxu0 %v6435_v17 }
 0xb87   :  { %5464 = vmatpush1.bf16.msra.mxu0 %v6434_v18  ;;  %v3936_v18 = vld [vmem:[%s9730_s21 + $0x308] sm:$0xff] }
 0xb88   :  { %5465 = vmatprep.subr.bf16.mxu0 %v6419_v21  ;;  %v6453_v23 = vcombine.high %v3936_v18, %v3944_v19 }
 0xb8b   :  { %5466 = vmatpush1.bf16.msra.mxu0 %v6418_v22 }
 0xb8c   :  { %5467 = vmatprep.subr.bf16.mxu0 %v6403_v25  ;;  %v3928_v25 = vld [vmem:[%s9730_s21 + $0x2c8] sm:$0xff] }
 0xb8d   :  { %v6437_v27 = vcombine.high %v3920_v24, %v3928_v25 }
 0xb8f   :  { %5468 = vmatpush1.bf16.msra.mxu0 %v6402_v26  ;;  %v6452_v26 = vcombine.low %v3936_v18, %v3944_v19  ;;  %v3992_v19 = vld [vmem:[%s9730_s21 + $0x4c8] sm:$0xff] }
 0xb90   :  { %5469 = vmatprep.subr.bf16.mxu0 %v6387_v29  ;;  %v3912_v29 = vld [vmem:[%s9730_s21 + $0x248] sm:$0xff] }
 0xb91   :  { %v6421_v31 = vcombine.high %v3904_v28, %v3912_v29 }
 0xb93   :  { %5470 = vmatpush1.bf16.msra.mxu0 %v6386_v30  ;;  %v6436_v30 = vcombine.low %v3920_v24, %v3928_v25  ;;  %v3975_v24 = vld [vmem:[%s9730_s21 + $0x440] sm:$0xff]  ;;  %v3968_v25 = vld [vmem:[%s9730_s21 + $0x408] sm:$0xff] }
 0xb94   :  { %5471 = vmatprep.subr.bf16.mxu0 %v6371_v33  ;;  %v3872_v33 = vld [vmem:[%s9730_s21 + $0x108] sm:$0xff] }
 0xb97   :  { %5472 = vmatpush1.bf16.msra.mxu0 %v6370_v11  ;;  %v3880_v11 = vld [vmem:[%s9730_s21 + $0x148] sm:$0xff] }
 0xb98   :  { %5473 = vmatprep.subr.bf16.mxu0 %v6355_v37  ;;  %v6389_v36 = vcombine.high %v3872_v33, %v3880_v11  ;;  %v3856_v37 = vld [vmem:[%s9730_s21 + $0x88] sm:$0xff]  ;;  %v6388_v43 = vcombine.low %v3872_v33, %v3880_v11 }
 0xb9b   :  { %5474 = vmatpush1.bf16.msra.mxu0 %v6354_v38  ;;  %v3864_v38 = vld [vmem:[%s9730_s21 + $0xc8] sm:$0xff] }
 0xb9c   :  { %5475 = vmatprep.subr.bf16.mxu0 %v6595_v46  ;;  %v6373_v44 = vcombine.high %v3856_v37, %v3864_v38  ;;  %v3840_v46 = vld [vmem:[%s9730_s21 + $0x8] sm:$0xff]  ;;  %v6372_v34 = vcombine.low %v3856_v37, %v3864_v38 }
 0xb9f   :  { %5476 = vmatpush2.bf16.msra.mxu0 %v6594_v48  ;;  %v3848_v48 = vld [vmem:[%s9730_s21 + $0x48] sm:$0xff] }
 0xba0   :  { %5477 = vmatprep.subr.bf16.mxu0 %v6579_v51  ;;  %v6357_v50 = vcombine.high %v3840_v46, %v3848_v48  ;;  %v4080_v51 = vld [vmem:[%s9730_s21 + $0x788] sm:$0xff]  ;;  %v6356_v53 = vcombine.low %v3840_v46, %v3848_v48 }
 0xba3   :  { %5478 = vmatpush2.bf16.msra.mxu0 %v6578_v52  ;;  %v4088_v52 = vld [vmem:[%s9730_s21 + $0x7c8] sm:$0xff] }
 0xba4   :  { %5479 = vmatprep.subr.bf16.mxu0 %v6563_v16  ;;  %v6597_v54 = vcombine.high %v4080_v51, %v4088_v52  ;;  %v4064_v16 = vld [vmem:[%s9730_s21 + $0x708] sm:$0xff]  ;;  %v6596_v56 = vcombine.low %v4080_v51, %v4088_v52  ;;  %v3937_v52 = vld [vmem:[%s9730_s21 + $0x310] sm:$0xff] }
 0xba7   :  { %5480 = vmatpush2.bf16.msra.mxu0 %v6562_v55  ;;  %v4072_v55 = vld [vmem:[%s9730_s21 + $0x748] sm:$0xff] }
 0xba8   :  { %5481 = vmatprep.subr.bf16.mxu0 %v6547_v58  ;;  %v6581_v57 = vcombine.high %v4064_v16, %v4072_v55  ;;  %v4048_v58 = vld [vmem:[%s9730_s21 + $0x688] sm:$0xff]  ;;  %v6580_v39 = vcombine.low %v4064_v16, %v4072_v55  ;;  %v3938_v16 = vld [vmem:[%s9730_s21 + $0x318] sm:$0xff] }
 0xba9   :  { %v3946_v55 = vld [vmem:[%s9730_s21 + $0x358] sm:$0xff] }
 0xbab   :  { %5482 = vmatpush2.bf16.msra.mxu0 %v6546_v59  ;;  %v4056_v59 = vld [vmem:[%s9730_s21 + $0x6c8] sm:$0xff] }
 0xbac   :  { %5483 = vmatprep.subr.bf16.mxu0 %v6531_v61  ;;  %v6565_v60 = vcombine.high %v4048_v58, %v4056_v59  ;;  %v4032_v61 = vld [vmem:[%s9730_s21 + $0x608] sm:$0xff]  ;;  %v6564_v62 = vcombine.low %v4048_v58, %v4056_v59  ;;  %v3921_v58 = vld [vmem:[%s9730_s21 + $0x290] sm:$0xff] }
 0xbaf   :  { %5484 = vmatpush2.bf16.msra.mxu0 %v6530_v41  ;;  %v4040_v41 = vld [vmem:[%s9730_s21 + $0x648] sm:$0xff] }
 0xbb0   :  { %5485 = vmatprep.subr.bf16.mxu0 %v6515_v0  ;;  %v6549_v63 = vcombine.high %v4032_v61, %v4040_v41  ;;  %v4016_v0 = vld [vmem:[%s9730_s21 + $0x588] sm:$0xff]  ;;  %v6548_v4 = vcombine.low %v4032_v61, %v4040_v41  ;;  %v3922_v61 = vld [vmem:[%s9730_s21 + $0x298] sm:$0xff] }
 0xbb1   :  { %v3930_v41 = vld [vmem:[%s9730_s21 + $0x2d8] sm:$0xff] }
 0xbb3   :  { %5486 = vmatpush2.bf16.msra.mxu0 %v6514_v1  ;;  %v4024_v1 = vld [vmem:[%s9730_s21 + $0x5c8] sm:$0xff] }
 0xc3e   :  { %v3579_v8 = vpop.f32.mrf.mxu0 }
 0xc3f   :  { %v3580_v10 = vadd.f32 %v3579_v8, %v3458_v3  ;;  %v6533_v3 = vcombine.high %v4016_v0, %v4024_v1  ;;  %v4008_v8 = vld [vmem:[%s9730_s21 + $0x548] sm:$0xff] }
 0xc40   :  { %v3581_v12 = vpop.f32.mrf.mxu0 }
 0xc41   :  { %v3582_v13 = vadd.f32 %v3581_v12, %v3462_v7  ;;  %v3586_v14 = vmax.f32 %v3580_v10, 0.0  ;;  %v4000_v7 = vld [vmem:[%s9730_s21 + $0x508] sm:$0xff]  ;;  %v6532_v10 = vcombine.low %v4016_v0, %v4024_v1  ;;  %v6441_v1 = vcombine.high %v3922_v61, %v3930_v41 }
 0xc42   :  { %v3583_v15 = vpop.f32.mrf.mxu0  ;;  %v6517_v12 = vcombine.high %v4000_v7, %v4008_v8 }
 0xc43   :  { %v3587_v17 = vmax.f32 %v3582_v13, 0.0  ;;  %v3588_v22 = vpack.c.bf16 %v3586_v14, %v3586_v14  ;;  %v6516_v13 = vcombine.low %v4000_v7, %v4008_v8  ;;  %v3983_v14 = vld [vmem:[%s9730_s21 + $0x480] sm:$0xff]  ;;  %v3906_v7 = vld [vmem:[%s9730_s21 + $0x218] sm:$0xff] }
 0xc44   :  { %v3584_v20 = vpop.f32.mrf.mxu0  ;;  %v3991_v15 = vld [vmem:[%s9730_s21 + $0x4c0] sm:$0xff]  ;;  %v3914_v8 = vld [vmem:[%s9730_s21 + $0x258] sm:$0xff] }
 0xc45   :  { %v3589_v21 = vpack.c.bf16 %v3587_v17, %v3587_v17  ;;  %v3984_v17 = vld [vmem:[%s9730_s21 + $0x488] sm:$0xff]  ;;  %v6499_v18 = vcombine.high %v3983_v14, %v3991_v15  ;;  %v6498_v20 = vcombine.low %v3983_v14, %v3991_v15  ;;  %v6425_v14 = vcombine.high %v3906_v7, %v3914_v8  ;;  %v3889_v15 = vld [vmem:[%s9730_s21 + $0x190] sm:$0xff] }
 0xc47   :  { %3826 = vmatprep.mubr.bf16.mxu1 %v3589_v21  ;;  %v6500_v21 = vcombine.low %v3984_v17, %v3992_v19  ;;  %5487 = vmatprep.subr.bf16.mxu0 %v6499_v18  ;;  %v3890_v18 = vld [vmem:[%s9730_s21 + $0x198] sm:$0xff] }
 0xc48   :  { %3827 = vmatmul.mubr.bf16.vlgmr.msra.gmra.mxu1 %v3588_v22  ;;  %v6501_v22 = vcombine.high %v3984_v17, %v3992_v19  ;;  %5488 = vmatpush2.bf16.msra.mxu0 %v6498_v20  ;;  %v3897_v17 = vld [vmem:[%s9730_s21 + $0x1d0] sm:$0xff]  ;;  %v3898_v19 = vld [vmem:[%s9730_s21 + $0x1d8] sm:$0xff] }
 0xc49   :  { %5501 = vmatpush1.bf16.msra.mxu1 %v6468_v9  ;;  %v6420_v9 = vcombine.low %v3904_v28, %v3912_v29 }
 0xc4a   :  { %5502 = vmatprep.subr.bf16.mxu1 %v6453_v23  ;;  %v3967_v23 = vld [vmem:[%s9730_s21 + $0x400] sm:$0xff] }
 0xc4b   :  { %v6482_v28 = vcombine.low %v3967_v23, %v3975_v24 }
 0xc4d   :  { %5503 = vmatpush1.bf16.msra.mxu1 %v6452_v26  ;;  %v6483_v26 = vcombine.high %v3967_v23, %v3975_v24  ;;  %v6409_v23 = vcombine.high %v3890_v18, %v3898_v19  ;;  %v3873_v24 = vld [vmem:[%s9730_s21 + $0x110] sm:$0xff] }
 0xc4e   :  { %5504 = vmatprep.subr.bf16.mxu1 %v6437_v27  ;;  %v3976_v27 = vld [vmem:[%s9730_s21 + $0x448] sm:$0xff] }
 0xc4f   :  { %v6484_v29 = vcombine.low %v3968_v25, %v3976_v27  ;;  %5489 = vmatprep.subr.bf16.mxu0 %v6483_v26  ;;  %v3874_v26 = vld [vmem:[%s9730_s21 + $0x118] sm:$0xff] }
 0xc50   :  { %5490 = vmatpush2.bf16.msra.mxu0 %v6482_v28  ;;  %v6406_v28 = vcombine.low %v3889_v15, %v3897_v17 }
 0xc51   :  { %5505 = vmatpush1.bf16.msra.mxu1 %v6436_v30  ;;  %v6485_v30 = vcombine.high %v3968_v25, %v3976_v27  ;;  %v3881_v25 = vld [vmem:[%s9730_s21 + $0x150] sm:$0xff]  ;;  %v3882_v27 = vld [vmem:[%s9730_s21 + $0x158] sm:$0xff] }
 0xc52   :  { %5506 = vmatprep.subr.bf16.mxu1 %v6421_v31  ;;  %v3953_v31 = vld [vmem:[%s9730_s21 + $0x390] sm:$0xff] }
 0xc53   :  { %v6470_v33 = vcombine.low %v3953_v31, %v3961_v2 }
 0xc55   :  { %5507 = vmatpush1.bf16.msra.mxu1 %v6420_v9  ;;  %v6471_v9 = vcombine.high %v3953_v31, %v3961_v2  ;;  %v6393_v31 = vcombine.high %v3874_v26, %v3882_v27  ;;  %v3857_v2 = vld [vmem:[%s9730_s21 + $0x90] sm:$0xff] }
 0xc56   :  { %5508 = vmatprep.subr.bf16.mxu1 %v6405_v32  ;;  %v3962_v32 = vld [vmem:[%s9730_s21 + $0x3d8] sm:$0xff] }
 0xc57   :  { %v6472_v11 = vcombine.low %v3954_v5, %v3962_v32  ;;  %5541 = vmatprep.subr.bf16.mxu0 %v6471_v9  ;;  %v3858_v9 = vld [vmem:[%s9730_s21 + $0x98] sm:$0xff] }
 0xc59   :  { %5509 = vmatpush1.bf16.msra.mxu1 %v6404_v35  ;;  %v6473_v35 = vcombine.high %v3954_v5, %v3962_v32  ;;  %v3865_v5 = vld [vmem:[%s9730_s21 + $0xd0] sm:$0xff]  ;;  %v3866_v32 = vld [vmem:[%s9730_s21 + $0xd8] sm:$0xff] }
 0xc5a   :  { %5510 = vmatprep.subr.bf16.mxu1 %v6389_v36  ;;  %v3622_v36 = vld [vmem:[%s9732_s20] sm:$0x3] }
 0xc5b   :  { %v3627_v37 = vrot.slane %v3622_v36, %v8303_v40  ;;  %v3631_v38 = vrot.slane %v3622_v36, %v8309_v6  ;;  %v6377_v36 = vcombine.high %v3858_v9, %v3866_v32 }
 0xc5d   :  { %5511 = vmatpush1.bf16.msra.mxu1 %v6388_v43 }
 0xc5e   :  { %5512 = vmatprep.subr.bf16.mxu1 %v6373_v44 }
 0xc61   :  { %5513 = vmatpush1.bf16.msra.mxu1 %v6372_v34 }
 0xc62   :  { %5514 = vmatprep.subr.bf16.mxu1 %v6357_v50 }
 0xc65   :  { %5515 = vmatpush1.bf16.msra.mxu1 %v6356_v53 }
 0xc66   :  { %5516 = vmatprep.subr.bf16.mxu1 %v6597_v54  ;;  %v3945_v54 = vld [vmem:[%s9730_s21 + $0x350] sm:$0xff] }
 0xc67   :  { %v6455_v59 = vcombine.high %v3937_v52, %v3945_v54 }
 0xc69   :  { %5517 = vmatpush2.bf16.msra.mxu1 %v6596_v56 }
 0xc6a   :  { %5518 = vmatprep.subr.bf16.mxu1 %v6581_v57 }
 0xc6d   :  { %5519 = vmatpush2.bf16.msra.mxu1 %v6580_v39  ;;  %v6457_v39 = vcombine.high %v3938_v16, %v3946_v55 }
 0xc6e   :  { %5520 = vmatprep.subr.bf16.mxu1 %v6565_v60  ;;  %v3929_v60 = vld [vmem:[%s9730_s21 + $0x2d0] sm:$0xff] }
 0xc6f   :  { %v6439_v0 = vcombine.high %v3921_v58, %v3929_v60 }
 0xc71   :  { %5521 = vmatpush2.bf16.msra.mxu1 %v6564_v62  ;;  %v6454_v62 = vcombine.low %v3937_v52, %v3945_v54  ;;  %v4089_v52 = vld [vmem:[%s9730_s21 + $0x7d0] sm:$0xff]  ;;  %v4090_v54 = vld [vmem:[%s9730_s21 + $0x7d8] sm:$0xff] }
 0xc72   :  { %5522 = vmatprep.subr.bf16.mxu1 %v6549_v63  ;;  %v6456_v63 = vcombine.low %v3938_v16, %v3946_v55 }
 0xc75   :  { %5523 = vmatpush2.bf16.msra.mxu1 %v6548_v4  ;;  %v3905_v4 = vld [vmem:[%s9730_s21 + $0x210] sm:$0xff] }
 0xc76   :  { %5524 = vmatprep.subr.bf16.mxu1 %v6533_v3  ;;  %v3913_v3 = vld [vmem:[%s9730_s21 + $0x250] sm:$0xff] }
 0xc77   :  { %v6422_v20 = vcombine.low %v3905_v4, %v3913_v3 }
 0xc79   :  { %5525 = vmatpush2.bf16.msra.mxu1 %v6532_v10  ;;  %v6438_v10 = vcombine.low %v3921_v58, %v3929_v60  ;;  %v4073_v60 = vld [vmem:[%s9730_s21 + $0x750] sm:$0xff] }
 0xc7a   :  { %5526 = vmatprep.subr.bf16.mxu1 %v6517_v12  ;;  %v6440_v12 = vcombine.low %v3922_v61, %v3930_v41  ;;  %v4066_v61 = vld [vmem:[%s9730_s21 + $0x718] sm:$0xff] }
 0xc7b   :  { %v4074_v41 = vld [vmem:[%s9730_s21 + $0x758] sm:$0xff] }
 0xc7d   :  { %5527 = vmatpush2.bf16.msra.mxu1 %v6516_v13  ;;  %v6423_v13 = vcombine.high %v3905_v4, %v3913_v3  ;;  %v4049_v4 = vld [vmem:[%s9730_s21 + $0x690] sm:$0xff] }
 0xc7e   :  { %5528 = vmatprep.subr.bf16.mxu1 %v6501_v22  ;;  %v6407_v22 = vcombine.high %v3889_v15, %v3897_v17  ;;  %v4057_v3 = vld [vmem:[%s9730_s21 + $0x6d0] sm:$0xff] }
 0xc7f   :  { %v4033_v15 = vld [vmem:[%s9730_s21 + $0x610] sm:$0xff] }
 0xc80   :  { %v4041_v17 = vld [vmem:[%s9730_s21 + $0x650] sm:$0xff] }
 0xc81   :  { %5529 = vmatpush2.bf16.msra.mxu1 %v6500_v21  ;;  %v6424_v21 = vcombine.low %v3906_v7, %v3914_v8  ;;  %v4050_v7 = vld [vmem:[%s9730_s21 + $0x698] sm:$0xff] }
 0xc82   :  { %5530 = vmatprep.subr.bf16.mxu1 %v6485_v30  ;;  %v6391_v30 = vcombine.high %v3873_v24, %v3881_v25  ;;  %v4058_v8 = vld [vmem:[%s9730_s21 + $0x6d8] sm:$0xff] }
 0xc85   :  { %5531 = vmatpush2.bf16.msra.mxu1 %v6484_v29  ;;  %v6408_v29 = vcombine.low %v3890_v18, %v3898_v19  ;;  %v4034_v18 = vld [vmem:[%s9730_s21 + $0x618] sm:$0xff] }
 0xc86   :  { %5582 = vmatprep.subr.bf16.mxu1 %v6473_v35  ;;  %v6375_v35 = vcombine.high %v3857_v2, %v3865_v5  ;;  %v4042_v19 = vld [vmem:[%s9730_s21 + $0x658] sm:$0xff] }
 0xd08   :  { %v3828_v43 = vpop.f32.mrf.mxu1 }
 0xd09   :  { %v3829_v44 = vadd.f32 %v3828_v43, %v3627_v37  ;;  %v3841_v37 = vld [vmem:[%s9730_s21 + $0x10] sm:$0xff]  ;;  %v3842_v43 = vld [vmem:[%s9730_s21 + $0x18] sm:$0xff] }
 0xd0a   :  { %v3830_v46 = vpop.f32.mrf.mxu1 }
 0xd0b   :  { %v3831_v48 = vadd.f32 %v3830_v46, %v3631_v38  ;;  %v3835_v34 = vmax.f32 %v3829_v44, 0.0  ;;  %v3849_v38 = vld [vmem:[%s9730_s21 + $0x50] sm:$0xff]  ;;  %v3850_v44 = vld [vmem:[%s9730_s21 + $0x58] sm:$0xff]  ;;  %v6374_v46 = vcombine.low %v3857_v2, %v3865_v5 }
 0xd0c   :  { %v3832_v50 = vpop.f32.mrf.mxu1  ;;  %v6358_v16 = vcombine.low %v3841_v37, %v3849_v38  ;;  %v6360_v55 = vcombine.low %v3842_v43, %v3850_v44  ;;  %v4001_v2 = vld [vmem:[%s9730_s21 + $0x510] sm:$0xff] }
 0xd0d   :  { %v3836_v51 = vmax.f32 %v3831_v48, 0.0  ;;  %v9105_v57 = vpack.c.bf16 %v3835_v34, %v3835_v34  ;;  %v6376_v48 = vcombine.low %v3858_v9, %v3866_v32  ;;  %v6359_v34 = vcombine.high %v3841_v37, %v3849_v38  ;;  %v4009_v5 = vld [vmem:[%s9730_s21 + $0x550] sm:$0xff]  ;;  %v4002_v9 = vld [vmem:[%s9730_s21 + $0x518] sm:$0xff] }
 0xd0e   :  { %v3833_v53 = vpop.f32.mrf.mxu1  ;;  %v6361_v50 = vcombine.high %v3842_v43, %v3850_v44  ;;  %v4010_v32 = vld [vmem:[%s9730_s21 + $0x558] sm:$0xff]  ;;  %v3985_v37 = vld [vmem:[%s9730_s21 + $0x490] sm:$0xff] }
 0xd0f   :  { %v9103_v56 = vpack.c.bf16 %v3836_v51, %v3836_v51  ;;  %v4081_v51 = vld [vmem:[%s9730_s21 + $0x790] sm:$0xff]  ;;  %v4082_v53 = vld [vmem:[%s9730_s21 + $0x798] sm:$0xff] }
 0xd10   :  { %v6599_v58 = vcombine.high %v4081_v51, %v4089_v52  ;;  %v3993_v38 = vld [vmem:[%s9730_s21 + $0x4d0] sm:$0xff]  ;;  %v3986_v43 = vld [vmem:[%s9730_s21 + $0x498] sm:$0xff] }
 0xd11   :  { %5491 = vmatprep.mubr.bf16.mxu0 %v9103_v56  ;;  %5532 = vmatprep.mubr.bf16.mxu1 %v9103_v56  ;;  %v3994_v44 = vld [vmem:[%s9730_s21 + $0x4d8] sm:$0xff] }
 0xd12   :  { %5492 = vmatmul.mubr.bf16.vlgmr.msra.gmra.mxu0 %v9105_v57  ;;  %5533 = vmatmul.mubr.bf16.vlgmr.msra.gmra.mxu1 %v9105_v57 }
 0xd13   :  { %5542 = vmatpush1.bf16.msra.mxu0 %v6470_v33  ;;  %5583 = vmatpush1.bf16.msra.mxu1 %v6472_v11  ;;  %v6390_v33 = vcombine.low %v3873_v24, %v3881_v25  ;;  %v6392_v11 = vcombine.low %v3874_v26, %v3882_v27  ;;  %v4017_v24 = vld [vmem:[%s9730_s21 + $0x590] sm:$0xff]  ;;  %v4018_v26 = vld [vmem:[%s9730_s21 + $0x598] sm:$0xff] }
 0xd14   :  { %5573 = vmatprep.mubr.bf16.mxu0 %v9103_v56  ;;  %5614 = vmatprep.mubr.bf16.mxu1 %v9103_v56  ;;  %v4025_v25 = vld [vmem:[%s9730_s21 + $0x5d0] sm:$0xff]  ;;  %v4026_v27 = vld [vmem:[%s9730_s21 + $0x5d8] sm:$0xff] }
 0xd15   :  { %5543 = vmatprep.subr.bf16.mxu0 %v6455_v59  ;;  %5584 = vmatprep.subr.bf16.mxu1 %v6457_v39  ;;  %v6601_v59 = vcombine.high %v4082_v53, %v4090_v54  ;;  %v4065_v39 = vld [vmem:[%s9730_s21 + $0x710] sm:$0xff] }
 0xd17   :  { %5544 = vmatpush1.bf16.msra.mxu0 %v6454_v62  ;;  %5585 = vmatpush1.bf16.msra.mxu1 %v6456_v63  ;;  %v6598_v62 = vcombine.low %v4081_v51, %v4089_v52  ;;  %v6600_v63 = vcombine.low %v4082_v53, %v4090_v54  ;;  %v3969_v51 = vld [vmem:[%s9730_s21 + $0x410] sm:$0xff]  ;;  %v3970_v53 = vld [vmem:[%s9730_s21 + $0x418] sm:$0xff] }
 0xd18   :  { %5545 = vmatprep.subr.bf16.mxu0 %v6439_v0  ;;  %5586 = vmatprep.subr.bf16.mxu1 %v6441_v1  ;;  %v6583_v0 = vcombine.high %v4065_v39, %v4073_v60  ;;  %v6585_v1 = vcombine.high %v4066_v61, %v4074_v41  ;;  %v3977_v52 = vld [vmem:[%s9730_s21 + $0x450] sm:$0xff]  ;;  %v3978_v54 = vld [vmem:[%s9730_s21 + $0x458] sm:$0xff] }
 0xd1b   :  { %5546 = vmatpush1.bf16.msra.mxu0 %v6438_v10  ;;  %5587 = vmatpush1.bf16.msra.mxu1 %v6440_v12  ;;  %v6582_v10 = vcombine.low %v4065_v39, %v4073_v60  ;;  %v6584_v12 = vcombine.low %v4066_v61, %v4074_v41  ;;  %v3955_v39 = vld [vmem:[%s9730_s21 + $0x3a0] sm:$0xff]  ;;  %v3956_v61 = vld [vmem:[%s9730_s21 + $0x3a8] sm:$0xff] }
 0xd1c   :  { %5547 = vmatprep.subr.bf16.mxu0 %v6423_v13  ;;  %5588 = vmatprep.subr.bf16.mxu1 %v6425_v14  ;;  %v6567_v13 = vcombine.high %v4049_v4, %v4057_v3  ;;  %v6569_v14 = vcombine.high %v4050_v7, %v4058_v8  ;;  %v3963_v60 = vld [vmem:[%s9730_s21 + $0x3e0] sm:$0xff]  ;;  %v3964_v41 = vld [vmem:[%s9730_s21 + $0x3e8] sm:$0xff] }
 0xd1f   :  { %5548 = vmatpush1.bf16.msra.mxu0 %v6422_v20  ;;  %5589 = vmatpush1.bf16.msra.mxu1 %v6424_v21  ;;  %v6566_v20 = vcombine.low %v4049_v4, %v4057_v3  ;;  %v6568_v21 = vcombine.low %v4050_v7, %v4058_v8  ;;  %v3939_v4 = vld [vmem:[%s9730_s21 + $0x320] sm:$0xff]  ;;  %v3940_v7 = vld [vmem:[%s9730_s21 + $0x328] sm:$0xff] }
 0xd20   :  { %5549 = vmatprep.subr.bf16.mxu0 %v6407_v22  ;;  %5590 = vmatprep.subr.bf16.mxu1 %v6409_v23  ;;  %v6551_v22 = vcombine.high %v4033_v15, %v4041_v17  ;;  %v6553_v23 = vcombine.high %v4034_v18, %v4042_v19  ;;  %v3947_v3 = vld [vmem:[%s9730_s21 + $0x360] sm:$0xff]  ;;  %v3948_v8 = vld [vmem:[%s9730_s21 + $0x368] sm:$0xff] }
 0xd23   :  { %5550 = vmatpush1.bf16.msra.mxu0 %v6406_v28  ;;  %5591 = vmatpush1.bf16.msra.mxu1 %v6408_v29  ;;  %v6550_v28 = vcombine.low %v4033_v15, %v4041_v17  ;;  %v6552_v29 = vcombine.low %v4034_v18, %v4042_v19  ;;  %v3923_v15 = vld [vmem:[%s9730_s21 + $0x2a0] sm:$0xff]  ;;  %v3924_v18 = vld [vmem:[%s9730_s21 + $0x2a8] sm:$0xff] }
 0xd24   :  { %5551 = vmatprep.subr.bf16.mxu0 %v6391_v30  ;;  %5592 = vmatprep.subr.bf16.mxu1 %v6393_v31  ;;  %v6535_v30 = vcombine.high %v4017_v24, %v4025_v25  ;;  %v6537_v31 = vcombine.high %v4018_v26, %v4026_v27  ;;  %v3931_v17 = vld [vmem:[%s9730_s21 + $0x2e0] sm:$0xff]  ;;  %v3932_v19 = vld [vmem:[%s9730_s21 + $0x2e8] sm:$0xff] }
 0xd27   :  { %5552 = vmatpush1.bf16.msra.mxu0 %v6390_v33  ;;  %5593 = vmatpush1.bf16.msra.mxu1 %v6392_v11  ;;  %v6534_v33 = vcombine.low %v4017_v24, %v4025_v25  ;;  %v6536_v11 = vcombine.low %v4018_v26, %v4026_v27  ;;  %v3907_v24 = vld [vmem:[%s9730_s21 + $0x220] sm:$0xff]  ;;  %v3908_v26 = vld [vmem:[%s9730_s21 + $0x228] sm:$0xff] }
 0xd28   :  { %5553 = vmatprep.subr.bf16.mxu0 %v6375_v35  ;;  %5594 = vmatprep.subr.bf16.mxu1 %v6377_v36  ;;  %v6519_v35 = vcombine.high %v4001_v2, %v4009_v5  ;;  %v6521_v36 = vcombine.high %v4002_v9, %v4010_v32  ;;  %v3915_v25 = vld [vmem:[%s9730_s21 + $0x260] sm:$0xff]  ;;  %v3916_v27 = vld [vmem:[%s9730_s21 + $0x268] sm:$0xff] }
 0xd2b   :  { %5554 = vmatpush1.bf16.msra.mxu0 %v6374_v46  ;;  %5595 = vmatpush1.bf16.msra.mxu1 %v6376_v48  ;;  %v6518_v46 = vcombine.low %v4001_v2, %v4009_v5  ;;  %v6520_v48 = vcombine.low %v4002_v9, %v4010_v32  ;;  %v3891_v2 = vld [vmem:[%s9730_s21 + $0x1a0] sm:$0xff]  ;;  %v3892_v9 = vld [vmem:[%s9730_s21 + $0x1a8] sm:$0xff] }
 0xd2c   :  { %5555 = vmatprep.subr.bf16.mxu0 %v6359_v34  ;;  %5596 = vmatprep.subr.bf16.mxu1 %v6361_v50  ;;  %v6503_v34 = vcombine.high %v3985_v37, %v3993_v38  ;;  %v6505_v50 = vcombine.high %v3986_v43, %v3994_v44  ;;  %v3899_v5 = vld [vmem:[%s9730_s21 + $0x1e0] sm:$0xff]  ;;  %v3900_v32 = vld [vmem:[%s9730_s21 + $0x1e8] sm:$0xff] }
 0xd2f   :  { %5556 = vmatpush1.bf16.msra.mxu0 %v6358_v16  ;;  %5597 = vmatpush1.bf16.msra.mxu1 %v6360_v55  ;;  %v6502_v16 = vcombine.low %v3985_v37, %v3993_v38  ;;  %v6504_v55 = vcombine.low %v3986_v43, %v3994_v44  ;;  %v3875_v37 = vld [vmem:[%s9730_s21 + $0x120] sm:$0xff]  ;;  %v3876_v43 = vld [vmem:[%s9730_s21 + $0x128] sm:$0xff] }
 0xd30   :  { %5557 = vmatprep.subr.bf16.mxu0 %v6599_v58  ;;  %5598 = vmatprep.subr.bf16.mxu1 %v6601_v59  ;;  %v6487_v58 = vcombine.high %v3969_v51, %v3977_v52  ;;  %v6489_v59 = vcombine.high %v3970_v53, %v3978_v54  ;;  %v3883_v38 = vld [vmem:[%s9730_s21 + $0x160] sm:$0xff]  ;;  %v3884_v44 = vld [vmem:[%s9730_s21 + $0x168] sm:$0xff] }
 0xd33   :  { %5558 = vmatpush2.bf16.msra.mxu0 %v6598_v62  ;;  %5599 = vmatpush2.bf16.msra.mxu1 %v6600_v63  ;;  %v6486_v62 = vcombine.low %v3969_v51, %v3977_v52  ;;  %v6488_v63 = vcombine.low %v3970_v53, %v3978_v54  ;;  %v3859_v51 = vld [vmem:[%s9730_s21 + $0xa0] sm:$0xff]  ;;  %v3860_v53 = vld [vmem:[%s9730_s21 + $0xa8] sm:$0xff] }
 0xd34   :  { %5559 = vmatprep.subr.bf16.mxu0 %v6583_v0  ;;  %5600 = vmatprep.subr.bf16.mxu1 %v6585_v1  ;;  %v6475_v0 = vcombine.high %v3955_v39, %v3963_v60  ;;  %v6477_v1 = vcombine.high %v3956_v61, %v3964_v41  ;;  %v3867_v52 = vld [vmem:[%s9730_s21 + $0xe0] sm:$0xff]  ;;  %v3868_v54 = vld [vmem:[%s9730_s21 + $0xe8] sm:$0xff] }
 0xd37   :  { %5560 = vmatpush2.bf16.msra.mxu0 %v6582_v10  ;;  %5601 = vmatpush2.bf16.msra.mxu1 %v6584_v12  ;;  %v6474_v10 = vcombine.low %v3955_v39, %v3963_v60  ;;  %v6476_v12 = vcombine.low %v3956_v61, %v3964_v41  ;;  %v3843_v39 = vld [vmem:[%s9730_s21 + $0x20] sm:$0xff]  ;;  %v3844_v61 = vld [vmem:[%s9730_s21 + $0x28] sm:$0xff] }
 0xd38   :  { %5561 = vmatprep.subr.bf16.mxu0 %v6567_v13  ;;  %5602 = vmatprep.subr.bf16.mxu1 %v6569_v14  ;;  %v6459_v13 = vcombine.high %v3939_v4, %v3947_v3  ;;  %v6461_v14 = vcombine.high %v3940_v7, %v3948_v8  ;;  %v3851_v60 = vld [vmem:[%s9730_s21 + $0x60] sm:$0xff]  ;;  %v3852_v41 = vld [vmem:[%s9730_s21 + $0x68] sm:$0xff] }
 0xd3b   :  { %5562 = vmatpush2.bf16.msra.mxu0 %v6566_v20  ;;  %5603 = vmatpush2.bf16.msra.mxu1 %v6568_v21  ;;  %v6458_v20 = vcombine.low %v3939_v4, %v3947_v3  ;;  %v6460_v21 = vcombine.low %v3940_v7, %v3948_v8  ;;  %v4083_v4 = vld [vmem:[%s9730_s21 + $0x7a0] sm:$0xff]  ;;  %v4084_v7 = vld [vmem:[%s9730_s21 + $0x7a8] sm:$0xff] }
 0xd3c   :  { %5563 = vmatprep.subr.bf16.mxu0 %v6551_v22  ;;  %5604 = vmatprep.subr.bf16.mxu1 %v6553_v23  ;;  %v6443_v22 = vcombine.high %v3923_v15, %v3931_v17  ;;  %v6445_v23 = vcombine.high %v3924_v18, %v3932_v19  ;;  %v4091_v3 = vld [vmem:[%s9730_s21 + $0x7e0] sm:$0xff]  ;;  %v4092_v8 = vld [vmem:[%s9730_s21 + $0x7e8] sm:$0xff] }
 0xd3f   :  { %5564 = vmatpush2.bf16.msra.mxu0 %v6550_v28  ;;  %5605 = vmatpush2.bf16.msra.mxu1 %v6552_v29  ;;  %v6442_v28 = vcombine.low %v3923_v15, %v3931_v17  ;;  %v6444_v29 = vcombine.low %v3924_v18, %v3932_v19  ;;  %v4067_v15 = vld [vmem:[%s9730_s21 + $0x720] sm:$0xff]  ;;  %v4068_v18 = vld [vmem:[%s9730_s21 + $0x728] sm:$0xff] }
 0xd40   :  { %5565 = vmatprep.subr.bf16.mxu0 %v6535_v30  ;;  %5606 = vmatprep.subr.bf16.mxu1 %v6537_v31  ;;  %v6427_v30 = vcombine.high %v3907_v24, %v3915_v25  ;;  %v6429_v31 = vcombine.high %v3908_v26, %v3916_v27  ;;  %v4075_v17 = vld [vmem:[%s9730_s21 + $0x760] sm:$0xff]  ;;  %v4076_v19 = vld [vmem:[%s9730_s21 + $0x768] sm:$0xff] }
 0xd43   :  { %5566 = vmatpush2.bf16.msra.mxu0 %v6534_v33  ;;  %5607 = vmatpush2.bf16.msra.mxu1 %v6536_v11  ;;  %v6426_v33 = vcombine.low %v3907_v24, %v3915_v25  ;;  %v6428_v11 = vcombine.low %v3908_v26, %v3916_v27  ;;  %v4051_v24 = vld [vmem:[%s9730_s21 + $0x6a0] sm:$0xff]  ;;  %v4052_v26 = vld [vmem:[%s9730_s21 + $0x6a8] sm:$0xff] }
 0xd44   :  { %5567 = vmatprep.subr.bf16.mxu0 %v6519_v35  ;;  %5608 = vmatprep.subr.bf16.mxu1 %v6521_v36  ;;  %v6411_v35 = vcombine.high %v3891_v2, %v3899_v5  ;;  %v6413_v36 = vcombine.high %v3892_v9, %v3900_v32  ;;  %v4059_v25 = vld [vmem:[%s9730_s21 + $0x6e0] sm:$0xff]  ;;  %v4060_v27 = vld [vmem:[%s9730_s21 + $0x6e8] sm:$0xff] }
 0xd47   :  { %5568 = vmatpush2.bf16.msra.mxu0 %v6518_v46  ;;  %5609 = vmatpush2.bf16.msra.mxu1 %v6520_v48  ;;  %v6410_v46 = vcombine.low %v3891_v2, %v3899_v5  ;;  %v6412_v48 = vcombine.low %v3892_v9, %v3900_v32  ;;  %v4035_v2 = vld [vmem:[%s9730_s21 + $0x620] sm:$0xff]  ;;  %v4036_v9 = vld [vmem:[%s9730_s21 + $0x628] sm:$0xff] }
 0xd48   :  { %5569 = vmatprep.subr.bf16.mxu0 %v6503_v34  ;;  %5610 = vmatprep.subr.bf16.mxu1 %v6505_v50  ;;  %v6395_v34 = vcombine.high %v3875_v37, %v3883_v38  ;;  %v6397_v50 = vcombine.high %v3876_v43, %v3884_v44  ;;  %v4043_v5 = vld [vmem:[%s9730_s21 + $0x660] sm:$0xff]  ;;  %v4044_v32 = vld [vmem:[%s9730_s21 + $0x668] sm:$0xff] }
 0xd4b   :  { %5570 = vmatpush2.bf16.msra.mxu0 %v6502_v16  ;;  %5611 = vmatpush2.bf16.msra.mxu1 %v6504_v55  ;;  %v6394_v16 = vcombine.low %v3875_v37, %v3883_v38  ;;  %v6396_v55 = vcombine.low %v3876_v43, %v3884_v44  ;;  %v4019_v37 = vld [vmem:[%s9730_s21 + $0x5a0] sm:$0xff]  ;;  %v4020_v43 = vld [vmem:[%s9730_s21 + $0x5a8] sm:$0xff] }
 0xd4c   :  { %5571 = vmatprep.subr.bf16.mxu0 %v6487_v58  ;;  %5612 = vmatprep.subr.bf16.mxu1 %v6489_v59  ;;  %v6379_v58 = vcombine.high %v3859_v51, %v3867_v52  ;;  %v6381_v59 = vcombine.high %v3860_v53, %v3868_v54  ;;  %v4027_v38 = vld [vmem:[%s9730_s21 + $0x5e0] sm:$0xff]  ;;  %v4028_v44 = vld [vmem:[%s9730_s21 + $0x5e8] sm:$0xff] }
 0xd4f   :  { %5572 = vmatpush2.bf16.msra.mxu0 %v6486_v62  ;;  %5613 = vmatpush2.bf16.msra.mxu1 %v6488_v63  ;;  %v6378_v62 = vcombine.low %v3859_v51, %v3867_v52  ;;  %v6380_v63 = vcombine.low %v3860_v53, %v3868_v54  ;;  %v4003_v51 = vld [vmem:[%s9730_s21 + $0x520] sm:$0xff]  ;;  %v4004_v53 = vld [vmem:[%s9730_s21 + $0x528] sm:$0xff] }
 0xd50   :  { %5623 = vmatprep.subr.bf16.mxu0 %v6475_v0  ;;  %5664 = vmatprep.subr.bf16.mxu1 %v6477_v1  ;;  %v6363_v0 = vcombine.high %v3843_v39, %v3851_v60  ;;  %v6365_v1 = vcombine.high %v3844_v61, %v3852_v41  ;;  %v4011_v52 = vld [vmem:[%s9730_s21 + $0x560] sm:$0xff]  ;;  %v4012_v54 = vld [vmem:[%s9730_s21 + $0x568] sm:$0xff] }
 0xd52   :  { %5574 = vmatmul.mubr.bf16.vlgmr.msra.gmra.mxu0 %v9105_v57  ;;  %5615 = vmatmul.mubr.bf16.vlgmr.msra.gmra.mxu1 %v9105_v57 }
 0xd53   :  { %5624 = vmatpush1.bf16.msra.mxu0 %v6474_v10  ;;  %5655 = vmatprep.mubr.bf16.mxu0 %v9103_v56  ;;  %v6362_v10 = vcombine.low %v3843_v39, %v3851_v60  ;;  %v3987_v39 = vld [vmem:[%s9730_s21 + $0x4a0] sm:$0xff] }
 0xd54   :  { %5665 = vmatpush1.bf16.msra.mxu1 %v6476_v12  ;;  %5696 = vmatprep.mubr.bf16.mxu1 %v9103_v56  ;;  %v6364_v12 = vcombine.low %v3844_v61, %v3852_v41  ;;  %v3995_v60 = vld [vmem:[%s9730_s21 + $0x4e0] sm:$0xff]  ;;  %v3988_v61 = vld [vmem:[%s9730_s21 + $0x4a8] sm:$0xff] }
 0xd55   :  { %5625 = vmatprep.subr.bf16.mxu0 %v6459_v13  ;;  %5666 = vmatprep.subr.bf16.mxu1 %v6461_v14  ;;  %v6603_v13 = vcombine.high %v4083_v4, %v4091_v3  ;;  %v6605_v14 = vcombine.high %v4084_v7, %v4092_v8  ;;  %v3996_v41 = vld [vmem:[%s9730_s21 + $0x4e8] sm:$0xff] }
 0xd57   :  { %5626 = vmatpush1.bf16.msra.mxu0 %v6458_v20  ;;  %v6602_v20 = vcombine.low %v4083_v4, %v4091_v3  ;;  %v3971_v4 = vld [vmem:[%s9730_s21 + $0x420] sm:$0xff] }
 0xd58   :  { %5667 = vmatpush1.bf16.msra.mxu1 %v6460_v21  ;;  %5627 = vmatprep.subr.bf16.mxu0 %v6443_v22  ;;  %v6604_v21 = vcombine.low %v4084_v7, %v4092_v8  ;;  %v6587_v22 = vcombine.high %v4067_v15, %v4075_v17  ;;  %v3979_v3 = vld [vmem:[%s9730_s21 + $0x460] sm:$0xff]  ;;  %v3972_v7 = vld [vmem:[%s9730_s21 + $0x428] sm:$0xff] }
 0xd59   :  { %5668 = vmatprep.subr.bf16.mxu1 %v6445_v23  ;;  %v6589_v23 = vcombine.high %v4068_v18, %v4076_v19  ;;  %v3980_v8 = vld [vmem:[%s9730_s21 + $0x468] sm:$0xff] }
 0xd5b   :  { %5628 = vmatpush1.bf16.msra.mxu0 %v6442_v28  ;;  %v6586_v28 = vcombine.low %v4067_v15, %v4075_v17  ;;  %v3957_v15 = vld [vmem:[%s9730_s21 + $0x3b0] sm:$0xff] }
 0xd5c   :  { %5669 = vmatpush1.bf16.msra.mxu1 %v6444_v29  ;;  %5629 = vmatprep.subr.bf16.mxu0 %v6427_v30  ;;  %v6588_v29 = vcombine.low %v4068_v18, %v4076_v19  ;;  %v6571_v30 = vcombine.high %v4051_v24, %v4059_v25  ;;  %v3965_v17 = vld [vmem:[%s9730_s21 + $0x3f0] sm:$0xff]  ;;  %v3958_v18 = vld [vmem:[%s9730_s21 + $0x3b8] sm:$0xff] }
 0xd5d   :  { %5670 = vmatprep.subr.bf16.mxu1 %v6429_v31  ;;  %v6573_v31 = vcombine.high %v4052_v26, %v4060_v27  ;;  %v3966_v19 = vld [vmem:[%s9730_s21 + $0x3f8] sm:$0xff] }
 0xd5f   :  { %5630 = vmatpush1.bf16.msra.mxu0 %v6426_v33  ;;  %v6570_v33 = vcombine.low %v4051_v24, %v4059_v25  ;;  %v3941_v24 = vld [vmem:[%s9730_s21 + $0x330] sm:$0xff] }
 0xd60   :  { %5671 = vmatpush1.bf16.msra.mxu1 %v6428_v11  ;;  %5631 = vmatprep.subr.bf16.mxu0 %v6411_v35  ;;  %v6572_v11 = vcombine.low %v4052_v26, %v4060_v27  ;;  %v6555_v35 = vcombine.high %v4035_v2, %v4043_v5  ;;  %v3949_v25 = vld [vmem:[%s9730_s21 + $0x370] sm:$0xff]  ;;  %v6478_v26 = vcombine.low %v3957_v15, %v3965_v17  ;;  %v3942_v27 = vld [vmem:[%s9730_s21 + $0x338] sm:$0xff] }
 0xd61   :  { %5672 = vmatprep.subr.bf16.mxu1 %v6413_v36  ;;  %v6557_v36 = vcombine.high %v4036_v9, %v4044_v32 }
 0xd63   :  { %5632 = vmatpush1.bf16.msra.mxu0 %v6410_v46  ;;  %v6554_v46 = vcombine.low %v4035_v2, %v4043_v5  ;;  %v3933_v2 = vld [vmem:[%s9730_s21 + $0x2f0] sm:$0xff] }
 0xd64   :  { %5673 = vmatpush1.bf16.msra.mxu1 %v6412_v48  ;;  %5633 = vmatprep.subr.bf16.mxu0 %v6395_v34  ;;  %v6556_v48 = vcombine.low %v4036_v9, %v4044_v32  ;;  %v6539_v34 = vcombine.high %v4019_v37, %v4027_v38  ;;  %v3926_v9 = vld [vmem:[%s9730_s21 + $0x2b8] sm:$0xff] }
 0xd65   :  { %5674 = vmatprep.subr.bf16.mxu1 %v6397_v50  ;;  %v6541_v50 = vcombine.high %v4020_v43, %v4028_v44  ;;  %v3934_v32 = vld [vmem:[%s9730_s21 + $0x2f8] sm:$0xff] }
 0xd67   :  { %5634 = vmatpush1.bf16.msra.mxu0 %v6394_v16  ;;  %v6538_v16 = vcombine.low %v4019_v37, %v4027_v38  ;;  %v3909_v37 = vld [vmem:[%s9730_s21 + $0x230] sm:$0xff] }
 0xd68   :  { %5675 = vmatpush1.bf16.msra.mxu1 %v6396_v55  ;;  %5635 = vmatprep.subr.bf16.mxu0 %v6379_v58  ;;  %v6540_v55 = vcombine.low %v4020_v43, %v4028_v44  ;;  %v6523_v58 = vcombine.high %v4003_v51, %v4011_v52  ;;  %v3917_v38 = vld [vmem:[%s9730_s21 + $0x270] sm:$0xff]  ;;  %v3910_v43 = vld [vmem:[%s9730_s21 + $0x238] sm:$0xff] }
 0xd69   :  { %5676 = vmatprep.subr.bf16.mxu1 %v6381_v59  ;;  %v6525_v59 = vcombine.high %v4004_v53, %v4012_v54  ;;  %v3918_v44 = vld [vmem:[%s9730_s21 + $0x278] sm:$0xff] }
 0xd6b   :  { %5636 = vmatpush1.bf16.msra.mxu0 %v6378_v62  ;;  %v6522_v62 = vcombine.low %v4003_v51, %v4011_v52  ;;  %v3901_v51 = vld [vmem:[%s9730_s21 + $0x1f0] sm:$0xff]  ;;  %v3894_v52 = vld [vmem:[%s9730_s21 + $0x1b8] sm:$0xff] }
 0xd6c   :  { %5677 = vmatpush1.bf16.msra.mxu1 %v6380_v63  ;;  %5637 = vmatprep.subr.bf16.mxu0 %v6363_v0  ;;  %v6524_v63 = vcombine.low %v4004_v53, %v4012_v54  ;;  %v6507_v0 = vcombine.high %v3987_v39, %v3995_v60  ;;  %v3902_v53 = vld [vmem:[%s9730_s21 + $0x1f8] sm:$0xff]  ;;  %v6430_v54 = vcombine.low %v3909_v37, %v3917_v38 }
 0xd6d   :  { %5678 = vmatprep.subr.bf16.mxu1 %v6365_v1  ;;  %v6509_v1 = vcombine.high %v3988_v61, %v3996_v41 }
 0xd6f   :  { %5638 = vmatpush1.bf16.msra.mxu0 %v6362_v10  ;;  %v6506_v10 = vcombine.low %v3987_v39, %v3995_v60  ;;  %v3885_v39 = vld [vmem:[%s9730_s21 + $0x170] sm:$0xff]  ;;  %v3878_v60 = vld [vmem:[%s9730_s21 + $0x138] sm:$0xff] }
 0xd70   :  { %5679 = vmatpush1.bf16.msra.mxu1 %v6364_v12  ;;  %5639 = vmatprep.subr.bf16.mxu0 %v6603_v13  ;;  %v6508_v12 = vcombine.low %v3988_v61, %v3996_v41  ;;  %v6491_v13 = vcombine.high %v3971_v4, %v3979_v3  ;;  %v3886_v61 = vld [vmem:[%s9730_s21 + $0x178] sm:$0xff] }
 0xd71   :  { %5680 = vmatprep.subr.bf16.mxu1 %v6605_v14  ;;  %v6493_v14 = vcombine.high %v3972_v7, %v3980_v8 }
 0xd73   :  { %5640 = vmatpush2.bf16.msra.mxu0 %v6602_v20  ;;  %v6490_v20 = vcombine.low %v3971_v4, %v3979_v3  ;;  %v3869_v4 = vld [vmem:[%s9730_s21 + $0xf0] sm:$0xff]  ;;  %v3862_v3 = vld [vmem:[%s9730_s21 + $0xb8] sm:$0xff] }
 0xd74   :  { %5681 = vmatpush2.bf16.msra.mxu1 %v6604_v21  ;;  %5641 = vmatprep.subr.bf16.mxu0 %v6587_v22  ;;  %v6492_v21 = vcombine.low %v3972_v7, %v3980_v8  ;;  %v6479_v22 = vcombine.high %v3957_v15, %v3965_v17  ;;  %v3870_v7 = vld [vmem:[%s9730_s21 + $0xf8] sm:$0xff]  ;;  %v3853_v15 = vld [vmem:[%s9730_s21 + $0x70] sm:$0xff] }
 0xd75   :  { %5682 = vmatprep.subr.bf16.mxu1 %v6589_v23  ;;  %v6481_v23 = vcombine.high %v3958_v18, %v3966_v19  ;;  %v3846_v17 = vld [vmem:[%s9730_s21 + $0x38] sm:$0xff] }
 0xd77   :  { %5642 = vmatpush2.bf16.msra.mxu0 %v6586_v28  ;;  %v3950_v28 = vld [vmem:[%s9730_s21 + $0x378] sm:$0xff] }
 0xd78   :  { %5683 = vmatpush2.bf16.msra.mxu1 %v6588_v29  ;;  %5643 = vmatprep.subr.bf16.mxu0 %v6571_v30  ;;  %v6480_v29 = vcombine.low %v3958_v18, %v3966_v19  ;;  %v6463_v30 = vcombine.high %v3941_v24, %v3949_v25  ;;  %v6465_v5 = vcombine.high %v3942_v27, %v3950_v28  ;;  %v3854_v18 = vld [vmem:[%s9730_s21 + $0x78] sm:$0xff] }
 0xd79   :  { %5684 = vmatprep.subr.bf16.mxu1 %v6573_v31  ;;  %v3925_v31 = vld [vmem:[%s9730_s21 + $0x2b0] sm:$0xff] }
 0xd7b   :  { %5644 = vmatpush2.bf16.msra.mxu0 %v6570_v33  ;;  %v6462_v33 = vcombine.low %v3941_v24, %v3949_v25  ;;  %v4093_v24 = vld [vmem:[%s9730_s21 + $0x7f0] sm:$0xff]  ;;  %v4086_v25 = vld [vmem:[%s9730_s21 + $0x7b8] sm:$0xff] }
 0xd7c   :  { %5685 = vmatpush2.bf16.msra.mxu1 %v6572_v11  ;;  %5645 = vmatprep.subr.bf16.mxu0 %v6555_v35  ;;  %v6464_v11 = vcombine.low %v3942_v27, %v3950_v28  ;;  %v6447_v35 = vcombine.high %v3925_v31, %v3933_v2  ;;  %v6368_v28 = vcombine.low %v3846_v17, %v3854_v18 }
 0xd7d   :  { %5686 = vmatprep.subr.bf16.mxu1 %v6557_v36  ;;  %v6449_v36 = vcombine.high %v3926_v9, %v3934_v32 }
 0xd7f   :  { %5646 = vmatpush2.bf16.msra.mxu0 %v6554_v46  ;;  %v6448_v46 = vcombine.low %v3926_v9, %v3934_v32  ;;  %v4078_v9 = vld [vmem:[%s9730_s21 + $0x778] sm:$0xff] }
 0xd80   :  { %5687 = vmatpush2.bf16.msra.mxu1 %v6556_v48  ;;  %5647 = vmatprep.subr.bf16.mxu0 %v6539_v34  ;;  %v6431_v48 = vcombine.high %v3909_v37, %v3917_v38  ;;  %v6433_v34 = vcombine.high %v3910_v43, %v3918_v44  ;;  %v4061_v37 = vld [vmem:[%s9730_s21 + $0x6f0] sm:$0xff]  ;;  %v4054_v38 = vld [vmem:[%s9730_s21 + $0x6b8] sm:$0xff] }
 0xd81   :  { %5688 = vmatprep.subr.bf16.mxu1 %v6541_v50  ;;  %v3893_v50 = vld [vmem:[%s9730_s21 + $0x1b0] sm:$0xff] }
 0xd82   :  { %v6414_v41 = vcombine.low %v3893_v50, %v3901_v51 }
 0xd83   :  { %5648 = vmatpush2.bf16.msra.mxu0 %v6538_v16  ;;  %v6432_v16 = vcombine.low %v3910_v43, %v3918_v44  ;;  %v4062_v43 = vld [vmem:[%s9730_s21 + $0x6f8] sm:$0xff] }
 0xd84   :  { %5689 = vmatpush2.bf16.msra.mxu1 %v6540_v55  ;;  %5649 = vmatprep.subr.bf16.mxu0 %v6523_v58  ;;  %v6415_v55 = vcombine.high %v3893_v50, %v3901_v51  ;;  %v6417_v58 = vcombine.high %v3894_v52, %v3902_v53  ;;  %v4045_v50 = vld [vmem:[%s9730_s21 + $0x670] sm:$0xff]  ;;  %v4038_v51 = vld [vmem:[%s9730_s21 + $0x638] sm:$0xff] }
 0xd85   :  { %5690 = vmatprep.subr.bf16.mxu1 %v6525_v59  ;;  %v3877_v59 = vld [vmem:[%s9730_s21 + $0x130] sm:$0xff] }
 0xd86   :  { %v6398_v8 = vcombine.low %v3877_v59, %v3885_v39 }
 0xd87   :  { %5650 = vmatpush2.bf16.msra.mxu0 %v6522_v62  ;;  %v6416_v62 = vcombine.low %v3894_v52, %v3902_v53  ;;  %v4046_v52 = vld [vmem:[%s9730_s21 + $0x678] sm:$0xff] }
 0xd88   :  { %5691 = vmatpush2.bf16.msra.mxu1 %v6524_v63  ;;  %5651 = vmatprep.subr.bf16.mxu0 %v6507_v0  ;;  %v6399_v63 = vcombine.high %v3877_v59, %v3885_v39  ;;  %v6401_v0 = vcombine.high %v3878_v60, %v3886_v61  ;;  %v4029_v59 = vld [vmem:[%s9730_s21 + $0x5f0] sm:$0xff]  ;;  %v4022_v39 = vld [vmem:[%s9730_s21 + $0x5b8] sm:$0xff] }
 0xd89   :  { %5692 = vmatprep.subr.bf16.mxu1 %v6509_v1  ;;  %v3861_v1 = vld [vmem:[%s9730_s21 + $0xb0] sm:$0xff] }
 0xd8a   :  { %v6382_v19 = vcombine.low %v3861_v1, %v3869_v4 }
 0xd8b   :  { %5652 = vmatpush2.bf16.msra.mxu0 %v6506_v10  ;;  %v6400_v10 = vcombine.low %v3878_v60, %v3886_v61  ;;  %v4030_v60 = vld [vmem:[%s9730_s21 + $0x5f8] sm:$0xff] }
 0xd8c   :  { %5693 = vmatpush2.bf16.msra.mxu1 %v6508_v12  ;;  %5653 = vmatprep.subr.bf16.mxu0 %v6491_v13  ;;  %v6383_v12 = vcombine.high %v3861_v1, %v3869_v4  ;;  %v6385_v13 = vcombine.high %v3862_v3, %v3870_v7  ;;  %v4013_v1 = vld [vmem:[%s9730_s21 + $0x570] sm:$0xff]  ;;  %v4006_v4 = vld [vmem:[%s9730_s21 + $0x538] sm:$0xff] }
 0xd8d   :  { %5694 = vmatprep.subr.bf16.mxu1 %v6493_v14  ;;  %v3845_v14 = vld [vmem:[%s9730_s21 + $0x30] sm:$0xff] }
 0xd8e   :  { %v6366_v27 = vcombine.low %v3845_v14, %v3853_v15 }
 0xd8f   :  { %5654 = vmatpush2.bf16.msra.mxu0 %v6490_v20  ;;  %v6384_v20 = vcombine.low %v3862_v3, %v3870_v7  ;;  %v4014_v3 = vld [vmem:[%s9730_s21 + $0x578] sm:$0xff] }
 0xd90   :  { %5695 = vmatpush2.bf16.msra.mxu1 %v6492_v21  ;;  %5705 = vmatprep.subr.bf16.mxu0 %v6479_v22  ;;  %v6367_v21 = vcombine.high %v3845_v14, %v3853_v15  ;;  %v6369_v22 = vcombine.high %v3846_v17, %v3854_v18  ;;  %v3997_v14 = vld [vmem:[%s9730_s21 + $0x4f0] sm:$0xff]  ;;  %v3990_v15 = vld [vmem:[%s9730_s21 + $0x4b8] sm:$0xff] }
 0xd91   :  { %5746 = vmatprep.subr.bf16.mxu1 %v6481_v23  ;;  %v4085_v23 = vld [vmem:[%s9730_s21 + $0x7b0] sm:$0xff]  ;;  %v3998_v17 = vld [vmem:[%s9730_s21 + $0x4f8] sm:$0xff] }
 0xd92   :  { %5656 = vmatmul.mubr.bf16.vlgmr.msra.gmra.mxu0 %v9105_v57  ;;  %v6606_v32 = vcombine.low %v4085_v23, %v4093_v24 }
 0xd93   :  { %5697 = vmatmul.mubr.bf16.vlgmr.msra.gmra.mxu1 %v9105_v57  ;;  %5706 = vmatpush1.bf16.msra.mxu0 %v6478_v26  ;;  %v4094_v26 = vld [vmem:[%s9730_s21 + $0x7f8] sm:$0xff] }
 0xd94   :  { %5737 = vmatprep.mubr.bf16.mxu0 %v9103_v56  ;;  %5747 = vmatpush1.bf16.msra.mxu1 %v6480_v29  ;;  %v6607_v29 = vcombine.high %v4085_v23, %v4093_v24  ;;  %v3981_v23 = vld [vmem:[%s9730_s21 + $0x470] sm:$0xff]  ;;  %v3974_v24 = vld [vmem:[%s9730_s21 + $0x438] sm:$0xff] }
 0xd95   :  { %5778 = vmatprep.mubr.bf16.mxu1 %v9103_v56  ;;  %5707 = vmatprep.subr.bf16.mxu0 %v6463_v30  ;;  %v6446_v56 = vcombine.low %v3925_v31, %v3933_v2  ;;  %v6609_v30 = vcombine.high %v4086_v25, %v4094_v26  ;;  %v4069_v31 = vld [vmem:[%s9730_s21 + $0x730] sm:$0xff] }
 0xd96   :  { %5748 = vmatprep.subr.bf16.mxu1 %v6465_v5  ;;  %v4077_v2 = vld [vmem:[%s9730_s21 + $0x770] sm:$0xff]  ;;  %v4070_v5 = vld [vmem:[%s9730_s21 + $0x738] sm:$0xff] }
 0xd97   :  { %5708 = vmatpush1.bf16.msra.mxu0 %v6462_v33  ;;  %v6608_v33 = vcombine.low %v4086_v25, %v4094_v26  ;;  %v6590_v44 = vcombine.low %v4069_v31, %v4077_v2  ;;  %v3982_v25 = vld [vmem:[%s9730_s21 + $0x478] sm:$0xff] }
 0xd98   :  { %5749 = vmatpush1.bf16.msra.mxu1 %v6464_v11  ;;  %5709 = vmatprep.subr.bf16.mxu0 %v6447_v35  ;;  %v6591_v11 = vcombine.high %v4069_v31, %v4077_v2  ;;  %v6593_v35 = vcombine.high %v4070_v5, %v4078_v9  ;;  %v6496_v31 = vcombine.low %v3974_v24, %v3982_v25  ;;  %v4095_v2 = vld [vmem:[%s9733_s22] sm:$0xff] }
 0xd99   :  { %5750 = vmatprep.subr.bf16.mxu1 %v6449_v36  ;;  %v4053_v36 = vld [vmem:[%s9730_s21 + $0x6b0] sm:$0xff] }
 0xd9a   :  { %v6574_v53 = vcombine.low %v4053_v36, %v4061_v37 }
 0xd9b   :  { %5710 = vmatpush1.bf16.msra.mxu0 %v6446_v56  ;;  %v6592_v56 = vcombine.low %v4070_v5, %v4078_v9  ;;  %v4102_v5 = vrot.slane %v4095_v2, %v8303_v40  ;;  %v4110_v9 = vrot.slane %v4095_v2, %v8682_v45 }
 0xd9c   :  { %5751 = vmatpush1.bf16.msra.mxu1 %v6448_v46  ;;  %5711 = vmatprep.subr.bf16.mxu0 %v6431_v48  ;;  %v6575_v46 = vcombine.high %v4053_v36, %v4061_v37  ;;  %v6577_v48 = vcombine.high %v4054_v38, %v4062_v43 }
 0xd9d   :  { %5752 = vmatprep.subr.bf16.mxu1 %v6433_v34  ;;  %v4037_v34 = vld [vmem:[%s9730_s21 + $0x630] sm:$0xff] }
 0xd9e   :  { %v6558_v61 = vcombine.low %v4037_v34, %v4045_v50 }
 0xd9f   :  { %5712 = vmatpush1.bf16.msra.mxu0 %v6430_v54  ;;  %v6576_v54 = vcombine.low %v4054_v38, %v4062_v43 }
 0xda0   :  { %5753 = vmatpush1.bf16.msra.mxu1 %v6432_v16  ;;  %5713 = vmatprep.subr.bf16.mxu0 %v6415_v55  ;;  %v6559_v16 = vcombine.high %v4037_v34, %v4045_v50  ;;  %v6561_v55 = vcombine.high %v4038_v51, %v4046_v52 }
 0xda1   :  { %5754 = vmatprep.subr.bf16.mxu1 %v6417_v58  ;;  %v4021_v58 = vld [vmem:[%s9730_s21 + $0x5b0] sm:$0xff] }
 0xda2   :  { %v6542_v7 = vcombine.low %v4021_v58, %v4029_v59 }
 0xda3   :  { %5714 = vmatpush1.bf16.msra.mxu0 %v6414_v41  ;;  %v6560_v41 = vcombine.low %v4038_v51, %v4046_v52 }
 0xda4   :  { %5755 = vmatpush1.bf16.msra.mxu1 %v6416_v62  ;;  %5715 = vmatprep.subr.bf16.mxu0 %v6399_v63  ;;  %v6543_v62 = vcombine.high %v4021_v58, %v4029_v59  ;;  %v6545_v63 = vcombine.high %v4022_v39, %v4030_v60 }
 0xda5   :  { %5756 = vmatprep.subr.bf16.mxu1 %v6401_v0  ;;  %v4005_v0 = vld [vmem:[%s9730_s21 + $0x530] sm:$0xff] }
 0xda6   :  { %v6526_v18 = vcombine.low %v4005_v0, %v4013_v1 }
 0xda7   :  { %5716 = vmatpush1.bf16.msra.mxu0 %v6398_v8  ;;  %v6544_v8 = vcombine.low %v4022_v39, %v4030_v60  ;;  %v4117_v39 = vsub.s32 4, %v7608_v42  ;;  %v4125_v60 = vsub.s32 6, %v7608_v42 }
 0xda8   :  { %5757 = vmatpush1.bf16.msra.mxu1 %v6400_v10  ;;  %5717 = vmatprep.subr.bf16.mxu0 %v6383_v12  ;;  %v6527_v10 = vcombine.high %v4005_v0, %v4013_v1  ;;  %v6529_v12 = vcombine.high %v4006_v4, %v4014_v3 }
 0xda9   :  { %5758 = vmatprep.subr.bf16.mxu1 %v6385_v13  ;;  %v3989_v13 = vld [vmem:[%s9730_s21 + $0x4b0] sm:$0xff] }
 0xdaa   :  { %v6510_v26 = vcombine.low %v3989_v13, %v3997_v14 }
 0xdab   :  { %5718 = vmatpush1.bf16.msra.mxu0 %v6382_v19  ;;  %v6528_v19 = vcombine.low %v4006_v4, %v4014_v3 }
 0xdac   :  { %5759 = vmatpush1.bf16.msra.mxu1 %v6384_v20  ;;  %5719 = vmatprep.subr.bf16.mxu0 %v6367_v21  ;;  %v6511_v20 = vcombine.high %v3989_v13, %v3997_v14  ;;  %v6513_v21 = vcombine.high %v3990_v15, %v3998_v17 }
 0xdad   :  { %5760 = vmatprep.subr.bf16.mxu1 %v6369_v22  ;;  %v3973_v22 = vld [vmem:[%s9730_s21 + $0x430] sm:$0xff] }
 0xdaf   :  { %5720 = vmatpush1.bf16.msra.mxu0 %v6366_v27  ;;  %v6512_v27 = vcombine.low %v3990_v15, %v3998_v17 }
 0xdb0   :  { %5761 = vmatpush1.bf16.msra.mxu1 %v6368_v28  ;;  %5721 = vmatprep.subr.bf16.mxu0 %v6607_v29  ;;  %v6495_v28 = vcombine.high %v3973_v22, %v3981_v23  ;;  %v6497_v29 = vcombine.high %v3974_v24, %v3982_v25 }
 0xdb1   :  { %5762 = vmatprep.subr.bf16.mxu1 %v6609_v30  ;;  %v6494_v30 = vcombine.low %v3973_v22, %v3981_v23 }
 0xdb3   :  { %5722 = vmatpush2.bf16.msra.mxu0 %v6606_v32  ;;  %v4106_v32 = vrot.slane %v4095_v2, %v8309_v6 }
 0xdb4   :  { %5763 = vmatpush2.bf16.msra.mxu1 %v6608_v33  ;;  %5723 = vmatprep.subr.bf16.mxu0 %v6591_v11  ;;  %v4114_v33 = vrot.slane %v4095_v2, %v8688_v47 }
 0xdb5   :  { %5764 = vmatprep.subr.bf16.mxu1 %v6593_v35 }
 0xdb7   :  { %5724 = vmatpush2.bf16.msra.mxu0 %v6590_v44 }
 0xdb8   :  { %5765 = vmatpush2.bf16.msra.mxu1 %v6592_v56  ;;  %5725 = vmatprep.subr.bf16.mxu0 %v6575_v46 }
 0xdb9   :  { %5766 = vmatprep.subr.bf16.mxu1 %v6577_v48 }
 0xdbb   :  { %5726 = vmatpush2.bf16.msra.mxu0 %v6574_v53 }
 0xdbc   :  { %5767 = vmatpush2.bf16.msra.mxu1 %v6576_v54  ;;  %5727 = vmatprep.subr.bf16.mxu0 %v6559_v16 }
 0xdbd   :  { %5768 = vmatprep.subr.bf16.mxu1 %v6561_v55 }
 0xdbf   :  { %5728 = vmatpush2.bf16.msra.mxu0 %v6558_v61  ;;  %v4121_v61 = vsub.s32 5, %v7608_v42 }
 0xdc0   :  { %5769 = vmatpush2.bf16.msra.mxu1 %v6560_v41  ;;  %5729 = vmatprep.subr.bf16.mxu0 %v6543_v62  ;;  %v4129_v41 = vsub.s32 7, %v7608_v42  ;;  %v4118_v62 = vrot.slane %v4095_v2, %v4117_v39 }
 0xdc1   :  { %5770 = vmatprep.subr.bf16.mxu1 %v6545_v63  ;;  %v4126_v63 = vrot.slane %v4095_v2, %v4125_v60  ;;  %v4122_v0 = vrot.slane %v4095_v2, %v4121_v61 }
 0xdc2   :  { %v4130_v1 = vrot.slane %v4095_v2, %v4129_v41 }
 0xdc3   :  { %5730 = vmatpush2.bf16.msra.mxu0 %v6542_v7 }
 0xdc4   :  { %5771 = vmatpush2.bf16.msra.mxu1 %v6544_v8  ;;  %5731 = vmatprep.subr.bf16.mxu0 %v6527_v10 }
 0xdc5   :  { %5772 = vmatprep.subr.bf16.mxu1 %v6529_v12 }
 0xdc7   :  { %5732 = vmatpush2.bf16.msra.mxu0 %v6526_v18 }
 0xdc8   :  { %5773 = vmatpush2.bf16.msra.mxu1 %v6528_v19  ;;  %5733 = vmatprep.subr.bf16.mxu0 %v6511_v20 }
 0xdc9   :  { %5774 = vmatprep.subr.bf16.mxu1 %v6513_v21 }
 0xdcb   :  { %5734 = vmatpush2.bf16.msra.mxu0 %v6510_v26 }
 0xdcc   :  { %5775 = vmatpush2.bf16.msra.mxu1 %v6512_v27  ;;  %5735 = vmatprep.subr.bf16.mxu0 %v6495_v28 }
 0xdcd   :  { %5776 = vmatprep.subr.bf16.mxu1 %v6497_v29 }
 0xdcf   :  { %5736 = vmatpush2.bf16.msra.mxu0 %v6494_v30 }
 0xdd0   :  { %5777 = vmatpush2.bf16.msra.mxu1 %v6496_v31  ;;  %v4096_v31 = vld [vmem:[%s9733_s22 + $0x8] sm:$0xff] }
 0xdd1   :  { %v4134_v2 = vrot.slane %v4096_v31, %v8303_v40 }
 0xdd2   :  { %5738 = vmatmul.mubr.bf16.vlgmr.msra.gmra.mxu0 %v9105_v57  ;;  %v5493_v11 = vpop.f32.mrf.mxu0  ;;  %v5534_v35 = vpop.f32.mrf.mxu1 }
 0xdd3   :  { %5779 = vmatmul.mubr.bf16.vlgmr.msra.gmra.mxu1 %v9105_v57  ;;  %v5494_v36 = vadd.f32 %v5493_v11, %v4102_v5  ;;  %v5535_v37 = vadd.f32 %v5534_v35, %v4110_v9  ;;  %v4142_v5 = vrot.slane %v4096_v31, %v8682_v45  ;;  %v4138_v9 = vrot.slane %v4096_v31, %v8309_v6 }
 0xdd4   :  { %v5495_v38 = vpop.f32.mrf.mxu0  ;;  %v5536_v43 = vpop.f32.mrf.mxu1 }
 0xdd5   :  { %v5496_v44 = vadd.f32 %v5495_v38, %v4106_v32  ;;  %v5537_v56 = vadd.f32 %v5536_v43, %v4114_v33  ;;  %v5787_v34 = vmax.f32 %v5494_v36, 0.0  ;;  %v5789_v50 = vmax.f32 %v5535_v37, 0.0 }
 0xdd6   :  { %v5497_v46 = vpop.f32.mrf.mxu0  ;;  %v5538_v48 = vpop.f32.mrf.mxu1  ;;  %v4146_v33 = vrot.slane %v4096_v31, %v8688_v47 }
 0xdd7   :  { %v5788_v51 = vmax.f32 %v5496_v44, 0.0  ;;  %v5790_v52 = vmax.f32 %v5537_v56, 0.0 }
 0xdd8   :  { %v5498_v53 = vpop.f32.mrf.mxu0  ;;  %v5539_v54 = vpop.f32.mrf.mxu1 }
 0xdd9   :  { %v6610_v16 = vpack.c.bf16 %v5788_v51, %v5787_v34  ;;  %v6611_v55 = vpack.c.bf16 %v5790_v52, %v5789_v50 }
 0xddb   :  { %v5845_v58 = vrot.slane %v6610_v16, %v7626_v49  ;;  %v5852_v57 = vrot.slane %v6611_v55, %v7626_v49  ;;  %v4150_v16 = vrot.slane %v4096_v31, %v4117_v39  ;;  %v4158_v55 = vrot.slane %v4096_v31, %v4125_v60 }
 0xddd   :  { %v5867_v59 = vcombine.low %v5845_v58, %v5852_v57  ;;  %v4154_v58 = vrot.slane %v4096_v31, %v4121_v61 }
 0xddf   :  { %v5875_v28 = vrot.slane %v5867_v59, %v7626_v49  ;;  %v4162_v59 = vrot.slane %v4096_v31, %v4129_v41 }
 0xe12   :  { %v5575_v4 = vpop.f32.mrf.mxu0  ;;  %v5616_v3 = vpop.f32.mrf.mxu1 }
 0xe13   :  { %v5576_v7 = vadd.f32 %v5575_v4, %v4118_v62  ;;  %v5617_v8 = vadd.f32 %v5616_v3, %v4126_v63 }
 0xe14   :  { %v5577_v10 = vpop.f32.mrf.mxu0  ;;  %v5618_v12 = vpop.f32.mrf.mxu1 }
 0xe15   :  { %v5578_v13 = vadd.f32 %v5577_v10, %v4122_v0  ;;  %v5619_v14 = vadd.f32 %v5618_v12, %v4130_v1  ;;  %v5791_v18 = vmax.f32 %v5576_v7, 0.0  ;;  %v5793_v19 = vmax.f32 %v5617_v8, 0.0 }
 0xe16   :  { %v5579_v15 = vpop.f32.mrf.mxu0  ;;  %v5620_v17 = vpop.f32.mrf.mxu1 }
 0xe17   :  { %v5792_v20 = vmax.f32 %v5578_v13, 0.0  ;;  %v5794_v21 = vmax.f32 %v5619_v14, 0.0 }
 0xe18   :  { %v5580_v22 = vpop.f32.mrf.mxu0  ;;  %v5621_v42 = vpop.f32.mrf.mxu1 }
 0xe19   :  { %v6612_v23 = vpack.c.bf16 %v5792_v20, %v5791_v18  ;;  %v6613_v24 = vpack.c.bf16 %v5794_v21, %v5793_v19 }
 0xe1b   :  { %v5859_v25 = vrot.slane %v6612_v23, %v7626_v49  ;;  %v5866_v26 = vrot.slane %v6613_v24, %v7626_v49 }
 0xe1d   :  { %v5868_v27 = vcombine.low %v5859_v25, %v5866_v26 }
 0xe1f   :  { %v5882_v29 = vrot.slane %v5868_v27, %v7626_v49 }
 0xe21   :  { %v5883_v30 = vcombine.low %v5875_v28, %v5882_v29 }
 0xe23   :  { %5935 = vst [vmem:[%s9734_s23] sm:$0xff] %v5883_v30 }
 0xe52   :  { %v5657_v32 = vpop.f32.mrf.mxu0 }
 0xe53   :  { %v5658_v11 = vadd.f32 %v5657_v32, %v4134_v2  ;;  %v5698_v35 = vpop.f32.mrf.mxu1 }
 0xe54   :  { %v5699_v36 = vadd.f32 %v5698_v35, %v4142_v5  ;;  %v5659_v37 = vpop.f32.mrf.mxu0 }
 0xe55   :  { %v5660_v38 = vadd.f32 %v5659_v37, %v4138_v9  ;;  %v5700_v43 = vpop.f32.mrf.mxu1  ;;  %v5795_v46 = vmax.f32 %v5658_v11, 0.0 }
 0xe56   :  { %v5701_v44 = vadd.f32 %v5700_v43, %v4146_v33  ;;  %v5661_v56 = vpop.f32.mrf.mxu0  ;;  %v5797_v50 = vmax.f32 %v5699_v36, 0.0 }
 0xe57   :  { %v5796_v48 = vmax.f32 %v5660_v38, 0.0  ;;  %v5702_v34 = vpop.f32.mrf.mxu1 }
 0xe58   :  { %v5798_v40 = vmax.f32 %v5701_v44, 0.0  ;;  %v5662_v51 = vpop.f32.mrf.mxu0 }
 0xe59   :  { %v6614_v45 = vpack.c.bf16 %v5796_v48, %v5795_v46  ;;  %v5703_v52 = vpop.f32.mrf.mxu1 }
 0xe5a   :  { %v6615_v6 = vpack.c.bf16 %v5798_v40, %v5797_v50 }
 0xe5b   :  { %v5894_v53 = vrot.slane %v6614_v45, %v7626_v49 }
 0xe5c   :  { %v5901_v47 = vrot.slane %v6615_v6, %v7626_v49 }
 0xe5e   :  { %v5916_v54 = vcombine.low %v5894_v53, %v5901_v47 }
 0xe60   :  { %v5924_v20 = vrot.slane %v5916_v54, %v7626_v49 }
 0xe92   :  { %v5739_v57 = vpop.f32.mrf.mxu0 }
 0xe93   :  { %v5740_v62 = vadd.f32 %v5739_v57, %v4150_v16  ;;  %v5780_v63 = vpop.f32.mrf.mxu1 }
 0xe94   :  { %v5781_v0 = vadd.f32 %v5780_v63, %v4158_v55  ;;  %v5741_v1 = vpop.f32.mrf.mxu0 }
 0xe95   :  { %v5742_v4 = vadd.f32 %v5741_v1, %v4154_v58  ;;  %v5782_v3 = vpop.f32.mrf.mxu1  ;;  %v5799_v10 = vmax.f32 %v5740_v62, 0.0 }
 0xe96   :  { %v5783_v7 = vadd.f32 %v5782_v3, %v4162_v59  ;;  %v5743_v8 = vpop.f32.mrf.mxu0  ;;  %v5801_v14 = vmax.f32 %v5781_v0, 0.0 }
 0xe97   :  { %v5800_v12 = vmax.f32 %v5742_v4, 0.0  ;;  %v5784_v13 = vpop.f32.mrf.mxu1 }
 0xe98   :  { %v5802_v15 = vmax.f32 %v5783_v7, 0.0  ;;  %v5744_v17 = vpop.f32.mrf.mxu0 }
 0xe99   :  { %v6616_v18 = vpack.c.bf16 %v5800_v12, %v5799_v10  ;;  %v5785_v39 = vpop.f32.mrf.mxu1 }
 0xe9a   :  { %v6617_v60 = vpack.c.bf16 %v5802_v15, %v5801_v14 }
 0xe9b   :  { %v5908_v61 = vrot.slane %v6616_v18, %v7626_v49 }
 0xe9c   :  { %v5915_v41 = vrot.slane %v6617_v60, %v7626_v49 }
 0xe9e   :  { %v5917_v19 = vcombine.low %v5908_v61, %v5915_v41 }
 0xea0   :  { %v5931_v21 = vrot.slane %v5917_v19, %v7626_v49 }
 0xea2   :  { %v5932_v22 = vcombine.low %v5924_v20, %v5931_v21 }
 0xea4   :  { %5936 = vst [vmem:[%s9734_s23 + $0x8] sm:$0xff] %v5932_v22 }

// kernel: sparse_attn_autoencoder_forward.13
= control target key start
LH: loop header
LB: loop body
LE: loop exit
PB: predicated region body
PF: predicated region fallthrough
CT: control target
= control target key end

     0   :  { %s3076_s12 = smov 0   ;;  %s3437_s0 = inlined_call_operand.vmem [shape: bf16[4,512,512], index: 0, kind: input, shape index: {}]   ;;  %s3438_s1 = inlined_call_operand.vmem [shape: bf16[4,512,128], index: 1, kind: input, shape index: {}]   ;;  %s3439_s2 = inlined_call_operand.vmem [shape: f32[1,1,128], index: 2, kind: input, shape index: {}]   ;;  %s3440_s3 = inlined_call_operand.vmem [shape: f32[4,512,128], index: 3, kind: output, shape index: {}]  }
   0x1 LB: > { %s2316_s13 = sadd.s32 4294967295, %s3053_s12   ;;  %p2320_p0 = scmp.ge.s32.totalorder %s3053_s12, 1  ;;  %s3053_s12 = sphi %s3076_s12, %s13_s12  }
   0x2   : > { %p147_p1 = scmp.lt.s32.totalorder %s3053_s12, 5 }
   0x4   : > { %p148_p2 = pnand %p2320_p0, %p147_p1 }
   0x5   : > { %p176_p3 = scmp.lt.s32.totalorder (!%p148_p2), %s2316_s13, 3 }
   0x6   : > { %151 = sbr.rel (%p148_p2) target bundleno = 561 (0x231), region = 32 }
   0xb   : > { %v3055_v0 = vmov 0   ;;  %s3442_s13 = smov (!%p176_p3, %s2316_s13), 3 }
   0xc   : > { %1223 = vmatprep.subr.bf16.mxu0 %v3055_v0  ;;  %1512 = vmatprep.subr.bf16.mxu1 %v3055_v0  ;;  %s2555_s14 = sshll.u32 %s3442_s13, 8  ;;  %s2554_s18 = sshll.u32 %s3442_s13, 10 }
   0xd   : > { %s3092_s17 = scalar_lea.vmem %s3438_s1, %s2555_s14  ;;  %s3129_s21 = scalar_lea.vmem %s3437_s0, %s2554_s18 }
   0xe   : > { %v2566_v1 = vld [vmem:[%s3092_s17 + $0x38] sm:$0xff]   ;;  %v2568_v3 = vld [vmem:[%s3092_s17 + $0x30] sm:$0xff]   ;;  %v2570_v5 = vld [vmem:[%s3092_s17 + $0x28] sm:$0xff]   ;;  %s2556_s24 = sshll.u32 %s3442_s13, 9 }
   0xf   : > { %v2567_v2 = vld [vmem:[%s3092_s17 + $0xb8] sm:$0xff]   ;;  %1224 = vmatpush1.bf16.msra.mxu0 %v2566_v1  ;;  %v2569_v4 = vld [vmem:[%s3092_s17 + $0xb0] sm:$0xff]   ;;  %v2571_v6 = vld [vmem:[%s3092_s17 + $0xa8] sm:$0xff]   ;;  %s3298_s27 = scalar_lea.vmem %s3440_s3, %s2556_s24 }
  0x10   : > { %1513 = vmatpush1.bf16.msra.mxu1 %v2567_v2  ;;  %1225 = vmatprep.subr.bf16.mxu0 %v3055_v0  ;;  %v2572_v7 = vld [vmem:[%s3092_s17 + $0x20] sm:$0xff]   ;;  %v2574_v9 = vld [vmem:[%s3092_s17 + $0x18] sm:$0xff]   ;;  %v2576_v11 = vld [vmem:[%s3092_s17 + $0x10] sm:$0xff]  }
  0x11   : > { %1514 = vmatprep.subr.bf16.mxu1 %v3055_v0  ;;  %v2573_v8 = vld [vmem:[%s3092_s17 + $0xa0] sm:$0xff]   ;;  %v2575_v10 = vld [vmem:[%s3092_s17 + $0x98] sm:$0xff]   ;;  %v2577_v12 = vld [vmem:[%s3092_s17 + $0x90] sm:$0xff]  }
  0x12   : > { %v2578_v13 = vld [vmem:[%s3092_s17 + $0x8] sm:$0xff]   ;;  %v2580_v15 = vld [vmem:[%s3092_s17] sm:$0xff]   ;;  %v2582_v17 = vld [vmem:[%s3092_s17 + $0x78] sm:$0xff]  }
  0x13   : > { %1226 = vmatpush1.bf16.msra.mxu0 %v2568_v3  ;;  %v2579_v14 = vld [vmem:[%s3092_s17 + $0x88] sm:$0xff]   ;;  %v2581_v16 = vld [vmem:[%s3092_s17 + $0x80] sm:$0xff]   ;;  %v2583_v18 = vld [vmem:[%s3092_s17 + $0xf8] sm:$0xff]  }
  0x14   : > { %1515 = vmatpush1.bf16.msra.mxu1 %v2569_v4  ;;  %1227 = vmatprep.subr.bf16.mxu0 %v3055_v0  ;;  %v2600_v19 = vld [vmem:[%s3129_s21 + $0x4] ss:$16 sps:$4 sm:$0xff]   ;;  %v2603_v21 = vld [vmem:[%s3129_s21 + $0xc] ss:$16 sps:$4 sm:$0xff]   ;;  %v2598_v35 = vld [vmem:[%s3129_s21] ss:$16 sps:$4 sm:$0xff]  }
  0x15   : > { %1516 = vmatprep.subr.bf16.mxu1 %v3055_v0  ;;  %v2584_v20 = vld [vmem:[%s3092_s17 + $0x70] sm:$0xff]   ;;  %1255 = vmatprep.mubr.bf16.mxu0 %v2600_v19  ;;  %v2586_v23 = vld [vmem:[%s3092_s17 + $0x68] sm:$0xff]   ;;  %v2588_v25 = vld [vmem:[%s3092_s17 + $0x60] sm:$0xff]  }
  0x16   : > { %v2585_v22 = vld [vmem:[%s3092_s17 + $0xf0] sm:$0xff]   ;;  %1544 = vmatprep.mubr.bf16.mxu1 %v2603_v21  ;;  %v2587_v24 = vld [vmem:[%s3092_s17 + $0xe8] sm:$0xff]   ;;  %v2589_v26 = vld [vmem:[%s3092_s17 + $0xe0] sm:$0xff]  }
  0x17   : > { %1228 = vmatpush1.bf16.msra.mxu0 %v2570_v5  ;;  %v2590_v27 = vld [vmem:[%s3092_s17 + $0x58] sm:$0xff]   ;;  %v2592_v29 = vld [vmem:[%s3092_s17 + $0x50] sm:$0xff]   ;;  %v2594_v31 = vld [vmem:[%s3092_s17 + $0x48] sm:$0xff]  }
  0x18   : > { %1517 = vmatpush1.bf16.msra.mxu1 %v2571_v6  ;;  %1229 = vmatprep.subr.bf16.mxu0 %v3055_v0  ;;  %v2591_v28 = vld [vmem:[%s3092_s17 + $0xd8] sm:$0xff]   ;;  %v2593_v30 = vld [vmem:[%s3092_s17 + $0xd0] sm:$0xff]   ;;  %v2595_v32 = vld [vmem:[%s3092_s17 + $0xc8] sm:$0xff]  }
  0x19   : > { %1518 = vmatprep.subr.bf16.mxu1 %v3055_v0  ;;  %v2596_v33 = vld [vmem:[%s3092_s17 + $0x40] sm:$0xff]   ;;  %v2601_v36 = vld [vmem:[%s3129_s21 + $0x8] ss:$16 sps:$4 sm:$0xff]   ;;  %v2606_v38 = vld [vmem:[%s3129_s21 + $0x2c] ss:$16 sps:$4 sm:$0xff]  }
  0x1a   : > { %v2597_v34 = vld [vmem:[%s3092_s17 + $0xc0] sm:$0xff]   ;;  %v2609_v40 = vld [vmem:[%s3129_s21 + $0x28] ss:$16 sps:$4 sm:$0xff]   ;;  %v2612_v42 = vld [vmem:[%s3129_s21 + $0x4c] ss:$16 sps:$4 sm:$0xff]  }
  0x1b   : > { %1230 = vmatpush1.bf16.msra.mxu0 %v2572_v7  ;;  %v2604_v37 = vld [vmem:[%s3129_s21 + $0x24] ss:$16 sps:$4 sm:$0xff]   ;;  %v2608_v39 = vld [vmem:[%s3129_s21 + $0x20] ss:$16 sps:$4 sm:$0xff]   ;;  %v2615_v44 = vld [vmem:[%s3129_s21 + $0x48] ss:$16 sps:$4 sm:$0xff]  }
  0x1c   : > { %1519 = vmatpush1.bf16.msra.mxu1 %v2573_v8  ;;  %1231 = vmatprep.subr.bf16.mxu0 %v3055_v0  ;;  %v2610_v41 = vld [vmem:[%s3129_s21 + $0x44] ss:$16 sps:$4 sm:$0xff]   ;;  %v2614_v43 = vld [vmem:[%s3129_s21 + $0x40] ss:$16 sps:$4 sm:$0xff]   ;;  %v2618_v46 = vld [vmem:[%s3129_s21 + $0x6c] ss:$16 sps:$4 sm:$0xff]  }
  0x1d   : > { %1520 = vmatprep.subr.bf16.mxu1 %v3055_v0  ;;  %v2616_v45 = vld [vmem:[%s3129_s21 + $0x64] ss:$16 sps:$4 sm:$0xff]   ;;  %v2620_v47 = vld [vmem:[%s3129_s21 + $0x60] ss:$16 sps:$4 sm:$0xff]   ;;  %v2621_v48 = vld [vmem:[%s3129_s21 + $0x68] ss:$16 sps:$4 sm:$0xff]  }
  0x1e   : > { %v2622_v49 = vld [vmem:[%s3129_s21 + $0x84] ss:$16 sps:$4 sm:$0xff]   ;;  %v2624_v50 = vld [vmem:[%s3129_s21 + $0x8c] ss:$16 sps:$4 sm:$0xff]   ;;  %v2626_v51 = vld [vmem:[%s3129_s21 + $0x80] ss:$16 sps:$4 sm:$0xff]  }
  0x1f   : > { %1232 = vmatpush1.bf16.msra.mxu0 %v2574_v9  ;;  %v2627_v52 = vld [vmem:[%s3129_s21 + $0x88] ss:$16 sps:$4 sm:$0xff]   ;;  %v2628_v53 = vld [vmem:[%s3129_s21 + $0xa4] ss:$16 sps:$4 sm:$0xff]   ;;  %v2630_v54 = vld [vmem:[%s3129_s21 + $0xac] ss:$16 sps:$4 sm:$0xff]  }
  0x20   : > { %1521 = vmatpush1.bf16.msra.mxu1 %v2575_v10  ;;  %1233 = vmatprep.subr.bf16.mxu0 %v3055_v0  ;;  %v2632_v55 = vld [vmem:[%s3129_s21 + $0xa0] ss:$16 sps:$4 sm:$0xff]   ;;  %v2633_v56 = vld [vmem:[%s3129_s21 + $0xa8] ss:$16 sps:$4 sm:$0xff]   ;;  %v2634_v57 = vld [vmem:[%s3129_s21 + $0xc4] ss:$16 sps:$4 sm:$0xff]  }
  0x21   : > { %1522 = vmatprep.subr.bf16.mxu1 %v3055_v0  ;;  %v2636_v58 = vld [vmem:[%s3129_s21 + $0xcc] ss:$16 sps:$4 sm:$0xff]   ;;  %v2638_v59 = vld [vmem:[%s3129_s21 + $0xc0] ss:$16 sps:$4 sm:$0xff]   ;;  %v2639_v60 = vld [vmem:[%s3129_s21 + $0xc8] ss:$16 sps:$4 sm:$0xff]  }
  0x22   : > { %v2640_v61 = vld [vmem:[%s3129_s21 + $0xe4] ss:$16 sps:$4 sm:$0xff]   ;;  %v2642_v62 = vld [vmem:[%s3129_s21 + $0xec] ss:$16 sps:$4 sm:$0xff]   ;;  %v2644_v63 = vld [vmem:[%s3129_s21 + $0xe0] ss:$16 sps:$4 sm:$0xff]  }
  0x23   : > { %1234 = vmatpush1.bf16.msra.mxu0 %v2576_v11  ;;  %v2646_v1 = vld [vmem:[%s3129_s21 + $0x104] ss:$16 sps:$4 sm:$0xff]   ;;  %v2648_v2 = vld [vmem:[%s3129_s21 + $0x10c] ss:$16 sps:$4 sm:$0xff]   ;;  %v2650_v3 = vld [vmem:[%s3129_s21 + $0x100] ss:$16 sps:$4 sm:$0xff]  }
  0x24   : > { %1523 = vmatpush1.bf16.msra.mxu1 %v2577_v12  ;;  %1235 = vmatprep.subr.bf16.mxu0 %v3055_v0  ;;  %v2651_v4 = vld [vmem:[%s3129_s21 + $0x108] ss:$16 sps:$4 sm:$0xff]   ;;  %v2652_v5 = vld [vmem:[%s3129_s21 + $0x124] ss:$16 sps:$4 sm:$0xff]   ;;  %v2654_v6 = vld [vmem:[%s3129_s21 + $0x12c] ss:$16 sps:$4 sm:$0xff]  }
  0x25   : > { %1524 = vmatprep.subr.bf16.mxu1 %v3055_v0  ;;  %v2656_v7 = vld [vmem:[%s3129_s21 + $0x120] ss:$16 sps:$4 sm:$0xff]   ;;  %v2657_v8 = vld [vmem:[%s3129_s21 + $0x128] ss:$16 sps:$4 sm:$0xff]   ;;  %v2658_v9 = vld [vmem:[%s3129_s21 + $0x144] ss:$16 sps:$4 sm:$0xff]  }
  0x26   : > { %v2660_v10 = vld [vmem:[%s3129_s21 + $0x14c] ss:$16 sps:$4 sm:$0xff]   ;;  %v2662_v11 = vld [vmem:[%s3129_s21 + $0x140] ss:$16 sps:$4 sm:$0xff]   ;;  %v2663_v12 = vld [vmem:[%s3129_s21 + $0x148] ss:$16 sps:$4 sm:$0xff]  }
  0x27   : > { %1236 = vmatpush1.bf16.msra.mxu0 %v2578_v13  ;;  %v2664_v13 = vld [vmem:[%s3129_s21 + $0x164] ss:$16 sps:$4 sm:$0xff]   ;;  %v2674_v19 = vld [vmem:[%s3129_s21 + $0x180] ss:$16 sps:$4 sm:$0xff]  }
  0x28   : > { %1525 = vmatpush1.bf16.msra.mxu1 %v2579_v14  ;;  %1237 = vmatprep.subr.bf16.mxu0 %v3055_v0  ;;  %v2666_v14 = vld [vmem:[%s3129_s21 + $0x16c] ss:$16 sps:$4 sm:$0xff]   ;;  %v2676_v21 = vld [vmem:[%s3129_s21 + $0x1a4] ss:$16 sps:$4 sm:$0xff]  }
  0x29   : > { %1526 = vmatprep.subr.bf16.mxu1 %v3055_v0 }
  0x2b   : > { %1238 = vmatpush1.bf16.msra.mxu0 %v2580_v15  ;;  %v2668_v15 = vld [vmem:[%s3129_s21 + $0x160] ss:$16 sps:$4 sm:$0xff]  }
  0x2c   : > { %1527 = vmatpush1.bf16.msra.mxu1 %v2581_v16  ;;  %1239 = vmatprep.subr.bf16.mxu0 %v3055_v0  ;;  %v2669_v16 = vld [vmem:[%s3129_s21 + $0x168] ss:$16 sps:$4 sm:$0xff]  }
  0x2d   : > { %1528 = vmatprep.subr.bf16.mxu1 %v3055_v0 }
  0x2f   : > { %1240 = vmatpush2.bf16.msra.mxu0 %v2582_v17  ;;  %v2670_v17 = vld [vmem:[%s3129_s21 + $0x184] ss:$16 sps:$4 sm:$0xff]  }
  0x30   : > { %1529 = vmatpush2.bf16.msra.mxu1 %v2583_v18  ;;  %1241 = vmatprep.subr.bf16.mxu0 %v3055_v0  ;;  %v2672_v18 = vld [vmem:[%s3129_s21 + $0x18c] ss:$16 sps:$4 sm:$0xff]  }
  0x31   : > { %1530 = vmatprep.subr.bf16.mxu1 %v3055_v0 }
  0x33   : > { %1242 = vmatpush2.bf16.msra.mxu0 %v2584_v20  ;;  %v2675_v20 = vld [vmem:[%s3129_s21 + $0x188] ss:$16 sps:$4 sm:$0xff]  }
  0x34   : > { %1531 = vmatpush2.bf16.msra.mxu1 %v2585_v22  ;;  %1243 = vmatprep.subr.bf16.mxu0 %v3055_v0  ;;  %v2678_v22 = vld [vmem:[%s3129_s21 + $0x1ac] ss:$16 sps:$4 sm:$0xff]  }
  0x35   : > { %1532 = vmatprep.subr.bf16.mxu1 %v3055_v0 }
  0x37   : > { %1244 = vmatpush2.bf16.msra.mxu0 %v2586_v23  ;;  %v2680_v23 = vld [vmem:[%s3129_s21 + $0x1a0] ss:$16 sps:$4 sm:$0xff]  }
  0x38   : > { %1533 = vmatpush2.bf16.msra.mxu1 %v2587_v24  ;;  %1245 = vmatprep.subr.bf16.mxu0 %v3055_v0  ;;  %v2681_v24 = vld [vmem:[%s3129_s21 + $0x1a8] ss:$16 sps:$4 sm:$0xff]  }
  0x39   : > { %1534 = vmatprep.subr.bf16.mxu1 %v3055_v0 }
  0x3b   : > { %1246 = vmatpush2.bf16.msra.mxu0 %v2588_v25  ;;  %v2682_v25 = vld [vmem:[%s3129_s21 + $0x1c4] ss:$16 sps:$4 sm:$0xff]  }
  0x3c   : > { %1535 = vmatpush2.bf16.msra.mxu1 %v2589_v26  ;;  %1247 = vmatprep.subr.bf16.mxu0 %v3055_v0  ;;  %v2684_v26 = vld [vmem:[%s3129_s21 + $0x1cc] ss:$16 sps:$4 sm:$0xff]  }
  0x3d   : > { %1536 = vmatprep.subr.bf16.mxu1 %v3055_v0 }
  0x3f   : > { %1248 = vmatpush2.bf16.msra.mxu0 %v2590_v27  ;;  %v2686_v27 = vld [vmem:[%s3129_s21 + $0x1c0] ss:$16 sps:$4 sm:$0xff]  }
  0x40   : > { %1537 = vmatpush2.bf16.msra.mxu1 %v2591_v28  ;;  %1249 = vmatprep.subr.bf16.mxu0 %v3055_v0  ;;  %v2687_v28 = vld [vmem:[%s3129_s21 + $0x1c8] ss:$16 sps:$4 sm:$0xff]  }
  0x41   : > { %1538 = vmatprep.subr.bf16.mxu1 %v3055_v0 }
  0x43   : > { %1250 = vmatpush2.bf16.msra.mxu0 %v2592_v29  ;;  %v2688_v29 = vld [vmem:[%s3129_s21 + $0x1e4] ss:$16 sps:$4 sm:$0xff]  }
  0x44   : > { %1539 = vmatpush2.bf16.msra.mxu1 %v2593_v30  ;;  %1251 = vmatprep.subr.bf16.mxu0 %v3055_v0  ;;  %v2690_v30 = vld [vmem:[%s3129_s21 + $0x1ec] ss:$16 sps:$4 sm:$0xff]  }
  0x45   : > { %1540 = vmatprep.subr.bf16.mxu1 %v3055_v0 }
  0x47   : > { %1252 = vmatpush2.bf16.msra.mxu0 %v2594_v31  ;;  %v2692_v31 = vld [vmem:[%s3129_s21 + $0x1e0] ss:$16 sps:$4 sm:$0xff]  }
  0x48   : > { %1541 = vmatpush2.bf16.msra.mxu1 %v2595_v32  ;;  %1253 = vmatprep.subr.bf16.mxu0 %v3055_v0  ;;  %v2693_v32 = vld [vmem:[%s3129_s21 + $0x1e8] ss:$16 sps:$4 sm:$0xff]  }
  0x49   : > { %1542 = vmatprep.subr.bf16.mxu1 %v3055_v0  ;;  %v2645_v0 = vld [vmem:[%s3129_s21 + $0xe8] ss:$16 sps:$4 sm:$0xff]  }
  0x4b   : > { %1254 = vmatpush2.bf16.msra.mxu0 %v2596_v33  ;;  %v2694_v33 = vld [vmem:[%s3129_s21 + $0x204] ss:$16 sps:$4 sm:$0xff]  }
  0x4c   : > { %1543 = vmatpush2.bf16.msra.mxu1 %v2597_v34  ;;  %v2696_v34 = vld [vmem:[%s3129_s21 + $0x20c] ss:$16 sps:$4 sm:$0xff]  }
  0x4e   : > { %1256 = vmatmul.mubr.bf16.vlgmr.msra.gmra.mxu0 %v2598_v35  ;;  %v2698_v35 = vld [vmem:[%s3129_s21 + $0x200] ss:$16 sps:$4 sm:$0xff]  }
  0x4f   : > { %1545 = vmatmul.mubr.bf16.vlgmr.msra.gmra.mxu1 %v2601_v36  ;;  %1263 = vmatprep.mubr.bf16.mxu0 %v2604_v37  ;;  %v2699_v36 = vld [vmem:[%s3129_s21 + $0x208] ss:$16 sps:$4 sm:$0xff]   ;;  %v2700_v37 = vld [vmem:[%s3129_s21 + $0x224] ss:$16 sps:$4 sm:$0xff]  }
  0x50   : > { %1552 = vmatprep.mubr.bf16.mxu1 %v2606_v38  ;;  %v2702_v38 = vld [vmem:[%s3129_s21 + $0x22c] ss:$16 sps:$4 sm:$0xff]  }
  0x56   : > { %1264 = vmatmul.mubr.bf16.gmra.mxu0 %v2608_v39  ;;  %v2704_v39 = vld [vmem:[%s3129_s21 + $0x220] ss:$16 sps:$4 sm:$0xff]  }
  0x57   : > { %1553 = vmatmul.mubr.bf16.gmra.mxu1 %v2609_v40  ;;  %1271 = vmatprep.mubr.bf16.mxu0 %v2610_v41  ;;  %v2705_v40 = vld [vmem:[%s3129_s21 + $0x228] ss:$16 sps:$4 sm:$0xff]   ;;  %v2706_v41 = vld [vmem:[%s3129_s21 + $0x244] ss:$16 sps:$4 sm:$0xff]  }
  0x58   : > { %1560 = vmatprep.mubr.bf16.mxu1 %v2612_v42  ;;  %v2708_v42 = vld [vmem:[%s3129_s21 + $0x24c] ss:$16 sps:$4 sm:$0xff]  }
  0x5e   : > { %1272 = vmatmul.mubr.bf16.gmra.mxu0 %v2614_v43  ;;  %v2710_v43 = vld [vmem:[%s3129_s21 + $0x240] ss:$16 sps:$4 sm:$0xff]  }
  0x5f   : > { %1561 = vmatmul.mubr.bf16.gmra.mxu1 %v2615_v44  ;;  %1279 = vmatprep.mubr.bf16.mxu0 %v2616_v45  ;;  %v2711_v44 = vld [vmem:[%s3129_s21 + $0x248] ss:$16 sps:$4 sm:$0xff]   ;;  %v2712_v45 = vld [vmem:[%s3129_s21 + $0x264] ss:$16 sps:$4 sm:$0xff]  }
  0x60   : > { %1568 = vmatprep.mubr.bf16.mxu1 %v2618_v46  ;;  %v2714_v46 = vld [vmem:[%s3129_s21 + $0x26c] ss:$16 sps:$4 sm:$0xff]  }
  0x66   : > { %1280 = vmatmul.mubr.bf16.gmra.mxu0 %v2620_v47  ;;  %v2716_v47 = vld [vmem:[%s3129_s21 + $0x260] ss:$16 sps:$4 sm:$0xff]  }
  0x67   : > { %1569 = vmatmul.mubr.bf16.gmra.mxu1 %v2621_v48  ;;  %1287 = vmatprep.mubr.bf16.mxu0 %v2622_v49  ;;  %v2717_v48 = vld [vmem:[%s3129_s21 + $0x268] ss:$16 sps:$4 sm:$0xff]   ;;  %v2718_v49 = vld [vmem:[%s3129_s21 + $0x284] ss:$16 sps:$4 sm:$0xff]  }
  0x68   : > { %1576 = vmatprep.mubr.bf16.mxu1 %v2624_v50  ;;  %v2720_v50 = vld [vmem:[%s3129_s21 + $0x28c] ss:$16 sps:$4 sm:$0xff]  }
  0x6e   : > { %1288 = vmatmul.mubr.bf16.gmra.mxu0 %v2626_v51  ;;  %v2722_v51 = vld [vmem:[%s3129_s21 + $0x280] ss:$16 sps:$4 sm:$0xff]  }
  0x6f   : > { %1577 = vmatmul.mubr.bf16.gmra.mxu1 %v2627_v52  ;;  %1295 = vmatprep.mubr.bf16.mxu0 %v2628_v53  ;;  %v2723_v52 = vld [vmem:[%s3129_s21 + $0x288] ss:$16 sps:$4 sm:$0xff]   ;;  %v2724_v53 = vld [vmem:[%s3129_s21 + $0x2a4] ss:$16 sps:$4 sm:$0xff]  }
  0x70   : > { %1584 = vmatprep.mubr.bf16.mxu1 %v2630_v54  ;;  %v2726_v54 = vld [vmem:[%s3129_s21 + $0x2ac] ss:$16 sps:$4 sm:$0xff]  }
  0x76   : > { %1296 = vmatmul.mubr.bf16.gmra.mxu0 %v2632_v55  ;;  %v2728_v55 = vld [vmem:[%s3129_s21 + $0x2a0] ss:$16 sps:$4 sm:$0xff]  }
  0x77   : > { %1585 = vmatmul.mubr.bf16.gmra.mxu1 %v2633_v56  ;;  %1303 = vmatprep.mubr.bf16.mxu0 %v2634_v57  ;;  %v2729_v56 = vld [vmem:[%s3129_s21 + $0x2a8] ss:$16 sps:$4 sm:$0xff]   ;;  %v2730_v57 = vld [vmem:[%s3129_s21 + $0x2c4] ss:$16 sps:$4 sm:$0xff]  }
  0x78   : > { %1592 = vmatprep.mubr.bf16.mxu1 %v2636_v58  ;;  %v2732_v58 = vld [vmem:[%s3129_s21 + $0x2cc] ss:$16 sps:$4 sm:$0xff]  }
  0x7e   : > { %1304 = vmatmul.mubr.bf16.gmra.mxu0 %v2638_v59  ;;  %v2734_v59 = vld [vmem:[%s3129_s21 + $0x2c0] ss:$16 sps:$4 sm:$0xff]  }
  0x7f   : > { %1593 = vmatmul.mubr.bf16.gmra.mxu1 %v2639_v60  ;;  %1311 = vmatprep.mubr.bf16.mxu0 %v2640_v61  ;;  %v2735_v60 = vld [vmem:[%s3129_s21 + $0x2c8] ss:$16 sps:$4 sm:$0xff]   ;;  %v2736_v61 = vld [vmem:[%s3129_s21 + $0x2e4] ss:$16 sps:$4 sm:$0xff]  }
  0x80   : > { %1600 = vmatprep.mubr.bf16.mxu1 %v2642_v62  ;;  %v2738_v62 = vld [vmem:[%s3129_s21 + $0x2ec] ss:$16 sps:$4 sm:$0xff]  }
  0x86   : > { %1312 = vmatmul.mubr.bf16.gmra.mxu0 %v2644_v63  ;;  %v2740_v63 = vld [vmem:[%s3129_s21 + $0x2e0] ss:$16 sps:$4 sm:$0xff]  }
  0x87   : > { %1601 = vmatmul.mubr.bf16.gmra.mxu1 %v2645_v0  ;;  %1319 = vmatprep.mubr.bf16.mxu0 %v2646_v1  ;;  %v2741_v0 = vld [vmem:[%s3129_s21 + $0x2e8] ss:$16 sps:$4 sm:$0xff]   ;;  %v2742_v1 = vld [vmem:[%s3129_s21 + $0x304] ss:$16 sps:$4 sm:$0xff]  }
  0x88   : > { %1608 = vmatprep.mubr.bf16.mxu1 %v2648_v2  ;;  %v2744_v2 = vld [vmem:[%s3129_s21 + $0x30c] ss:$16 sps:$4 sm:$0xff]  }
  0x8e   : > { %1320 = vmatmul.mubr.bf16.gmra.mxu0 %v2650_v3  ;;  %v2746_v3 = vld [vmem:[%s3129_s21 + $0x300] ss:$16 sps:$4 sm:$0xff]  }
  0x8f   : > { %1609 = vmatmul.mubr.bf16.gmra.mxu1 %v2651_v4  ;;  %1327 = vmatprep.mubr.bf16.mxu0 %v2652_v5  ;;  %v2747_v4 = vld [vmem:[%s3129_s21 + $0x308] ss:$16 sps:$4 sm:$0xff]   ;;  %v2748_v5 = vld [vmem:[%s3129_s21 + $0x324] ss:$16 sps:$4 sm:$0xff]  }
  0x90   : > { %1616 = vmatprep.mubr.bf16.mxu1 %v2654_v6  ;;  %v3266_v6 = vld [vmem:[%s3439_s2] ss:$0 sm:$0xff] }
  0x96   : > { %1328 = vmatmul.mubr.bf16.gmra.mxu0 %v2656_v7  ;;  %v2750_v7 = vld [vmem:[%s3129_s21 + $0x32c] ss:$16 sps:$4 sm:$0xff]  }
  0x97   : > { %1617 = vmatmul.mubr.bf16.gmra.mxu1 %v2657_v8  ;;  %1335 = vmatprep.mubr.bf16.mxu0 %v2658_v9 }
  0x98   : > { %1624 = vmatprep.mubr.bf16.mxu1 %v2660_v10 }
  0x9e   : > { %1336 = vmatmul.mubr.bf16.gmra.mxu0 %v2662_v11 }
  0x9f   : > { %1625 = vmatmul.mubr.bf16.gmra.mxu1 %v2663_v12  ;;  %1343 = vmatprep.mubr.bf16.mxu0 %v2664_v13 }
  0xa0   : > { %1632 = vmatprep.mubr.bf16.mxu1 %v2666_v14 }
  0xa6   : > { %1344 = vmatmul.mubr.bf16.gmra.mxu0 %v2668_v15  ;;  %v2752_v15 = vld [vmem:[%s3129_s21 + $0x320] ss:$16 sps:$4 sm:$0xff]  }
  0xa7   : > { %1633 = vmatmul.mubr.bf16.gmra.mxu1 %v2669_v16  ;;  %1351 = vmatprep.mubr.bf16.mxu0 %v2670_v17 }
  0xa8   : > { %1640 = vmatprep.mubr.bf16.mxu1 %v2672_v18 }
  0xae   : > { %1352 = vmatmul.mubr.bf16.gmra.mxu0 %v2674_v19  ;;  %v2753_v19 = vld [vmem:[%s3129_s21 + $0x328] ss:$16 sps:$4 sm:$0xff]  }
  0xaf   : > { %1641 = vmatmul.mubr.bf16.gmra.mxu1 %v2675_v20  ;;  %1359 = vmatprep.mubr.bf16.mxu0 %v2676_v21  ;;  %v2754_v20 = vld [vmem:[%s3129_s21 + $0x344] ss:$16 sps:$4 sm:$0xff]  }
  0xb0   : > { %1648 = vmatprep.mubr.bf16.mxu1 %v2678_v22  ;;  %v2756_v22 = vld [vmem:[%s3129_s21 + $0x34c] ss:$16 sps:$4 sm:$0xff]  }
  0xb6   : > { %1360 = vmatmul.mubr.bf16.gmra.mxu0 %v2680_v23 }
  0xb7   : > { %1649 = vmatmul.mubr.bf16.gmra.mxu1 %v2681_v24  ;;  %1367 = vmatprep.mubr.bf16.mxu0 %v2682_v25 }
  0xb8   : > { %1656 = vmatprep.mubr.bf16.mxu1 %v2684_v26 }
  0xbe   : > { %1368 = vmatmul.mubr.bf16.gmra.mxu0 %v2686_v27 }
  0xbf   : > { %1657 = vmatmul.mubr.bf16.gmra.mxu1 %v2687_v28  ;;  %1375 = vmatprep.mubr.bf16.mxu0 %v2688_v29 }
  0xc0   : > { %1664 = vmatprep.mubr.bf16.mxu1 %v2690_v30 }
  0xc6   : > { %1376 = vmatmul.mubr.bf16.gmra.mxu0 %v2692_v31 }
  0xc7   : > { %1665 = vmatmul.mubr.bf16.gmra.mxu1 %v2693_v32  ;;  %1383 = vmatprep.mubr.bf16.mxu0 %v2694_v33  ;;  %v2758_v33 = vld [vmem:[%s3129_s21 + $0x340] ss:$16 sps:$4 sm:$0xff]  }
  0xc8   : > { %1672 = vmatprep.mubr.bf16.mxu1 %v2696_v34 }
  0xce   : > { %1384 = vmatmul.mubr.bf16.gmra.mxu0 %v2698_v35 }
  0xcf   : > { %1673 = vmatmul.mubr.bf16.gmra.mxu1 %v2699_v36  ;;  %1391 = vmatprep.mubr.bf16.mxu0 %v2700_v37  ;;  %v2759_v37 = vld [vmem:[%s3129_s21 + $0x348] ss:$16 sps:$4 sm:$0xff]  }
  0xd0   : > { %1680 = vmatprep.mubr.bf16.mxu1 %v2702_v38  ;;  %v2760_v38 = vld [vmem:[%s3129_s21 + $0x364] ss:$16 sps:$4 sm:$0xff]  }
  0xd6   : > { %1392 = vmatmul.mubr.bf16.gmra.mxu0 %v2704_v39 }
  0xd7   : > { %1681 = vmatmul.mubr.bf16.gmra.mxu1 %v2705_v40  ;;  %1399 = vmatprep.mubr.bf16.mxu0 %v2706_v41  ;;  %v2762_v40 = vld [vmem:[%s3129_s21 + $0x36c] ss:$16 sps:$4 sm:$0xff]  }
  0xd8   : > { %1688 = vmatprep.mubr.bf16.mxu1 %v2708_v42 }
  0xde   : > { %1400 = vmatmul.mubr.bf16.gmra.mxu0 %v2710_v43 }
  0xdf   : > { %1689 = vmatmul.mubr.bf16.gmra.mxu1 %v2711_v44  ;;  %1407 = vmatprep.mubr.bf16.mxu0 %v2712_v45 }
  0xe0   : > { %1696 = vmatprep.mubr.bf16.mxu1 %v2714_v46 }
  0xe6   : > { %1408 = vmatmul.mubr.bf16.gmra.mxu0 %v2716_v47 }
  0xe7   : > { %1697 = vmatmul.mubr.bf16.gmra.mxu1 %v2717_v48  ;;  %1415 = vmatprep.mubr.bf16.mxu0 %v2718_v49 }
  0xe8   : > { %1704 = vmatprep.mubr.bf16.mxu1 %v2720_v50 }
  0xee   : > { %1416 = vmatmul.mubr.bf16.gmra.mxu0 %v2722_v51 }
  0xef   : > { %1705 = vmatmul.mubr.bf16.gmra.mxu1 %v2723_v52  ;;  %1423 = vmatprep.mubr.bf16.mxu0 %v2724_v53  ;;  %v2764_v52 = vld [vmem:[%s3129_s21 + $0x360] ss:$16 sps:$4 sm:$0xff]   ;;  %v2765_v53 = vld [vmem:[%s3129_s21 + $0x368] ss:$16 sps:$4 sm:$0xff]  }
  0xf0   : > { %1712 = vmatprep.mubr.bf16.mxu1 %v2726_v54 }
  0xf6   : > { %1424 = vmatmul.mubr.bf16.gmra.mxu0 %v2728_v55 }
  0xf7   : > { %1713 = vmatmul.mubr.bf16.gmra.mxu1 %v2729_v56  ;;  %1431 = vmatprep.mubr.bf16.mxu0 %v2730_v57 }
  0xf8   : > { %1720 = vmatprep.mubr.bf16.mxu1 %v2732_v58  ;;  %v2768_v58 = vld [vmem:[%s3129_s21 + $0x384] ss:$16 sps:$4 sm:$0xff]  }
  0xfe   : > { %1432 = vmatmul.mubr.bf16.gmra.mxu0 %v2734_v59 }
  0xff   : > { %1721 = vmatmul.mubr.bf16.gmra.mxu1 %v2735_v60  ;;  %1439 = vmatprep.mubr.bf16.mxu0 %v2736_v61  ;;  %v2771_v60 = vld [vmem:[%s3129_s21 + $0x38c] ss:$16 sps:$4 sm:$0xff]  }
 0x100   : > { %1728 = vmatprep.mubr.bf16.mxu1 %v2738_v62 }
 0x106   : > { %1440 = vmatmul.mubr.bf16.gmra.mxu0 %v2740_v63 }
 0x107   : > { %1729 = vmatmul.mubr.bf16.gmra.mxu1 %v2741_v0  ;;  %1447 = vmatprep.mubr.bf16.mxu0 %v2742_v1 }
 0x108   : > { %1736 = vmatprep.mubr.bf16.mxu1 %v2744_v2 }
 0x10e   : > { %v1257_v8 = vpop.f32.mrf.mxu0  ;;  %1448 = vmatmul.mubr.bf16.gmra.mxu0 %v2746_v3 }
 0x10f   : > { %v1258_v9 = vadd.f32 %v3266_v6, %v1257_v8  ;;  %v1546_v10 = vpop.f32.mrf.mxu1  ;;  %1737 = vmatmul.mubr.bf16.gmra.mxu1 %v2747_v4  ;;  %1455 = vmatprep.mubr.bf16.mxu0 %v2748_v5 }
 0x110   : > { %v1259_v11 = vpop.f32.mrf.mxu0  ;;  %1744 = vmatprep.mubr.bf16.mxu1 %v2750_v7 }
 0x111   : > { %v1547_v12 = vadd.f32 %v1546_v10, %v1258_v9  ;;  %v1548_v13 = vpop.f32.mrf.mxu1  ;;  %v2766_v11 = vld [vmem:[%s3129_s21 + $0x380] ss:$16 sps:$4 sm:$0xff]  }
 0x112   : > { %v1260_v14 = vpop.f32.mrf.mxu0 }
 0x113   : > { %v2488_v16 = vmul.f32 -1.442695, %v1547_v12  ;;  %v1261_v17 = vadd.f32 %v3266_v6, %v1260_v14  ;;  %v1549_v18 = vpop.f32.mrf.mxu1  ;;  %v2769_v12 = vld [vmem:[%s3129_s21 + $0x388] ss:$16 sps:$4 sm:$0xff]  }
 0x114   : > { %v1262_v21 = vpop.f32.mrf.mxu0 }
 0x115   : > { %2790 = vpow2.f32 %v2488_v16  ;;  %v1550_v23 = vadd.f32 %v1549_v18, %v1261_v17  ;;  %v1551_v24 = vpop.f32.mrf.mxu1  ;;  %v2774_v17 = vld [vmem:[%s3129_s21 + $0x3a4] ss:$16 sps:$4 sm:$0xff]  }
 0x116   : > { %v1265_v25 = vpop.f32.mrf.mxu0  ;;  %1456 = vmatmul.mubr.bf16.gmra.mxu0 %v2752_v15 }
 0x117   : > { %v2489_v26 = vmul.f32 -1.442695, %v1550_v23  ;;  %v1266_v27 = vadd.f32 %v3266_v6, %v1265_v25  ;;  %v1554_v28 = vpop.f32.mrf.mxu1  ;;  %1745 = vmatmul.mubr.bf16.gmra.mxu1 %v2753_v19  ;;  %1463 = vmatprep.mubr.bf16.mxu0 %v2754_v20  ;;  %v2777_v19 = vld [vmem:[%s3129_s21 + $0x3ac] ss:$16 sps:$4 sm:$0xff]  }
 0x118   : > { %v1267_v29 = vpop.f32.mrf.mxu0  ;;  %1752 = vmatprep.mubr.bf16.mxu1 %v2756_v22 }
 0x119   : > { %2792 = vpow2.f32 %v2489_v26  ;;  %v1555_v30 = vadd.f32 %v1554_v28, %v1266_v27  ;;  %v1556_v31 = vpop.f32.mrf.mxu1 }
 0x11a   : > { %v1268_v32 = vpop.f32.mrf.mxu0 }
 0x11b   : > { %v2490_v34 = vmul.f32 -1.442695, %v1555_v30  ;;  %v1269_v35 = vadd.f32 %v3266_v6, %v1268_v32  ;;  %v1557_v36 = vpop.f32.mrf.mxu1 }
 0x11c   : > { %v1270_v39 = vpop.f32.mrf.mxu0 }
 0x11d   : > { %2794 = vpow2.f32 %v2490_v34  ;;  %v1558_v41 = vadd.f32 %v1557_v36, %v1269_v35  ;;  %v1559_v42 = vpop.f32.mrf.mxu1  ;;  %v2780_v39 = vld [vmem:[%s3129_s21 + $0x3c4] ss:$16 sps:$4 sm:$0xff]  }
 0x11e   : > { %v1273_v43 = vpop.f32.mrf.mxu0  ;;  %1464 = vmatmul.mubr.bf16.gmra.mxu0 %v2758_v33  ;;  %v2772_v33 = vld [vmem:[%s3129_s21 + $0x3a0] ss:$16 sps:$4 sm:$0xff]   ;;  %v2783_v42 = vld [vmem:[%s3129_s21 + $0x3cc] ss:$16 sps:$4 sm:$0xff]  }
 0x11f   : > { %v2491_v44 = vmul.f32 -1.442695, %v1558_v41  ;;  %v1274_v45 = vadd.f32 %v3266_v6, %v1273_v43  ;;  %v1562_v46 = vpop.f32.mrf.mxu1  ;;  %1753 = vmatmul.mubr.bf16.gmra.mxu1 %v2759_v37  ;;  %1471 = vmatprep.mubr.bf16.mxu0 %v2760_v38  ;;  %v2775_v38 = vld [vmem:[%s3129_s21 + $0x3a8] ss:$16 sps:$4 sm:$0xff]  }
 0x120   : > { %v1275_v47 = vpop.f32.mrf.mxu0  ;;  %1760 = vmatprep.mubr.bf16.mxu1 %v2762_v40 }
 0x121   : > { %2796 = vpow2.f32 %v2491_v44  ;;  %v1563_v48 = vadd.f32 %v1562_v46, %v1274_v45  ;;  %v1564_v49 = vpop.f32.mrf.mxu1 }
 0x122   : > { %v2791_v50 = vpop.eup %2790  ;;  %v1276_v51 = vpop.f32.mrf.mxu0 }
 0x123   : > { %v1993_v54 = vadd.f32 1.0, %v2791_v50  ;;  %v2492_v55 = vmul.f32 -1.442695, %v1563_v48  ;;  %v1277_v56 = vadd.f32 %v3266_v6, %v1276_v51  ;;  %v1565_v57 = vpop.f32.mrf.mxu1 }
 0x124   : > { %v1278_v59 = vpop.f32.mrf.mxu0 }
 0x125   : > { %2798 = vrcp.f32 %v1993_v54  ;;  %v1566_v61 = vadd.f32 %v1565_v57, %v1277_v56  ;;  %v1567_v62 = vpop.f32.mrf.mxu1  ;;  %v2778_v57 = vld [vmem:[%s3129_s21 + $0x3c0] ss:$16 sps:$4 sm:$0xff]  }
 0x126   : > { %v2793_v63 = vpop.eup %2792  ;;  %2800 = vpow2.f32 %v2492_v55  ;;  %v1281_v0 = vpop.f32.mrf.mxu0  ;;  %1472 = vmatmul.mubr.bf16.gmra.mxu0 %v2764_v52  ;;  %v2781_v62 = vld [vmem:[%s3129_s21 + $0x3c8] ss:$16 sps:$4 sm:$0xff]  }
 0x127   : > { %v1994_v1 = vadd.f32 1.0, %v2793_v63  ;;  %v2493_v2 = vmul.f32 -1.442695, %v1566_v61  ;;  %v1282_v3 = vadd.f32 %v3266_v6, %v1281_v0  ;;  %v1570_v4 = vpop.f32.mrf.mxu1  ;;  %1761 = vmatmul.mubr.bf16.gmra.mxu1 %v2765_v53  ;;  %1479 = vmatprep.mubr.bf16.mxu0 %v2768_v58  ;;  %v2786_v63 = vld [vmem:[%s3129_s21 + $0x3e4] ss:$16 sps:$4 sm:$0xff]  }
 0x128   : > { %v1283_v5 = vpop.f32.mrf.mxu0  ;;  %1768 = vmatprep.mubr.bf16.mxu1 %v2771_v60 }
 0x129   : > { %2802 = vrcp.f32 %v1994_v1  ;;  %v1571_v7 = vadd.f32 %v1570_v4, %v1282_v3  ;;  %v1572_v8 = vpop.f32.mrf.mxu1 }
 0x12a   : > { %v2795_v9 = vpop.eup %2794  ;;  %2804 = vpow2.f32 %v2493_v2  ;;  %v1284_v10 = vpop.f32.mrf.mxu0  ;;  %v2789_v2 = vld [vmem:[%s3129_s21 + $0x3ec] ss:$16 sps:$4 sm:$0xff]  }
 0x12b   : > { %v1995_v13 = vadd.f32 1.0, %v2795_v9  ;;  %v2494_v14 = vmul.f32 -1.442695, %v1571_v7  ;;  %v1285_v15 = vadd.f32 %v3266_v6, %v1284_v10  ;;  %v1573_v16 = vpop.f32.mrf.mxu1 }
 0x12c   : > { %v1286_v18 = vpop.f32.mrf.mxu0 }
 0x12d   : > { %2806 = vrcp.f32 %v1995_v13  ;;  %v1574_v20 = vadd.f32 %v1573_v16, %v1285_v15  ;;  %v1575_v21 = vpop.f32.mrf.mxu1  ;;  %v2784_v18 = vld [vmem:[%s3129_s21 + $0x3e0] ss:$16 sps:$4 sm:$0xff]  }
 0x12e   : > { %v2797_v22 = vpop.eup %2796  ;;  %2808 = vpow2.f32 %v2494_v14  ;;  %v1289_v23 = vpop.f32.mrf.mxu0  ;;  %1480 = vmatmul.mubr.bf16.gmra.mxu0 %v2766_v11 }
 0x12f   : > { %v1996_v24 = vadd.f32 1.0, %v2797_v22  ;;  %v2495_v25 = vmul.f32 -1.442695, %v1574_v20  ;;  %v1290_v26 = vadd.f32 %v3266_v6, %v1289_v23  ;;  %v1578_v27 = vpop.f32.mrf.mxu1  ;;  %1769 = vmatmul.mubr.bf16.gmra.mxu1 %v2769_v12  ;;  %1487 = vmatprep.mubr.bf16.mxu0 %v2774_v17 }
 0x130   : > { %v1291_v28 = vpop.f32.mrf.mxu0  ;;  %1776 = vmatprep.mubr.bf16.mxu1 %v2777_v19 }
 0x131   : > { %2810 = vrcp.f32 %v1996_v24  ;;  %v1579_v29 = vadd.f32 %v1578_v27, %v1290_v26  ;;  %v1580_v30 = vpop.f32.mrf.mxu1  ;;  %v2787_v24 = vld [vmem:[%s3129_s21 + $0x3e8] ss:$16 sps:$4 sm:$0xff]  }
 0x132   : > { %v2799_v31 = vpop.eup %2798  ;;  %2812 = vpow2.f32 %v2495_v25  ;;  %v1292_v32 = vpop.f32.mrf.mxu0 }
 0x133   : > { %v2801_v34 = vpop.eup %2800  ;;  %2185 = vst [vmem:[%s3298_s27] sm:$0xff] %v2799_v31  ;;  %v2496_v35 = vmul.f32 -1.442695, %v1579_v29  ;;  %v1293_v36 = vadd.f32 %v3266_v6, %v1292_v32  ;;  %v1581_v37 = vpop.f32.mrf.mxu1 }
 0x134   : > { %v1997_v40 = vadd.f32 1.0, %v2801_v34  ;;  %v1294_v41 = vpop.f32.mrf.mxu0 }
 0x135   : > { %2814 = vpow2.f32 %v2496_v35  ;;  %v1582_v43 = vadd.f32 %v1581_v37, %v1293_v36  ;;  %v1583_v44 = vpop.f32.mrf.mxu1 }
 0x136   : > { %v2803_v45 = vpop.eup %2802  ;;  %2816 = vrcp.f32 %v1997_v40  ;;  %v1297_v46 = vpop.f32.mrf.mxu0  ;;  %1488 = vmatmul.mubr.bf16.gmra.mxu0 %v2772_v33 }
 0x137   : > { %v2805_v47 = vpop.eup %2804  ;;  %2186 = vst [vmem:[%s3298_s27 + $0x8] sm:$0xff] %v2803_v45  ;;  %v2497_v48 = vmul.f32 -1.442695, %v1582_v43  ;;  %v1298_v49 = vadd.f32 %v3266_v6, %v1297_v46  ;;  %v1586_v50 = vpop.f32.mrf.mxu1  ;;  %1777 = vmatmul.mubr.bf16.gmra.mxu1 %v2775_v38  ;;  %1495 = vmatprep.mubr.bf16.mxu0 %v2780_v39 }
 0x138   : > { %v1998_v51 = vadd.f32 1.0, %v2805_v47  ;;  %v1299_v52 = vpop.f32.mrf.mxu0  ;;  %1784 = vmatprep.mubr.bf16.mxu1 %v2783_v42 }
 0x139   : > { %2818 = vpow2.f32 %v2497_v48  ;;  %v1587_v53 = vadd.f32 %v1586_v50, %v1298_v49  ;;  %v1588_v54 = vpop.f32.mrf.mxu1 }
 0x13a   : > { %v2807_v55 = vpop.eup %2806  ;;  %2820 = vrcp.f32 %v1998_v51  ;;  %v1300_v56 = vpop.f32.mrf.mxu0 }
 0x13b   : > { %v2809_v58 = vpop.eup %2808  ;;  %2187 = vst [vmem:[%s3298_s27 + $0x10] sm:$0xff] %v2807_v55  ;;  %v2498_v59 = vmul.f32 -1.442695, %v1587_v53  ;;  %v1301_v60 = vadd.f32 %v3266_v6, %v1300_v56  ;;  %v1589_v61 = vpop.f32.mrf.mxu1 }
 0x13c   : > { %v1999_v0 = vadd.f32 1.0, %v2809_v58  ;;  %v1302_v1 = vpop.f32.mrf.mxu0 }
 0x13d   : > { %2822 = vpow2.f32 %v2498_v59  ;;  %v1590_v3 = vadd.f32 %v1589_v61, %v1301_v60  ;;  %v1591_v4 = vpop.f32.mrf.mxu1 }
 0x13e   : > { %v2811_v5 = vpop.eup %2810  ;;  %2824 = vrcp.f32 %v1999_v0  ;;  %v1305_v7 = vpop.f32.mrf.mxu0  ;;  %1496 = vmatmul.mubr.bf16.gmra.mxu0 %v2778_v57 }
 0x13f   : > { %v2813_v8 = vpop.eup %2812  ;;  %2188 = vst [vmem:[%s3298_s27 + $0x18] sm:$0xff] %v2811_v5  ;;  %v2499_v9 = vmul.f32 -1.442695, %v1590_v3  ;;  %v1306_v10 = vadd.f32 %v3266_v6, %v1305_v7  ;;  %v1594_v11 = vpop.f32.mrf.mxu1  ;;  %1785 = vmatmul.mubr.bf16.gmra.mxu1 %v2781_v62  ;;  %1503 = vmatprep.mubr.bf16.mxu0 %v2786_v63 }
 0x140   : > { %v2000_v12 = vadd.f32 1.0, %v2813_v8  ;;  %v1307_v13 = vpop.f32.mrf.mxu0  ;;  %1792 = vmatprep.mubr.bf16.mxu1 %v2789_v2 }
 0x141   : > { %2826 = vpow2.f32 %v2499_v9  ;;  %v1595_v14 = vadd.f32 %v1594_v11, %v1306_v10  ;;  %v1596_v15 = vpop.f32.mrf.mxu1 }
 0x142   : > { %v2815_v16 = vpop.eup %2814  ;;  %2828 = vrcp.f32 %v2000_v12  ;;  %v1308_v17 = vpop.f32.mrf.mxu0 }
 0x143   : > { %v2817_v19 = vpop.eup %2816  ;;  %v2001_v20 = vadd.f32 1.0, %v2815_v16  ;;  %v2500_v21 = vmul.f32 -1.442695, %v1595_v14  ;;  %v1309_v22 = vadd.f32 %v3266_v6, %v1308_v17  ;;  %v1597_v23 = vpop.f32.mrf.mxu1 }
 0x144   : > { %2189 = vst [vmem:[%s3298_s27 + $0x20] sm:$0xff] %v2817_v19  ;;  %v1310_v25 = vpop.f32.mrf.mxu0 }
 0x145   : > { %2830 = vrcp.f32 %v2001_v20  ;;  %v1598_v26 = vadd.f32 %v1597_v23, %v1309_v22  ;;  %v1599_v27 = vpop.f32.mrf.mxu1 }
 0x146   : > { %v2819_v28 = vpop.eup %2818  ;;  %2832 = vpow2.f32 %v2500_v21  ;;  %v1313_v29 = vpop.f32.mrf.mxu0  ;;  %1504 = vmatmul.mubr.bf16.gmra.mxu0 %v2784_v18 }
 0x147   : > { %v2821_v30 = vpop.eup %2820  ;;  %v2002_v31 = vadd.f32 1.0, %v2819_v28  ;;  %v2501_v32 = vmul.f32 -1.442695, %v1598_v26  ;;  %v1314_v33 = vadd.f32 %v3266_v6, %v1313_v29  ;;  %v1602_v34 = vpop.f32.mrf.mxu1  ;;  %1793 = vmatmul.mubr.bf16.gmra.mxu1 %v2787_v24 }
 0x148   : > { %2190 = vst [vmem:[%s3298_s27 + $0x28] sm:$0xff] %v2821_v30  ;;  %v1315_v35 = vpop.f32.mrf.mxu0 }
 0x149   : > { %2834 = vrcp.f32 %v2002_v31  ;;  %v1603_v36 = vadd.f32 %v1602_v34, %v1314_v33  ;;  %v1604_v37 = vpop.f32.mrf.mxu1 }
 0x14a   : > { %v2823_v38 = vpop.eup %2822  ;;  %2836 = vpow2.f32 %v2501_v32  ;;  %v1316_v39 = vpop.f32.mrf.mxu0 }
 0x14b   : > { %v2825_v40 = vpop.eup %2824  ;;  %v2003_v41 = vadd.f32 1.0, %v2823_v38  ;;  %v2502_v42 = vmul.f32 -1.442695, %v1603_v36  ;;  %v1317_v43 = vadd.f32 %v3266_v6, %v1316_v39  ;;  %v1605_v44 = vpop.f32.mrf.mxu1 }
 0x14c   : > { %2191 = vst [vmem:[%s3298_s27 + $0x30] sm:$0xff] %v2825_v40  ;;  %v1318_v45 = vpop.f32.mrf.mxu0 }
 0x14d   : > { %2838 = vrcp.f32 %v2003_v41  ;;  %v1606_v46 = vadd.f32 %v1605_v44, %v1317_v43  ;;  %v1607_v47 = vpop.f32.mrf.mxu1 }
 0x14e   : > { %v2827_v48 = vpop.eup %2826  ;;  %2840 = vpow2.f32 %v2502_v42  ;;  %v1321_v49 = vpop.f32.mrf.mxu0 }
 0x14f   : > { %v2829_v50 = vpop.eup %2828  ;;  %v2004_v51 = vadd.f32 1.0, %v2827_v48  ;;  %v2503_v52 = vmul.f32 -1.442695, %v1606_v46  ;;  %v1322_v53 = vadd.f32 %v3266_v6, %v1321_v49  ;;  %v1610_v54 = vpop.f32.mrf.mxu1 }
 0x150   : > { %2192 = vst [vmem:[%s3298_s27 + $0x38] sm:$0xff] %v2829_v50  ;;  %v1323_v55 = vpop.f32.mrf.mxu0 }
 0x151   : > { %2842 = vrcp.f32 %v2004_v51  ;;  %v1611_v56 = vadd.f32 %v1610_v54, %v1322_v53  ;;  %v1612_v57 = vpop.f32.mrf.mxu1 }
 0x152   : > { %v2831_v58 = vpop.eup %2830  ;;  %2844 = vpow2.f32 %v2503_v52  ;;  %v1324_v59 = vpop.f32.mrf.mxu0 }
 0x153   : > { %v2833_v60 = vpop.eup %2832  ;;  %2193 = vst [vmem:[%s3298_s27 + $0x40] sm:$0xff] %v2831_v58  ;;  %v2504_v61 = vmul.f32 -1.442695, %v1611_v56  ;;  %v1325_v62 = vadd.f32 %v3266_v6, %v1324_v59  ;;  %v1613_v63 = vpop.f32.mrf.mxu1 }
 0x154   : > { %v2005_v0 = vadd.f32 1.0, %v2833_v60  ;;  %v1326_v1 = vpop.f32.mrf.mxu0 }
 0x155   : > { %2846 = vpow2.f32 %v2504_v61  ;;  %v1614_v2 = vadd.f32 %v1613_v63, %v1325_v62  ;;  %v1615_v3 = vpop.f32.mrf.mxu1 }
 0x156   : > { %v2835_v4 = vpop.eup %2834  ;;  %2848 = vrcp.f32 %v2005_v0  ;;  %v1329_v5 = vpop.f32.mrf.mxu0 }
 0x157   : > { %v2837_v7 = vpop.eup %2836  ;;  %2194 = vst [vmem:[%s3298_s27 + $0x48] sm:$0xff] %v2835_v4  ;;  %v2505_v8 = vmul.f32 -1.442695, %v1614_v2  ;;  %v1330_v9 = vadd.f32 %v3266_v6, %v1329_v5  ;;  %v1618_v10 = vpop.f32.mrf.mxu1 }
 0x158   : > { %v2006_v11 = vadd.f32 1.0, %v2837_v7  ;;  %v1331_v12 = vpop.f32.mrf.mxu0 }
 0x159   : > { %2850 = vpow2.f32 %v2505_v8  ;;  %v1619_v13 = vadd.f32 %v1618_v10, %v1330_v9  ;;  %v1620_v14 = vpop.f32.mrf.mxu1 }
 0x15a   : > { %v2839_v15 = vpop.eup %2838  ;;  %2852 = vrcp.f32 %v2006_v11  ;;  %v1332_v16 = vpop.f32.mrf.mxu0 }
 0x15b   : > { %v2841_v17 = vpop.eup %2840  ;;  %2195 = vst [vmem:[%s3298_s27 + $0x50] sm:$0xff] %v2839_v15  ;;  %v2506_v18 = vmul.f32 -1.442695, %v1619_v13  ;;  %v1333_v19 = vadd.f32 %v3266_v6, %v1332_v16  ;;  %v1621_v20 = vpop.f32.mrf.mxu1 }
 0x15c   : > { %v2007_v21 = vadd.f32 1.0, %v2841_v17  ;;  %v1334_v22 = vpop.f32.mrf.mxu0 }
 0x15d   : > { %2854 = vpow2.f32 %v2506_v18  ;;  %v1622_v23 = vadd.f32 %v1621_v20, %v1333_v19  ;;  %v1623_v24 = vpop.f32.mrf.mxu1 }
 0x15e   : > { %v2843_v25 = vpop.eup %2842  ;;  %2856 = vrcp.f32 %v2007_v21  ;;  %v1337_v26 = vpop.f32.mrf.mxu0 }
 0x15f   : > { %v2845_v27 = vpop.eup %2844  ;;  %2196 = vst [vmem:[%s3298_s27 + $0x58] sm:$0xff] %v2843_v25  ;;  %v2507_v28 = vmul.f32 -1.442695, %v1622_v23  ;;  %v1338_v29 = vadd.f32 %v3266_v6, %v1337_v26  ;;  %v1626_v30 = vpop.f32.mrf.mxu1 }
 0x160   : > { %v2008_v31 = vadd.f32 1.0, %v2845_v27  ;;  %v1339_v32 = vpop.f32.mrf.mxu0 }
 0x161   : > { %2858 = vpow2.f32 %v2507_v28  ;;  %v1627_v33 = vadd.f32 %v1626_v30, %v1338_v29  ;;  %v1628_v34 = vpop.f32.mrf.mxu1 }
 0x162   : > { %v2847_v35 = vpop.eup %2846  ;;  %2860 = vrcp.f32 %v2008_v31  ;;  %v1340_v36 = vpop.f32.mrf.mxu0 }
 0x163   : > { %v2849_v37 = vpop.eup %2848  ;;  %v2009_v38 = vadd.f32 1.0, %v2847_v35  ;;  %v2508_v39 = vmul.f32 -1.442695, %v1627_v33  ;;  %v1341_v40 = vadd.f32 %v3266_v6, %v1340_v36  ;;  %v1629_v41 = vpop.f32.mrf.mxu1 }
 0x164   : > { %2197 = vst [vmem:[%s3298_s27 + $0x60] sm:$0xff] %v2849_v37  ;;  %v1342_v42 = vpop.f32.mrf.mxu0 }
 0x165   : > { %2862 = vrcp.f32 %v2009_v38  ;;  %v1630_v43 = vadd.f32 %v1629_v41, %v1341_v40  ;;  %v1631_v44 = vpop.f32.mrf.mxu1 }
 0x166   : > { %v2851_v45 = vpop.eup %2850  ;;  %2864 = vpow2.f32 %v2508_v39  ;;  %v1345_v46 = vpop.f32.mrf.mxu0 }
 0x167   : > { %v2853_v47 = vpop.eup %2852  ;;  %v2010_v48 = vadd.f32 1.0, %v2851_v45  ;;  %v2509_v49 = vmul.f32 -1.442695, %v1630_v43  ;;  %v1346_v50 = vadd.f32 %v3266_v6, %v1345_v46  ;;  %v1634_v51 = vpop.f32.mrf.mxu1 }
 0x168   : > { %2198 = vst [vmem:[%s3298_s27 + $0x68] sm:$0xff] %v2853_v47  ;;  %v1347_v52 = vpop.f32.mrf.mxu0 }
 0x169   : > { %2866 = vrcp.f32 %v2010_v48  ;;  %v1635_v53 = vadd.f32 %v1634_v51, %v1346_v50  ;;  %v1636_v54 = vpop.f32.mrf.mxu1 }
 0x16a   : > { %v2855_v55 = vpop.eup %2854  ;;  %2868 = vpow2.f32 %v2509_v49  ;;  %v1348_v56 = vpop.f32.mrf.mxu0 }
 0x16b   : > { %v2857_v57 = vpop.eup %2856  ;;  %v2011_v58 = vadd.f32 1.0, %v2855_v55  ;;  %v2510_v59 = vmul.f32 -1.442695, %v1635_v53  ;;  %v1349_v60 = vadd.f32 %v3266_v6, %v1348_v56  ;;  %v1637_v61 = vpop.f32.mrf.mxu1 }
 0x16c   : > { %2199 = vst [vmem:[%s3298_s27 + $0x70] sm:$0xff] %v2857_v57  ;;  %v1350_v62 = vpop.f32.mrf.mxu0 }
 0x16d   : > { %2870 = vrcp.f32 %v2011_v58  ;;  %v1638_v63 = vadd.f32 %v1637_v61, %v1349_v60  ;;  %v1639_v0 = vpop.f32.mrf.mxu1 }
 0x16e   : > { %v2859_v1 = vpop.eup %2858  ;;  %2872 = vpow2.f32 %v2510_v59  ;;  %v1353_v2 = vpop.f32.mrf.mxu0 }
 0x16f   : > { %v2861_v3 = vpop.eup %2860  ;;  %v2012_v4 = vadd.f32 1.0, %v2859_v1  ;;  %v2511_v5 = vmul.f32 -1.442695, %v1638_v63  ;;  %v1354_v7 = vadd.f32 %v3266_v6, %v1353_v2  ;;  %v1642_v8 = vpop.f32.mrf.mxu1 }
 0x170   : > { %2200 = vst [vmem:[%s3298_s27 + $0x78] sm:$0xff] %v2861_v3  ;;  %v1355_v9 = vpop.f32.mrf.mxu0 }
 0x171   : > { %2874 = vrcp.f32 %v2012_v4  ;;  %v1643_v10 = vadd.f32 %v1642_v8, %v1354_v7  ;;  %v1644_v11 = vpop.f32.mrf.mxu1 }
 0x172   : > { %v2863_v12 = vpop.eup %2862  ;;  %2876 = vpow2.f32 %v2511_v5  ;;  %v1356_v13 = vpop.f32.mrf.mxu0 }
 0x173   : > { %v2865_v14 = vpop.eup %2864  ;;  %2201 = vst [vmem:[%s3298_s27 + $0x80] sm:$0xff] %v2863_v12  ;;  %v2512_v15 = vmul.f32 -1.442695, %v1643_v10  ;;  %v1357_v16 = vadd.f32 %v3266_v6, %v1356_v13  ;;  %v1645_v17 = vpop.f32.mrf.mxu1 }
 0x174   : > { %v2013_v18 = vadd.f32 1.0, %v2865_v14  ;;  %v1358_v19 = vpop.f32.mrf.mxu0 }
 0x175   : > { %2878 = vpow2.f32 %v2512_v15  ;;  %v1646_v20 = vadd.f32 %v1645_v17, %v1357_v16  ;;  %v1647_v21 = vpop.f32.mrf.mxu1 }
 0x176   : > { %v2867_v22 = vpop.eup %2866  ;;  %2880 = vrcp.f32 %v2013_v18  ;;  %v1361_v23 = vpop.f32.mrf.mxu0 }
 0x177   : > { %v2869_v24 = vpop.eup %2868  ;;  %2202 = vst [vmem:[%s3298_s27 + $0x88] sm:$0xff] %v2867_v22  ;;  %v2513_v25 = vmul.f32 -1.442695, %v1646_v20  ;;  %v1362_v26 = vadd.f32 %v3266_v6, %v1361_v23  ;;  %v1650_v27 = vpop.f32.mrf.mxu1 }
 0x178   : > { %v2014_v28 = vadd.f32 1.0, %v2869_v24  ;;  %v1363_v29 = vpop.f32.mrf.mxu0 }
 0x179   : > { %2882 = vpow2.f32 %v2513_v25  ;;  %v1651_v30 = vadd.f32 %v1650_v27, %v1362_v26  ;;  %v1652_v31 = vpop.f32.mrf.mxu1 }
 0x17a   : > { %v2871_v32 = vpop.eup %2870  ;;  %2884 = vrcp.f32 %v2014_v28  ;;  %v1364_v33 = vpop.f32.mrf.mxu0 }
 0x17b   : > { %v2873_v34 = vpop.eup %2872  ;;  %2203 = vst [vmem:[%s3298_s27 + $0x90] sm:$0xff] %v2871_v32  ;;  %v2514_v35 = vmul.f32 -1.442695, %v1651_v30  ;;  %v1365_v36 = vadd.f32 %v3266_v6, %v1364_v33  ;;  %v1653_v37 = vpop.f32.mrf.mxu1 }
 0x17c   : > { %v2015_v38 = vadd.f32 1.0, %v2873_v34  ;;  %v1366_v39 = vpop.f32.mrf.mxu0 }
 0x17d   : > { %2886 = vpow2.f32 %v2514_v35  ;;  %v1654_v40 = vadd.f32 %v1653_v37, %v1365_v36  ;;  %v1655_v41 = vpop.f32.mrf.mxu1 }
 0x17e   : > { %v2875_v42 = vpop.eup %2874  ;;  %2888 = vrcp.f32 %v2015_v38  ;;  %v1369_v43 = vpop.f32.mrf.mxu0 }
 0x17f   : > { %v2877_v44 = vpop.eup %2876  ;;  %2204 = vst [vmem:[%s3298_s27 + $0x98] sm:$0xff] %v2875_v42  ;;  %v2515_v45 = vmul.f32 -1.442695, %v1654_v40  ;;  %v1370_v46 = vadd.f32 %v3266_v6, %v1369_v43  ;;  %v1658_v47 = vpop.f32.mrf.mxu1 }
 0x180   : > { %v2016_v48 = vadd.f32 1.0, %v2877_v44  ;;  %v1371_v49 = vpop.f32.mrf.mxu0 }
 0x181   : > { %2890 = vpow2.f32 %v2515_v45  ;;  %v1659_v50 = vadd.f32 %v1658_v47, %v1370_v46  ;;  %v1660_v51 = vpop.f32.mrf.mxu1 }
 0x182   : > { %v2879_v52 = vpop.eup %2878  ;;  %2892 = vrcp.f32 %v2016_v48  ;;  %v1372_v53 = vpop.f32.mrf.mxu0 }
 0x183   : > { %v2881_v54 = vpop.eup %2880  ;;  %v2017_v55 = vadd.f32 1.0, %v2879_v52  ;;  %v2516_v56 = vmul.f32 -1.442695, %v1659_v50  ;;  %v1373_v57 = vadd.f32 %v3266_v6, %v1372_v53  ;;  %v1661_v58 = vpop.f32.mrf.mxu1 }
 0x184   : > { %2205 = vst [vmem:[%s3298_s27 + $0xa0] sm:$0xff] %v2881_v54  ;;  %v1374_v59 = vpop.f32.mrf.mxu0 }
 0x185   : > { %2894 = vrcp.f32 %v2017_v55  ;;  %v1662_v60 = vadd.f32 %v1661_v58, %v1373_v57  ;;  %v1663_v61 = vpop.f32.mrf.mxu1 }
 0x186   : > { %v2883_v62 = vpop.eup %2882  ;;  %2896 = vpow2.f32 %v2516_v56  ;;  %v1377_v63 = vpop.f32.mrf.mxu0 }
 0x187   : > { %v2885_v0 = vpop.eup %2884  ;;  %v2018_v1 = vadd.f32 1.0, %v2883_v62  ;;  %v2517_v2 = vmul.f32 -1.442695, %v1662_v60  ;;  %v1378_v3 = vadd.f32 %v3266_v6, %v1377_v63  ;;  %v1666_v4 = vpop.f32.mrf.mxu1 }
 0x188   : > { %2206 = vst [vmem:[%s3298_s27 + $0xa8] sm:$0xff] %v2885_v0  ;;  %v1379_v5 = vpop.f32.mrf.mxu0 }
 0x189   : > { %2898 = vrcp.f32 %v2018_v1  ;;  %v1667_v7 = vadd.f32 %v1666_v4, %v1378_v3  ;;  %v1668_v8 = vpop.f32.mrf.mxu1 }
 0x18a   : > { %v2887_v9 = vpop.eup %2886  ;;  %2900 = vpow2.f32 %v2517_v2  ;;  %v1380_v10 = vpop.f32.mrf.mxu0 }
 0x18b   : > { %v2889_v11 = vpop.eup %2888  ;;  %v2019_v12 = vadd.f32 1.0, %v2887_v9  ;;  %v2518_v13 = vmul.f32 -1.442695, %v1667_v7  ;;  %v1381_v14 = vadd.f32 %v3266_v6, %v1380_v10  ;;  %v1669_v15 = vpop.f32.mrf.mxu1 }
 0x18c   : > { %2207 = vst [vmem:[%s3298_s27 + $0xb0] sm:$0xff] %v2889_v11  ;;  %v1382_v16 = vpop.f32.mrf.mxu0 }
 0x18d   : > { %2902 = vrcp.f32 %v2019_v12  ;;  %v1670_v17 = vadd.f32 %v1669_v15, %v1381_v14  ;;  %v1671_v18 = vpop.f32.mrf.mxu1 }
 0x18e   : > { %v2891_v19 = vpop.eup %2890  ;;  %2904 = vpow2.f32 %v2518_v13  ;;  %v1385_v20 = vpop.f32.mrf.mxu0 }
 0x18f   : > { %v2893_v21 = vpop.eup %2892  ;;  %v2020_v22 = vadd.f32 1.0, %v2891_v19  ;;  %v2519_v23 = vmul.f32 -1.442695, %v1670_v17  ;;  %v1386_v24 = vadd.f32 %v3266_v6, %v1385_v20  ;;  %v1674_v25 = vpop.f32.mrf.mxu1 }
 0x190   : > { %2208 = vst [vmem:[%s3298_s27 + $0xb8] sm:$0xff] %v2893_v21  ;;  %v1387_v26 = vpop.f32.mrf.mxu0  ;;  %v3371_v21 = vld [vmem:[%s3439_s2] ss:$0 sm:$0xff] }
 0x191   : > { %2906 = vrcp.f32 %v2020_v22  ;;  %v1675_v27 = vadd.f32 %v1674_v25, %v1386_v24  ;;  %v1676_v28 = vpop.f32.mrf.mxu1 }
 0x192   : > { %v2895_v29 = vpop.eup %2894  ;;  %2908 = vpow2.f32 %v2519_v23  ;;  %v1388_v30 = vpop.f32.mrf.mxu0 }
 0x193   : > { %v2897_v31 = vpop.eup %2896  ;;  %2209 = vst [vmem:[%s3298_s27 + $0xc0] sm:$0xff] %v2895_v29  ;;  %v2520_v32 = vmul.f32 -1.442695, %v1675_v27  ;;  %v1389_v33 = vadd.f32 %v3266_v6, %v1388_v30  ;;  %v1677_v34 = vpop.f32.mrf.mxu1 }
 0x194   : > { %v2021_v35 = vadd.f32 1.0, %v2897_v31  ;;  %v1390_v36 = vpop.f32.mrf.mxu0 }
 0x195   : > { %2910 = vpow2.f32 %v2520_v32  ;;  %v1678_v37 = vadd.f32 %v1677_v34, %v1389_v33  ;;  %v1679_v38 = vpop.f32.mrf.mxu1 }
 0x196   : > { %v2899_v39 = vpop.eup %2898  ;;  %2912 = vrcp.f32 %v2021_v35  ;;  %v1393_v40 = vpop.f32.mrf.mxu0 }
 0x197   : > { %v2901_v41 = vpop.eup %2900  ;;  %2210 = vst [vmem:[%s3298_s27 + $0xc8] sm:$0xff] %v2899_v39  ;;  %v2521_v42 = vmul.f32 -1.442695, %v1678_v37  ;;  %v1394_v43 = vadd.f32 %v3266_v6, %v1393_v40  ;;  %v1682_v44 = vpop.f32.mrf.mxu1 }
 0x198   : > { %v2022_v45 = vadd.f32 1.0, %v2901_v41  ;;  %v1395_v46 = vpop.f32.mrf.mxu0 }
 0x199   : > { %2914 = vpow2.f32 %v2521_v42  ;;  %v1683_v47 = vadd.f32 %v1682_v44, %v1394_v43  ;;  %v1684_v48 = vpop.f32.mrf.mxu1 }
 0x19a   : > { %v2903_v49 = vpop.eup %2902  ;;  %2916 = vrcp.f32 %v2022_v45  ;;  %v1396_v50 = vpop.f32.mrf.mxu0 }
 0x19b   : > { %v2905_v51 = vpop.eup %2904  ;;  %2211 = vst [vmem:[%s3298_s27 + $0xd0] sm:$0xff] %v2903_v49  ;;  %v2522_v52 = vmul.f32 -1.442695, %v1683_v47  ;;  %v1397_v53 = vadd.f32 %v3266_v6, %v1396_v50  ;;  %v1685_v54 = vpop.f32.mrf.mxu1 }
 0x19c   : > { %v2023_v55 = vadd.f32 1.0, %v2905_v51  ;;  %v1398_v56 = vpop.f32.mrf.mxu0 }
 0x19d   : > { %2918 = vpow2.f32 %v2522_v52  ;;  %v1686_v57 = vadd.f32 %v1685_v54, %v1397_v53  ;;  %v1687_v58 = vpop.f32.mrf.mxu1 }
 0x19e   : > { %v2907_v59 = vpop.eup %2906  ;;  %2920 = vrcp.f32 %v2023_v55  ;;  %v1401_v60 = vpop.f32.mrf.mxu0 }
 0x19f   : > { %v2909_v61 = vpop.eup %2908  ;;  %2212 = vst [vmem:[%s3298_s27 + $0xd8] sm:$0xff] %v2907_v59  ;;  %v2523_v62 = vmul.f32 -1.442695, %v1686_v57  ;;  %v1402_v63 = vadd.f32 %v3266_v6, %v1401_v60  ;;  %v1690_v0 = vpop.f32.mrf.mxu1 }
 0x1a0   : > { %v2024_v1 = vadd.f32 1.0, %v2909_v61  ;;  %v1403_v2 = vpop.f32.mrf.mxu0 }
 0x1a1   : > { %2922 = vpow2.f32 %v2523_v62  ;;  %v1691_v3 = vadd.f32 %v1690_v0, %v1402_v63  ;;  %v1692_v4 = vpop.f32.mrf.mxu1 }
 0x1a2   : > { %v2911_v5 = vpop.eup %2910  ;;  %2924 = vrcp.f32 %v2024_v1  ;;  %v1404_v7 = vpop.f32.mrf.mxu0 }
 0x1a3   : > { %v2913_v8 = vpop.eup %2912  ;;  %v2025_v9 = vadd.f32 1.0, %v2911_v5  ;;  %v2524_v10 = vmul.f32 -1.442695, %v1691_v3  ;;  %v1405_v11 = vadd.f32 %v3266_v6, %v1404_v7  ;;  %v1693_v12 = vpop.f32.mrf.mxu1 }
 0x1a4   : > { %2213 = vst [vmem:[%s3298_s27 + $0xe0] sm:$0xff] %v2913_v8  ;;  %v1406_v13 = vpop.f32.mrf.mxu0 }
 0x1a5   : > { %2926 = vrcp.f32 %v2025_v9  ;;  %v1694_v14 = vadd.f32 %v1693_v12, %v1405_v11  ;;  %v1695_v15 = vpop.f32.mrf.mxu1 }
 0x1a6   : > { %v2915_v16 = vpop.eup %2914  ;;  %2928 = vpow2.f32 %v2524_v10  ;;  %v1409_v17 = vpop.f32.mrf.mxu0 }
 0x1a7   : > { %v2917_v18 = vpop.eup %2916  ;;  %v2026_v19 = vadd.f32 1.0, %v2915_v16  ;;  %v2525_v20 = vmul.f32 -1.442695, %v1694_v14  ;;  %v1410_v6 = vadd.f32 %v3371_v21, %v1409_v17  ;;  %v1698_v22 = vpop.f32.mrf.mxu1 }
 0x1a8   : > { %2214 = vst [vmem:[%s3298_s27 + $0xe8] sm:$0xff] %v2917_v18  ;;  %v1411_v23 = vpop.f32.mrf.mxu0 }
 0x1a9   : > { %2930 = vrcp.f32 %v2026_v19  ;;  %v1699_v24 = vadd.f32 %v1698_v22, %v1410_v6  ;;  %v1700_v25 = vpop.f32.mrf.mxu1 }
 0x1aa   : > { %v2919_v26 = vpop.eup %2918  ;;  %2932 = vpow2.f32 %v2525_v20  ;;  %v1412_v27 = vpop.f32.mrf.mxu0 }
 0x1ab   : > { %v2921_v28 = vpop.eup %2920  ;;  %v2027_v29 = vadd.f32 1.0, %v2919_v26  ;;  %v2526_v30 = vmul.f32 -1.442695, %v1699_v24  ;;  %v1413_v31 = vadd.f32 %v3371_v21, %v1412_v27  ;;  %v1701_v32 = vpop.f32.mrf.mxu1 }
 0x1ac   : > { %2215 = vst [vmem:[%s3298_s27 + $0xf0] sm:$0xff] %v2921_v28  ;;  %v1414_v33 = vpop.f32.mrf.mxu0 }
 0x1ad   : > { %2934 = vrcp.f32 %v2027_v29  ;;  %v1702_v34 = vadd.f32 %v1701_v32, %v1413_v31  ;;  %v1703_v35 = vpop.f32.mrf.mxu1 }
 0x1ae   : > { %v2923_v36 = vpop.eup %2922  ;;  %2936 = vpow2.f32 %v2526_v30  ;;  %v1417_v37 = vpop.f32.mrf.mxu0 }
 0x1af   : > { %v2925_v38 = vpop.eup %2924  ;;  %v2028_v39 = vadd.f32 1.0, %v2923_v36  ;;  %v2527_v40 = vmul.f32 -1.442695, %v1702_v34  ;;  %v1418_v41 = vadd.f32 %v3371_v21, %v1417_v37  ;;  %v1706_v42 = vpop.f32.mrf.mxu1 }
 0x1b0   : > { %2216 = vst [vmem:[%s3298_s27 + $0xf8] sm:$0xff] %v2925_v38  ;;  %v1419_v43 = vpop.f32.mrf.mxu0 }
 0x1b1   : > { %2938 = vrcp.f32 %v2028_v39  ;;  %v1707_v44 = vadd.f32 %v1706_v42, %v1418_v41  ;;  %v1708_v45 = vpop.f32.mrf.mxu1 }
 0x1b2   : > { %v2927_v46 = vpop.eup %2926  ;;  %2940 = vpow2.f32 %v2527_v40  ;;  %v1420_v47 = vpop.f32.mrf.mxu0 }
 0x1b3   : > { %v2929_v48 = vpop.eup %2928  ;;  %2217 = vst [vmem:[%s3298_s27 + $0x100] sm:$0xff] %v2927_v46  ;;  %v2528_v49 = vmul.f32 -1.442695, %v1707_v44  ;;  %v1421_v50 = vadd.f32 %v3371_v21, %v1420_v47  ;;  %v1709_v51 = vpop.f32.mrf.mxu1 }
 0x1b4   : > { %v2029_v52 = vadd.f32 1.0, %v2929_v48  ;;  %v1422_v53 = vpop.f32.mrf.mxu0 }
 0x1b5   : > { %2942 = vpow2.f32 %v2528_v49  ;;  %v1710_v54 = vadd.f32 %v1709_v51, %v1421_v50  ;;  %v1711_v55 = vpop.f32.mrf.mxu1 }
 0x1b6   : > { %v2931_v56 = vpop.eup %2930  ;;  %2944 = vrcp.f32 %v2029_v52  ;;  %v1425_v57 = vpop.f32.mrf.mxu0 }
 0x1b7   : > { %v2933_v58 = vpop.eup %2932  ;;  %2218 = vst [vmem:[%s3298_s27 + $0x108] sm:$0xff] %v2931_v56  ;;  %v2529_v59 = vmul.f32 -1.442695, %v1710_v54  ;;  %v1426_v60 = vadd.f32 %v3371_v21, %v1425_v57  ;;  %v1714_v61 = vpop.f32.mrf.mxu1 }
 0x1b8   : > { %v2030_v62 = vadd.f32 1.0, %v2933_v58  ;;  %v1427_v63 = vpop.f32.mrf.mxu0 }
 0x1b9   : > { %2946 = vpow2.f32 %v2529_v59  ;;  %v1715_v0 = vadd.f32 %v1714_v61, %v1426_v60  ;;  %v1716_v1 = vpop.f32.mrf.mxu1 }
 0x1ba   : > { %v2935_v2 = vpop.eup %2934  ;;  %2948 = vrcp.f32 %v2030_v62  ;;  %v1428_v3 = vpop.f32.mrf.mxu0 }
 0x1bb   : > { %v2937_v4 = vpop.eup %2936  ;;  %2219 = vst [vmem:[%s3298_s27 + $0x110] sm:$0xff] %v2935_v2  ;;  %v2530_v5 = vmul.f32 -1.442695, %v1715_v0  ;;  %v1429_v7 = vadd.f32 %v3371_v21, %v1428_v3  ;;  %v1717_v8 = vpop.f32.mrf.mxu1 }
 0x1bc   : > { %v2031_v9 = vadd.f32 1.0, %v2937_v4  ;;  %v1430_v10 = vpop.f32.mrf.mxu0 }
 0x1bd   : > { %2950 = vpow2.f32 %v2530_v5  ;;  %v1718_v11 = vadd.f32 %v1717_v8, %v1429_v7  ;;  %v1719_v12 = vpop.f32.mrf.mxu1 }
 0x1be   : > { %v2939_v13 = vpop.eup %2938  ;;  %2952 = vrcp.f32 %v2031_v9  ;;  %v1433_v14 = vpop.f32.mrf.mxu0 }
 0x1bf   : > { %v2941_v15 = vpop.eup %2940  ;;  %2220 = vst [vmem:[%s3298_s27 + $0x118] sm:$0xff] %v2939_v13  ;;  %v2531_v16 = vmul.f32 -1.442695, %v1718_v11  ;;  %v1434_v17 = vadd.f32 %v3371_v21, %v1433_v14  ;;  %v1722_v18 = vpop.f32.mrf.mxu1 }
 0x1c0   : > { %v2032_v19 = vadd.f32 1.0, %v2941_v15  ;;  %v1435_v20 = vpop.f32.mrf.mxu0 }
 0x1c1   : > { %2954 = vpow2.f32 %v2531_v16  ;;  %v1723_v6 = vadd.f32 %v1722_v18, %v1434_v17  ;;  %v1724_v22 = vpop.f32.mrf.mxu1 }
 0x1c2   : > { %v2943_v23 = vpop.eup %2942  ;;  %2956 = vrcp.f32 %v2032_v19  ;;  %v1436_v24 = vpop.f32.mrf.mxu0 }
 0x1c3   : > { %v2945_v25 = vpop.eup %2944  ;;  %v2033_v26 = vadd.f32 1.0, %v2943_v23  ;;  %v2532_v27 = vmul.f32 -1.442695, %v1723_v6  ;;  %v1437_v28 = vadd.f32 %v3371_v21, %v1436_v24  ;;  %v1725_v29 = vpop.f32.mrf.mxu1 }
 0x1c4   : > { %2221 = vst [vmem:[%s3298_s27 + $0x120] sm:$0xff] %v2945_v25  ;;  %v1438_v30 = vpop.f32.mrf.mxu0 }
 0x1c5   : > { %2958 = vrcp.f32 %v2033_v26  ;;  %v1726_v31 = vadd.f32 %v1725_v29, %v1437_v28  ;;  %v1727_v32 = vpop.f32.mrf.mxu1 }
 0x1c6   : > { %v2947_v33 = vpop.eup %2946  ;;  %2960 = vpow2.f32 %v2532_v27  ;;  %v1441_v34 = vpop.f32.mrf.mxu0 }
 0x1c7   : > { %v2949_v35 = vpop.eup %2948  ;;  %v2034_v36 = vadd.f32 1.0, %v2947_v33  ;;  %v2533_v37 = vmul.f32 -1.442695, %v1726_v31  ;;  %v1442_v38 = vadd.f32 %v3371_v21, %v1441_v34  ;;  %v1730_v39 = vpop.f32.mrf.mxu1 }
 0x1c8   : > { %2222 = vst [vmem:[%s3298_s27 + $0x128] sm:$0xff] %v2949_v35  ;;  %v1443_v40 = vpop.f32.mrf.mxu0 }
 0x1c9   : > { %2962 = vrcp.f32 %v2034_v36  ;;  %v1731_v41 = vadd.f32 %v1730_v39, %v1442_v38  ;;  %v1732_v42 = vpop.f32.mrf.mxu1 }
 0x1ca   : > { %v2951_v43 = vpop.eup %2950  ;;  %2964 = vpow2.f32 %v2533_v37  ;;  %v1444_v44 = vpop.f32.mrf.mxu0 }
 0x1cb   : > { %v2953_v45 = vpop.eup %2952  ;;  %v2035_v46 = vadd.f32 1.0, %v2951_v43  ;;  %v2534_v47 = vmul.f32 -1.442695, %v1731_v41  ;;  %v1445_v48 = vadd.f32 %v3371_v21, %v1444_v44  ;;  %v1733_v49 = vpop.f32.mrf.mxu1 }
 0x1cc   : > { %2223 = vst [vmem:[%s3298_s27 + $0x130] sm:$0xff] %v2953_v45  ;;  %v1446_v50 = vpop.f32.mrf.mxu0 }
 0x1cd   : > { %2966 = vrcp.f32 %v2035_v46  ;;  %v1734_v51 = vadd.f32 %v1733_v49, %v1445_v48  ;;  %v1735_v52 = vpop.f32.mrf.mxu1 }
 0x1ce   : > { %v2955_v53 = vpop.eup %2954  ;;  %2968 = vpow2.f32 %v2534_v47  ;;  %v1449_v54 = vpop.f32.mrf.mxu0 }
 0x1cf   : > { %v2957_v55 = vpop.eup %2956  ;;  %v2036_v56 = vadd.f32 1.0, %v2955_v53  ;;  %v2535_v57 = vmul.f32 -1.442695, %v1734_v51  ;;  %v1450_v58 = vadd.f32 %v3371_v21, %v1449_v54  ;;  %v1738_v59 = vpop.f32.mrf.mxu1 }
 0x1d0   : > { %2224 = vst [vmem:[%s3298_s27 + $0x138] sm:$0xff] %v2957_v55  ;;  %v1451_v60 = vpop.f32.mrf.mxu0 }
 0x1d1   : > { %2970 = vrcp.f32 %v2036_v56  ;;  %v1739_v61 = vadd.f32 %v1738_v59, %v1450_v58  ;;  %v1740_v62 = vpop.f32.mrf.mxu1 }
 0x1d2   : > { %v2959_v63 = vpop.eup %2958  ;;  %2972 = vpow2.f32 %v2535_v57  ;;  %v1452_v0 = vpop.f32.mrf.mxu0 }
 0x1d3   : > { %v2961_v1 = vpop.eup %2960  ;;  %2225 = vst [vmem:[%s3298_s27 + $0x140] sm:$0xff] %v2959_v63  ;;  %v2536_v2 = vmul.f32 -1.442695, %v1739_v61  ;;  %v1453_v3 = vadd.f32 %v3371_v21, %v1452_v0  ;;  %v1741_v4 = vpop.f32.mrf.mxu1 }
 0x1d4   : > { %v2037_v5 = vadd.f32 1.0, %v2961_v1  ;;  %v1454_v7 = vpop.f32.mrf.mxu0 }
 0x1d5   : > { %2974 = vpow2.f32 %v2536_v2  ;;  %v1742_v8 = vadd.f32 %v1741_v4, %v1453_v3  ;;  %v1743_v9 = vpop.f32.mrf.mxu1 }
 0x1d6   : > { %v2963_v10 = vpop.eup %2962  ;;  %2976 = vrcp.f32 %v2037_v5  ;;  %v1457_v11 = vpop.f32.mrf.mxu0 }
 0x1d7   : > { %v2965_v12 = vpop.eup %2964  ;;  %2226 = vst [vmem:[%s3298_s27 + $0x148] sm:$0xff] %v2963_v10  ;;  %v2537_v13 = vmul.f32 -1.442695, %v1742_v8  ;;  %v1458_v14 = vadd.f32 %v3371_v21, %v1457_v11  ;;  %v1746_v15 = vpop.f32.mrf.mxu1 }
 0x1d8   : > { %v2038_v16 = vadd.f32 1.0, %v2965_v12  ;;  %v1459_v17 = vpop.f32.mrf.mxu0 }
 0x1d9   : > { %2978 = vpow2.f32 %v2537_v13  ;;  %v1747_v18 = vadd.f32 %v1746_v15, %v1458_v14  ;;  %v1748_v19 = vpop.f32.mrf.mxu1 }
 0x1da   : > { %v2967_v20 = vpop.eup %2966  ;;  %2980 = vrcp.f32 %v2038_v16  ;;  %v1460_v6 = vpop.f32.mrf.mxu0 }
 0x1db   : > { %v2969_v22 = vpop.eup %2968  ;;  %2227 = vst [vmem:[%s3298_s27 + $0x150] sm:$0xff] %v2967_v20  ;;  %v2538_v23 = vmul.f32 -1.442695, %v1747_v18  ;;  %v1461_v24 = vadd.f32 %v3371_v21, %v1460_v6  ;;  %v1749_v25 = vpop.f32.mrf.mxu1 }
 0x1dc   : > { %v2039_v26 = vadd.f32 1.0, %v2969_v22  ;;  %v1462_v27 = vpop.f32.mrf.mxu0 }
 0x1dd   : > { %2982 = vpow2.f32 %v2538_v23  ;;  %v1750_v28 = vadd.f32 %v1749_v25, %v1461_v24  ;;  %v1751_v29 = vpop.f32.mrf.mxu1 }
 0x1de   : > { %v2971_v30 = vpop.eup %2970  ;;  %2984 = vrcp.f32 %v2039_v26  ;;  %v1465_v31 = vpop.f32.mrf.mxu0 }
 0x1df   : > { %v2973_v32 = vpop.eup %2972  ;;  %2228 = vst [vmem:[%s3298_s27 + $0x158] sm:$0xff] %v2971_v30  ;;  %v2539_v33 = vmul.f32 -1.442695, %v1750_v28  ;;  %v1466_v34 = vadd.f32 %v3371_v21, %v1465_v31  ;;  %v1754_v35 = vpop.f32.mrf.mxu1 }
 0x1e0   : > { %v2040_v36 = vadd.f32 1.0, %v2973_v32  ;;  %v1467_v37 = vpop.f32.mrf.mxu0 }
 0x1e1   : > { %2986 = vpow2.f32 %v2539_v33  ;;  %v1755_v38 = vadd.f32 %v1754_v35, %v1466_v34  ;;  %v1756_v39 = vpop.f32.mrf.mxu1 }
 0x1e2   : > { %v2975_v40 = vpop.eup %2974  ;;  %2988 = vrcp.f32 %v2040_v36  ;;  %v1468_v41 = vpop.f32.mrf.mxu0 }
 0x1e3   : > { %v2977_v42 = vpop.eup %2976  ;;  %v2041_v43 = vadd.f32 1.0, %v2975_v40  ;;  %v2540_v44 = vmul.f32 -1.442695, %v1755_v38  ;;  %v1469_v45 = vadd.f32 %v3371_v21, %v1468_v41  ;;  %v1757_v46 = vpop.f32.mrf.mxu1 }
 0x1e4   : > { %2229 = vst [vmem:[%s3298_s27 + $0x160] sm:$0xff] %v2977_v42  ;;  %v1470_v47 = vpop.f32.mrf.mxu0 }
 0x1e5   : > { %2990 = vrcp.f32 %v2041_v43  ;;  %v1758_v48 = vadd.f32 %v1757_v46, %v1469_v45  ;;  %v1759_v49 = vpop.f32.mrf.mxu1 }
 0x1e6   : > { %v2979_v50 = vpop.eup %2978  ;;  %2992 = vpow2.f32 %v2540_v44  ;;  %v1473_v51 = vpop.f32.mrf.mxu0 }
 0x1e7   : > { %v2981_v52 = vpop.eup %2980  ;;  %v2042_v53 = vadd.f32 1.0, %v2979_v50  ;;  %v2541_v54 = vmul.f32 -1.442695, %v1758_v48  ;;  %v1474_v55 = vadd.f32 %v3371_v21, %v1473_v51  ;;  %v1762_v56 = vpop.f32.mrf.mxu1 }
 0x1e8   : > { %2230 = vst [vmem:[%s3298_s27 + $0x168] sm:$0xff] %v2981_v52  ;;  %v1475_v57 = vpop.f32.mrf.mxu0 }
 0x1e9   : > { %2994 = vrcp.f32 %v2042_v53  ;;  %v1763_v58 = vadd.f32 %v1762_v56, %v1474_v55  ;;  %v1764_v59 = vpop.f32.mrf.mxu1 }
 0x1ea   : > { %v2983_v60 = vpop.eup %2982  ;;  %2996 = vpow2.f32 %v2541_v54  ;;  %v1476_v61 = vpop.f32.mrf.mxu0 }
 0x1eb   : > { %v2985_v62 = vpop.eup %2984  ;;  %v2043_v63 = vadd.f32 1.0, %v2983_v60  ;;  %v2542_v0 = vmul.f32 -1.442695, %v1763_v58  ;;  %v1477_v1 = vadd.f32 %v3371_v21, %v1476_v61  ;;  %v1765_v2 = vpop.f32.mrf.mxu1 }
 0x1ec   : > { %2231 = vst [vmem:[%s3298_s27 + $0x170] sm:$0xff] %v2985_v62  ;;  %v1478_v3 = vpop.f32.mrf.mxu0 }
 0x1ed   : > { %2998 = vrcp.f32 %v2043_v63  ;;  %v1766_v4 = vadd.f32 %v1765_v2, %v1477_v1  ;;  %v1767_v5 = vpop.f32.mrf.mxu1 }
 0x1ee   : > { %v2987_v7 = vpop.eup %2986  ;;  %3000 = vpow2.f32 %v2542_v0  ;;  %v1481_v8 = vpop.f32.mrf.mxu0 }
 0x1ef   : > { %v2989_v9 = vpop.eup %2988  ;;  %v2044_v10 = vadd.f32 1.0, %v2987_v7  ;;  %v2543_v11 = vmul.f32 -1.442695, %v1766_v4  ;;  %v1482_v12 = vadd.f32 %v3371_v21, %v1481_v8  ;;  %v1770_v13 = vpop.f32.mrf.mxu1 }
 0x1f0   : > { %2232 = vst [vmem:[%s3298_s27 + $0x178] sm:$0xff] %v2989_v9  ;;  %v1483_v14 = vpop.f32.mrf.mxu0 }
 0x1f1   : > { %3002 = vrcp.f32 %v2044_v10  ;;  %v1771_v15 = vadd.f32 %v1770_v13, %v1482_v12  ;;  %v1772_v16 = vpop.f32.mrf.mxu1 }
 0x1f2   : > { %v2991_v17 = vpop.eup %2990  ;;  %3004 = vpow2.f32 %v2543_v11  ;;  %v1484_v18 = vpop.f32.mrf.mxu0 }
 0x1f3   : > { %v2993_v19 = vpop.eup %2992  ;;  %2233 = vst [vmem:[%s3298_s27 + $0x180] sm:$0xff] %v2991_v17  ;;  %v2544_v20 = vmul.f32 -1.442695, %v1771_v15  ;;  %v1485_v6 = vadd.f32 %v3371_v21, %v1484_v18  ;;  %v1773_v22 = vpop.f32.mrf.mxu1 }
 0x1f4   : > { %v2045_v23 = vadd.f32 1.0, %v2993_v19  ;;  %v1486_v24 = vpop.f32.mrf.mxu0 }
 0x1f5   : > { %3006 = vpow2.f32 %v2544_v20  ;;  %v1774_v25 = vadd.f32 %v1773_v22, %v1485_v6  ;;  %v1775_v26 = vpop.f32.mrf.mxu1 }
 0x1f6   : > { %v2995_v27 = vpop.eup %2994  ;;  %3008 = vrcp.f32 %v2045_v23  ;;  %v1489_v28 = vpop.f32.mrf.mxu0 }
 0x1f7   : > { %v2997_v29 = vpop.eup %2996  ;;  %2234 = vst [vmem:[%s3298_s27 + $0x188] sm:$0xff] %v2995_v27  ;;  %v2545_v30 = vmul.f32 -1.442695, %v1774_v25  ;;  %v1490_v31 = vadd.f32 %v3371_v21, %v1489_v28  ;;  %v1778_v32 = vpop.f32.mrf.mxu1 }
 0x1f8   : > { %v2046_v33 = vadd.f32 1.0, %v2997_v29  ;;  %v1491_v34 = vpop.f32.mrf.mxu0 }
 0x1f9   : > { %3010 = vpow2.f32 %v2545_v30  ;;  %v1779_v35 = vadd.f32 %v1778_v32, %v1490_v31  ;;  %v1780_v36 = vpop.f32.mrf.mxu1 }
 0x1fa   : > { %v2999_v37 = vpop.eup %2998  ;;  %3012 = vrcp.f32 %v2046_v33  ;;  %v1492_v38 = vpop.f32.mrf.mxu0 }
 0x1fb   : > { %v3001_v39 = vpop.eup %3000  ;;  %2235 = vst [vmem:[%s3298_s27 + $0x190] sm:$0xff] %v2999_v37  ;;  %v2546_v40 = vmul.f32 -1.442695, %v1779_v35  ;;  %v1493_v41 = vadd.f32 %v3371_v21, %v1492_v38  ;;  %v1781_v42 = vpop.f32.mrf.mxu1 }
 0x1fc   : > { %v2047_v43 = vadd.f32 1.0, %v3001_v39  ;;  %v1494_v44 = vpop.f32.mrf.mxu0 }
 0x1fd   : > { %3014 = vpow2.f32 %v2546_v40  ;;  %v1782_v45 = vadd.f32 %v1781_v42, %v1493_v41  ;;  %v1783_v46 = vpop.f32.mrf.mxu1 }
 0x1fe   : > { %v3003_v47 = vpop.eup %3002  ;;  %3016 = vrcp.f32 %v2047_v43  ;;  %v1497_v48 = vpop.f32.mrf.mxu0 }
 0x1ff   : > { %v3005_v49 = vpop.eup %3004  ;;  %2236 = vst [vmem:[%s3298_s27 + $0x198] sm:$0xff] %v3003_v47  ;;  %v2547_v50 = vmul.f32 -1.442695, %v1782_v45  ;;  %v1498_v51 = vadd.f32 %v3371_v21, %v1497_v48  ;;  %v1786_v52 = vpop.f32.mrf.mxu1 }
 0x200   : > { %v2048_v53 = vadd.f32 1.0, %v3005_v49  ;;  %v1499_v54 = vpop.f32.mrf.mxu0 }
 0x201   : > { %3018 = vpow2.f32 %v2547_v50  ;;  %v1787_v55 = vadd.f32 %v1786_v52, %v1498_v51  ;;  %v1788_v56 = vpop.f32.mrf.mxu1 }
 0x202   : > { %v3007_v57 = vpop.eup %3006  ;;  %3020 = vrcp.f32 %v2048_v53  ;;  %v1500_v58 = vpop.f32.mrf.mxu0 }
 0x203   : > { %v3009_v59 = vpop.eup %3008  ;;  %v2049_v60 = vadd.f32 1.0, %v3007_v57  ;;  %v2548_v61 = vmul.f32 -1.442695, %v1787_v55  ;;  %v1501_v62 = vadd.f32 %v3371_v21, %v1500_v58  ;;  %v1789_v63 = vpop.f32.mrf.mxu1 }
 0x204   : > { %2237 = vst [vmem:[%s3298_s27 + $0x1a0] sm:$0xff] %v3009_v59  ;;  %v1502_v0 = vpop.f32.mrf.mxu0 }
 0x205   : > { %3022 = vrcp.f32 %v2049_v60  ;;  %v1790_v1 = vadd.f32 %v1789_v63, %v1501_v62  ;;  %v1791_v2 = vpop.f32.mrf.mxu1 }
 0x206   : > { %v3011_v3 = vpop.eup %3010  ;;  %3024 = vpow2.f32 %v2548_v61  ;;  %v1505_v4 = vpop.f32.mrf.mxu0 }
 0x207   : > { %v3013_v5 = vpop.eup %3012  ;;  %v2050_v7 = vadd.f32 1.0, %v3011_v3  ;;  %v2549_v8 = vmul.f32 -1.442695, %v1790_v1  ;;  %v1506_v9 = vadd.f32 %v3371_v21, %v1505_v4  ;;  %v1794_v10 = vpop.f32.mrf.mxu1 }
 0x208   : > { %2238 = vst [vmem:[%s3298_s27 + $0x1a8] sm:$0xff] %v3013_v5  ;;  %v1507_v11 = vpop.f32.mrf.mxu0 }
 0x209   : > { %3026 = vrcp.f32 %v2050_v7  ;;  %v1795_v12 = vadd.f32 %v1794_v10, %v1506_v9  ;;  %v1796_v13 = vpop.f32.mrf.mxu1 }
 0x20a   : > { %v3015_v14 = vpop.eup %3014  ;;  %3028 = vpow2.f32 %v2549_v8  ;;  %v1508_v15 = vpop.f32.mrf.mxu0 }
 0x20b   : > { %v3017_v16 = vpop.eup %3016  ;;  %v2051_v17 = vadd.f32 1.0, %v3015_v14  ;;  %v2550_v18 = vmul.f32 -1.442695, %v1795_v12  ;;  %v1509_v19 = vadd.f32 %v3371_v21, %v1508_v15  ;;  %v1797_v20 = vpop.f32.mrf.mxu1 }
 0x20c   : > { %2239 = vst [vmem:[%s3298_s27 + $0x1b0] sm:$0xff] %v3017_v16  ;;  %v1510_v6 = vpop.f32.mrf.mxu0 }
 0x20d   : > { %3030 = vrcp.f32 %v2051_v17  ;;  %v1798_v22 = vadd.f32 %v1797_v20, %v1509_v19  ;;  %v1799_v23 = vpop.f32.mrf.mxu1 }
 0x20e   : > { %v3019_v24 = vpop.eup %3018  ;;  %3032 = vpow2.f32 %v2550_v18 }
 0x20f   : > { %v3021_v25 = vpop.eup %3020  ;;  %v2052_v26 = vadd.f32 1.0, %v3019_v24  ;;  %v2551_v27 = vmul.f32 -1.442695, %v1798_v22 }
 0x210   : > { %2240 = vst [vmem:[%s3298_s27 + $0x1b8] sm:$0xff] %v3021_v25 }
 0x211   : > { %3034 = vrcp.f32 %v2052_v26 }
 0x212   : > { %v3023_v28 = vpop.eup %3022  ;;  %3036 = vpow2.f32 %v2551_v27 }
 0x213   : > { %v3025_v29 = vpop.eup %3024  ;;  %2241 = vst [vmem:[%s3298_s27 + $0x1c0] sm:$0xff] %v3023_v28 }
 0x214   : > { %v2053_v21 = vadd.f32 1.0, %v3025_v29 }
 0x216   : > { %v3027_v30 = vpop.eup %3026  ;;  %3038 = vrcp.f32 %v2053_v21 }
 0x217   : > { %v3029_v31 = vpop.eup %3028  ;;  %2242 = vst [vmem:[%s3298_s27 + $0x1c8] sm:$0xff] %v3027_v30 }
 0x218   : > { %v2054_v32 = vadd.f32 1.0, %v3029_v31 }
 0x21a   : > { %v3031_v33 = vpop.eup %3030  ;;  %3040 = vrcp.f32 %v2054_v32 }
 0x21b   : > { %v3033_v34 = vpop.eup %3032  ;;  %2243 = vst [vmem:[%s3298_s27 + $0x1d0] sm:$0xff] %v3031_v33 }
 0x21c   : > { %v2055_v35 = vadd.f32 1.0, %v3033_v34 }
 0x21e   : > { %v3035_v36 = vpop.eup %3034  ;;  %3042 = vrcp.f32 %v2055_v35 }
 0x21f   : > { %v3037_v37 = vpop.eup %3036  ;;  %2244 = vst [vmem:[%s3298_s27 + $0x1d8] sm:$0xff] %v3035_v36 }
 0x220   : > { %v2056_v38 = vadd.f32 1.0, %v3037_v37 }
 0x222   : > { %3044 = vrcp.f32 %v2056_v38 }
 0x223   : > { %v3039_v39 = vpop.eup %3038 }
 0x224   : > { %2245 = vst [vmem:[%s3298_s27 + $0x1e0] sm:$0xff] %v3039_v39 }
 0x227   : > { %v3041_v40 = vpop.eup %3040 }
 0x228   : > { %2246 = vst [vmem:[%s3298_s27 + $0x1e8] sm:$0xff] %v3041_v40 }
 0x22b   : > { %v3043_v41 = vpop.eup %3042 }
 0x22c   : > { %2247 = vst [vmem:[%s3298_s27 + $0x1f0] sm:$0xff] %v3043_v41 }
 0x22f   : > { %v3045_v42 = vpop.eup %3044 }
 0x230   : > { %2248 = vst [vmem:[%s3298_s27 + $0x1f8] sm:$0xff] %v3045_v42 }
 0x231 PF: > { %s13_s12 = sadd.s32 1, %s3053_s12  }
 0x232   : > { %p10_p4 = scmp.ge.s32.totalorder %s13_s12, 6  }
 0x234   :  { %12 = sbr.rel (!%p10_p4) target bundleno = 1 (0x1), region = 65 }

</bundles_post_ra>
